<compile_context>
chip_gen: v7x
topology: tpu7x:2x2x1
jax: 0.10.0
libtpu: 0.0.40
codegen_flags: <defaults>
</compile_context>

<pallas_src>
import functools

import jax
import jax.numpy as jnp
from jax import lax
from jax.experimental import pallas as pl
from jax.experimental.pallas import tpu as pltpu

EPS = 1e-8  # matches the PyTorch module's EPS


# ----------------------------------------------------------------------------
# In-kernel helpers
# ----------------------------------------------------------------------------

def _gln(h, g, b):
    """Global layer norm over one sample.  h: [C, L]; g, b: [C, 1].

    Single-pass statistics: one traversal for sum(h) and one for sum(h*h),
    var = E[x^2] - E[x]^2 (clamped at 0), instead of mean -> subtract ->
    mean((h-m)^2).
    """
    n = h.shape[0] * h.shape[1]
    s = jnp.sum(jnp.sum(h, axis=0, keepdims=True), axis=1, keepdims=True)
    ss = jnp.sum(jnp.sum(h * h, axis=0, keepdims=True), axis=1, keepdims=True)
    mean = s * (1.0 / n)
    var = jnp.maximum(ss * (1.0 / n) - mean * mean, 0.0)
    return g * (h - mean) * lax.rsqrt(var + EPS) + b


# ----------------------------------------------------------------------------
# Fused Pallas kernel (one sample per grid step)
# ----------------------------------------------------------------------------

def _visual_conv1d_kernel(x_ref, g0_ref, b0_ref, w1_ref, g1_ref, b1_ref,
                          wd_ref, alpha_ref, g2_ref, b2_ref, w2_ref, o_ref):
    x = x_ref[0]                                   # [V, L] f32
    L = x.shape[1]

    # relu -> gLN(V)
    h = _gln(jnp.maximum(x, 0.0), g0_ref[0], b0_ref[0])

    # conv1x1 V->H on the MXU (bf16 operands / f32 accumulation by default).
    y = jnp.dot(w1_ref[...], h.astype(w1_ref.dtype),
                preferred_element_type=jnp.float32)          # [H, L]

    # relu -> gLN(H)
    y = _gln(jnp.maximum(y, 0.0), g1_ref[0], b1_ref[0])

    # Depthwise k=3, pad=1: XLU lane rolls + iota boundary masks, all in VMEM.
    col = lax.broadcasted_iota(jnp.int32, y.shape, 1)
    y_lm1 = jnp.where(col == 0, 0.0, pltpu.roll(y, shift=1, axis=1))      # y[:, l-1]
    y_lp1 = jnp.where(col == L - 1, 0.0, pltpu.roll(y, shift=L - 1, axis=1))  # y[:, l+1]
    wd = wd_ref[...]                                          # [H, 3]
    dw = wd[:, 0:1] * y_lm1 + wd[:, 1:2] * y + wd[:, 2:3] * y_lp1

    # PReLU (alpha is a scalar in SMEM) -> gLN(H)
    a = alpha_ref[0]
    h2 = _gln(jnp.where(dw >= 0.0, dw, a * dw), g2_ref[0], b2_ref[0])

    # conv1x1 H->V on the MXU + fused residual add.
    out = jnp.dot(w2_ref[...], h2.astype(w2_ref.dtype),
                  preferred_element_type=jnp.float32) + x
    o_ref[0] = out.astype(o_ref.dtype)


# ----------------------------------------------------------------------------
# Forward wrapper
# ----------------------------------------------------------------------------

def _per_step_vmem_bytes(V, H, L, weight_itemsize):
    """Conservative per-grid-step VMEM footprint estimate."""
    f32 = 4
    io = 2 * 2 * V * L * f32                    # x + out blocks, double-buffered
    temps = (2 * V * L + 8 * H * L) * f32       # live f32 [C,L] temporaries
    weights = 2 * H * V * weight_itemsize + (H * 3 + 4 * (V + H)) * f32
    return io + temps + weights


def visual_conv1d_forward(p, x, matmul_dtype=jnp.bfloat16):
    """VisualConv1D forward.  x: [M, V, L] -> [M, V, L] (f32).

    For best TPU efficiency L should be a multiple of 128 (lane-dense matmul N
    axis and unmasked vector stores); correctness does not depend on it.
    """
    x = x.astype(jnp.float32)
    M, V, L = x.shape
    H = p["w1"].shape[0]

    w1 = p["w1"].astype(matmul_dtype)
    w2 = p["w2"].astype(matmul_dtype)

    est = _per_step_vmem_bytes(V, H, L, jnp.dtype(matmul_dtype).itemsize)
    budget = 48 << 20   # stay well under v7x's 64 MiB physical VMEM
    if est > budget:
        # TODO(synk): L-tiled two-pass gLN path for very long sequences.
        raise ValueError(
            f"per-sample VMEM footprint ~{est >> 20} MiB exceeds {budget >> 20} MiB "
            "budget; needs the L-tiled gLN path")
    vmem_limit = int(min(est + (8 << 20), 56 << 20))

    return pl.pallas_call(
        _visual_conv1d_kernel,
        grid=(M,),
        in_specs=[
            pl.BlockSpec((1, V, L), lambda m: (m, 0, 0)),        # x (also residual)
            pl.BlockSpec((1, V, 1), lambda m: (0, 0, 0)),        # g0
            pl.BlockSpec((1, V, 1), lambda m: (0, 0, 0)),        # b0
            pl.BlockSpec((H, V), lambda m: (0, 0)),              # w1 (VMEM-resident)
            pl.BlockSpec((1, H, 1), lambda m: (0, 0, 0)),        # g1
            pl.BlockSpec((1, H, 1), lambda m: (0, 0, 0)),        # b1
            pl.BlockSpec((H, 3), lambda m: (0, 0)),              # depthwise weights
            pl.BlockSpec(memory_space=pltpu.MemorySpace.SMEM),   # PReLU alpha scalar
            pl.BlockSpec((1, H, 1), lambda m: (0, 0, 0)),        # g2
            pl.BlockSpec((1, H, 1), lambda m: (0, 0, 0)),        # b2
            pl.BlockSpec((V, H), lambda m: (0, 0)),              # w2 (VMEM-resident)
        ],
        out_specs=pl.BlockSpec((1, V, L), lambda m: (m, 0, 0)),
        out_shape=jax.ShapeDtypeStruct((M, V, L), jnp.float32),
        compiler_params=pltpu.CompilerParams(
            dimension_semantics=("parallel",),
            vmem_limit_bytes=vmem_limit,
        ),
    )(x, p["g0"], p["b0"], w1, p["g1"], p["b1"],
      p["wd"], p["alpha"], p["g2"], p["b2"], w2)


# ----------------------------------------------------------------------------
# Pure-JAX reference (mirrors the PyTorch module)
# ----------------------------------------------------------------------------

def _gln_ref(y, g, b):
    mean = jnp.mean(y, axis=1, keepdims=True).mean(axis=2, keepdims=True)
    var = jnp.mean((y - mean) ** 2, axis=1, keepdims=True).mean(axis=2, keepdims=True)
    return g * (y - mean) / jnp.sqrt(var + EPS) + b


def visual_conv1d_reference(p, x, matmul_dtype=jnp.float32):
    M, V, L = x.shape

    def mm(w, h):
        return jnp.einsum("oc,mcl->mol", w.astype(matmul_dtype),
                          h.astype(matmul_dtype),
                          preferred_element_type=jnp.float32)

    h = jnp.maximum(x, 0.0)
    h = _gln_ref(h, p["g0"], p["b0"])
    h = mm(p["w1"], h)
    h = jnp.maximum(h, 0.0)
    h = _gln_ref(h, p["g1"], p["b1"])
    hp = jnp.pad(h, ((0, 0), (0, 0), (1, 1)))
    wd = p["wd"][None]                             # [1, H, 3]
    h = (wd[:, :, 0:1] * hp[:, :, 0:L]
         + wd[:, :, 1:2] * hp[:, :, 1:L + 1]
         + wd[:, :, 2:3] * hp[:, :, 2:L + 2])
    h = jnp.where(h >= 0.0, h, p["alpha"][0] * h)
    h = _gln_ref(h, p["g2"], p["b2"])
    h = mm(p["w2"], h)
    return h + x


# ----------------------------------------------------------------------------
# Demo / self-check
# ----------------------------------------------------------------------------

if __name__ == "__main__":
    V, H = 256, 512            # module defaults
    M, L = 2, 128              # small batch; L multiple of 128 for lane density

    key = jax.random.PRNGKey(0)
    kx, k1, kd, k2 = jax.random.split(key, 4)
    params = {
        "g0": jnp.ones((1, V, 1), jnp.float32),
        "b0": jnp.zeros((1, V, 1), jnp.float32),
        "w1": 0.05 * jax.random.normal(k1, (H, V), jnp.float32),   # conv1x1 V->H
        "g1": jnp.ones((1, H, 1), jnp.float32),
        "b1": jnp.zeros((1, H, 1), jnp.float32),
        "wd": 0.3 * jax.random.normal(kd, (H, 3), jnp.float32),    # depthwise k=3
        "alpha": jnp.full((1,), 0.25, jnp.float32),                # PReLU default
        "g2": jnp.ones((1, H, 1), jnp.float32),
        "b2": jnp.zeros((1, H, 1), jnp.float32),
        "w2": 0.05 * jax.random.normal(k2, (V, H), jnp.float32),   # conv1x1 H->V
    }
    x = jax.random.normal(kx, (M, V, L), jnp.float32)

    # --- bf16-MXU (default) path ---
    out = jax.block_until_ready(jax.jit(visual_conv1d_forward)(params, x))
    assert out.shape == (M, V, L), out.shape
    assert bool(jnp.all(jnp.isfinite(out)))

    # Tight check against a reference using the same bf16 MXU numerics.
    ref_matched = visual_conv1d_reference(params, x, jnp.bfloat16)
    err_matched = float(jnp.max(jnp.abs(out - ref_matched)))
    assert err_matched < 1e-2, f"matched-precision mismatch: {err_matched}"

    # Loose sanity check against full-f32 PyTorch-equivalent semantics
    # (difference is only the intentional bf16 MXU quantization).
    ref_f32 = visual_conv1d_reference(params, x, jnp.float32)
    err_f32 = float(jnp.max(jnp.abs(out - ref_f32)))
    assert err_f32 < 2.5e-1, f"f32 reference sanity mismatch: {err_f32}"

    # --- f32-matmul fallback path (addresses the precision concern) ---
    fwd_f32 = jax.jit(functools.partial(visual_conv1d_forward,
                                        matmul_dtype=jnp.float32))
    out_f32 = jax.block_until_ready(fwd_f32(params, x))
    err_f32_path = float(jnp.max(jnp.abs(out_f32 - ref_f32)))
    assert err_f32_path < 5e-2, f"f32-path mismatch: {err_f32_path}"

    print("KERNEL_OK")
</pallas_src>

<mosaic_0001>
module attributes {stable_mosaic.version = 11 : i64} {
  func.func @_visual_conv1d_kernel(%arg0: i32, %arg1: memref<1x256x128xf32, #tpu.memory_space<vmem>>, %arg2: memref<1x256x1xf32, #tpu.memory_space<vmem>>, %arg3: memref<1x256x1xf32, #tpu.memory_space<vmem>>, %arg4: memref<512x256xbf16, #tpu.memory_space<vmem>>, %arg5: memref<1x512x1xf32, #tpu.memory_space<vmem>>, %arg6: memref<1x512x1xf32, #tpu.memory_space<vmem>>, %arg7: memref<512x3xf32, #tpu.memory_space<vmem>>, %arg8: memref<1xf32, #tpu.memory_space<smem>>, %arg9: memref<1x512x1xf32, #tpu.memory_space<vmem>>, %arg10: memref<1x512x1xf32, #tpu.memory_space<vmem>>, %arg11: memref<256x512xbf16, #tpu.memory_space<vmem>>, %arg12: memref<1x256x128xf32, #tpu.memory_space<vmem>>) attributes {dimension_semantics = [#tpu.dimension_semantics<parallel>], iteration_bounds = array<i64: 2>, scalar_prefetch = 0 : i64, scratch_operands = 0 : i64, tpu.core_type = #tpu.core_type<tc>, window_params = [{transform_indices = @transform_0, window_bounds = array<i64: 1, 256, 128>}, {pipeline_mode = #tpu.pipeline_mode<synchronous>, transform_indices = @transform_1, window_bounds = array<i64: 1, 256, 1>}, {pipeline_mode = #tpu.pipeline_mode<synchronous>, transform_indices = @transform_2, window_bounds = array<i64: 1, 256, 1>}, {pipeline_mode = #tpu.pipeline_mode<synchronous>, transform_indices = @transform_3, window_bounds = array<i64: 512, 256>}, {pipeline_mode = #tpu.pipeline_mode<synchronous>, transform_indices = @transform_4, window_bounds = array<i64: 1, 512, 1>}, {pipeline_mode = #tpu.pipeline_mode<synchronous>, transform_indices = @transform_5, window_bounds = array<i64: 1, 512, 1>}, {pipeline_mode = #tpu.pipeline_mode<synchronous>, transform_indices = @transform_6, window_bounds = array<i64: 512, 3>}, {transform_indices = @transform_7, window_bounds = array<i64: 1>}, {pipeline_mode = #tpu.pipeline_mode<synchronous>, transform_indices = @transform_8, window_bounds = array<i64: 1, 512, 1>}, {pipeline_mode = #tpu.pipeline_mode<synchronous>, transform_indices = @transform_9, window_bounds = array<i64: 1, 512, 1>}, {pipeline_mode = #tpu.pipeline_mode<synchronous>, transform_indices = @transform_10, window_bounds = array<i64: 256, 512>}, {transform_indices = @transform_11, window_bounds = array<i64: 1, 256, 128>}]} {
    %c0 = arith.constant 0 : index
    %c0_0 = arith.constant 0 : index
    %c0_1 = arith.constant 0 : index
    %0 = vector.load %arg1[%c0, %c0_0, %c0_1] : memref<1x256x128xf32, #tpu.memory_space<vmem>>, vector<1x256x128xf32>
    %1 = vector.shape_cast %0 : vector<1x256x128xf32> to vector<256x128xf32>
    %cst = arith.constant 0.000000e+00 : f32
    %2 = vector.broadcast %cst : f32 to vector<256x128xf32>
    %3 = arith.maximumf %1, %2 : vector<256x128xf32>
    %c0_2 = arith.constant 0 : index
    %c0_3 = arith.constant 0 : index
    %c0_4 = arith.constant 0 : index
    %4 = vector.load %arg2[%c0_2, %c0_3, %c0_4] : memref<1x256x1xf32, #tpu.memory_space<vmem>>, vector<1x256x1xf32>
    %5 = vector.shape_cast %4 : vector<1x256x1xf32> to vector<256x1xf32>
    %c0_5 = arith.constant 0 : index
    %c0_6 = arith.constant 0 : index
    %c0_7 = arith.constant 0 : index
    %6 = vector.load %arg3[%c0_5, %c0_6, %c0_7] : memref<1x256x1xf32, #tpu.memory_space<vmem>>, vector<1x256x1xf32>
    %7 = vector.shape_cast %6 : vector<1x256x1xf32> to vector<256x1xf32>
    %cst_8 = arith.constant dense<0.000000e+00> : vector<128xf32>
    %8 = vector.multi_reduction <add>, %3, %cst_8 [0] : vector<256x128xf32> to vector<128xf32>
    %9 = vector.shape_cast %8 : vector<128xf32> to vector<1x128xf32>
    %cst_9 = arith.constant dense<0.000000e+00> : vector<1xf32>
    %10 = vector.multi_reduction <add>, %9, %cst_9 [1] : vector<1x128xf32> to vector<1xf32>
    %11 = vector.shape_cast %10 : vector<1xf32> to vector<1x1xf32>
    %12 = arith.mulf %3, %3 : vector<256x128xf32>
    %cst_10 = arith.constant dense<0.000000e+00> : vector<128xf32>
    %13 = vector.multi_reduction <add>, %12, %cst_10 [0] : vector<256x128xf32> to vector<128xf32>
    %14 = vector.shape_cast %13 : vector<128xf32> to vector<1x128xf32>
    %cst_11 = arith.constant dense<0.000000e+00> : vector<1xf32>
    %15 = vector.multi_reduction <add>, %14, %cst_11 [1] : vector<1x128xf32> to vector<1xf32>
    %16 = vector.shape_cast %15 : vector<1xf32> to vector<1x1xf32>
    %cst_12 = arith.constant 3.05175781E-5 : f32
    %17 = vector.broadcast %cst_12 : f32 to vector<1x1xf32>
    %18 = arith.mulf %11, %17 : vector<1x1xf32>
    %cst_13 = arith.constant 3.05175781E-5 : f32
    %19 = vector.broadcast %cst_13 : f32 to vector<1x1xf32>
    %20 = arith.mulf %16, %19 : vector<1x1xf32>
    %21 = arith.mulf %18, %18 : vector<1x1xf32>
    %22 = arith.subf %20, %21 : vector<1x1xf32>
    %cst_14 = arith.constant 0.000000e+00 : f32
    %23 = vector.broadcast %cst_14 : f32 to vector<1x1xf32>
    %24 = arith.maximumf %22, %23 : vector<1x1xf32>
    %25 = vector.broadcast %18 : vector<1x1xf32> to vector<256x128xf32>
    %26 = arith.subf %3, %25 : vector<256x128xf32>
    %27 = vector.broadcast %5 : vector<256x1xf32> to vector<256x128xf32>
    %28 = arith.mulf %27, %26 : vector<256x128xf32>
    %cst_15 = arith.constant 9.99999993E-9 : f32
    %29 = vector.broadcast %cst_15 : f32 to vector<1x1xf32>
    %30 = arith.addf %24, %29 : vector<1x1xf32>
    %31 = math.rsqrt %30 : vector<1x1xf32>
    %32 = vector.broadcast %31 : vector<1x1xf32> to vector<256x128xf32>
    %33 = arith.mulf %28, %32 : vector<256x128xf32>
    %34 = vector.broadcast %7 : vector<256x1xf32> to vector<256x128xf32>
    %35 = arith.addf %33, %34 : vector<256x128xf32>
    %c0_16 = arith.constant 0 : index
    %c0_17 = arith.constant 0 : index
    %36 = vector.load %arg4[%c0_16, %c0_17] : memref<512x256xbf16, #tpu.memory_space<vmem>>, vector<512x256xbf16>
    %37 = arith.truncf %35 : vector<256x128xf32> to vector<256x128xbf16>
    %cst_18 = arith.constant dense<0.000000e+00> : vector<512x128xf32>
    %38 = tpu.matmul %36, %37, %cst_18 {dimension_numbers = #tpu.dot_dimension_numbers<[1], [0], [0], [1], [0, 0, 1, 1], [], []>} : vector<512x256xbf16>, vector<256x128xbf16>, vector<512x128xf32> -> vector<512x128xf32>
    %cst_19 = arith.constant 0.000000e+00 : f32
    %39 = vector.broadcast %cst_19 : f32 to vector<512x128xf32>
    %40 = arith.maximumf %38, %39 : vector<512x128xf32>
    %c0_20 = arith.constant 0 : index
    %c0_21 = arith.constant 0 : index
    %c0_22 = arith.constant 0 : index
    %41 = vector.load %arg5[%c0_20, %c0_21, %c0_22] : memref<1x512x1xf32, #tpu.memory_space<vmem>>, vector<1x512x1xf32>
    %42 = vector.shape_cast %41 : vector<1x512x1xf32> to vector<512x1xf32>
    %c0_23 = arith.constant 0 : index
    %c0_24 = arith.constant 0 : index
    %c0_25 = arith.constant 0 : index
    %43 = vector.load %arg6[%c0_23, %c0_24, %c0_25] : memref<1x512x1xf32, #tpu.memory_space<vmem>>, vector<1x512x1xf32>
    %44 = vector.shape_cast %43 : vector<1x512x1xf32> to vector<512x1xf32>
    %cst_26 = arith.constant dense<0.000000e+00> : vector<128xf32>
    %45 = vector.multi_reduction <add>, %40, %cst_26 [0] : vector<512x128xf32> to vector<128xf32>
    %46 = vector.shape_cast %45 : vector<128xf32> to vector<1x128xf32>
    %cst_27 = arith.constant dense<0.000000e+00> : vector<1xf32>
    %47 = vector.multi_reduction <add>, %46, %cst_27 [1] : vector<1x128xf32> to vector<1xf32>
    %48 = vector.shape_cast %47 : vector<1xf32> to vector<1x1xf32>
    %49 = arith.mulf %40, %40 : vector<512x128xf32>
    %cst_28 = arith.constant dense<0.000000e+00> : vector<128xf32>
    %50 = vector.multi_reduction <add>, %49, %cst_28 [0] : vector<512x128xf32> to vector<128xf32>
    %51 = vector.shape_cast %50 : vector<128xf32> to vector<1x128xf32>
    %cst_29 = arith.constant dense<0.000000e+00> : vector<1xf32>
    %52 = vector.multi_reduction <add>, %51, %cst_29 [1] : vector<1x128xf32> to vector<1xf32>
    %53 = vector.shape_cast %52 : vector<1xf32> to vector<1x1xf32>
    %cst_30 = arith.constant 1.52587891E-5 : f32
    %54 = vector.broadcast %cst_30 : f32 to vector<1x1xf32>
    %55 = arith.mulf %48, %54 : vector<1x1xf32>
    %cst_31 = arith.constant 1.52587891E-5 : f32
    %56 = vector.broadcast %cst_31 : f32 to vector<1x1xf32>
    %57 = arith.mulf %53, %56 : vector<1x1xf32>
    %58 = arith.mulf %55, %55 : vector<1x1xf32>
    %59 = arith.subf %57, %58 : vector<1x1xf32>
    %cst_32 = arith.constant 0.000000e+00 : f32
    %60 = vector.broadcast %cst_32 : f32 to vector<1x1xf32>
    %61 = arith.maximumf %59, %60 : vector<1x1xf32>
    %62 = vector.broadcast %55 : vector<1x1xf32> to vector<512x128xf32>
    %63 = arith.subf %40, %62 : vector<512x128xf32>
    %64 = vector.broadcast %42 : vector<512x1xf32> to vector<512x128xf32>
    %65 = arith.mulf %64, %63 : vector<512x128xf32>
    %cst_33 = arith.constant 9.99999993E-9 : f32
    %66 = vector.broadcast %cst_33 : f32 to vector<1x1xf32>
    %67 = arith.addf %61, %66 : vector<1x1xf32>
    %68 = math.rsqrt %67 : vector<1x1xf32>
    %69 = vector.broadcast %68 : vector<1x1xf32> to vector<512x128xf32>
    %70 = arith.mulf %65, %69 : vector<512x128xf32>
    %71 = vector.broadcast %44 : vector<512x1xf32> to vector<512x128xf32>
    %72 = arith.addf %70, %71 : vector<512x128xf32>
    %73 = tpu.iota {dimensions = array<i32: 1>} : vector<512x128xi32>
    %c0_i32 = arith.constant 0 : i32
    %74 = vector.broadcast %c0_i32 : i32 to vector<512x128xi32>
    %75 = arith.cmpi eq, %73, %74 : vector<512x128xi32>
    %c1_i32 = arith.constant 1 : i32
    %76 = tpu.dynamic_rotate %72 by %c1_i32 dim 1 : vector<512x128xf32>, i32 -> vector<512x128xf32>
    %cst_34 = arith.constant 0.000000e+00 : f32
    %77 = vector.broadcast %cst_34 : f32 to vector<512x128xf32>
    %78 = arith.select %75, %77, %76 : vector<512x128xi1>, vector<512x128xf32>
    %c127_i32 = arith.constant 127 : i32
    %79 = vector.broadcast %c127_i32 : i32 to vector<512x128xi32>
    %80 = arith.cmpi eq, %73, %79 : vector<512x128xi32>
    %c127_i32_35 = arith.constant 127 : i32
    %81 = tpu.dynamic_rotate %72 by %c127_i32_35 dim 1 : vector<512x128xf32>, i32 -> vector<512x128xf32>
    %cst_36 = arith.constant 0.000000e+00 : f32
    %82 = vector.broadcast %cst_36 : f32 to vector<512x128xf32>
    %83 = arith.select %80, %82, %81 : vector<512x128xi1>, vector<512x128xf32>
    %c0_37 = arith.constant 0 : index
    %c0_38 = arith.constant 0 : index
    %84 = vector.load %arg7[%c0_37, %c0_38] : memref<512x3xf32, #tpu.memory_space<vmem>>, vector<512x3xf32>
    %85 = vector.extract_strided_slice %84 {offsets = [0, 0], sizes = [512, 1], strides = [1, 1]} : vector<512x3xf32> to vector<512x1xf32>
    %86 = vector.broadcast %85 : vector<512x1xf32> to vector<512x128xf32>
    %87 = arith.mulf %86, %78 : vector<512x128xf32>
    %88 = vector.extract_strided_slice %84 {offsets = [0, 1], sizes = [512, 1], strides = [1, 1]} : vector<512x3xf32> to vector<512x1xf32>
    %89 = vector.broadcast %88 : vector<512x1xf32> to vector<512x128xf32>
    %90 = arith.mulf %89, %72 : vector<512x128xf32>
    %91 = arith.addf %87, %90 : vector<512x128xf32>
    %92 = vector.extract_strided_slice %84 {offsets = [0, 2], sizes = [512, 1], strides = [1, 1]} : vector<512x3xf32> to vector<512x1xf32>
    %93 = vector.broadcast %92 : vector<512x1xf32> to vector<512x128xf32>
    %94 = arith.mulf %93, %83 : vector<512x128xf32>
    %95 = arith.addf %91, %94 : vector<512x128xf32>
    %c0_39 = arith.constant 0 : index
    %96 = memref.load %arg8[%c0_39] : memref<1xf32, #tpu.memory_space<smem>>
    %cst_40 = arith.constant 0.000000e+00 : f32
    %97 = vector.broadcast %cst_40 : f32 to vector<512x128xf32>
    %98 = arith.cmpf oge, %95, %97 : vector<512x128xf32>
    %99 = vector.broadcast %96 : f32 to vector<512x128xf32>
    %100 = arith.mulf %99, %95 : vector<512x128xf32>
    %101 = arith.select %98, %95, %100 : vector<512x128xi1>, vector<512x128xf32>
    %c0_41 = arith.constant 0 : index
    %c0_42 = arith.constant 0 : index
    %c0_43 = arith.constant 0 : index
    %102 = vector.load %arg9[%c0_41, %c0_42, %c0_43] : memref<1x512x1xf32, #tpu.memory_space<vmem>>, vector<1x512x1xf32>
    %103 = vector.shape_cast %102 : vector<1x512x1xf32> to vector<512x1xf32>
    %c0_44 = arith.constant 0 : index
    %c0_45 = arith.constant 0 : index
    %c0_46 = arith.constant 0 : index
    %104 = vector.load %arg10[%c0_44, %c0_45, %c0_46] : memref<1x512x1xf32, #tpu.memory_space<vmem>>, vector<1x512x1xf32>
    %105 = vector.shape_cast %104 : vector<1x512x1xf32> to vector<512x1xf32>
    %cst_47 = arith.constant dense<0.000000e+00> : vector<128xf32>
    %106 = vector.multi_reduction <add>, %101, %cst_47 [0] : vector<512x128xf32> to vector<128xf32>
    %107 = vector.shape_cast %106 : vector<128xf32> to vector<1x128xf32>
    %cst_48 = arith.constant dense<0.000000e+00> : vector<1xf32>
    %108 = vector.multi_reduction <add>, %107, %cst_48 [1] : vector<1x128xf32> to vector<1xf32>
    %109 = vector.shape_cast %108 : vector<1xf32> to vector<1x1xf32>
    %110 = arith.mulf %101, %101 : vector<512x128xf32>
    %cst_49 = arith.constant dense<0.000000e+00> : vector<128xf32>
    %111 = vector.multi_reduction <add>, %110, %cst_49 [0] : vector<512x128xf32> to vector<128xf32>
    %112 = vector.shape_cast %111 : vector<128xf32> to vector<1x128xf32>
    %cst_50 = arith.constant dense<0.000000e+00> : vector<1xf32>
    %113 = vector.multi_reduction <add>, %112, %cst_50 [1] : vector<1x128xf32> to vector<1xf32>
    %114 = vector.shape_cast %113 : vector<1xf32> to vector<1x1xf32>
    %cst_51 = arith.constant 1.52587891E-5 : f32
    %115 = vector.broadcast %cst_51 : f32 to vector<1x1xf32>
    %116 = arith.mulf %109, %115 : vector<1x1xf32>
    %cst_52 = arith.constant 1.52587891E-5 : f32
    %117 = vector.broadcast %cst_52 : f32 to vector<1x1xf32>
    %118 = arith.mulf %114, %117 : vector<1x1xf32>
    %119 = arith.mulf %116, %116 : vector<1x1xf32>
    %120 = arith.subf %118, %119 : vector<1x1xf32>
    %cst_53 = arith.constant 0.000000e+00 : f32
    %121 = vector.broadcast %cst_53 : f32 to vector<1x1xf32>
    %122 = arith.maximumf %120, %121 : vector<1x1xf32>
    %123 = vector.broadcast %116 : vector<1x1xf32> to vector<512x128xf32>
    %124 = arith.subf %101, %123 : vector<512x128xf32>
    %125 = vector.broadcast %103 : vector<512x1xf32> to vector<512x128xf32>
    %126 = arith.mulf %125, %124 : vector<512x128xf32>
    %cst_54 = arith.constant 9.99999993E-9 : f32
    %127 = vector.broadcast %cst_54 : f32 to vector<1x1xf32>
    %128 = arith.addf %122, %127 : vector<1x1xf32>
    %129 = math.rsqrt %128 : vector<1x1xf32>
    %130 = vector.broadcast %129 : vector<1x1xf32> to vector<512x128xf32>
    %131 = arith.mulf %126, %130 : vector<512x128xf32>
    %132 = vector.broadcast %105 : vector<512x1xf32> to vector<512x128xf32>
    %133 = arith.addf %131, %132 : vector<512x128xf32>
    %c0_55 = arith.constant 0 : index
    %c0_56 = arith.constant 0 : index
    %134 = vector.load %arg11[%c0_55, %c0_56] : memref<256x512xbf16, #tpu.memory_space<vmem>>, vector<256x512xbf16>
    %135 = arith.truncf %133 : vector<512x128xf32> to vector<512x128xbf16>
    %cst_57 = arith.constant dense<0.000000e+00> : vector<256x128xf32>
    %136 = tpu.matmul %134, %135, %cst_57 {dimension_numbers = #tpu.dot_dimension_numbers<[1], [0], [0], [1], [0, 0, 1, 1], [], []>} : vector<256x512xbf16>, vector<512x128xbf16>, vector<256x128xf32> -> vector<256x128xf32>
    %137 = arith.addf %136, %1 : vector<256x128xf32>
    %c0_58 = arith.constant 0 : index
    %c0_59 = arith.constant 0 : index
    %c0_60 = arith.constant 0 : index
    %138 = vector.load %arg12[%c0_58, %c0_59, %c0_60] : memref<1x256x128xf32, #tpu.memory_space<vmem>>, vector<1x256x128xf32>
    %139 = vector.shape_cast %138 : vector<1x256x128xf32> to vector<256x128xf32>
    %140 = vector.shape_cast %137 : vector<256x128xf32> to vector<1x256x128xf32>
    tpu.vector_store %arg12[%c0_58, %c0_59, %c0_60], %140 {strides = array<i32>} : memref<1x256x128xf32, #tpu.memory_space<vmem>>, vector<1x256x128xf32>,
    return
  }
  func.func @transform_0(%arg0: i32) -> (i32, i32, i32) {
    %c0_i32 = arith.constant 0 : i32
    %c0_i32_0 = arith.constant 0 : i32
    %c0_i32_1 = arith.constant 0 : i32
    return %arg0, %c0_i32, %c0_i32_0 : i32, i32, i32
  }
  func.func @transform_1(%arg0: i32) -> (i32, i32, i32) {
    %c0_i32 = arith.constant 0 : i32
    %c0_i32_0 = arith.constant 0 : i32
    %c0_i32_1 = arith.constant 0 : i32
    %c0_i32_2 = arith.constant 0 : i32
    return %c0_i32, %c0_i32_0, %c0_i32_1 : i32, i32, i32
  }
  func.func @transform_2(%arg0: i32) -> (i32, i32, i32) {
    %c0_i32 = arith.constant 0 : i32
    %c0_i32_0 = arith.constant 0 : i32
    %c0_i32_1 = arith.constant 0 : i32
    %c0_i32_2 = arith.constant 0 : i32
    return %c0_i32, %c0_i32_0, %c0_i32_1 : i32, i32, i32
  }
  func.func @transform_3(%arg0: i32) -> (i32, i32) {
    %c0_i32 = arith.constant 0 : i32
    %c0_i32_0 = arith.constant 0 : i32
    %c0_i32_1 = arith.constant 0 : i32
    return %c0_i32, %c0_i32_0 : i32, i32
  }
  func.func @transform_4(%arg0: i32) -> (i32, i32, i32) {
    %c0_i32 = arith.constant 0 : i32
    %c0_i32_0 = arith.constant 0 : i32
    %c0_i32_1 = arith.constant 0 : i32
    %c0_i32_2 = arith.constant 0 : i32
    return %c0_i32, %c0_i32_0, %c0_i32_1 : i32, i32, i32
  }
  func.func @transform_5(%arg0: i32) -> (i32, i32, i32) {
    %c0_i32 = arith.constant 0 : i32
    %c0_i32_0 = arith.constant 0 : i32
    %c0_i32_1 = arith.constant 0 : i32
    %c0_i32_2 = arith.constant 0 : i32
    return %c0_i32, %c0_i32_0, %c0_i32_1 : i32, i32, i32
  }
  func.func @transform_6(%arg0: i32) -> (i32, i32) {
    %c0_i32 = arith.constant 0 : i32
    %c0_i32_0 = arith.constant 0 : i32
    %c0_i32_1 = arith.constant 0 : i32
    return %c0_i32, %c0_i32_0 : i32, i32
  }
  func.func @transform_7(%arg0: i32) -> i32 {
    %c0_i32 = arith.constant 0 : i32
    %c0_i32_0 = arith.constant 0 : i32
    return %c0_i32 : i32
  }
  func.func @transform_8(%arg0: i32) -> (i32, i32, i32) {
    %c0_i32 = arith.constant 0 : i32
    %c0_i32_0 = arith.constant 0 : i32
    %c0_i32_1 = arith.constant 0 : i32
    %c0_i32_2 = arith.constant 0 : i32
    return %c0_i32, %c0_i32_0, %c0_i32_1 : i32, i32, i32
  }
  func.func @transform_9(%arg0: i32) -> (i32, i32, i32) {
    %c0_i32 = arith.constant 0 : i32
    %c0_i32_0 = arith.constant 0 : i32
    %c0_i32_1 = arith.constant 0 : i32
    %c0_i32_2 = arith.constant 0 : i32
    return %c0_i32, %c0_i32_0, %c0_i32_1 : i32, i32, i32
  }
  func.func @transform_10(%arg0: i32) -> (i32, i32) {
    %c0_i32 = arith.constant 0 : i32
    %c0_i32_0 = arith.constant 0 : i32
    %c0_i32_1 = arith.constant 0 : i32
    return %c0_i32, %c0_i32_0 : i32, i32
  }
  func.func @transform_11(%arg0: i32) -> (i32, i32, i32) {
    %c0_i32 = arith.constant 0 : i32
    %c0_i32_0 = arith.constant 0 : i32
    %c0_i32_1 = arith.constant 0 : i32
    return %arg0, %c0_i32, %c0_i32_0 : i32, i32, i32
  }
}

</mosaic_0001>

<bundles_post_ra>
// kernel: visual_conv1d_forward.1
= control target key start
LH: loop header
LB: loop body
LE: loop exit
PB: predicated region body
PF: predicated region fallthrough
CT: control target
= control target key end

     0   :  { %s14653_s0 = inlined_call_operand.vmem [shape: f32[2,256,128], index: 0, kind: input, shape index: {}]   ;;  %s14654_s1 = inlined_call_operand.vmem [shape: f32[1,256,1], index: 1, kind: input, shape index: {}]   ;;  %s14655_s2 = inlined_call_operand.vmem [shape: f32[1,256,1], index: 2, kind: input, shape index: {}]   ;;  %s14656_s3 = inlined_call_operand.vmem [shape: bf16[512,256], index: 3, kind: input, shape index: {}]   ;;  %s14657_s4 = inlined_call_operand.vmem [shape: f32[1,512,1], index: 4, kind: input, shape index: {}]   ;;  %s14658_s5 = inlined_call_operand.vmem [shape: f32[1,512,1], index: 5, kind: input, shape index: {}]   ;;  %s14659_s6 = inlined_call_operand.vmem [shape: f32[512,3], index: 6, kind: input, shape index: {}]   ;;  %s14660_s7 = inlined_call_operand.<no memory space> [shape: f32[1], index: 7, kind: input, shape index: {}]   ;;  %s14661_s8 = inlined_call_operand.vmem [shape: f32[1,512,1], index: 8, kind: input, shape index: {}]   ;;  %s14662_s9 = inlined_call_operand.vmem [shape: f32[1,512,1], index: 9, kind: input, shape index: {}]   ;;  %s14663_s10 = inlined_call_operand.vmem [shape: bf16[256,512], index: 10, kind: input, shape index: {}]   ;;  %s14664_s11 = inlined_call_operand.hbm [shape: f32[2,256,128], index: 11, kind: output, shape index: {}]  }
   0x1   :  { %16 = sst [smem:[#allocation2]] %s14660_s7 }
   0x2   :  { %17 = vsyncpa [#allocation4], 0 }
   0x3   :  { %19 = vsyncpa [#allocation4 + $0x1], 0  ;;  %s7802_s19 = smov 0   ;;  %s7804_s20 = smov 0  }
   0x4   :  { %s7806_s21 = smov 0   ;;  %s7808_s22 = smov 0  }
   0x5 LB: > { %s7823_s7 = sadd.s32 4294967295, %s7729_s22   ;;  %s6951_s23 = sadd.s32 4294967294, %s7729_s22   ;;  %s7729_s22 = sphi %s7808_s22, %s16145_s22   ;;  %s7725_s21 = sphi %s7806_s21, %s16144_s21   ;;  %s7721_s20 = sphi %s7804_s20, %s16143_s20   ;;  %s7717_s19 = sphi %s7802_s19, %s16142_s19  }
   0x6   : > { %s7827_s24 = sadd.s32 1, %s7729_s22   ;;  %s268_s25 = sadd.s32 1, %s7725_s21 }
   0x7   : > { %s265_s26 = ssub.s32 %s7729_s22, %s7827_s24  ;;  %p278_p0 = scmp.ne.s32.totalorder %s7725_s21, %s7721_s20 }
   0x8   : > { %p266_p1 = scmp.eq.s32.totalorder %s265_s26, 0  ;;  %p279_p2 = scmp.eq.s32.totalorder %s7823_s7, 1 }
   0x9   : > { %p284_p3 = scmp.ne.s32.totalorder %s7721_s20, %s7717_s19  ;;  %p285_p4 = scmp.eq.s32.totalorder %s6951_s23, 1 }
   0xa   : > { %s7838_s27 = scalar_select %p266_p1, %s7725_s21, %s268_s25  }
   0xb   : > { %p7840_p5 = por %p279_p2, %p278_p0  ;;  %p7844_p6 = por %p285_p4, %p284_p3 }
   0xc   : > { %p6954_p7 = scmp.ge.s32.totalorder %s7729_s22, 1  ;;  %p341_p8 = scmp.lt.s32.totalorder %s7729_s22, 3 }
   0xe   : > { %p342_p9 = pnand %p6954_p7, %p341_p8 }
  0x10   : > { %345 = sbr.rel (%p342_p9) target bundleno = 2422 (0x976), region = 64 }
  0x17   : > { %v453_v0 = vld [vmem:[%s14654_s1 + $0x10] sm:$0xff]  ;;  %v451_v1 = vld [vmem:[%s14654_s1] sm:$0xff]  ;;  %p381_p10 = scmp.lt.s32.totalorder %s7823_s7, 1  ;;  %v14665_v2 = vmov 0   ;;  %v452_v4 = vld [vmem:[%s14654_s1 + $0x8] sm:$0xff]  ;;  %s7734_s30 = smov 127  }
  0x18   : > { %7364 = vset.pattern.permute.xlu0 %v14665_v2  ;;  %7363 = vset.pattern.permute.xlu1 %v14665_v2  ;;  %v465_v3 = vld [vmem:[%s14654_s1 + $0x70] sm:$0xff]  ;;  %v467_v5 = vld [vmem:[%s14654_s1 + $0x80] sm:$0xff]  ;;  %v454_v6 = vld [vmem:[%s14654_s1 + $0x18] sm:$0xff]  ;;  %s12334_s23 = sld [smem:[#allocation2]]  ;;  %s378_s26 = sand.u32 1, %s7721_s20  }
  0x19   : > { %674 = vperm.xlu0 %7364, %v453_v0   ;;  %664 = vperm.xlu1 %7363, %v451_v1   ;;  %s382_s15 = scalar_select %p381_p10, %s7823_s7, 1  ;;  %v469_v7 = vld [vmem:[%s14654_s1 + $0x90] sm:$0xff]  ;;  %v455_v10 = vld [vmem:[%s14654_s1 + $0x20] sm:$0xff]  ;;  %v456_v21 = vld [vmem:[%s14654_s1 + $0x28] sm:$0xff] }
  0x1a   : > { %1480 = vmatprep.subr.bf16.mxu0 %v14665_v2  ;;  %v471_v20 = vld [vmem:[%s14654_s1 + $0xa0] sm:$0xff]  ;;  %v473_v28 = vld [vmem:[%s14654_s1 + $0xb0] sm:$0xff]  ;;  %v458_v37 = vld [vmem:[%s14654_s1 + $0x38] sm:$0xff]  ;;  %s7092_s12 = sshll.u32 %s7823_s7, 12  ;;  %s14612_s7 = scalar_lea.sflag [#allocation4], %s378_s26 }
  0x1b   : > { %s7091_s25 = sshll.u32 %s382_s15, 8  ;;  %v457_v29 = vld [vmem:[%s14654_s1 + $0x30] sm:$0xff]  ;;  %v475_v36 = vld [vmem:[%s14654_s1 + $0xc0] sm:$0xff]  ;;  %v460_v53 = vld [vmem:[%s14654_s1 + $0x48] sm:$0xff]  ;;  %s14604_s15 = scalar_lea.hbm %s14664_s11, %s7092_s12 }
  0x1c   : > { %s7876_s17 = scalar_lea.vmem %s14653_s0, %s7091_s25  ;;  %v477_v46 = vld [vmem:[%s14654_s1 + $0xd0] sm:$0xff]  ;;  %v459_v47 = vld [vmem:[%s14654_s1 + $0x40] sm:$0xff]  ;;  %s7733_s25 = smov 1  }
  0x1d   : > { %734 = vperm.xlu0 %7364, %v465_v3   ;;  %669 = vperm.xlu1 %7363, %v452_v4   ;;  %v387_v8 = vld [vmem:[%s7876_s17] sm:$0xff]  ;;  %v388_v9 = vld [vmem:[%s7876_s17 + $0x8] sm:$0xff]  ;;  %v389_v11 = vld [vmem:[%s7876_s17 + $0x10] sm:$0xff]  ;;  %s7736_s18 = smov [#allocation3]  }
  0x1e   : > { %v390_v12 = vld [vmem:[%s7876_s17 + $0x18] sm:$0xff]  ;;  %v7888_v13 = vmax.f32 %v387_v8, 0.0  ;;  %v7890_v14 = vmax.f32 %v388_v9, 0.0  ;;  %v391_v15 = vld [vmem:[%s7876_s17 + $0x20] sm:$0xff]  ;;  %v7893_v16 = vmax.f32 %v389_v11, 0.0  ;;  %v392_v19 = vld [vmem:[%s7876_s17 + $0x28] sm:$0xff] }
  0x1f   : > { %v7895_v17 = vmax.f32 %v390_v12, 0.0  ;;  %v7906_v22 = vmax.f32 %v391_v15, 0.0  ;;  %v393_v24 = vld [vmem:[%s7876_s17 + $0x30] sm:$0xff]  ;;  %v7910_v25 = vmax.f32 %v392_v19, 0.0  ;;  %v394_v27 = vld [vmem:[%s7876_s17 + $0x38] sm:$0xff]  ;;  %v395_v32 = vld [vmem:[%s7876_s17 + $0x40] sm:$0xff] }
  0x20   : > { %v515_v18 = vadd.f32 %v7890_v14, %v7888_v13  ;;  %v7920_v30 = vmax.f32 %v393_v24, 0.0  ;;  %v7924_v33 = vmax.f32 %v394_v27, 0.0  ;;  %v396_v35 = vld [vmem:[%s7876_s17 + $0x48] sm:$0xff]  ;;  %v7934_v38 = vmax.f32 %v395_v32, 0.0  ;;  %v397_v40 = vld [vmem:[%s7876_s17 + $0x50] sm:$0xff]  ;;  %v398_v43 = vld [vmem:[%s7876_s17 + $0x58] sm:$0xff] }
  0x21   : > { %744 = vperm.xlu0 %7364, %v467_v5   ;;  %679 = vperm.xlu1 %7363, %v454_v6   ;;  %v7938_v41 = vmax.f32 %v396_v35, 0.0  ;;  %v554_v44 = vmul.f32 %v7888_v13, %v7888_v13  ;;  %v555_v45 = vmul.f32 %v7890_v14, %v7890_v14  ;;  %v7952_v48 = vmax.f32 %v397_v40, 0.0  ;;  %v399_v50 = vld [vmem:[%s7876_s17 + $0x60] sm:$0xff]  ;;  %v400_v56 = vld [vmem:[%s7876_s17 + $0x68] sm:$0xff]  ;;  %v401_v57 = vld [vmem:[%s7876_s17 + $0x70] sm:$0xff] }
  0x22   : > { %v516_v23 = vadd.f32 %v515_v18, %v7893_v16  ;;  %v556_v51 = vmul.f32 %v7893_v16, %v7893_v16  ;;  %v479_v52 = vld [vmem:[%s14654_s1 + $0xe0] sm:$0xff]  ;;  %v7964_v54 = vmax.f32 %v398_v43, 0.0  ;;  %v557_v58 = vmul.f32 %v7895_v17, %v7895_v17  ;;  %v481_v0 = vld [vmem:[%s14654_s1 + $0xf0] sm:$0xff]  ;;  %v402_v5 = vld [vmem:[%s7876_s17 + $0x78] sm:$0xff] }
  0x23   : > { %v586_v59 = vadd.f32 %v555_v45, %v554_v44  ;;  %v7971_v60 = vmax.f32 %v399_v50, 0.0  ;;  %v558_v62 = vmul.f32 %v7906_v22, %v7906_v22  ;;  %v461_v1 = vld [vmem:[%s14654_s1 + $0x50] sm:$0xff]  ;;  %v7982_v3 = vmax.f32 %v400_v56, 0.0  ;;  %v403_v6 = vld [vmem:[%s7876_s17 + $0x80] sm:$0xff]  ;;  %v462_v15 = vld [vmem:[%s14654_s1 + $0x58] sm:$0xff] }
  0x24   : > { %v517_v26 = vadd.f32 %v516_v23, %v7895_v17  ;;  %v7989_v9 = vmax.f32 %v401_v57, 0.0  ;;  %v560_v11 = vmul.f32 %v7920_v30, %v7920_v30  ;;  %v7997_v18 = vmax.f32 %v402_v5, 0.0  ;;  %v406_v35 = vld [vmem:[%s7876_s17 + $0x98] sm:$0xff]  ;;  %v464_v45 = vld [vmem:[%s14654_s1 + $0x68] sm:$0xff]  ;;  %v409_v50 = vld [vmem:[%s7876_s17 + $0xb0] sm:$0xff] }
  0x25   : > { %754 = vperm.xlu0 %7364, %v469_v7   ;;  %684 = vperm.xlu1 %7363, %v455_v10   ;;  %v587_v63 = vadd.f32 %v586_v59, %v556_v51  ;;  %v559_v7 = vmul.f32 %v7910_v25, %v7910_v25  ;;  %v561_v23 = vmul.f32 %v7924_v33, %v7924_v33 }
  0x26   : > { %v518_v31 = vadd.f32 %v517_v26, %v7906_v22  ;;  %v8004_v26 = vmax.f32 %v403_v6, 0.0  ;;  %v564_v43 = vmul.f32 %v7952_v48, %v7952_v48  ;;  %v565_v51 = vmul.f32 %v7964_v54, %v7964_v54 }
  0x27   : > { %v588_v8 = vadd.f32 %v587_v63, %v557_v58  ;;  %v566_v56 = vmul.f32 %v7971_v60, %v7971_v60  ;;  %v466_v58 = vld [vmem:[%s14654_s1 + $0x78] sm:$0xff]  ;;  %v411_v63 = vld [vmem:[%s7876_s17 + $0xc0] sm:$0xff]  ;;  %v568_v6 = vmul.f32 %v7989_v9, %v7989_v9 }
  0x28   : > { %v519_v34 = vadd.f32 %v518_v31, %v7910_v25  ;;  %v463_v31 = vld [vmem:[%s14654_s1 + $0x60] sm:$0xff] }
  0x29   : > { %764 = vperm.xlu0 %7364, %v471_v20   ;;  %689 = vperm.xlu1 %7363, %v456_v21   ;;  %v589_v12 = vadd.f32 %v588_v8, %v558_v62  ;;  %v404_v20 = vld [vmem:[%s7876_s17 + $0x88] sm:$0xff]  ;;  %v405_v21 = vld [vmem:[%s7876_s17 + $0x90] sm:$0xff]  ;;  %v410_v62 = vld [vmem:[%s7876_s17 + $0xb8] sm:$0xff] }
  0x2a   : > { %v520_v39 = vadd.f32 %v519_v34, %v7920_v30  ;;  %v8012_v32 = vmax.f32 %v404_v20, 0.0  ;;  %v8019_v40 = vmax.f32 %v405_v21, 0.0  ;;  %v468_v8 = vld [vmem:[%s14654_s1 + $0x88] sm:$0xff]  ;;  %v8064_v21 = vmax.f32 %v411_v63, 0.0 }
  0x2b   : > { %v590_v24 = vadd.f32 %v589_v12, %v559_v7  ;;  %v412_v12 = vld [vmem:[%s7876_s17 + $0xc8] sm:$0xff] }
  0x2c   : > { %v521_v42 = vadd.f32 %v520_v39, %v7924_v33  ;;  %14818 = vst [vmem:[#allocation6_spill] sm:$0xff] %v8019_v40  ;;  %14824 = vst [vmem:[#allocation12_spill] sm:$0xff] %v8064_v21 }
  0x2d   : > { %774 = vperm.xlu0 %7364, %v473_v28   ;;  %694 = vperm.xlu1 %7363, %v457_v29   ;;  %v562_v28 = vmul.f32 %v7934_v38, %v7934_v38  ;;  %v591_v29 = vadd.f32 %v590_v24, %v560_v11  ;;  %v570_v24 = vmul.f32 %v8004_v26, %v8004_v26 }
  0x2e   : > { %v522_v49 = vadd.f32 %v521_v42, %v7934_v38 }
  0x2f   : > { %v592_v39 = vadd.f32 %v591_v29, %v561_v23  ;;  %v8072_v29 = vmax.f32 %v412_v12, 0.0 }
  0x30   : > { %v523_v55 = vadd.f32 %v522_v49, %v7938_v41  ;;  %v408_v49 = vld [vmem:[%s7876_s17 + $0xa8] sm:$0xff] }
  0x31   : > { %784 = vperm.xlu0 %7364, %v475_v36   ;;  %699 = vperm.xlu1 %7363, %v458_v37   ;;  %v407_v36 = vld [vmem:[%s7876_s17 + $0xa0] sm:$0xff]  ;;  %v563_v37 = vmul.f32 %v7938_v41, %v7938_v41  ;;  %v593_v44 = vadd.f32 %v592_v39, %v562_v28  ;;  %v8042_v59 = vmax.f32 %v408_v49, 0.0  ;;  %v470_v28 = vld [vmem:[%s14654_s1 + $0x98] sm:$0xff]  ;;  %14825 = vst [vmem:[#allocation13_spill] sm:$0xff] %v8072_v29 }
  0x32   : > { %v524_v61 = vadd.f32 %v523_v55, %v7952_v48 }
  0x33   : > { %14821 = vst [vmem:[#allocation9_spill] sm:$0xff] %v8042_v59 }
  0x34   : > { %v525_v4 = vadd.f32 %v524_v61, %v7964_v54 }
  0x35   : > { %794 = vperm.xlu0 %7364, %v477_v46   ;;  %704 = vperm.xlu1 %7363, %v459_v47   ;;  %v8027_v46 = vmax.f32 %v406_v35, 0.0  ;;  %v415_v35 = vld [vmem:[%s7876_s17 + $0xe0] sm:$0xff] }
  0x36   : > { %v526_v10 = vadd.f32 %v525_v4, %v7971_v60  ;;  %v8049_v4 = vmax.f32 %v409_v50, 0.0  ;;  %v416_v50 = vld [vmem:[%s7876_s17 + $0xe8] sm:$0xff] }
  0x37   : > { %14819 = vst [vmem:[#allocation7_spill] sm:$0xff] %v8027_v46 }
  0x38   : > { %v527_v19 = vadd.f32 %v526_v10, %v7982_v3  ;;  %14822 = vst [vmem:[#allocation10_spill] sm:$0xff] %v8049_v4  ;;  %v8057_v10 = vmax.f32 %v410_v62, 0.0  ;;  %v8099_v62 = vmax.f32 %v416_v50, 0.0 }
  0x39   : > { %804 = vperm.xlu0 %7364, %v479_v52   ;;  %709 = vperm.xlu1 %7363, %v460_v53   ;;  %v594_v52 = vadd.f32 %v593_v44, %v563_v37  ;;  %v8034_v53 = vmax.f32 %v407_v36, 0.0  ;;  %v571_v36 = vmul.f32 %v8012_v32, %v8012_v32 }
  0x3a   : > { %v528_v27 = vadd.f32 %v527_v19, %v7989_v9  ;;  %14823 = vst [vmem:[#allocation11_spill] sm:$0xff] %v8057_v10  ;;  %v569_v19 = vmul.f32 %v7997_v18, %v7997_v18 }
  0x3b   : > { %14820 = vst [vmem:[#allocation8_spill] sm:$0xff] %v8034_v53  ;;  %v595_v57 = vadd.f32 %v594_v52, %v564_v43  ;;  %v572_v43 = vmul.f32 %v8019_v40, %v8019_v40  ;;  %v573_v52 = vmul.f32 %v8027_v46, %v8027_v46 }
  0x3c   : > { %v529_v34 = vadd.f32 %v528_v27, %v7997_v18 }
  0x3d   : > { %814 = vperm.xlu0 %7364, %v481_v0   ;;  %714 = vperm.xlu1 %7363, %v461_v1   ;;  %v567_v0 = vmul.f32 %v7982_v3, %v7982_v3  ;;  %v596_v1 = vadd.f32 %v595_v57, %v565_v51  ;;  %v417_v51 = vld [vmem:[%s7876_s17 + $0xf0] sm:$0xff] }
  0x3e   : > { %v530_v42 = vadd.f32 %v529_v34, %v8004_v26  ;;  %v414_v34 = vld [vmem:[%s7876_s17 + $0xd8] sm:$0xff] }
  0x3f   : > { %v597_v7 = vadd.f32 %v596_v1, %v566_v56  ;;  %v8094_v56 = vmax.f32 %v415_v35, 0.0  ;;  %v418_v1 = vld [vmem:[%s7876_s17 + $0xf8] sm:$0xff] }
  0x40   : > { %v531_v47 = vadd.f32 %v530_v42, %v8012_v32  ;;  %v478_v35 = vld [vmem:[%s14654_s1 + $0xd8] sm:$0xff] }
  0x41   : > { %719 = vperm.xlu1 %7363, %v462_v15   ;;  %v413_v15 = vld [vmem:[%s7876_s17 + $0xd0] sm:$0xff]  ;;  %v598_v20 = vadd.f32 %v597_v7, %v567_v0  ;;  %v474_v0 = vld [vmem:[%s14654_s1 + $0xb8] sm:$0xff]  ;;  %v8108_v7 = vmax.f32 %v417_v51, 0.0 }
  0x42   : > { %v532_v55 = vadd.f32 %v531_v47, %v8019_v40  ;;  %v8079_v39 = vmax.f32 %v413_v15, 0.0  ;;  %v8087_v47 = vmax.f32 %v414_v34, 0.0  ;;  %v8113_v15 = vmax.f32 %v418_v1, 0.0  ;;  %v482_v1 = vld [vmem:[%s14654_s1 + $0xf8] sm:$0xff] }
  0x43   : > { %v599_v27 = vadd.f32 %v598_v20, %v568_v6  ;;  %v476_v20 = vld [vmem:[%s14654_s1 + $0xc8] sm:$0xff] }
  0x44   : > { %v533_v61 = vadd.f32 %v532_v55, %v8027_v46  ;;  %14826 = vst [vmem:[#allocation14_spill] sm:$0xff] %v8079_v39  ;;  %14827 = vst [vmem:[#allocation15_spill] sm:$0xff] %v8087_v47  ;;  %v581_v50 = vmul.f32 %v8087_v47, %v8087_v47 }
  0x45   : > { %724 = vperm.xlu1 %7363, %v463_v31   ;;  %v600_v37 = vadd.f32 %v599_v27, %v569_v19 }
  0x46   : > { %v534_v5 = vadd.f32 %v533_v61, %v8034_v53 }
  0x47   : > { %v601_v44 = vadd.f32 %v600_v37, %v570_v24 }
  0x48   : > { %v535_v11 = vadd.f32 %v534_v5, %v8042_v59  ;;  %v575_v5 = vmul.f32 %v8042_v59, %v8042_v59 }
  0x49   : > { %729 = vperm.xlu1 %7363, %v464_v45   ;;  %v472_v45 = vld [vmem:[%s14654_s1 + $0xa8] sm:$0xff]  ;;  %v602_v55 = vadd.f32 %v601_v44, %v571_v36  ;;  %v579_v36 = vmul.f32 %v8072_v29, %v8072_v29 }
  0x4a   : > { %v536_v23 = vadd.f32 %v535_v11, %v8049_v4  ;;  %v576_v11 = vmul.f32 %v8049_v4, %v8049_v4  ;;  %v1861_v4 = vld [vmem:[%s14657_s4 + $0xe0] sm:$0xff] }
  0x4b   : > { %v603_v61 = vadd.f32 %v602_v55, %v572_v43  ;;  %v580_v43 = vmul.f32 %v8079_v39, %v8079_v39  ;;  %v582_v55 = vmul.f32 %v8094_v56, %v8094_v56 }
  0x4c   : > { %v537_v31 = vadd.f32 %v536_v23, %v8057_v10  ;;  %v577_v23 = vmul.f32 %v8057_v10, %v8057_v10  ;;  %v1859_v10 = vld [vmem:[%s14657_s4 + $0xd0] sm:$0xff] }
  0x4d   : > { %739 = vperm.xlu1 %7363, %v466_v58   ;;  %v574_v58 = vmul.f32 %v8034_v53, %v8034_v53  ;;  %v604_v6 = vadd.f32 %v603_v61, %v573_v52  ;;  %v583_v61 = vmul.f32 %v8099_v62, %v8099_v62 }
  0x4e   : > { %v538_v42 = vadd.f32 %v537_v31, %v8064_v21 }
  0x4f   : > { %v605_v12 = vadd.f32 %v604_v6, %v574_v58 }
  0x50   : > { %v539_v49 = vadd.f32 %v538_v42, %v8072_v29  ;;  %v1855_v29 = vld [vmem:[%s14657_s4 + $0xb0] sm:$0xff] }
  0x51   : > { %749 = vperm.xlu1 %7363, %v468_v8   ;;  %v606_v24 = vadd.f32 %v605_v12, %v575_v5  ;;  %v584_v5 = vmul.f32 %v8108_v7, %v8108_v7 }
  0x52   : > { %v540_v57 = vadd.f32 %v539_v49, %v8079_v39  ;;  %v480_v49 = vld [vmem:[%s14654_s1 + $0xe8] sm:$0xff] }
  0x53   : > { %v607_v31 = vadd.f32 %v606_v24, %v576_v11  ;;  %v585_v11 = vmul.f32 %v8113_v15, %v8113_v15  ;;  %v486_v24 = vld [vmem:[%s14655_s2 + $0x18] sm:$0xff] }
  0x54   : > { %v541_v63 = vadd.f32 %v540_v57, %v8087_v47  ;;  %v1849_v47 = vld [vmem:[%s14657_s4 + $0x80] sm:$0xff] }
  0x55   : > { %759 = vperm.xlu1 %7363, %v470_v28   ;;  %v578_v28 = vmul.f32 %v8064_v21, %v8064_v21  ;;  %v608_v37 = vadd.f32 %v607_v31, %v577_v23  ;;  %v488_v31 = vld [vmem:[%s14655_s2 + $0x28] sm:$0xff]  ;;  %v1857_v21 = vld [vmem:[%s14657_s4 + $0xc0] sm:$0xff] }
  0x56   : > { %v542_v8 = vadd.f32 %v541_v63, %v8094_v56 }
  0x57   : > { %v609_v44 = vadd.f32 %v608_v37, %v578_v28 }
  0x58   : > { %v543_v19 = vadd.f32 %v542_v8, %v8099_v62 }
  0x59   : > { %769 = vperm.xlu1 %7363, %v472_v45   ;;  %v610_v51 = vadd.f32 %v609_v44, %v579_v36  ;;  %v490_v36 = vld [vmem:[%s14655_s2 + $0x38] sm:$0xff] }
  0x5a   : > { %v544_v27 = vadd.f32 %v543_v19, %v8108_v7  ;;  %v484_v19 = vld [vmem:[%s14655_s2 + $0x8] sm:$0xff]  ;;  %v494_v44 = vld [vmem:[%s14655_s2 + $0x58] sm:$0xff] }
  0x5b   : > { %v611_v57 = vadd.f32 %v610_v51, %v580_v43  ;;  %v492_v43 = vld [vmem:[%s14655_s2 + $0x48] sm:$0xff]  ;;  %v483_v51 = vld [vmem:[%s14655_s2] sm:$0xff] }
  0x5c   : > { %v545_v34 = vadd.f32 %v544_v27, %v8113_v15 }
  0x5d   : > { %779 = vperm.xlu1 %7363, %v474_v0   ;;  %v612_v63 = vadd.f32 %v611_v57, %v581_v50  ;;  %v500_v50 = vld [vmem:[%s14655_s2 + $0x88] sm:$0xff] }
  0x5e   : > { %v546_v42 = vrot.slane %v545_v34, 4  ;;  %v504_v57 = vld [vmem:[%s14655_s2 + $0xa8] sm:$0xff] }
  0x5f   : > { %v613_v6 = vadd.f32 %v612_v63, %v582_v55  ;;  %v485_v55 = vld [vmem:[%s14655_s2 + $0x10] sm:$0xff]  ;;  %v506_v63 = vld [vmem:[%s14655_s2 + $0xb8] sm:$0xff] }
  0x60   : > { %v547_v45 = vadd.f32 %v546_v42, %v545_v34 }
  0x61   : > { %789 = vperm.xlu1 %7363, %v476_v20   ;;  %v614_v12 = vadd.f32 %v613_v6, %v583_v61  ;;  %v487_v61 = vld [vmem:[%s14655_s2 + $0x20] sm:$0xff] }
  0x62   : > { %v548_v52 = vrot.slane %v547_v45, 2 }
  0x63   : > { %v615_v20 = vadd.f32 %v614_v12, %v584_v5  ;;  %v508_v5 = vld [vmem:[%s14655_s2 + $0xc8] sm:$0xff] }
  0x64   : > { %v549_v58 = vadd.f32 %v548_v52, %v547_v45  ;;  %v496_v45 = vld [vmem:[%s14655_s2 + $0x68] sm:$0xff]  ;;  %v502_v52 = vld [vmem:[%s14655_s2 + $0x98] sm:$0xff] }
  0x65   : > { %799 = vperm.xlu1 %7363, %v478_v35   ;;  %v616_v23 = vadd.f32 %v615_v20, %v585_v11  ;;  %v510_v11 = vld [vmem:[%s14655_s2 + $0xd8] sm:$0xff]  ;;  %v512_v20 = vld [vmem:[%s14655_s2 + $0xe8] sm:$0xff] }
  0x66   : > { %v550_v0 = vrot.slane %v549_v58, 1 }
  0x67   : > { %v617_v27 = vrot.slane %v616_v23, 4 }
  0x68   : > { %v551_v8 = vadd.f32 %v550_v0, %v549_v58 }
  0x69   : > { %809 = vperm.xlu1 %7363, %v480_v49   ;;  %v618_v28 = vadd.f32 %v617_v27, %v616_v23  ;;  %v498_v49 = vld [vmem:[%s14655_s2 + $0x78] sm:$0xff] }
  0x6a   : > { %552 = vadd.xlane.f32.xlu0 %v551_v8  ;;  %v491_v8 = vld [vmem:[%s14655_s2 + $0x40] sm:$0xff]  ;;  %v514_v27 = vld [vmem:[%s14655_s2 + $0xf8] sm:$0xff] }
  0x6b   : > { %v619_v34 = vrot.slane %v618_v28, 2 }
  0x6d   : > { %819 = vperm.xlu1 %7363, %v482_v1   ;;  %v620_v35 = vadd.f32 %v619_v34, %v618_v28  ;;  %v489_v1 = vld [vmem:[%s14655_s2 + $0x30] sm:$0xff]  ;;  %v1834_v34 = vld [vmem:[%s14657_s4 + $0x8] sm:$0xff] }
  0x6f   : > { %v621_v37 = vrot.slane %v620_v35, 1 }
  0x71   : > { %895 = vperm.xlu1 %7363, %v484_v19   ;;  %v622_v42 = vadd.f32 %v621_v37, %v620_v35  ;;  %v493_v19 = vld [vmem:[%s14655_s2 + $0x50] sm:$0xff]  ;;  %v1836_v37 = vld [vmem:[%s14657_s4 + $0x18] sm:$0xff] }
  0x73   : > { %623 = vadd.xlane.f32.xlu0 %v622_v42 }
  0x75   : > { %905 = vperm.xlu1 %7363, %v486_v24   ;;  %v495_v24 = vld [vmem:[%s14655_s2 + $0x60] sm:$0xff] }
  0x79   : > { %915 = vperm.xlu1 %7363, %v488_v31   ;;  %v497_v31 = vld [vmem:[%s14655_s2 + $0x70] sm:$0xff] }
  0x7d   : > { %925 = vperm.xlu1 %7363, %v490_v36   ;;  %v499_v36 = vld [vmem:[%s14655_s2 + $0x80] sm:$0xff] }
  0x81   : > { %935 = vperm.xlu1 %7363, %v492_v43   ;;  %v501_v43 = vld [vmem:[%s14655_s2 + $0x90] sm:$0xff] }
  0x85   : > { %945 = vperm.xlu1 %7363, %v494_v44   ;;  %v1838_v44 = vld [vmem:[%s14657_s4 + $0x28] sm:$0xff] }
  0x89   : > { %955 = vperm.xlu1 %7363, %v496_v45   ;;  %890 = vperm.xlu0 %7364, %v483_v51  }
  0x8d   : > { %965 = vperm.xlu1 %7363, %v498_v49   ;;  %900 = vperm.xlu0 %7364, %v485_v55   ;;  %v503_v49 = vld [vmem:[%s14655_s2 + $0xa0] sm:$0xff]  ;;  %v1842_v55 = vld [vmem:[%s14657_s4 + $0x48] sm:$0xff] }
  0x91   : > { %975 = vperm.xlu1 %7363, %v500_v50   ;;  %910 = vperm.xlu0 %7364, %v487_v61   ;;  %v1840_v50 = vld [vmem:[%s14657_s4 + $0x38] sm:$0xff]  ;;  %v507_v61 = vld [vmem:[%s14655_s2 + $0xc0] sm:$0xff] }
  0x95   : > { %985 = vperm.xlu1 %7363, %v502_v52   ;;  %920 = vperm.xlu0 %7364, %v489_v1   ;;  %v505_v52 = vld [vmem:[%s14655_s2 + $0xb0] sm:$0xff] }
  0x98   : > { %v8187_v58 = vpop.permute.xlu1 %664 }
  0x99   : > { %995 = vperm.xlu1 %7363, %v504_v57   ;;  %930 = vperm.xlu0 %7364, %v491_v8   ;;  %v1846_v8 = vld [vmem:[%s14657_s4 + $0x68] sm:$0xff] }
  0x9c   : > { %v8195_v0 = vpop.permute.xlu1 %669 }
  0x9d   : > { %1005 = vperm.xlu1 %7363, %v506_v63   ;;  %940 = vperm.xlu0 %7364, %v493_v19   ;;  %v1844_v63 = vld [vmem:[%s14657_s4 + $0x58] sm:$0xff]  ;;  %v511_v19 = vld [vmem:[%s14655_s2 + $0xe0] sm:$0xff] }
  0xa0   : > { %v8203_v6 = vpop.permute.xlu1 %679 }
  0xa1   : > { %1015 = vperm.xlu1 %7363, %v508_v5   ;;  %950 = vperm.xlu0 %7364, %v495_v24   ;;  %v509_v5 = vld [vmem:[%s14655_s2 + $0xd0] sm:$0xff]  ;;  %v8291_v24 = vpop.permute.xlu0 %674 }
  0xa4   : > { %v8211_v12 = vpop.permute.xlu1 %684 }
  0xa5   : > { %1025 = vperm.xlu1 %7363, %v510_v11   ;;  %960 = vperm.xlu0 %7364, %v497_v31   ;;  %v513_v31 = vld [vmem:[%s14655_s2 + $0xf0] sm:$0xff] }
  0xa8   : > { %v8219_v23 = vpop.permute.xlu1 %689 }
  0xa9   : > { %1035 = vperm.xlu1 %7363, %v512_v20   ;;  %970 = vperm.xlu0 %7364, %v499_v36   ;;  %v1848_v20 = vld [vmem:[%s14657_s4 + $0x78] sm:$0xff] }
  0xac   : > { %v8227_v28 = vpop.permute.xlu1 %694 }
  0xad   : > { %1045 = vperm.xlu1 %7363, %v514_v27   ;;  %980 = vperm.xlu0 %7364, %v501_v43   ;;  %v1833_v43 = vld [vmem:[%s14657_s4] sm:$0xff] }
  0xb0   : > { %v8235_v35 = vpop.permute.xlu1 %699 }
  0xb1   : > { %2243 = vperm.xlu1 %7363, %v1834_v34   ;;  %990 = vperm.xlu0 %7364, %v503_v49   ;;  %v1850_v34 = vld [vmem:[%s14657_s4 + $0x88] sm:$0xff] }
  0xb4   : > { %v8243_v42 = vpop.permute.xlu1 %704 }
  0xb5   : > { %2253 = vperm.xlu1 %7363, %v1836_v37   ;;  %1000 = vperm.xlu0 %7364, %v505_v52   ;;  %v8303_v37 = vpop.permute.xlu0 %734  ;;  %v1854_v52 = vld [vmem:[%s14657_s4 + $0xa8] sm:$0xff] }
  0xb8   : > { %v8251_v45 = vpop.permute.xlu1 %709 }
  0xb9   : > { %2263 = vperm.xlu1 %7363, %v1838_v44   ;;  %1010 = vperm.xlu0 %7364, %v507_v61   ;;  %v1852_v44 = vld [vmem:[%s14657_s4 + $0x98] sm:$0xff] }
  0xbc   : > { %v8259_v51 = vpop.permute.xlu1 %714 }
  0xbd   : > { %2273 = vperm.xlu1 %7363, %v1840_v50   ;;  %1020 = vperm.xlu0 %7364, %v509_v5   ;;  %v1835_v50 = vld [vmem:[%s14657_s4 + $0x10] sm:$0xff]  ;;  %v1856_v5 = vld [vmem:[%s14657_s4 + $0xb8] sm:$0xff] }
  0xc0   : > { %v8267_v57 = vpop.permute.xlu1 %719 }
  0xc1   : > { %2283 = vperm.xlu1 %7363, %v1842_v55   ;;  %1030 = vperm.xlu0 %7364, %v511_v19   ;;  %v8319_v55 = vpop.permute.xlu0 %744 }
  0xc2   : > { %14830 = vst [vmem:[#allocation18_spill] sm:$0xff] %v8319_v55 }
  0xc4   : > { %v8275_v1 = vpop.permute.xlu1 %724 }
  0xc5   : > { %2293 = vperm.xlu1 %7363, %v1844_v63   ;;  %1040 = vperm.xlu0 %7364, %v513_v31   ;;  %v1837_v63 = vld [vmem:[%s14657_s4 + $0x20] sm:$0xff]  ;;  %v8331_v19 = vpop.permute.xlu0 %754  ;;  %v1858_v31 = vld [vmem:[%s14657_s4 + $0xc8] sm:$0xff] }
  0xc6   : > { %14833 = vst [vmem:[#allocation21_spill] sm:$0xff] %v8331_v19 }
  0xc8   : > { %v8283_v11 = vpop.permute.xlu1 %729 }
  0xc9   : > { %2303 = vperm.xlu1 %7363, %v1846_v8   ;;  %2238 = vperm.xlu0 %7364, %v1833_v43   ;;  %v1841_v43 = vld [vmem:[%s14657_s4 + $0x40] sm:$0xff] }
  0xcc   : > { %v8293_v27 = vpop.permute.xlu1 %739 }
  0xcd   : > { %2313 = vperm.xlu1 %7363, %v1848_v20   ;;  %2248 = vperm.xlu0 %7364, %v1835_v50   ;;  %v1839_v20 = vld [vmem:[%s14657_s4 + $0x30] sm:$0xff]  ;;  %v8347_v50 = vpop.permute.xlu0 %764 }
  0xce   : > { %14835 = vst [vmem:[#allocation23_spill] sm:$0xff] %v8347_v50 }
  0xd0   : > { %v8301_v36 = vpop.permute.xlu1 %749 }
  0xd1   : > { %14828 = vst [vmem:[#allocation16_spill] sm:$0xff] %v8301_v36  ;;  %2323 = vperm.xlu1 %7363, %v1850_v34   ;;  %2258 = vperm.xlu0 %7364, %v1837_v63   ;;  %v1843_v63 = vld [vmem:[%s14657_s4 + $0x50] sm:$0xff]  ;;  %v8362_v2 = vpop.permute.xlu0 %774 }
  0xd2   : > { %14837 = vst [vmem:[#allocation25_spill] sm:$0xff] %v8362_v2 }
  0xd4   : > { %v8311_v49 = vpop.permute.xlu1 %759 }
  0xd5   : > { %14829 = vst [vmem:[#allocation17_spill] sm:$0xff] %v8311_v49  ;;  %2333 = vperm.xlu1 %7363, %v1852_v44   ;;  %2268 = vperm.xlu0 %7364, %v1839_v20   ;;  %v1860_v44 = vld [vmem:[%s14657_s4 + $0xd8] sm:$0xff]  ;;  %v7375_v20 = vld [vmem:[%s14656_s3 + $0x4] ss:$8 sps:$4 sm:$0xff]  }
  0xd6   : > { %1512 = vmatprep.mubr.bf16.mxu0 %v7375_v20  ;;  %v1847_v20 = vld [vmem:[%s14657_s4 + $0x70] sm:$0xff] }
  0xd8   : > { %v8321_v61 = vpop.permute.xlu1 %769 }
  0xd9   : > { %14831 = vst [vmem:[#allocation19_spill] sm:$0xff] %v8321_v61  ;;  %2343 = vperm.xlu1 %7363, %v1854_v52   ;;  %2278 = vperm.xlu0 %7364, %v1841_v43   ;;  %v1845_v43 = vld [vmem:[%s14657_s4 + $0x60] sm:$0xff] }
  0xdc   : > { %v8329_v8 = vpop.permute.xlu1 %779 }
  0xdd   : > { %14832 = vst [vmem:[#allocation20_spill] sm:$0xff] %v8329_v8  ;;  %2353 = vperm.xlu1 %7363, %v1856_v5   ;;  %v1862_v5 = vld [vmem:[%s14657_s4 + $0xe8] sm:$0xff]  ;;  %2288 = vperm.xlu0 %7364, %v1843_v63   ;;  %v1853_v8 = vld [vmem:[%s14657_s4 + $0xa0] sm:$0xff] }
  0xde   : > { %v1866_v63 = vld [vmem:[%s14657_s4 + $0x108] sm:$0xff] }
  0xe0   : > { %v8339_v34 = vpop.permute.xlu1 %789 }
  0xe1   : > { %14834 = vst [vmem:[#allocation22_spill] sm:$0xff] %v8339_v34  ;;  %2363 = vperm.xlu1 %7363, %v1858_v31   ;;  %2298 = vperm.xlu0 %7364, %v1845_v43   ;;  %v1868_v43 = vld [vmem:[%s14657_s4 + $0x118] sm:$0xff] }
  0xe4   : > { %v8349_v52 = vpop.permute.xlu1 %799 }
  0xe5   : > { %14836 = vst [vmem:[#allocation24_spill] sm:$0xff] %v8349_v52  ;;  %2373 = vperm.xlu1 %7363, %v1860_v44   ;;  %v1864_v44 = vld [vmem:[%s14657_s4 + $0xf8] sm:$0xff]  ;;  %2308 = vperm.xlu0 %7364, %v1847_v20   ;;  %v1870_v20 = vld [vmem:[%s14657_s4 + $0x128] sm:$0xff] }
  0xe8   : > { %v8360_v31 = vpop.permute.xlu1 %809 }
  0xe9   : > { %2383 = vperm.xlu1 %7363, %v1862_v5   ;;  %v8378_v5 = vpop.permute.xlu0 %784  ;;  %2318 = vperm.xlu0 %7364, %v1849_v47   ;;  %v1872_v47 = vld [vmem:[%s14657_s4 + $0x138] sm:$0xff] }
  0xea   : > { %14838 = vst [vmem:[#allocation26_spill] sm:$0xff] %v8378_v5  ;;  %v1851_v5 = vld [vmem:[%s14657_s4 + $0x90] sm:$0xff] }
  0xec   : > { %v8370_v52 = vpop.permute.xlu1 %819 }
  0xed   : > { %2393 = vperm.xlu1 %7363, %v1864_v44   ;;  %v8390_v39 = vpop.permute.xlu0 %794  ;;  %2328 = vperm.xlu0 %7364, %v1851_v5   ;;  %v1874_v5 = vld [vmem:[%s14657_s4 + $0x148] sm:$0xff] }
  0xee   : > { %14839 = vst [vmem:[#allocation27_spill] sm:$0xff] %v8390_v39 }
  0xf0   : > { %v8380_v34 = vpop.permute.xlu1 %895 }
  0xf1   : > { %2403 = vperm.xlu1 %7363, %v1866_v63   ;;  %2338 = vperm.xlu0 %7364, %v1853_v8   ;;  %v1876_v8 = vld [vmem:[%s14657_s4 + $0x158] sm:$0xff] }
  0xf4   : > { %v8388_v44 = vpop.permute.xlu1 %905 }
  0xf5   : > { %2413 = vperm.xlu1 %7363, %v1868_v43   ;;  %v8406_v43 = vpop.permute.xlu0 %804  ;;  %2348 = vperm.xlu0 %7364, %v1855_v29   ;;  %v1878_v29 = vld [vmem:[%s14657_s4 + $0x168] sm:$0xff] }
  0xf8   : > { %v8398_v63 = vpop.permute.xlu1 %915 }
  0xf9   : > { %2423 = vperm.xlu1 %7363, %v1870_v20   ;;  %v8418_v2 = vpop.permute.xlu0 %814  ;;  %2358 = vperm.xlu0 %7364, %v1857_v21   ;;  %v1880_v21 = vld [vmem:[%s14657_s4 + $0x178] sm:$0xff] }
  0xfc   : > { %v8408_v39 = vpop.permute.xlu1 %925 }
  0xfd   : > { %2433 = vperm.xlu1 %7363, %v1872_v47   ;;  %v553_v61 = vpop.xlane.xlu0 %552  ;;  %2368 = vperm.xlu0 %7364, %v1859_v10   ;;  %v1863_v10 = vld [vmem:[%s14657_s4 + $0xf0] sm:$0xff] }
 0x100   : > { %v8416_v20 = vpop.permute.xlu1 %935 }
 0x101   : > { %2443 = vperm.xlu1 %7363, %v1874_v5   ;;  %v8436_v5 = vmul.f32 3.0517578e-05, %v553_v61  ;;  %v624_v49 = vpop.xlane.xlu0 %623  ;;  %2378 = vperm.xlu0 %7364, %v1861_v4   ;;  %v1882_v61 = vld [vmem:[%s14657_s4 + $0x188] sm:$0xff]  ;;  %v1865_v4 = vld [vmem:[%s14657_s4 + $0x100] sm:$0xff] }
 0x102   : > { %v626_v19 = vmul.f32 3.0517578e-05, %v624_v49  ;;  %v1884_v49 = vld [vmem:[%s14657_s4 + $0x198] sm:$0xff] }
 0x103   : > { %v627_v59 = vmul.f32 %v8436_v5, %v8436_v5 }
 0x104   : > { %v8426_v47 = vpop.permute.xlu1 %945 }
 0x105   : > { %2453 = vperm.xlu1 %7363, %v1876_v8   ;;  %2388 = vperm.xlu0 %7364, %v1863_v10  }
 0x108   : > { %v8434_v50 = vpop.permute.xlu1 %955 }
 0x109   : > { %2463 = vperm.xlu1 %7363, %v1878_v29   ;;  %v628_v29 = vsub.f32 %v626_v19, %v627_v59  ;;  %2398 = vperm.xlu0 %7364, %v1865_v4   ;;  %v1867_v59 = vld [vmem:[%s14657_s4 + $0x110] sm:$0xff]  ;;  %v1886_v19 = vld [vmem:[%s14657_s4 + $0x1a8] sm:$0xff]  ;;  %v630_v4 = vsub.f32 %v7888_v13, %v8436_v5 }
 0x10a   : > { %v1890_v13 = vld [vmem:[%s14657_s4 + $0x1c8] sm:$0xff] }
 0x10b   : > { %v629_v46 = vmax.f32 %v628_v29, 0.0  ;;  %v1888_v29 = vld [vmem:[%s14657_s4 + $0x1b8] sm:$0xff] }
 0x10c   : > { %v8444_v8 = vpop.permute.xlu1 %965 }
 0x10d   : > { %14840 = vst [vmem:[#allocation28_spill] sm:$0xff] %v8444_v8  ;;  %2473 = vperm.xlu1 %7363, %v1880_v21   ;;  %v854_v8 = vadd.f32 1e-08, %v629_v46  ;;  %v891_v21 = vpop.permute.xlu0 %890  ;;  %2408 = vperm.xlu0 %7364, %v1867_v59   ;;  %v1869_v46 = vld [vmem:[%s14657_s4 + $0x120] sm:$0xff]  ;;  %v632_v59 = vsub.f32 %v7893_v16, %v8436_v5 }
 0x10f   : > { %7565 = vrsqrt.f32 %v854_v8  ;;  %v631_v8 = vsub.f32 %v7890_v14, %v8436_v5  ;;  %v1871_v14 = vld [vmem:[%s14657_s4 + $0x130] sm:$0xff] }
 0x110   : > { %v8454_v53 = vpop.permute.xlu1 %975 }
 0x111   : > { %14841 = vst [vmem:[#allocation29_spill] sm:$0xff] %v8454_v53  ;;  %2483 = vperm.xlu1 %7363, %v1882_v61   ;;  %v901_v10 = vpop.permute.xlu0 %900  ;;  %2418 = vperm.xlu0 %7364, %v1869_v46   ;;  %v822_v46 = vmul.f32 %v8187_v58, %v630_v4  ;;  %v1873_v58 = vld [vmem:[%s14657_s4 + $0x140] sm:$0xff] }
 0x114   : > { %v8462_v36 = vpop.permute.xlu1 %985 }
 0x115   : > { %14842 = vst [vmem:[#allocation30_spill] sm:$0xff] %v8462_v36  ;;  %2493 = vperm.xlu1 %7363, %v1884_v49   ;;  %v911_v49 = vpop.permute.xlu0 %910  ;;  %2428 = vperm.xlu0 %7364, %v1871_v14  }
 0x118   : > { %v8470_v61 = vpop.permute.xlu1 %995 }
 0x119   : > { %14843 = vst [vmem:[#allocation31_spill] sm:$0xff] %v8470_v61  ;;  %2503 = vperm.xlu1 %7363, %v1886_v19   ;;  %v633_v19 = vsub.f32 %v7895_v17, %v8436_v5  ;;  %v823_v61 = vmul.f32 %v8195_v0, %v631_v8  ;;  %v8495_v53 = vpop.eup %7565  ;;  %v635_v17 = vsub.f32 %v7910_v25, %v8436_v5  ;;  %v1892_v25 = vld [vmem:[%s14657_s4 + $0x1d8] sm:$0xff] }
 0x11a   : > { %v634_v0 = vsub.f32 %v7906_v22, %v8436_v5  ;;  %v824_v8 = vmul.f32 %v8291_v24, %v632_v59  ;;  %v856_v40 = vmul.f32 %v8495_v53, %v822_v46  ;;  %2438 = vperm.xlu0 %7364, %v1873_v58   ;;  %v659_v46 = vsub.f32 %v8099_v62, %v8436_v5 }
 0x11b   : > { %v857_v55 = vmul.f32 %v8495_v53, %v823_v61  ;;  %v827_v14 = vmul.f32 %v8219_v23, %v635_v17 }
 0x11c   : > { %v8482_v36 = vpop.permute.xlu1 %1005  ;;  %v1048_v22 = vadd.f32 %v891_v21, %v856_v40  ;;  %v858_v24 = vmul.f32 %v8495_v53, %v824_v8  ;;  %v826_v40 = vmul.f32 %v8211_v12, %v634_v0  ;;  %v658_v12 = vsub.f32 %v8094_v56, %v8436_v5  ;;  %v1877_v56 = vld [vmem:[%s14657_s4 + $0x160] sm:$0xff] }
 0x11d   : > { %14844 = vst [vmem:[#allocation32_spill] sm:$0xff] %v8482_v36  ;;  %2513 = vperm.xlu1 %7363, %v1888_v29   ;;  %v8498_v36 = vpop.permute.xlu0 %920  ;;  %v825_v29 = vmul.f32 %v8203_v6, %v633_v19  ;;  %v1049_v4 = vadd.f32 %v8380_v34, %v857_v55  ;;  %v637_v19 = vsub.f32 %v7924_v33, %v8436_v5  ;;  %v1875_v55 = vld [vmem:[%s14657_s4 + $0x150] sm:$0xff] }
 0x11e   : > { %v661_v34 = vsub.f32 %v8113_v15, %v8436_v5  ;;  %v861_v33 = vmul.f32 %v8495_v53, %v827_v14  ;;  %v1050_v21 = vadd.f32 %v901_v10, %v858_v24  ;;  %2448 = vperm.xlu0 %7364, %v1875_v55   ;;  %v1894_v15 = vld [vmem:[%s14657_s4 + $0x1e8] sm:$0xff]  ;;  %v660_v10 = vsub.f32 %v8108_v7, %v8436_v5  ;;  %v1879_v14 = vld [vmem:[%s14657_s4 + $0x170] sm:$0xff] }
 0x11f   : > { %v859_v61 = vmul.f32 %v8495_v53, %v825_v29  ;;  %v1144_v17 = vpack.c.bf16 %v1049_v4, %v1048_v22  ;;  %v829_v0 = vmul.f32 %v8235_v35, %v637_v19  ;;  %v851_v58 = vmul.f32 %v8360_v31, %v659_v46 }
 0x120   : > { %v8500_v16 = vpop.permute.xlu1 %1015  ;;  %v639_v35 = vsub.f32 %v7938_v41, %v8436_v5  ;;  %v14845_v4 = vmov 0   ;;  %v850_v41 = vmul.f32 %v8406_v43, %v658_v12  ;;  %v641_v43 = vsub.f32 %v7964_v54, %v8436_v5 }
 0x121   : > { %2523 = vperm.xlu1 %7363, %v1890_v13   ;;  %v8519_v59 = vpop.permute.xlu0 %930  ;;  %v636_v13 = vsub.f32 %v7920_v30, %v8436_v5  ;;  %v1051_v23 = vadd.f32 %v8388_v44, %v859_v61  ;;  %v860_v30 = vmul.f32 %v8495_v53, %v826_v40  ;;  %v638_v44 = vsub.f32 %v7934_v38, %v8436_v5 }
 0x122   : > { %1481 = vmatpush1.bf16.msra.mxu0 %v1144_v17  ;;  %v863_v61 = vmul.f32 %v8495_v53, %v829_v0  ;;  %v1053_v38 = vadd.f32 %v8398_v63, %v861_v33  ;;  %v8568_v24 = vmul.f32 %v8495_v53, %v851_v58  ;;  %2458 = vperm.xlu0 %7364, %v1877_v56  }
 0x123   : > { %v828_v29 = vmul.f32 %v8227_v28, %v636_v13  ;;  %1482 = vmatprep.subr.bf16.mxu0 %v14845_v4  ;;  %v1145_v7 = vpack.c.bf16 %v1051_v23, %v1050_v21  ;;  %v1052_v28 = vadd.f32 %v911_v49, %v860_v30  ;;  %v640_v63 = vsub.f32 %v7952_v48, %v8436_v5 }
 0x124   : > { %v8521_v6 = vpop.permute.xlu1 %1025  ;;  %v852_v49 = vmul.f32 %v8418_v2, %v660_v10  ;;  %v830_v46 = vmul.f32 %v8243_v42, %v638_v44  ;;  %v831_v40 = vmul.f32 %v8251_v45, %v639_v35  ;;  %v8591_v48 = vmul.f32 %v8495_v53, %v850_v41  ;;  %v1898_v42 = vld [vmem:[%s14658_s5 + $0x8] sm:$0xff] }
 0x125   : > { %2533 = vperm.xlu1 %7363, %v1892_v25   ;;  %v8539_v8 = vpop.permute.xlu0 %940  ;;  %v853_v25 = vmul.f32 %v8370_v52, %v661_v34  ;;  %v862_v31 = vmul.f32 %v8495_v53, %v828_v29  ;;  %v1896_v52 = vld [vmem:[%s14657_s4 + $0x1f8] sm:$0xff]  ;;  %v1055_v2 = vadd.f32 %v8408_v39, %v863_v61  ;;  %v1146_v55 = vpack.c.bf16 %v1053_v38, %v1052_v28 }
 0x126   : > { %1483 = vmatpush1.bf16.msra.mxu0 %v1145_v7  ;;  %v8600_v54 = vmul.f32 %v8495_v53, %v852_v49  ;;  %2468 = vperm.xlu0 %7364, %v1879_v14   ;;  %v865_v45 = vmul.f32 %v8495_v53, %v831_v40  ;;  %v864_v39 = vmul.f32 %v8495_v53, %v830_v46  ;;  %v14851_v46 = vld [vmem:[#allocation18_spill] sm:$0xff] }
 0x127   : > { %v8583_v13 = vmul.f32 %v8495_v53, %v853_v25  ;;  %1484 = vmatprep.subr.bf16.mxu0 %v14845_v4  ;;  %v1054_v34 = vadd.f32 %v8498_v36, %v862_v31  ;;  %v1881_v36 = vld [vmem:[%s14657_s4 + $0x180] sm:$0xff]  ;;  %v642_v21 = vsub.f32 %v7971_v60, %v8436_v5  ;;  %v643_v30 = vsub.f32 %v7982_v3, %v8436_v5  ;;  %v1900_v60 = vld [vmem:[%s14658_s5 + $0x18] sm:$0xff] }
 0x128   : > { %v8541_v62 = vpop.permute.xlu1 %1035  ;;  %v832_v17 = vmul.f32 %v8259_v51, %v640_v63  ;;  %v833_v12 = vmul.f32 %v8267_v57, %v641_v43  ;;  %v1057_v3 = vadd.f32 %v8416_v20, %v865_v45  ;;  %v1883_v57 = vld [vmem:[%s14657_s4 + $0x190] sm:$0xff]  ;;  %v645_v58 = vsub.f32 %v7997_v18, %v8436_v5 }
 0x129   : > { %v8565_v22 = vpop.permute.xlu0 %950  ;;  %2543 = vperm.xlu1 %7363, %v1894_v15   ;;  %v1147_v0 = vpack.c.bf16 %v1055_v2, %v1054_v34  ;;  %v1056_v15 = vadd.f32 %v8519_v59, %v864_v39  ;;  %v644_v59 = vsub.f32 %v7989_v9, %v8436_v5  ;;  %v834_v56 = vmul.f32 %v8275_v1, %v642_v21  ;;  %v1902_v9 = vld [vmem:[%s14658_s5 + $0x28] sm:$0xff]  ;;  %v14852_v2 = vld [vmem:[#allocation16_spill] sm:$0xff] }
 0x12a   : > { %1485 = vmatpush1.bf16.msra.mxu0 %v1146_v55  ;;  %2478 = vperm.xlu0 %7364, %v1881_v36   ;;  %v867_v29 = vmul.f32 %v8495_v53, %v833_v12  ;;  %v866_v51 = vmul.f32 %v8495_v53, %v832_v17  ;;  %v835_v20 = vmul.f32 %v8283_v11, %v643_v30  ;;  %v1885_v11 = vld [vmem:[%s14657_s4 + $0x1a0] sm:$0xff]  ;;  %v1906_v39 = vld [vmem:[%s14658_s5 + $0x48] sm:$0xff]  ;;  %v14855_v30 = vld [vmem:[#allocation28_spill] sm:$0xff] }
 0x12b   : > { %1486 = vmatprep.subr.bf16.mxu0 %v14845_v4  ;;  %v1148_v35 = vpack.c.bf16 %v1057_v3, %v1056_v15  ;;  %v868_v1 = vmul.f32 %v8495_v53, %v834_v56  ;;  %v647_v28 = vsub.f32 %v8012_v32, %v8436_v5  ;;  %v836_v31 = vmul.f32 %v8303_v37, %v644_v59  ;;  %v14854_v36 = vld [vmem:[#allocation7_spill] sm:$0xff]  ;;  %v14856_v15 = vld [vmem:[#allocation8_spill] sm:$0xff]  ;;  %v14857_v3 = vld [vmem:[#allocation21_spill] sm:$0xff] }
 0x12c   : > { %v8570_v19 = vpop.permute.xlu1 %1045  ;;  %v1058_v25 = vadd.f32 %v8539_v8, %v866_v51  ;;  %v1059_v18 = vadd.f32 %v8426_v47, %v867_v29  ;;  %v869_v7 = vmul.f32 %v8495_v53, %v835_v20  ;;  %v646_v8 = vsub.f32 %v8004_v26, %v8436_v5  ;;  %v1904_v26 = vld [vmem:[%s14658_s5 + $0x38] sm:$0xff] }
 0x12d   : > { %v8595_v33 = vpop.permute.xlu0 %960  ;;  %2553 = vperm.xlu1 %7363, %v1896_v52   ;;  %v837_v47 = vmul.f32 %v8293_v27, %v645_v58  ;;  %v1060_v52 = vadd.f32 %v8565_v22, %v868_v1  ;;  %v870_v37 = vmul.f32 %v8495_v53, %v836_v31  ;;  %v1887_v27 = vld [vmem:[%s14657_s4 + $0x1b0] sm:$0xff]  ;;  %v14850_v22 = vld [vmem:[#allocation6_spill] sm:$0xff]  ;;  %v839_v55 = vmul.f32 %v14852_v2, %v647_v28  ;;  %v1908_v56 = vld [vmem:[%s14658_s5 + $0x58] sm:$0xff] }
 0x12e   : > { %1487 = vmatpush1.bf16.msra.mxu0 %v1147_v0  ;;  %2488 = vperm.xlu0 %7364, %v1883_v57   ;;  %v1149_v41 = vpack.c.bf16 %v1059_v18, %v1058_v25  ;;  %v1061_v32 = vadd.f32 %v8434_v50, %v869_v7  ;;  %v648_v43 = vsub.f32 %v14850_v22, %v8436_v5  ;;  %v14859_v20 = vld [vmem:[#allocation9_spill] sm:$0xff]  ;;  %v14863_v28 = vld [vmem:[#allocation23_spill] sm:$0xff] }
 0x12f   : > { %1488 = vmatprep.subr.bf16.mxu0 %v14845_v4  ;;  %v871_v14 = vmul.f32 %v8495_v53, %v837_v47  ;;  %v838_v40 = vmul.f32 %v14851_v46, %v646_v8  ;;  %v1062_v50 = vadd.f32 %v8595_v33, %v870_v37  ;;  %v649_v21 = vsub.f32 %v14854_v36, %v8436_v5  ;;  %v1889_v33 = vld [vmem:[%s14657_s4 + $0x1c0] sm:$0xff]  ;;  %v14860_v25 = vld [vmem:[#allocation17_spill] sm:$0xff]  ;;  %v14865_v37 = vld [vmem:[#allocation11_spill] sm:$0xff] }
 0x130   : > { %v8597_v23 = vpop.permute.xlu1 %2243  ;;  %v1150_v34 = vpack.c.bf16 %v1061_v32, %v1060_v52  ;;  %v873_v12 = vmul.f32 %v8495_v53, %v839_v55  ;;  %v840_v29 = vmul.f32 %v14857_v3, %v648_v43  ;;  %v14861_v18 = vld [vmem:[#allocation29_spill] sm:$0xff]  ;;  %v14866_v22 = vld [vmem:[#allocation19_spill] sm:$0xff]  ;;  %v14867_v46 = vld [vmem:[#allocation30_spill] sm:$0xff] }
 0x131   : > { %14846 = vst [vmem:[#allocation33_spill] sm:$0xff] %v8597_v23  ;;  %v8618_v44 = vpop.permute.xlu0 %970  ;;  %2693 = vperm.xlu1 %7363, %v1898_v42   ;;  %v1063_v17 = vadd.f32 %v14855_v30, %v871_v14  ;;  %v872_v0 = vmul.f32 %v8495_v53, %v838_v40  ;;  %v1910_v14 = vld [vmem:[%s14658_s5 + $0x68] sm:$0xff]  ;;  %v14868_v55 = vld [vmem:[#allocation12_spill] sm:$0xff] }
 0x132   : > { %1489 = vmatpush1.bf16.msra.mxu0 %v1148_v35  ;;  %2498 = vperm.xlu0 %7364, %v1885_v11   ;;  %v651_v35 = vsub.f32 %v14859_v20, %v8436_v5  ;;  %v1065_v7 = vadd.f32 %v14861_v18, %v873_v12  ;;  %v874_v1 = vmul.f32 %v8495_v53, %v840_v29  ;;  %v14862_v11 = vld [vmem:[#allocation10_spill] sm:$0xff] }
 0x133   : > { %1490 = vmatprep.subr.bf16.mxu0 %v14845_v4  ;;  %v1151_v51 = vpack.c.bf16 %v1063_v17, %v1062_v50  ;;  %v1064_v57 = vadd.f32 %v8618_v44, %v872_v0  ;;  %v1891_v44 = vld [vmem:[%s14657_s4 + $0x1d0] sm:$0xff]  ;;  %v652_v8 = vsub.f32 %v14862_v11, %v8436_v5  ;;  %v14869_v50 = vld [vmem:[#allocation25_spill] sm:$0xff]  ;;  %v8745_v0 = vadd.f32 %v8541_v62, %v8568_v24  ;;  %v14874_v24 = vld [vmem:[#allocation14_spill] sm:$0xff] }
 0x134   : > { %v8620_v10 = vpop.permute.xlu1 %2253  ;;  %v843_v43 = vmul.f32 %v14866_v22, %v651_v35  ;;  %v1895_v62 = vld [vmem:[%s14657_s4 + $0x1f0] sm:$0xff]  ;;  %v14875_v35 = vld [vmem:[#allocation26_spill] sm:$0xff]  ;;  %v1079_v11 = vadd.f32 %v8570_v19, %v8583_v13 }
 0x135   : > { %14847 = vst [vmem:[#allocation34_spill] sm:$0xff] %v8620_v10  ;;  %v8639_v61 = vpop.permute.xlu0 %980  ;;  %2703 = vperm.xlu1 %7363, %v1900_v60   ;;  %v650_v60 = vsub.f32 %v14856_v15, %v8436_v5  ;;  %v1912_v15 = vld [vmem:[%s14658_s5 + $0x78] sm:$0xff]  ;;  %v1897_v19 = vld [vmem:[%s14658_s5] sm:$0xff] }
 0x136   : > { %1491 = vmatpush1.bf16.msra.mxu0 %v1149_v41  ;;  %2508 = vperm.xlu0 %7364, %v1887_v27   ;;  %v1152_v41 = vpack.c.bf16 %v1065_v7, %v1064_v57  ;;  %v1066_v52 = vadd.f32 %v8639_v61, %v874_v1  ;;  %v653_v27 = vsub.f32 %v14865_v37, %v8436_v5  ;;  %v1893_v61 = vld [vmem:[%s14657_s4 + $0x1e0] sm:$0xff] }
 0x137   : > { %1492 = vmatprep.subr.bf16.mxu0 %v14845_v4  ;;  %v842_v31 = vmul.f32 %v14863_v28, %v650_v60  ;;  %v877_v36 = vmul.f32 %v8495_v53, %v843_v43  ;;  %v14871_v60 = vld [vmem:[#allocation13_spill] sm:$0xff]  ;;  %v1914_v28 = vld [vmem:[%s14658_s5 + $0x88] sm:$0xff] }
 0x138   : > { %v8641_v38 = vpop.permute.xlu1 %2263  ;;  %v655_v3 = vsub.f32 %v14871_v60, %v8436_v5  ;;  %v1920_v60 = vld [vmem:[%s14658_s5 + $0xb8] sm:$0xff] }
 0x139   : > { %14848 = vst [vmem:[#allocation35_spill] sm:$0xff] %v8641_v38  ;;  %v8660_v63 = vpop.permute.xlu0 %990  ;;  %2713 = vperm.xlu1 %7363, %v1902_v9   ;;  %v841_v9 = vmul.f32 %v14860_v25, %v649_v21  ;;  %v876_v2 = vmul.f32 %v8495_v53, %v842_v31  ;;  %v14877_v31 = vld [vmem:[#allocation15_spill] sm:$0xff] }
 0x13a   : > { %1493 = vmatpush1.bf16.msra.mxu0 %v1150_v34  ;;  %2518 = vperm.xlu0 %7364, %v1889_v33   ;;  %v654_v34 = vsub.f32 %v14868_v55, %v8436_v5 }
 0x13b   : > { %1494 = vmatprep.subr.bf16.mxu0 %v14845_v4  ;;  %v875_v47 = vmul.f32 %v8495_v53, %v841_v9  ;;  %v1068_v30 = vadd.f32 %v8660_v63, %v876_v2  ;;  %v14872_v63 = vld [vmem:[#allocation20_spill] sm:$0xff]  ;;  %v1916_v2 = vld [vmem:[%s14658_s5 + $0x98] sm:$0xff] }
 0x13c   : > { %v8662_v49 = vpop.permute.xlu1 %2273  ;;  %v845_v29 = vmul.f32 %v14872_v63, %v653_v27  ;;  %v846_v25 = vmul.f32 %v14875_v35, %v654_v34 }
 0x13d   : > { %14849 = vst [vmem:[#allocation36_spill] sm:$0xff] %v8662_v49  ;;  %v8679_v42 = vpop.permute.xlu0 %1000  ;;  %2723 = vperm.xlu1 %7363, %v1904_v26   ;;  %v1067_v40 = vadd.f32 %v14867_v46, %v875_v47  ;;  %v657_v47 = vsub.f32 %v14877_v31, %v8436_v5  ;;  %v7379_v31 = vld [vmem:[%s14656_s3 + $0x24] ss:$8 sps:$4 sm:$0xff]   ;;  %v7426_v49 = vld [vmem:[%s14656_s3 + $0x110] ss:$8 sps:$4 sm:$0xff]  }
 0x13e   : > { %1495 = vmatpush1.bf16.msra.mxu0 %v1151_v51  ;;  %2528 = vperm.xlu0 %7364, %v1891_v44   ;;  %v14873_v51 = vld [vmem:[#allocation31_spill] sm:$0xff]  ;;  %v879_v9 = vmul.f32 %v8495_v53, %v845_v29  ;;  %v880_v37 = vmul.f32 %v8495_v53, %v846_v25 }
 0x13f   : > { %1496 = vmatprep.subr.bf16.mxu0 %v14845_v4  ;;  %v1153_v21 = vpack.c.bf16 %v1067_v40, %v1066_v52  ;;  %v1069_v57 = vadd.f32 %v14873_v51, %v877_v36  ;;  %v1922_v29 = vld [vmem:[%s14658_s5 + $0xc8] sm:$0xff]  ;;  %v1905_v51 = vld [vmem:[%s14658_s5 + $0x40] sm:$0xff] }
 0x140   : > { %v8681_v45 = vpop.permute.xlu1 %2283 }
 0x141   : > { %14853 = vst [vmem:[#allocation6_spill] sm:$0xff] %v8681_v45  ;;  %v8699_v59 = vpop.permute.xlu0 %1010  ;;  %2733 = vperm.xlu1 %7363, %v1906_v39   ;;  %v844_v39 = vmul.f32 %v14869_v50, %v652_v8  ;;  %v1154_v18 = vpack.c.bf16 %v1069_v57, %v1068_v30  ;;  %v3479_v45 = vld [vmem:[%s14659_s6 + $0xa8] sm:$0xff] }
 0x142   : > { %1497 = vmatpush1.bf16.msra.mxu0 %v1152_v41  ;;  %2538 = vperm.xlu0 %7364, %v1893_v61   ;;  %v14878_v41 = vld [vmem:[#allocation22_spill] sm:$0xff]  ;;  %v14883_v61 = vld [vmem:[#allocation24_spill] sm:$0xff] }
 0x143   : > { %1498 = vmatprep.subr.bf16.mxu0 %v14845_v4  ;;  %v847_v52 = vmul.f32 %v14878_v41, %v655_v3  ;;  %v849_v55 = vmul.f32 %v14883_v61, %v657_v47 }
 0x144   : > { %v8701_v58 = vpop.permute.xlu1 %2293 }
 0x145   : > { %14858 = vst [vmem:[#allocation18_spill] sm:$0xff] %v8701_v58  ;;  %v8720_v26 = vpop.permute.xlu0 %1020  ;;  %2743 = vperm.xlu1 %7363, %v1908_v56   ;;  %v878_v56 = vmul.f32 %v8495_v53, %v844_v39  ;;  %v881_v22 = vmul.f32 %v8495_v53, %v847_v52  ;;  %v883_v39 = vmul.f32 %v8495_v53, %v849_v55  ;;  %v1930_v52 = vld [vmem:[%s14658_s5 + $0x108] sm:$0xff]  ;;  %v7384_v55 = vld [vmem:[%s14656_s3 + $0x30] ss:$8 sps:$4 sm:$0xff]  }
 0x146   : > { %1499 = vmatpush1.bf16.msra.mxu0 %v1153_v21  ;;  %2548 = vperm.xlu0 %7364, %v1895_v62   ;;  %v7373_v62 = vld [vmem:[%s14656_s3] ss:$8 sps:$4 sm:$0xff]  }
 0x147   : > { %1500 = vmatprep.subr.bf16.mxu0 %v14845_v4  ;;  %v1070_v7 = vadd.f32 %v8679_v42, %v878_v56  ;;  %v14879_v42 = vld [vmem:[#allocation32_spill] sm:$0xff]  ;;  %v1073_v34 = vadd.f32 %v8500_v16, %v881_v22  ;;  %v1918_v16 = vld [vmem:[%s14658_s5 + $0xa8] sm:$0xff] }
 0x148   : > { %v8722_v32 = vpop.permute.xlu1 %2303 }
 0x149   : > { %14864 = vst [vmem:[#allocation16_spill] sm:$0xff] %v8722_v32  ;;  %v1031_v17 = vpop.permute.xlu0 %1030  ;;  %2753 = vperm.xlu1 %7363, %v1910_v14   ;;  %v1071_v14 = vadd.f32 %v14879_v42, %v879_v9  ;;  %v1926_v9 = vld [vmem:[%s14658_s5 + $0xe8] sm:$0xff]  ;;  %v1913_v42 = vld [vmem:[%s14658_s5 + $0x80] sm:$0xff] }
 0x14a   : > { %v8748_v33 = vadd.f32 %v1031_v17, %v8591_v48  ;;  %v656_v48 = vsub.f32 %v14874_v24, %v8436_v5  ;;  %1501 = vmatpush1.bf16.msra.mxu0 %v1154_v18  ;;  %v1072_v5 = vadd.f32 %v8699_v59, %v880_v37  ;;  %2688 = vperm.xlu0 %7364, %v1897_v19   ;;  %v1899_v59 = vld [vmem:[%s14658_s5 + $0x10] sm:$0xff]  ;;  %v1924_v24 = vld [vmem:[%s14658_s5 + $0xd8] sm:$0xff]  ;;  %v1909_v18 = vld [vmem:[%s14658_s5 + $0x60] sm:$0xff] }
 0x14b   : > { %1502 = vmatprep.subr.bf16.mxu0 %v14845_v4  ;;  %v1155_v43 = vpack.c.bf16 %v1071_v14, %v1070_v7  ;;  %v7381_v19 = vld [vmem:[%s14656_s3 + $0x20] ss:$8 sps:$4 sm:$0xff]  }
 0x14c   : > { %v8741_v12 = vpop.permute.xlu1 %2313  ;;  %v1158_v20 = vpack.c.bf16 %v8745_v0, %v8748_v33  ;;  %v1156_v36 = vpack.c.bf16 %v1073_v34, %v1072_v5  ;;  %v1075_v0 = vadd.f32 %v8521_v6, %v883_v39  ;;  %v1903_v6 = vld [vmem:[%s14658_s5 + $0x30] sm:$0xff]  ;;  %v1934_v5 = vld [vmem:[%s14658_s5 + $0x128] sm:$0xff]  ;;  %v1936_v34 = vld [vmem:[%s14658_s5 + $0x138] sm:$0xff] }
 0x14d   : > { %14870 = vst [vmem:[#allocation7_spill] sm:$0xff] %v8741_v12  ;;  %v1041_v1 = vpop.permute.xlu0 %1040  ;;  %2763 = vperm.xlu1 %7363, %v1912_v15   ;;  %v7385_v39 = vld [vmem:[%s14656_s3 + $0x44] ss:$8 sps:$4 sm:$0xff]  }
 0x14e   : > { %v1078_v8 = vadd.f32 %v1041_v1, %v8600_v54  ;;  %v14880_v54 = vld [vmem:[#allocation27_spill] sm:$0xff]  ;;  %1503 = vmatpush1.bf16.msra.mxu0 %v1155_v43  ;;  %2698 = vperm.xlu0 %7364, %v1899_v59   ;;  %v1919_v59 = vld [vmem:[%s14658_s5 + $0xb0] sm:$0xff] }
 0x14f   : > { %v848_v27 = vmul.f32 %v14880_v54, %v656_v48  ;;  %1504 = vmatprep.subr.bf16.mxu0 %v14845_v4  ;;  %v1907_v48 = vld [vmem:[%s14658_s5 + $0x50] sm:$0xff] }
 0x150   : > { %v8769_v44 = vpop.permute.xlu1 %2323  ;;  %v1159_v13 = vpack.c.bf16 %v1079_v11, %v1078_v8  ;;  %v7378_v11 = vld [vmem:[%s14656_s3 + $0x10] ss:$8 sps:$4 sm:$0xff]  }
 0x151   : > { %14876 = vst [vmem:[#allocation28_spill] sm:$0xff] %v8769_v44  ;;  %v8789_v46 = vpop.permute.xlu0 %2238  ;;  %2773 = vperm.xlu1 %7363, %v1914_v28   ;;  %v882_v50 = vmul.f32 %v8495_v53, %v848_v27  ;;  %v1901_v53 = vld [vmem:[%s14658_s5 + $0x20] sm:$0xff]  ;;  %v1928_v8 = vld [vmem:[%s14658_s5 + $0xf8] sm:$0xff]  ;;  %v1911_v28 = vld [vmem:[%s14658_s5 + $0x70] sm:$0xff] }
 0x152   : > { %14881 = vst [vmem:[#allocation8_spill] sm:$0xff] %v8789_v46  ;;  %1505 = vmatpush1.bf16.msra.mxu0 %v1156_v36  ;;  %2708 = vperm.xlu0 %7364, %v1901_v53   ;;  %v1915_v54 = vld [vmem:[%s14658_s5 + $0x90] sm:$0xff]  ;;  %v7387_v53 = vld [vmem:[%s14656_s3 + $0x40] ss:$8 sps:$4 sm:$0xff]  }
 0x153   : > { %v1074_v21 = vadd.f32 %v8720_v26, %v882_v50  ;;  %1506 = vmatprep.subr.bf16.mxu0 %v14845_v4  ;;  %v7382_v27 = vld [vmem:[%s14656_s3 + $0x34] ss:$8 sps:$4 sm:$0xff]   ;;  %v7411_v44 = vld [vmem:[%s14656_s3 + $0xc0] ss:$8 sps:$4 sm:$0xff]  }
 0x154   : > { %v8791_v40 = vpop.permute.xlu1 %2333 }
 0x155   : > { %14882 = vst [vmem:[#allocation21_spill] sm:$0xff] %v8791_v40  ;;  %v8805_v30 = vpop.permute.xlu0 %2248  ;;  %2783 = vperm.xlu1 %7363, %v1916_v2   ;;  %v1157_v26 = vpack.c.bf16 %v1075_v0, %v1074_v21  ;;  %v1917_v2 = vld [vmem:[%s14658_s5 + $0xa0] sm:$0xff]  ;;  %v1938_v21 = vld [vmem:[%s14658_s5 + $0x148] sm:$0xff] }
 0x156   : > { %14884 = vst [vmem:[#allocation9_spill] sm:$0xff] %v8805_v30  ;;  %2718 = vperm.xlu0 %7364, %v1903_v6   ;;  %v1923_v6 = vld [vmem:[%s14658_s5 + $0xd0] sm:$0xff]  ;;  %v1953_v40 = vld [vmem:[%s14658_s5 + $0x1c0] sm:$0xff] }
 0x157   : > { %1507 = vmatpush1.bf16.msra.mxu0 %v1157_v26 }
 0x158   : > { %v8807_v17 = vpop.permute.xlu1 %2343  ;;  %1508 = vmatprep.subr.bf16.mxu0 %v14845_v4 }
 0x159   : > { %14885 = vst [vmem:[#allocation17_spill] sm:$0xff] %v8807_v17  ;;  %v8817_v33 = vpop.permute.xlu0 %2258  ;;  %2793 = vperm.xlu1 %7363, %v1918_v16   ;;  %v1921_v16 = vld [vmem:[%s14658_s5 + $0xc0] sm:$0xff] }
 0x15a   : > { %14886 = vst [vmem:[#allocation29_spill] sm:$0xff] %v8817_v33  ;;  %2728 = vperm.xlu0 %7364, %v1905_v51   ;;  %v7429_v33 = vld [vmem:[%s14656_s3 + $0x120] ss:$8 sps:$4 sm:$0xff]  }
 0x15b   : > { %1509 = vmatpush1.bf16.msra.mxu0 %v1158_v20  ;;  %v7376_v20 = vld [vmem:[%s14656_s3 + $0x14] ss:$8 sps:$4 sm:$0xff]  }
 0x15c   : > { %v8819_v15 = vpop.permute.xlu1 %2353  ;;  %1510 = vmatprep.subr.bf16.mxu0 %v14845_v4  ;;  %v7409_v4 = vld [vmem:[%s14656_s3 + $0xc4] ss:$8 sps:$4 sm:$0xff]  }
 0x15d   : > { %14887 = vst [vmem:[#allocation10_spill] sm:$0xff] %v8819_v15  ;;  %v8828_v3 = vpop.permute.xlu0 %2268  ;;  %2803 = vperm.xlu1 %7363, %v1920_v60   ;;  %v1940_v60 = vld [vmem:[%s14658_s5 + $0x158] sm:$0xff] }
 0x15e   : > { %14888 = vst [vmem:[#allocation23_spill] sm:$0xff] %v8828_v3  ;;  %2738 = vperm.xlu0 %7364, %v1907_v48   ;;  %v1925_v48 = vld [vmem:[%s14658_s5 + $0xe0] sm:$0xff] }
 0x15f   : > { %1511 = vmatpush1.bf16.msra.mxu0 %v1159_v13  ;;  %v1932_v13 = vld [vmem:[%s14658_s5 + $0x118] sm:$0xff] }
 0x160   : > { %v8830_v63 = vpop.permute.xlu1 %2363 }
 0x161   : > { %14889 = vst [vmem:[#allocation11_spill] sm:$0xff] %v8830_v63  ;;  %v8839_v57 = vpop.permute.xlu0 %2278  ;;  %2813 = vperm.xlu1 %7363, %v1922_v29   ;;  %v7388_v29 = vld [vmem:[%s14656_s3 + $0x54] ss:$8 sps:$4 sm:$0xff]  }
 0x162   : > { %14890 = vst [vmem:[#allocation19_spill] sm:$0xff] %v8839_v57  ;;  %1513 = vmatmul.mubr.bf16.vlgmr.msra.gmra.mrb[0].mxu0 %v7373_v62  ;;  %2748 = vperm.xlu0 %7364, %v1909_v18   ;;  %v1942_v62 = vld [vmem:[%s14658_s5 + $0x168] sm:$0xff]  ;;  %v1944_v18 = vld [vmem:[%s14658_s5 + $0x178] sm:$0xff]  ;;  %v3458_v57 = vld [vmem:[%s14659_s6] sm:$0xff] }
 0x163   : > { %1520 = vmatprep.mubr.bf16.mxu0 %v7376_v20  ;;  %v7390_v20 = vld [vmem:[%s14656_s3 + $0x50] ss:$8 sps:$4 sm:$0xff]  }
 0x164   : > { %v8841_v56 = vpop.permute.xlu1 %2373 }
 0x165   : > { %14891 = vst [vmem:[#allocation30_spill] sm:$0xff] %v8841_v56  ;;  %v8855_v35 = vpop.permute.xlu0 %2288  ;;  %2823 = vperm.xlu1 %7363, %v1924_v24  }
 0x166   : > { %14892 = vst [vmem:[#allocation12_spill] sm:$0xff] %v8855_v35  ;;  %2758 = vperm.xlu0 %7364, %v1911_v28  }
 0x168   : > { %v8857_v25 = vpop.permute.xlu1 %2383 }
 0x169   : > { %14893 = vst [vmem:[#allocation25_spill] sm:$0xff] %v8857_v25  ;;  %v8865_v7 = vpop.permute.xlu0 %2298  ;;  %2833 = vperm.xlu1 %7363, %v1926_v9  }
 0x16a   : > { %14894 = vst [vmem:[#allocation13_spill] sm:$0xff] %v8865_v7  ;;  %1521 = vmatmul.mubr.bf16.gmra.mrb[4].mxu0 %v7378_v11  ;;  %2768 = vperm.xlu0 %7364, %v1913_v42   ;;  %v1927_v11 = vld [vmem:[%s14658_s5 + $0xf0] sm:$0xff]  ;;  %v1929_v42 = vld [vmem:[%s14658_s5 + $0x100] sm:$0xff] }
 0x16b   : > { %1528 = vmatprep.mubr.bf16.mxu0 %v7379_v31  ;;  %v1957_v7 = vld [vmem:[%s14658_s5 + $0x1e0] sm:$0xff] }
 0x16c   : > { %v8867_v1 = vpop.permute.xlu1 %2393 }
 0x16d   : > { %14895 = vst [vmem:[#allocation20_spill] sm:$0xff] %v8867_v1  ;;  %v8881_v47 = vpop.permute.xlu0 %2308  ;;  %2843 = vperm.xlu1 %7363, %v1928_v8   ;;  %v7391_v8 = vld [vmem:[%s14656_s3 + $0x64] ss:$8 sps:$4 sm:$0xff]  }
 0x16e   : > { %14896 = vst [vmem:[#allocation31_spill] sm:$0xff] %v8881_v47  ;;  %2778 = vperm.xlu0 %7364, %v1915_v54   ;;  %v1948_v54 = vld [vmem:[%s14658_s5 + $0x198] sm:$0xff] }
 0x16f   : > { %v7412_v47 = vld [vmem:[%s14656_s3 + $0xd4] ss:$8 sps:$4 sm:$0xff]  }
 0x170   : > { %v8883_v41 = vpop.permute.xlu1 %2403 }
 0x171   : > { %14897 = vst [vmem:[#allocation14_spill] sm:$0xff] %v8883_v41  ;;  %v8891_v14 = vpop.permute.xlu0 %2318  ;;  %2853 = vperm.xlu1 %7363, %v1930_v52   ;;  %v1946_v52 = vld [vmem:[%s14658_s5 + $0x188] sm:$0xff] }
 0x172   : > { %14898 = vst [vmem:[#allocation26_spill] sm:$0xff] %v8891_v14  ;;  %1529 = vmatmul.mubr.bf16.gmra.mrb[8].mxu0 %v7381_v19  ;;  %2788 = vperm.xlu0 %7364, %v1917_v2   ;;  %v7393_v19 = vld [vmem:[%s14656_s3 + $0x60] ss:$8 sps:$4 sm:$0xff]   ;;  %v7394_v2 = vld [vmem:[%s14656_s3 + $0x74] ss:$8 sps:$4 sm:$0xff]  }
 0x173   : > { %1536 = vmatprep.mubr.bf16.mxu0 %v7382_v27 }
 0x174   : > { %v8893_v37 = vpop.permute.xlu1 %2413 }
 0x175   : > { %14899 = vst [vmem:[#allocation15_spill] sm:$0xff] %v8893_v37  ;;  %v8907_v22 = vpop.permute.xlu0 %2328  ;;  %2863 = vperm.xlu1 %7363, %v1932_v13  }
 0x176   : > { %14900 = vst [vmem:[#allocation22_spill] sm:$0xff] %v8907_v22  ;;  %2798 = vperm.xlu0 %7364, %v1919_v59   ;;  %v1933_v59 = vld [vmem:[%s14658_s5 + $0x120] sm:$0xff] }
 0x178   : > { %v8909_v43 = vpop.permute.xlu1 %2423 }
 0x179   : > { %14901 = vst [vmem:[#allocation32_spill] sm:$0xff] %v8909_v43  ;;  %2873 = vperm.xlu1 %7363, %v1934_v5   ;;  %v8925_v50 = vpop.permute.xlu0 %2338  ;;  %v1931_v5 = vld [vmem:[%s14658_s5 + $0x110] sm:$0xff] }
 0x17a   : > { %14903 = vst [vmem:[#allocation24_spill] sm:$0xff] %v8925_v50  ;;  %1537 = vmatmul.mubr.bf16.gmra.mrb[12].mxu0 %v7384_v55  ;;  %2808 = vperm.xlu0 %7364, %v1921_v16  }
 0x17b   : > { %1544 = vmatprep.mubr.bf16.mxu0 %v7385_v39 }
 0x17c   : > { %v8917_v61 = vpop.permute.xlu1 %2433 }
 0x17d   : > { %14902 = vst [vmem:[#allocation27_spill] sm:$0xff] %v8917_v61  ;;  %2883 = vperm.xlu1 %7363, %v1936_v34   ;;  %v8941_v0 = vpop.permute.xlu0 %2348  ;;  %v1950_v34 = vld [vmem:[%s14658_s5 + $0x1a8] sm:$0xff] }
 0x17e   : > { %14905 = vst [vmem:[#allocation38_spill] sm:$0xff] %v8941_v0  ;;  %2818 = vperm.xlu0 %7364, %v1923_v6   ;;  %v7397_v6 = vld [vmem:[%s14656_s3 + $0x84] ss:$8 sps:$4 sm:$0xff]  }
 0x180   : > { %v8933_v36 = vpop.permute.xlu1 %2443 }
 0x181   : > { %14904 = vst [vmem:[#allocation37_spill] sm:$0xff] %v8933_v36  ;;  %2893 = vperm.xlu1 %7363, %v1938_v21   ;;  %v8962_v24 = vpop.permute.xlu0 %2358  ;;  %v7396_v21 = vld [vmem:[%s14656_s3 + $0x70] ss:$8 sps:$4 sm:$0xff]  }
 0x182   : > { %1545 = vmatmul.mubr.bf16.gmra.mrb[16].mxu0 %v7387_v53  ;;  %14908 = vst [vmem:[#allocation41_spill] sm:$0xff] %v8962_v24  ;;  %2828 = vperm.xlu0 %7364, %v1925_v48   ;;  %v1952_v53 = vld [vmem:[%s14658_s5 + $0x1b8] sm:$0xff] }
 0x183   : > { %1552 = vmatprep.mubr.bf16.mxu0 %v7388_v29 }
 0x184   : > { %v8946_v26 = vpop.permute.xlu1 %2453 }
 0x185   : > { %14906 = vst [vmem:[#allocation39_spill] sm:$0xff] %v8946_v26  ;;  %2903 = vperm.xlu1 %7363, %v1940_v60   ;;  %v8981_v28 = vpop.permute.xlu0 %2368  ;;  %v1935_v60 = vld [vmem:[%s14658_s5 + $0x130] sm:$0xff] }
 0x186   : > { %14910 = vst [vmem:[#allocation43_spill] sm:$0xff] %v8981_v28  ;;  %2838 = vperm.xlu0 %7364, %v1927_v11  }
 0x188   : > { %v8957_v51 = vpop.permute.xlu1 %2463 }
 0x189   : > { %14907 = vst [vmem:[#allocation40_spill] sm:$0xff] %v8957_v51  ;;  %2913 = vperm.xlu1 %7363, %v1942_v62   ;;  %v8999_v27 = vpop.permute.xlu0 %2378  ;;  %v1954_v62 = vld [vmem:[%s14658_s5 + $0x1c8] sm:$0xff] }
 0x18a   : > { %1553 = vmatmul.mubr.bf16.gmra.mrb[20].mxu0 %v7390_v20  ;;  %2848 = vperm.xlu0 %7364, %v1929_v42   ;;  %14913 = vst [vmem:[#allocation46_spill] sm:$0xff] %v8999_v27  ;;  %v1937_v20 = vld [vmem:[%s14658_s5 + $0x140] sm:$0xff]  ;;  %v7400_v42 = vld [vmem:[%s14656_s3 + $0x94] ss:$8 sps:$4 sm:$0xff]  }
 0x18b   : > { %1560 = vmatprep.mubr.bf16.mxu0 %v7391_v8  ;;  %v1956_v8 = vld [vmem:[%s14658_s5 + $0x1d8] sm:$0xff] }
 0x18c   : > { %v8970_v9 = vpop.permute.xlu1 %2473 }
 0x18d   : > { %14909 = vst [vmem:[#allocation42_spill] sm:$0xff] %v8970_v9  ;;  %2923 = vperm.xlu1 %7363, %v1944_v18   ;;  %v9015_v39 = vpop.permute.xlu0 %2388  ;;  %v7399_v18 = vld [vmem:[%s14656_s3 + $0x80] ss:$8 sps:$4 sm:$0xff]  }
 0x18e   : > { %2858 = vperm.xlu0 %7364, %v1931_v5   ;;  %14915 = vst [vmem:[#allocation48_spill] sm:$0xff] %v9015_v39  ;;  %v1941_v5 = vld [vmem:[%s14658_s5 + $0x160] sm:$0xff] }
 0x190   : > { %v8983_v31 = vpop.permute.xlu1 %2483 }
 0x191   : > { %14911 = vst [vmem:[#allocation44_spill] sm:$0xff] %v8983_v31  ;;  %2933 = vperm.xlu1 %7363, %v1946_v52   ;;  %v9036_v48 = vpop.permute.xlu0 %2398  ;;  %v1939_v52 = vld [vmem:[%s14658_s5 + $0x150] sm:$0xff] }
 0x192   : > { %1561 = vmatmul.mubr.bf16.gmra.mrb[24].mxu0 %v7393_v19  ;;  %2868 = vperm.xlu0 %7364, %v1933_v59   ;;  %14918 = vst [vmem:[#allocation51_spill] sm:$0xff] %v9036_v48  ;;  %v1960_v59 = vld [vmem:[%s14658_s5 + $0x1f8] sm:$0xff] }
 0x193   : > { %1568 = vmatprep.mubr.bf16.mxu0 %v7394_v2 }
 0x194   : > { %v8994_v13 = vpop.permute.xlu1 %2493 }
 0x195   : > { %14912 = vst [vmem:[#allocation45_spill] sm:$0xff] %v8994_v13  ;;  %2943 = vperm.xlu1 %7363, %v1948_v54   ;;  %v9055_v19 = vpop.permute.xlu0 %2408  ;;  %v1958_v54 = vld [vmem:[%s14658_s5 + $0x1e8] sm:$0xff] }
 0x196   : > { %2878 = vperm.xlu0 %7364, %v1935_v60   ;;  %14920 = vst [vmem:[#allocation53_spill] sm:$0xff] %v9055_v19  ;;  %v7403_v60 = vld [vmem:[%s14656_s3 + $0xa4] ss:$8 sps:$4 sm:$0xff]  }
 0x198   : > { %v9007_v55 = vpop.permute.xlu1 %2503 }
 0x199   : > { %14914 = vst [vmem:[#allocation47_spill] sm:$0xff] %v9007_v55  ;;  %2953 = vperm.xlu1 %7363, %v1950_v34   ;;  %v7402_v34 = vld [vmem:[%s14656_s3 + $0x90] ss:$8 sps:$4 sm:$0xff]   ;;  %v3498_v55 = vld [vmem:[%s14659_s6 + $0x140] sm:$0xff] }
 0x19a   : > { %1569 = vmatmul.mubr.bf16.gmra.mrb[28].mxu0 %v7396_v21  ;;  %2888 = vperm.xlu0 %7364, %v1937_v20   ;;  %v9071_v21 = vpop.permute.xlu0 %2418  ;;  %v1945_v20 = vld [vmem:[%s14658_s5 + $0x180] sm:$0xff] }
 0x19b   : > { %1576 = vmatprep.mubr.bf16.mxu0 %v7397_v6  ;;  %14922 = vst [vmem:[#allocation55_spill] sm:$0xff] %v9071_v21 }
 0x19c   : > { %v9020_v16 = vpop.permute.xlu1 %2513 }
 0x19d   : > { %14916 = vst [vmem:[#allocation49_spill] sm:$0xff] %v9020_v16  ;;  %2963 = vperm.xlu1 %7363, %v1952_v53   ;;  %v1943_v53 = vld [vmem:[%s14658_s5 + $0x170] sm:$0xff] }
 0x19e   : > { %2898 = vperm.xlu0 %7364, %v1939_v52   ;;  %v7405_v52 = vld [vmem:[%s14656_s3 + $0xa0] ss:$8 sps:$4 sm:$0xff]  }
 0x1a0   : > { %v9031_v29 = vpop.permute.xlu1 %2523 }
 0x1a1   : > { %14917 = vst [vmem:[#allocation50_spill] sm:$0xff] %v9031_v29  ;;  %2973 = vperm.xlu1 %7363, %v1954_v62   ;;  %v9084_v62 = vld [vmem:[%s14659_s6 + $0x8] sm:$0xff] }
 0x1a2   : > { %1577 = vmatmul.mubr.bf16.gmra.mrb[32].mxu0 %v7399_v18  ;;  %2908 = vperm.xlu0 %7364, %v1941_v5   ;;  %v7406_v5 = vld [vmem:[%s14656_s3 + $0xb4] ss:$8 sps:$4 sm:$0xff]  }
 0x1a3   : > { %1584 = vmatprep.mubr.bf16.mxu0 %v7400_v42  ;;  %v9100_v42 = vld [vmem:[%s14659_s6 + $0x18] sm:$0xff] }
 0x1a4   : > { %v9044_v11 = vpop.permute.xlu1 %2533 }
 0x1a5   : > { %14919 = vst [vmem:[#allocation52_spill] sm:$0xff] %v9044_v11  ;;  %2983 = vperm.xlu1 %7363, %v1956_v8   ;;  %v9091_v8 = vpop.permute.xlu0 %2428 }
 0x1a6   : > { %2918 = vperm.xlu0 %7364, %v1943_v53   ;;  %14925 = vst [vmem:[#allocation58_spill] sm:$0xff] %v9091_v8 }
 0x1a8   : > { %v9063_v2 = vpop.permute.xlu1 %2543 }
 0x1a9   : > { %14921 = vst [vmem:[#allocation54_spill] sm:$0xff] %v9063_v2  ;;  %2993 = vperm.xlu1 %7363, %v1958_v54   ;;  %v1947_v54 = vld [vmem:[%s14658_s5 + $0x190] sm:$0xff]  ;;  %v9116_v53 = vpop.permute.xlu0 %2438 }
 0x1aa   : > { %1585 = vmatmul.mubr.bf16.gmra.mrb[36].mxu0 %v7402_v34  ;;  %2928 = vperm.xlu0 %7364, %v1945_v20   ;;  %14927 = vst [vmem:[#allocation60_spill] sm:$0xff] %v9116_v53 }
 0x1ab   : > { %1592 = vmatprep.mubr.bf16.mxu0 %v7403_v60  ;;  %v1949_v60 = vld [vmem:[%s14658_s5 + $0x1a0] sm:$0xff] }
 0x1ac   : > { %v9079_v6 = vpop.permute.xlu1 %2553 }
 0x1ad   : > { %14923 = vst [vmem:[#allocation56_spill] sm:$0xff] %v9079_v6  ;;  %3003 = vperm.xlu1 %7363, %v1960_v59   ;;  %v9114_v59 = vld [vmem:[%s14659_s6 + $0x28] sm:$0xff]  ;;  %v9140_v22 = vpop.permute.xlu0 %2448  ;;  %v7432_v6 = vld [vmem:[%s14656_s3 + $0x130] ss:$8 sps:$4 sm:$0xff]  }
 0x1ae   : > { %2938 = vperm.xlu0 %7364, %v1947_v54   ;;  %v9130_v54 = vld [vmem:[%s14659_s6 + $0x38] sm:$0xff]  ;;  %14930 = vst [vmem:[#allocation63_spill] sm:$0xff] %v9140_v22 }
 0x1b0   : > { %v9089_v18 = vpop.permute.xlu1 %2693 }
 0x1b1   : > { %14924 = vst [vmem:[#allocation57_spill] sm:$0xff] %v9089_v18  ;;  %3529 = vperm.xlu1 %7363, %v9084_v62  }
 0x1b2   : > { %1593 = vmatmul.mubr.bf16.gmra.mrb[40].mxu0 %v7405_v52  ;;  %v7408_v52 = vld [vmem:[%s14656_s3 + $0xb0] ss:$8 sps:$4 sm:$0xff]   ;;  %2948 = vperm.xlu0 %7364, %v1949_v60   ;;  %v9146_v60 = vld [vmem:[%s14659_s6 + $0x48] sm:$0xff] }
 0x1b3   : > { %1600 = vmatprep.mubr.bf16.mxu0 %v7406_v5  ;;  %v1951_v5 = vld [vmem:[%s14658_s5 + $0x1b0] sm:$0xff] }
 0x1b4   : > { %v9108_v34 = vpop.permute.xlu1 %2703 }
 0x1b5   : > { %14926 = vst [vmem:[#allocation59_spill] sm:$0xff] %v9108_v34  ;;  %3539 = vperm.xlu1 %7363, %v9100_v42  }
 0x1b6   : > { %2958 = vperm.xlu0 %7364, %v1951_v5   ;;  %v9162_v5 = vpop.permute.xlu0 %2458 }
 0x1b7   : > { %14932 = vst [vmem:[#allocation65_spill] sm:$0xff] %v9162_v5 }
 0x1b8   : > { %v9121_v20 = vpop.permute.xlu1 %2713 }
 0x1b9   : > { %14928 = vst [vmem:[#allocation61_spill] sm:$0xff] %v9121_v20  ;;  %3549 = vperm.xlu1 %7363, %v9114_v59   ;;  %v7423_v20 = vld [vmem:[%s14656_s3 + $0x100] ss:$8 sps:$4 sm:$0xff]  }
 0x1ba   : > { %1601 = vmatmul.mubr.bf16.gmra.mrb[44].mxu0 %v7408_v52  ;;  %2968 = vperm.xlu0 %7364, %v1953_v40   ;;  %v9160_v52 = vld [vmem:[%s14659_s6 + $0x58] sm:$0xff]  ;;  %v9176_v40 = vld [vmem:[%s14659_s6 + $0x68] sm:$0xff]  ;;  %v9183_v35 = vpop.permute.xlu0 %2468 }
 0x1bb   : > { %1608 = vmatprep.mubr.bf16.mxu0 %v7409_v4  ;;  %v1955_v4 = vld [vmem:[%s14658_s5 + $0x1d0] sm:$0xff]  ;;  %14935 = vst [vmem:[#allocation68_spill] sm:$0xff] %v9183_v35 }
 0x1bc   : > { %v9138_v17 = vpop.permute.xlu1 %2723 }
 0x1bd   : > { %14929 = vst [vmem:[#allocation62_spill] sm:$0xff] %v9138_v17  ;;  %3559 = vperm.xlu1 %7363, %v9130_v54  }
 0x1be   : > { %2978 = vperm.xlu0 %7364, %v1955_v4   ;;  %v3473_v4 = vld [vmem:[%s14659_s6 + $0x78] sm:$0xff] }
 0x1c0   : > { %v9151_v14 = vpop.permute.xlu1 %2733 }
 0x1c1   : > { %14931 = vst [vmem:[#allocation64_spill] sm:$0xff] %v9151_v14  ;;  %3569 = vperm.xlu1 %7363, %v9146_v60   ;;  %v9203_v14 = vpop.permute.xlu0 %2478 }
 0x1c2   : > { %1609 = vmatmul.mubr.bf16.gmra.mrb[48].mxu0 %v7411_v44  ;;  %v7414_v44 = vld [vmem:[%s14656_s3 + $0xd0] ss:$8 sps:$4 sm:$0xff]   ;;  %2988 = vperm.xlu0 %7364, %v1957_v7   ;;  %v3475_v7 = vld [vmem:[%s14659_s6 + $0x88] sm:$0xff]  ;;  %14937 = vst [vmem:[#allocation70_spill] sm:$0xff] %v9203_v14 }
 0x1c3   : > { %1616 = vmatprep.mubr.bf16.mxu0 %v7412_v47  ;;  %v1959_v47 = vld [vmem:[%s14658_s5 + $0x1f0] sm:$0xff] }
 0x1c4   : > { %v9170_v12 = vpop.permute.xlu1 %2743 }
 0x1c5   : > { %14933 = vst [vmem:[#allocation66_spill] sm:$0xff] %v9170_v12  ;;  %3579 = vperm.xlu1 %7363, %v9160_v52   ;;  %v9222_v17 = vpop.permute.xlu0 %2488 }
 0x1c6   : > { %2998 = vperm.xlu0 %7364, %v1959_v47   ;;  %v14678_v47 = vmov 1   ;;  %14940 = vst [vmem:[#allocation73_spill] sm:$0xff] %v9222_v17 }
 0x1c8   : > { %v9181_v32 = vpop.permute.xlu1 %2753 }
 0x1c9   : > { %14934 = vst [vmem:[#allocation67_spill] sm:$0xff] %v9181_v32  ;;  %3589 = vperm.xlu1 %7363, %v9176_v40   ;;  %v7415_v32 = vld [vmem:[%s14656_s3 + $0xe4] ss:$8 sps:$4 sm:$0xff]  }
 0x1ca   : > { %1617 = vmatmul.mubr.bf16.gmra.mrb[52].mxu0 %v7414_v44  ;;  %v3477_v44 = vld [vmem:[%s14659_s6 + $0x98] sm:$0xff]  ;;  %7365 = vset.pattern.permute.xlu0 %v14678_v47 }
 0x1cb   : > { %1624 = vmatprep.mubr.bf16.mxu0 %v7415_v32  ;;  %v7418_v32 = vld [vmem:[%s14656_s3 + $0xf4] ss:$8 sps:$4 sm:$0xff]   ;;  %3907 = vperm.xlu0 %7365, %v3458_v57   ;;  %v7420_v47 = vld [vmem:[%s14656_s3 + $0xf0] ss:$8 sps:$4 sm:$0xff]  }
 0x1cc   : > { %v9198_v12 = vpop.permute.xlu1 %2763  ;;  %v3481_v57 = vld [vmem:[%s14659_s6 + $0xb8] sm:$0xff] }
 0x1cd   : > { %14936 = vst [vmem:[#allocation69_spill] sm:$0xff] %v9198_v12  ;;  %3599 = vperm.xlu1 %7363, %v3473_v4   ;;  %v7417_v12 = vld [vmem:[%s14656_s3 + $0xe0] ss:$8 sps:$4 sm:$0xff]  }
 0x1cf   : > { %3919 = vperm.xlu0 %7365, %v9100_v42   ;;  %v3483_v42 = vld [vmem:[%s14659_s6 + $0xc8] sm:$0xff] }
 0x1d0   : > { %v9205_v58 = vpop.permute.xlu1 %2773 }
 0x1d1   : > { %14938 = vst [vmem:[#allocation71_spill] sm:$0xff] %v9205_v58  ;;  %3609 = vperm.xlu1 %7363, %v3475_v7  }
 0x1d2   : > { %1625 = vmatmul.mubr.bf16.gmra.mrb[56].mxu0 %v7417_v12  ;;  %v7421_v12 = vld [vmem:[%s14656_s3 + $0x104] ss:$8 sps:$4 sm:$0xff]  }
 0x1d3   : > { %1632 = vmatprep.mubr.bf16.mxu0 %v7418_v32  ;;  %3927 = vperm.xlu0 %7365, %v9114_v59   ;;  %v3485_v59 = vld [vmem:[%s14659_s6 + $0xd8] sm:$0xff] }
 0x1d4   : > { %v9220_v58 = vpop.permute.xlu1 %2783 }
 0x1d5   : > { %14939 = vst [vmem:[#allocation72_spill] sm:$0xff] %v9220_v58  ;;  %3619 = vperm.xlu1 %7363, %v3477_v44   ;;  %v9236_v58 = vpop.permute.xlu0 %2498 }
 0x1d6   : > { %14942 = vst [vmem:[#allocation75_spill] sm:$0xff] %v9236_v58 }
 0x1d7   : > { %3935 = vperm.xlu0 %7365, %v9130_v54  }
 0x1d8   : > { %v9231_v3 = vpop.permute.xlu1 %2793 }
 0x1d9   : > { %3629 = vperm.xlu1 %7363, %v3479_v45   ;;  %14941 = vst [vmem:[#allocation74_spill] sm:$0xff] %v9231_v3  ;;  %v9248_v3 = vpop.permute.xlu0 %2508 }
 0x1da   : > { %1633 = vmatmul.mubr.bf16.gmra.mrb[60].mxu0 %v7420_v47  ;;  %14944 = vst [vmem:[#allocation77_spill] sm:$0xff] %v9248_v3  ;;  %v7424_v47 = vld [vmem:[%s14656_s3 + $0x114] ss:$8 sps:$4 sm:$0xff]  }
 0x1db   : > { %1640 = vmatprep.mubr.bf16.mxu0 %v7421_v12  ;;  %3943 = vperm.xlu0 %7365, %v9146_v60   ;;  %v3487_v12 = vld [vmem:[%s14659_s6 + $0xe8] sm:$0xff] }
 0x1dc   : > { %v9246_v32 = vpop.permute.xlu1 %2803  ;;  %v7427_v60 = vld [vmem:[%s14656_s3 + $0x124] ss:$8 sps:$4 sm:$0xff]  }
 0x1dd   : > { %3639 = vperm.xlu1 %7363, %v3481_v57   ;;  %14943 = vst [vmem:[#allocation76_spill] sm:$0xff] %v9246_v32  ;;  %v9265_v32 = vpop.permute.xlu0 %2518 }
 0x1de   : > { %14946 = vst [vmem:[#allocation79_spill] sm:$0xff] %v9265_v32 }
 0x1df   : > { %3951 = vperm.xlu0 %7365, %v9160_v52   ;;  %v3491_v52 = vld [vmem:[%s14659_s6 + $0x108] sm:$0xff] }
 0x1e0   : > { %v9260_v54 = vpop.permute.xlu1 %2813 }
 0x1e1   : > { %3649 = vperm.xlu1 %7363, %v3483_v42   ;;  %14945 = vst [vmem:[#allocation78_spill] sm:$0xff] %v9260_v54 }
 0x1e2   : > { %1641 = vmatmul.mubr.bf16.gmra.mrb[64].mxu0 %v7423_v20  ;;  %v3489_v20 = vld [vmem:[%s14659_s6 + $0xf8] sm:$0xff] }
 0x1e3   : > { %1648 = vmatprep.mubr.bf16.mxu0 %v7424_v47  ;;  %3959 = vperm.xlu0 %7365, %v9176_v40   ;;  %v9280_v47 = vpop.permute.xlu0 %2528  ;;  %v3493_v40 = vld [vmem:[%s14659_s6 + $0x118] sm:$0xff] }
 0x1e4   : > { %v9278_v54 = vpop.permute.xlu1 %2823  ;;  %14948 = vst [vmem:[#allocation81_spill] sm:$0xff] %v9280_v47  ;;  %v3488_v47 = vld [vmem:[%s14659_s6 + $0xf0] sm:$0xff] }
 0x1e5   : > { %3659 = vperm.xlu1 %7363, %v3485_v59   ;;  %14947 = vst [vmem:[#allocation80_spill] sm:$0xff] %v9278_v54 }
 0x1e7   : > { %3967 = vperm.xlu0 %7365, %v3473_v4   ;;  %v9293_v54 = vpop.permute.xlu0 %2538  ;;  %v3495_v4 = vld [vmem:[%s14659_s6 + $0x128] sm:$0xff] }
 0x1e8   : > { %v9288_v34 = vpop.permute.xlu1 %2833  ;;  %14950 = vst [vmem:[#allocation83_spill] sm:$0xff] %v9293_v54  ;;  %v3484_v54 = vld [vmem:[%s14659_s6 + $0xd0] sm:$0xff] }
 0x1e9   : > { %3669 = vperm.xlu1 %7363, %v3487_v12   ;;  %14949 = vst [vmem:[#allocation82_spill] sm:$0xff] %v9288_v34 }
 0x1ea   : > { %1649 = vmatmul.mubr.bf16.gmra.mrb[68].mxu0 %v7426_v49  ;;  %v7430_v49 = vld [vmem:[%s14656_s3 + $0x134] ss:$8 sps:$4 sm:$0xff]  }
 0x1eb   : > { %1656 = vmatprep.mubr.bf16.mxu0 %v7427_v60  ;;  %3975 = vperm.xlu0 %7365, %v3475_v7   ;;  %v9303_v34 = vpop.permute.xlu0 %2548  ;;  %v3497_v7 = vld [vmem:[%s14659_s6 + $0x138] sm:$0xff] }
 0x1ec   : > { %v9301_v60 = vpop.permute.xlu1 %2843  ;;  %14952 = vst [vmem:[#allocation85_spill] sm:$0xff] %v9303_v34  ;;  %v7435_v34 = vld [vmem:[%s14656_s3 + $0x140] ss:$8 sps:$4 sm:$0xff]  }
 0x1ed   : > { %3679 = vperm.xlu1 %7363, %v3489_v20   ;;  %14951 = vst [vmem:[#allocation84_spill] sm:$0xff] %v9301_v60 }
 0x1ef   : > { %3983 = vperm.xlu0 %7365, %v3477_v44   ;;  %v9319_v60 = vpop.permute.xlu0 %2688 }
 0x1f0   : > { %v9314_v44 = vpop.permute.xlu1 %2853  ;;  %14954 = vst [vmem:[#allocation87_spill] sm:$0xff] %v9319_v60  ;;  %v7438_v60 = vld [vmem:[%s14656_s3 + $0x150] ss:$8 sps:$4 sm:$0xff]  }
 0x1f1   : > { %3689 = vperm.xlu1 %7363, %v3491_v52   ;;  %14953 = vst [vmem:[#allocation86_spill] sm:$0xff] %v9314_v44 }
 0x1f2   : > { %1657 = vmatmul.mubr.bf16.gmra.mrb[72].mxu0 %v7429_v33  ;;  %v7433_v33 = vld [vmem:[%s14656_s3 + $0x144] ss:$8 sps:$4 sm:$0xff]  }
 0x1f3   : > { %1664 = vmatprep.mubr.bf16.mxu0 %v7430_v49  ;;  %3991 = vperm.xlu0 %7365, %v3479_v45   ;;  %v3499_v49 = vld [vmem:[%s14659_s6 + $0x148] sm:$0xff]  ;;  %v3501_v45 = vld [vmem:[%s14659_s6 + $0x158] sm:$0xff]  ;;  %v9332_v2 = vpop.permute.xlu0 %2698 }
 0x1f4   : > { %v9330_v44 = vpop.permute.xlu1 %2863  ;;  %14956 = vst [vmem:[#allocation89_spill] sm:$0xff] %v9332_v2 }
 0x1f5   : > { %3699 = vperm.xlu1 %7363, %v3493_v40   ;;  %14955 = vst [vmem:[#allocation88_spill] sm:$0xff] %v9330_v44 }
 0x1f7   : > { %3999 = vperm.xlu0 %7365, %v3481_v57   ;;  %v3503_v57 = vld [vmem:[%s14659_s6 + $0x168] sm:$0xff]  ;;  %v9345_v44 = vpop.permute.xlu0 %2708 }
 0x1f8   : > { %14958 = vst [vmem:[#allocation91_spill] sm:$0xff] %v9345_v44  ;;  %v7441_v44 = vld [vmem:[%s14656_s3 + $0x160] ss:$8 sps:$4 sm:$0xff]  }
 0x1f9   : > { %3709 = vperm.xlu1 %7363, %v3495_v4  }
 0x1fa   : > { %1665 = vmatmul.mubr.bf16.gmra.mrb[76].mxu0 %v7432_v6  ;;  %v7436_v6 = vld [vmem:[%s14656_s3 + $0x154] ss:$8 sps:$4 sm:$0xff]  }
 0x1fb   : > { %1672 = vmatprep.mubr.bf16.mxu0 %v7433_v33  ;;  %4007 = vperm.xlu0 %7365, %v3483_v42   ;;  %v9337_v33 = vpop.permute.xlu1 %2873  ;;  %v3505_v42 = vld [vmem:[%s14659_s6 + $0x178] sm:$0xff] }
 0x1fc   : > { %14957 = vst [vmem:[#allocation90_spill] sm:$0xff] %v9337_v33  ;;  %v9355_v33 = vpop.permute.xlu0 %2718 }
 0x1fd   : > { %3719 = vperm.xlu1 %7363, %v3497_v7   ;;  %14960 = vst [vmem:[#allocation93_spill] sm:$0xff] %v9355_v33  ;;  %v7444_v33 = vld [vmem:[%s14656_s3 + $0x170] ss:$8 sps:$4 sm:$0xff]  }
 0x1ff   : > { %4015 = vperm.xlu0 %7365, %v3485_v59   ;;  %v3507_v59 = vld [vmem:[%s14659_s6 + $0x188] sm:$0xff] }
 0x201   : > { %3729 = vperm.xlu1 %7363, %v3499_v49  }
 0x202   : > { %1673 = vmatmul.mubr.bf16.gmra.mrb[80].mxu0 %v7435_v34  ;;  %v7439_v34 = vld [vmem:[%s14656_s3 + $0x164] ss:$8 sps:$4 sm:$0xff]  }
 0x203   : > { %1680 = vmatprep.mubr.bf16.mxu0 %v7436_v6  ;;  %4023 = vperm.xlu0 %7365, %v3487_v12   ;;  %v9353_v6 = vpop.permute.xlu1 %2883  ;;  %v3509_v12 = vld [vmem:[%s14659_s6 + $0x198] sm:$0xff] }
 0x204   : > { %14959 = vst [vmem:[#allocation92_spill] sm:$0xff] %v9353_v6  ;;  %v9371_v6 = vpop.permute.xlu0 %2728 }
 0x205   : > { %3739 = vperm.xlu1 %7363, %v3501_v45   ;;  %14962 = vst [vmem:[#allocation95_spill] sm:$0xff] %v9371_v6 }
 0x207   : > { %4031 = vperm.xlu0 %7365, %v3489_v20   ;;  %v9366_v20 = vpop.permute.xlu1 %2893 }
 0x208   : > { %14961 = vst [vmem:[#allocation94_spill] sm:$0xff] %v9366_v20  ;;  %v9384_v2 = vpop.permute.xlu0 %2738 }
 0x209   : > { %3749 = vperm.xlu1 %7363, %v3503_v57   ;;  %14964 = vst [vmem:[#allocation97_spill] sm:$0xff] %v9384_v2 }
 0x20a   : > { %1681 = vmatmul.mubr.bf16.gmra.mrb[84].mxu0 %v7438_v60  ;;  %v7442_v60 = vld [vmem:[%s14656_s3 + $0x174] ss:$8 sps:$4 sm:$0xff]  }
 0x20b   : > { %1688 = vmatprep.mubr.bf16.mxu0 %v7439_v34  ;;  %4039 = vperm.xlu0 %7365, %v3491_v52   ;;  %v3511_v34 = vld [vmem:[%s14659_s6 + $0x1a8] sm:$0xff]  ;;  %v3513_v52 = vld [vmem:[%s14659_s6 + $0x1b8] sm:$0xff]  ;;  %v9382_v20 = vpop.permute.xlu1 %2903 }
 0x20c   : > { %14963 = vst [vmem:[#allocation96_spill] sm:$0xff] %v9382_v20  ;;  %v9400_v20 = vld [vmem:[%s14659_s6 + $0x1d8] sm:$0xff] }
 0x20d   : > { %3759 = vperm.xlu1 %7363, %v3505_v42  }
 0x20f   : > { %4047 = vperm.xlu0 %7365, %v3493_v40   ;;  %v9389_v40 = vld [vmem:[%s14659_s6 + $0x1c8] sm:$0xff] }
 0x211   : > { %3769 = vperm.xlu1 %7363, %v3507_v59  }
 0x212   : > { %1689 = vmatmul.mubr.bf16.gmra.mrb[88].mxu0 %v7441_v44  ;;  %v7445_v44 = vld [vmem:[%s14656_s3 + $0x184] ss:$8 sps:$4 sm:$0xff]  }
 0x213   : > { %1696 = vmatprep.mubr.bf16.mxu0 %v7442_v60  ;;  %4055 = vperm.xlu0 %7365, %v3495_v4   ;;  %v9392_v60 = vpop.permute.xlu1 %2913  ;;  %v7447_v4 = vld [vmem:[%s14656_s3 + $0x180] ss:$8 sps:$4 sm:$0xff]  }
 0x214   : > { %14965 = vst [vmem:[#allocation98_spill] sm:$0xff] %v9392_v60 }
 0x215   : > { %3779 = vperm.xlu1 %7363, %v3509_v12  }
 0x217   : > { %4063 = vperm.xlu0 %7365, %v3497_v7   ;;  %v3519_v7 = vld [vmem:[%s14659_s6 + $0x1e8] sm:$0xff]  ;;  %v9411_v60 = vpop.permute.xlu1 %2923 }
 0x218   : > { %14967 = vst [vmem:[#allocation100_spill] sm:$0xff] %v9411_v60  ;;  %v7453_v60 = vld [vmem:[%s14656_s3 + $0x1a0] ss:$8 sps:$4 sm:$0xff]  }
 0x219   : > { %3789 = vperm.xlu1 %7363, %v3511_v34  }
 0x21a   : > { %1697 = vmatmul.mubr.bf16.gmra.mrb[92].mxu0 %v7444_v33  ;;  %v9402_v33 = vpop.permute.xlu0 %2748 }
 0x21b   : > { %1704 = vmatprep.mubr.bf16.mxu0 %v7445_v44  ;;  %14966 = vst [vmem:[#allocation99_spill] sm:$0xff] %v9402_v33  ;;  %v7448_v44 = vld [vmem:[%s14656_s3 + $0x194] ss:$8 sps:$4 sm:$0xff]   ;;  %4071 = vperm.xlu0 %7365, %v3499_v49   ;;  %v7450_v33 = vld [vmem:[%s14656_s3 + $0x190] ss:$8 sps:$4 sm:$0xff]  }
 0x21c   : > { %v3521_v49 = vld [vmem:[%s14659_s6 + $0x1f8] sm:$0xff] }
 0x21d   : > { %3799 = vperm.xlu1 %7363, %v3513_v52  }
 0x21e   : > { %v9413_v2 = vpop.permute.xlu0 %2758 }
 0x21f   : > { %4079 = vperm.xlu0 %7365, %v3501_v45   ;;  %14968 = vst [vmem:[#allocation101_spill] sm:$0xff] %v9413_v2  ;;  %v9424_v45 = vpop.permute.xlu1 %2933 }
 0x220   : > { %14969 = vst [vmem:[#allocation102_spill] sm:$0xff] %v9424_v45 }
 0x221   : > { %3809 = vperm.xlu1 %7363, %v9389_v40  }
 0x222   : > { %1705 = vmatmul.mubr.bf16.gmra.mrb[96].mxu0 %v7447_v4  ;;  %v7451_v4 = vld [vmem:[%s14656_s3 + $0x1a4] ss:$8 sps:$4 sm:$0xff]  }
 0x223   : > { %1712 = vmatprep.mubr.bf16.mxu0 %v7448_v44  ;;  %4087 = vperm.xlu0 %7365, %v3503_v57   ;;  %v9426_v44 = vpop.permute.xlu0 %2768  ;;  %v7454_v57 = vld [vmem:[%s14656_s3 + $0x1b4] ss:$8 sps:$4 sm:$0xff]  }
 0x224   : > { %14970 = vst [vmem:[#allocation103_spill] sm:$0xff] %v9426_v44  ;;  %v7465_v44 = vld [vmem:[%s14656_s3 + $0x1e0] ss:$8 sps:$4 sm:$0xff]  }
 0x225   : > { %3819 = vperm.xlu1 %7363, %v9400_v20  }
 0x227   : > { %4095 = vperm.xlu0 %7365, %v3505_v42   ;;  %v9441_v42 = vpop.permute.xlu0 %2778 }
 0x228   : > { %14973 = vst [vmem:[#allocation105_spill] sm:$0xff] %v9441_v42 }
 0x229   : > { %3829 = vperm.xlu1 %7363, %v3519_v7   ;;  %v14971_v7 = vmov 1  }
 0x22a   : > { %1713 = vmatmul.mubr.bf16.gmra.mrb[100].mxu0 %v7450_v33  ;;  %v3460_v33 = vld [vmem:[%s14659_s6 + $0x10] sm:$0xff] }
 0x22b   : > { %1720 = vmatprep.mubr.bf16.mxu0 %v7451_v4  ;;  %4103 = vperm.xlu0 %7365, %v3507_v59   ;;  %v7456_v59 = vld [vmem:[%s14656_s3 + $0x1b0] ss:$8 sps:$4 sm:$0xff]  }
 0x22d   : > { %3839 = vperm.xlu1 %7363, %v3521_v49   ;;  %v9439_v49 = vpop.permute.xlu1 %2943 }
 0x22e   : > { %14972 = vst [vmem:[#allocation104_spill] sm:$0xff] %v9439_v49  ;;  %v9453_v49 = vpop.permute.xlu0 %2788 }
 0x22f   : > { %4111 = vperm.xlu0 %7365, %v3509_v12   ;;  %14975 = vst [vmem:[#allocation107_spill] sm:$0xff] %v9453_v49  ;;  %v3464_v12 = vld [vmem:[%s14659_s6 + $0x30] sm:$0xff] }
 0x231   : > { %7366 = vset.pattern.permute.xlu1 %v14971_v7  ;;  %v9448_v7 = vpop.permute.xlu1 %2953 }
 0x232   : > { %3911 = vperm.xlu1 %7366, %v9084_v62   ;;  %1721 = vmatmul.mubr.bf16.gmra.mrb[104].mxu0 %v7453_v60  ;;  %v3462_v62 = vld [vmem:[%s14659_s6 + $0x20] sm:$0xff]  ;;  %14974 = vst [vmem:[#allocation106_spill] sm:$0xff] %v9448_v7  ;;  %v9468_v7 = vpop.permute.xlu0 %2798 }
 0x233   : > { %1728 = vmatprep.mubr.bf16.mxu0 %v7454_v57  ;;  %v7457_v57 = vld [vmem:[%s14656_s3 + $0x1c4] ss:$8 sps:$4 sm:$0xff]   ;;  %4119 = vperm.xlu0 %7365, %v3511_v34   ;;  %14977 = vst [vmem:[#allocation109_spill] sm:$0xff] %v9468_v7  ;;  %v7459_v34 = vld [vmem:[%s14656_s3 + $0x1c0] ss:$8 sps:$4 sm:$0xff]  }
 0x235   : > { %v9446_v4 = vpop.f32.mrb[0].mxu0 }
 0x236   : > { %3915 = vperm.xlu1 %7366, %v3460_v33   ;;  %v1516_v45 = vpop.f32.mrb[1].mxu0 }
 0x237   : > { %v9455_v60 = vpop.f32.mrb[2].mxu0  ;;  %v3466_v45 = vld [vmem:[%s14659_s6 + $0x40] sm:$0xff]  ;;  %4127 = vperm.xlu0 %7365, %v3513_v52   ;;  %v3468_v52 = vld [vmem:[%s14659_s6 + $0x50] sm:$0xff] }
 0x238   : > { %v1519_v33 = vpop.f32.mrb[3].mxu0 }
 0x23a   : > { %3923 = vperm.xlu1 %7366, %v3462_v62   ;;  %1729 = vmatmul.mubr.bf16.gmra.mrb[108].mxu0 %v7456_v59  ;;  %v9466_v62 = vpop.permute.xlu1 %2963 }
 0x23b   : > { %1736 = vmatprep.mubr.bf16.mxu0 %v7457_v57  ;;  %14976 = vst [vmem:[#allocation108_spill] sm:$0xff] %v9466_v62  ;;  %v7460_v57 = vld [vmem:[%s14656_s3 + $0x1d4] ss:$8 sps:$4 sm:$0xff]   ;;  %4135 = vperm.xlu0 %7365, %v9389_v40   ;;  %v7462_v40 = vld [vmem:[%s14656_s3 + $0x1d0] ss:$8 sps:$4 sm:$0xff]  }
 0x23d   : > { %v9470_v49 = vpop.f32.mrb[4].mxu0 }
 0x23e   : > { %3931 = vperm.xlu1 %7366, %v3464_v12   ;;  %v1524_v42 = vpop.f32.mrb[5].mxu0  ;;  %v9484_v33 = vpop.permute.xlu1 %2973 }
 0x23f   : > { %v9475_v59 = vpop.f32.mrb[6].mxu0  ;;  %14978 = vst [vmem:[#allocation110_spill] sm:$0xff] %v9484_v33  ;;  %v9486_v42 = vpop.permute.xlu0 %2808  ;;  %4143 = vperm.xlu0 %7365, %v9400_v20  }
 0x240   : > { %v1527_v12 = vpop.f32.mrb[7].mxu0  ;;  %14979 = vst [vmem:[#allocation111_spill] sm:$0xff] %v9486_v42 }
 0x242   : > { %3939 = vperm.xlu1 %7366, %v3466_v45   ;;  %1737 = vmatmul.mubr.bf16.gmra.mrb[112].mxu0 %v7459_v34  ;;  %v3470_v45 = vld [vmem:[%s14659_s6 + $0x60] sm:$0xff] }
 0x243   : > { %1744 = vmatprep.mubr.bf16.mxu0 %v7460_v57  ;;  %v7463_v34 = vld [vmem:[%s14656_s3 + $0x1e4] ss:$8 sps:$4 sm:$0xff]   ;;  %v3472_v57 = vld [vmem:[%s14659_s6 + $0x70] sm:$0xff] }
 0x245   : > { %v9492_v62 = vpop.f32.mrb[8].mxu0 }
 0x246   : > { %3947 = vperm.xlu1 %7366, %v3468_v52   ;;  %v1532_v7 = vpop.f32.mrb[9].mxu0  ;;  %v9505_v52 = vpop.permute.xlu1 %2983 }
 0x247   : > { %v9497_v12 = vpop.f32.mrb[10].mxu0  ;;  %14980 = vst [vmem:[#allocation112_spill] sm:$0xff] %v9505_v52  ;;  %v3474_v7 = vld [vmem:[%s14659_s6 + $0x80] sm:$0xff]  ;;  %v7468_v52 = vld [vmem:[%s14656_s3 + $0x1f0] ss:$8 sps:$4 sm:$0xff]  }
 0x248   : > { %v1535_v20 = vpop.f32.mrb[11].mxu0 }
 0x24a   : > { %3955 = vperm.xlu1 %7366, %v3470_v45   ;;  %1745 = vmatmul.mubr.bf16.gmra.mrb[116].mxu0 %v7462_v40  ;;  %v9512_v33 = vpop.permute.xlu1 %2993  ;;  %v7466_v40 = vld [vmem:[%s14656_s3 + $0x1f4] ss:$8 sps:$4 sm:$0xff]  }
 0x24b   : > { %1752 = vmatprep.mubr.bf16.mxu0 %v7463_v34  ;;  %14981 = vst [vmem:[#allocation113_spill] sm:$0xff] %v9512_v33  ;;  %v3476_v34 = vld [vmem:[%s14659_s6 + $0x90] sm:$0xff] }
 0x24d   : > { %v9510_v45 = vpop.f32.mrb[12].mxu0 }
 0x24e   : > { %3963 = vperm.xlu1 %7366, %v3472_v57   ;;  %v1540_v42 = vpop.f32.mrb[13].mxu0  ;;  %v9528_v20 = vpop.permute.xlu1 %3003 }
 0x24f   : > { %v9517_v2 = vpop.f32.mrb[14].mxu0  ;;  %v3478_v42 = vld [vmem:[%s14659_s6 + $0xa0] sm:$0xff]  ;;  %14982 = vst [vmem:[#allocation114_spill] sm:$0xff] %v9528_v20 }
 0x250   : > { %v1543_v57 = vpop.f32.mrb[15].mxu0 }
 0x252   : > { %3971 = vperm.xlu1 %7366, %v3474_v7   ;;  %1753 = vmatmul.mubr.bf16.gmra.mrb[120].mxu0 %v7465_v44  ;;  %v3480_v44 = vld [vmem:[%s14659_s6 + $0xb0] sm:$0xff] }
 0x253   : > { %1760 = vmatprep.mubr.bf16.mxu0 %v7466_v40 }
 0x255   : > { %v9530_v7 = vpop.f32.mrb[16].mxu0 }
 0x256   : > { %3979 = vperm.xlu1 %7366, %v3476_v34   ;;  %v1548_v33 = vpop.f32.mrb[17].mxu0  ;;  %v9540_v34 = vpop.permute.xlu1 %3529 }
 0x257   : > { %v9535_v6 = vpop.f32.mrb[18].mxu0  ;;  %14983 = vst [vmem:[#allocation115_spill] sm:$0xff] %v9540_v34  ;;  %v3482_v33 = vld [vmem:[%s14659_s6 + $0xc0] sm:$0xff] }
 0x258   : > { %v1551_v40 = vpop.f32.mrb[19].mxu0 }
 0x25a   : > { %3987 = vperm.xlu1 %7366, %v3478_v42   ;;  %1761 = vmatmul.mubr.bf16.gmra.mrb[124].mxu0 %v7468_v52  ;;  %v9552_v11 = vpop.permute.xlu1 %3539  ;;  %v3486_v52 = vld [vmem:[%s14659_s6 + $0xe0] sm:$0xff] }
 0x25b   : > { %14984 = vst [vmem:[#allocation116_spill] sm:$0xff] %v9552_v11 }
 0x25d   : > { %v9545_v57 = vpop.f32.mrb[20].mxu0 }
 0x25e   : > { %3995 = vperm.xlu1 %7366, %v3480_v44   ;;  %v1556_v20 = vpop.f32.mrb[21].mxu0  ;;  %v9559_v34 = vpop.permute.xlu1 %3549 }
 0x25f   : > { %v9547_v42 = vpop.f32.mrb[22].mxu0  ;;  %14985 = vst [vmem:[#allocation117_spill] sm:$0xff] %v9559_v34 }
 0x260   : > { %v1559_v40 = vpop.f32.mrb[23].mxu0 }
 0x262   : > { %4003 = vperm.xlu1 %7366, %v3482_v33   ;;  %v9569_v40 = vpop.permute.xlu1 %3559 }
 0x263   : > { %14986 = vst [vmem:[#allocation118_spill] sm:$0xff] %v9569_v40 }
 0x265   : > { %v9557_v44 = vpop.f32.mrb[24].mxu0 }
 0x266   : > { %4011 = vperm.xlu1 %7366, %v3484_v54   ;;  %v1564_v20 = vpop.f32.mrb[25].mxu0  ;;  %v3490_v54 = vld [vmem:[%s14659_s6 + $0x100] sm:$0xff]  ;;  %v9578_v18 = vpop.permute.xlu1 %3569 }
 0x267   : > { %v9561_v33 = vpop.f32.mrb[26].mxu0  ;;  %14987 = vst [vmem:[#allocation119_spill] sm:$0xff] %v9578_v18 }
 0x268   : > { %v1567_v29 = vpop.f32.mrb[27].mxu0 }
 0x269   : > { %v3494_v29 = vld [vmem:[%s14659_s6 + $0x120] sm:$0xff] }
 0x26a   : > { %4019 = vperm.xlu1 %7366, %v3486_v52   ;;  %v3492_v52 = vld [vmem:[%s14659_s6 + $0x110] sm:$0xff]  ;;  %v9601_v18 = vpop.permute.xlu1 %3579 }
 0x26b   : > { %14988 = vst [vmem:[#allocation120_spill] sm:$0xff] %v9601_v18  ;;  %v9617_v18 = vmax.f32 %v9492_v62, 0.0 }
 0x26d   : > { %v9571_v11 = vpop.f32.mrb[28].mxu0  ;;  %14989 = vst [vmem:[#allocation121_spill] sm:$0xff] %v9617_v18  ;;  %v2036_v62 = vmul.f32 %v9617_v18, %v9617_v18 }
 0x26e   : > { %4027 = vperm.xlu1 %7366, %v3488_v47   ;;  %v1572_v32 = vpop.f32.mrb[29].mxu0  ;;  %v9584_v47 = vmax.f32 %v9455_v60, 0.0  ;;  %v9623_v14 = vpop.permute.xlu1 %3589 }
 0x26f   : > { %v9573_v20 = vpop.f32.mrb[30].mxu0  ;;  %v9589_v32 = vmax.f32 %v9446_v4, 0.0  ;;  %14990 = vst [vmem:[#allocation122_spill] sm:$0xff] %v9623_v14 }
 0x270   : > { %v1575_v34 = vpop.f32.mrb[31].mxu0  ;;  %v2033_v60 = vmul.f32 %v9584_v47, %v9584_v47 }
 0x271   : > { %v2032_v4 = vmul.f32 %v9589_v32, %v9589_v32 }
 0x272   : > { %4035 = vperm.xlu1 %7366, %v3490_v54   ;;  %v9592_v54 = vmax.f32 %v9470_v49, 0.0  ;;  %v1961_v49 = vadd.f32 %v9584_v47, %v9589_v32  ;;  %v9645_v35 = vpop.permute.xlu1 %3599 }
 0x273   : > { %v2096_v58 = vadd.f32 %v2033_v60, %v2032_v4  ;;  %v3500_v60 = vld [vmem:[%s14659_s6 + $0x150] sm:$0xff]  ;;  %14992 = vst [vmem:[#allocation124_spill] sm:$0xff] %v9645_v35  ;;  %v9662_v35 = vmax.f32 %v9530_v7, 0.0  ;;  %v9675_v7 = vmax.f32 %v9535_v6, 0.0 }
 0x275   : > { %v9586_v40 = vpop.f32.mrb[32].mxu0  ;;  %14994 = vst [vmem:[#allocation126_spill] sm:$0xff] %v9662_v35  ;;  %14996 = vst [vmem:[#allocation128_spill] sm:$0xff] %v9675_v7  ;;  %v2041_v6 = vmul.f32 %v9675_v7, %v9675_v7 }
 0x276   : > { %4043 = vperm.xlu1 %7366, %v3492_v52   ;;  %v1580_v16 = vpop.f32.mrb[33].mxu0  ;;  %v3496_v52 = vld [vmem:[%s14659_s6 + $0x130] sm:$0xff]  ;;  %v9666_v5 = vpop.permute.xlu1 %3609 }
 0x277   : > { %v9594_v34 = vpop.f32.mrb[34].mxu0  ;;  %v2034_v16 = vmul.f32 %v9592_v54, %v9592_v54  ;;  %14995 = vst [vmem:[#allocation127_spill] sm:$0xff] %v9666_v5 }
 0x278   : > { %v1583_v3 = vpop.f32.mrb[35].mxu0 }
 0x279   : > { %v1962_v3 = vadd.f32 %v1961_v49, %v9592_v54  ;;  %v2097_v17 = vadd.f32 %v2096_v58, %v2034_v16  ;;  %v9634_v58 = vmax.f32 %v9497_v12, 0.0 }
 0x27a   : > { %4051 = vperm.xlu1 %7366, %v3494_v29   ;;  %v9610_v29 = vmax.f32 %v9475_v59, 0.0 }
 0x27c   : > { %v2035_v31 = vmul.f32 %v9610_v29, %v9610_v29  ;;  %v1963_v4 = vadd.f32 %v1962_v3, %v9610_v29  ;;  %v2037_v3 = vmul.f32 %v9634_v58, %v9634_v58 }
 0x27d   : > { %v9619_v13 = vpop.f32.mrb[36].mxu0 }
 0x27e   : > { %4059 = vperm.xlu1 %7366, %v3496_v52   ;;  %v1588_v59 = vpop.f32.mrb[37].mxu0  ;;  %v2098_v16 = vadd.f32 %v2097_v17, %v2035_v31  ;;  %v1964_v14 = vadd.f32 %v1963_v4, %v9617_v18  ;;  %v15129_v18 = vld [vmem:[#allocation38_spill] sm:$0xff] }
 0x27f   : > { %v9625_v52 = vpop.f32.mrb[38].mxu0  ;;  %v3502_v59 = vld [vmem:[%s14659_s6 + $0x160] sm:$0xff] }
 0x280   : > { %v1591_v49 = vpop.f32.mrb[39].mxu0  ;;  %v2099_v9 = vadd.f32 %v2098_v16, %v2036_v62  ;;  %v1965_v17 = vadd.f32 %v1964_v14, %v9634_v58  ;;  %v3504_v62 = vld [vmem:[%s14659_s6 + $0x170] sm:$0xff] }
 0x282   : > { %4067 = vperm.xlu1 %7366, %v3498_v55   ;;  %v9638_v55 = vmax.f32 %v9510_v45, 0.0  ;;  %v9653_v45 = vmax.f32 %v9517_v2, 0.0  ;;  %v2100_v49 = vadd.f32 %v2099_v9, %v2037_v3  ;;  %v2040_v9 = vmul.f32 %v9662_v35, %v9662_v35 }
 0x284   : > { %14991 = vst [vmem:[#allocation123_spill] sm:$0xff] %v9638_v55  ;;  %v2038_v31 = vmul.f32 %v9638_v55, %v9638_v55  ;;  %14993 = vst [vmem:[#allocation125_spill] sm:$0xff] %v9653_v45  ;;  %v1966_v16 = vadd.f32 %v1965_v17, %v9638_v55  ;;  %v2039_v2 = vmul.f32 %v9653_v45, %v9653_v45  ;;  %v9690_v55 = vpop.permute.xlu1 %3619 }
 0x285   : > { %v9647_v12 = vpop.f32.mrb[40].mxu0  ;;  %14998 = vst [vmem:[#allocation130_spill] sm:$0xff] %v9690_v55 }
 0x286   : > { %4075 = vperm.xlu1 %7366, %v3500_v60   ;;  %v1596_v60 = vpop.f32.mrb[41].mxu0  ;;  %v2101_v51 = vadd.f32 %v2100_v49, %v2038_v31  ;;  %v9681_v49 = vmax.f32 %v9545_v57, 0.0 }
 0x287   : > { %v9655_v4 = vpop.f32.mrb[42].mxu0  ;;  %v1967_v60 = vadd.f32 %v1966_v16, %v9653_v45  ;;  %v3508_v16 = vld [vmem:[%s14659_s6 + $0x190] sm:$0xff] }
 0x288   : > { %v1599_v14 = vpop.f32.mrb[43].mxu0  ;;  %v2102_v17 = vadd.f32 %v2101_v51, %v2039_v2  ;;  %14997 = vst [vmem:[#allocation129_spill] sm:$0xff] %v9681_v49  ;;  %v2042_v57 = vmul.f32 %v9681_v49, %v9681_v49  ;;  %v15128_v45 = vld [vmem:[#allocation24_spill] sm:$0xff] }
 0x289   : > { %v1968_v31 = vadd.f32 %v1967_v60, %v9662_v35  ;;  %v3510_v60 = vld [vmem:[%s14659_s6 + $0x1a0] sm:$0xff]  ;;  %v9709_v35 = vpop.permute.xlu1 %3629 }
 0x28a   : > { %4083 = vperm.xlu1 %7366, %v3502_v59   ;;  %v3506_v59 = vld [vmem:[%s14659_s6 + $0x180] sm:$0xff]  ;;  %v2103_v5 = vadd.f32 %v2102_v17, %v2040_v9  ;;  %15001 = vst [vmem:[#allocation133_spill] sm:$0xff] %v9709_v35 }
 0x28b   : > { %v1969_v2 = vadd.f32 %v1968_v31, %v9675_v7 }
 0x28c   : > { %v2104_v9 = vadd.f32 %v2103_v5, %v2041_v6  ;;  %v3512_v5 = vld [vmem:[%s14659_s6 + $0x1b0] sm:$0xff] }
 0x28d   : > { %v9677_v3 = vpop.f32.mrb[44].mxu0  ;;  %v1970_v17 = vadd.f32 %v1969_v2, %v9681_v49  ;;  %v9720_v2 = vmax.f32 %v9561_v33, 0.0 }
 0x28e   : > { %4091 = vperm.xlu1 %7366, %v3504_v62   ;;  %v1604_v62 = vpop.f32.mrb[45].mxu0  ;;  %v2105_v31 = vadd.f32 %v2104_v9, %v2042_v57 }
 0x28f   : > { %v9683_v14 = vpop.f32.mrb[46].mxu0  ;;  %v9703_v62 = vmax.f32 %v9557_v44, 0.0  ;;  %15002 = vst [vmem:[#allocation134_spill] sm:$0xff] %v9720_v2 }
 0x290   : > { %v1607_v51 = vpop.f32.mrb[47].mxu0 }
 0x291   : > { %15000 = vst [vmem:[#allocation132_spill] sm:$0xff] %v9703_v62  ;;  %v2044_v44 = vmul.f32 %v9703_v62, %v9703_v62 }
 0x292   : > { %4099 = vperm.xlu1 %7366, %v3506_v59   ;;  %v9696_v59 = vmax.f32 %v9547_v42, 0.0 }
 0x294   : > { %14999 = vst [vmem:[#allocation131_spill] sm:$0xff] %v9696_v59  ;;  %v2043_v55 = vmul.f32 %v9696_v59, %v9696_v59  ;;  %v1971_v6 = vadd.f32 %v1970_v17, %v9696_v59  ;;  %v2045_v17 = vmul.f32 %v9720_v2, %v9720_v2  ;;  %v9731_v59 = vpop.permute.xlu1 %3639 }
 0x295   : > { %v9705_v51 = vpop.f32.mrb[48].mxu0  ;;  %15004 = vst [vmem:[#allocation136_spill] sm:$0xff] %v9731_v59  ;;  %v9748_v59 = vmax.f32 %v9586_v40, 0.0 }
 0x296   : > { %4107 = vperm.xlu1 %7366, %v3508_v16   ;;  %v1612_v42 = vpop.f32.mrb[49].mxu0  ;;  %v2106_v9 = vadd.f32 %v2105_v31, %v2043_v55  ;;  %v1972_v35 = vadd.f32 %v1971_v6, %v9703_v62 }
 0x297   : > { %v9711_v16 = vpop.f32.mrb[50].mxu0  ;;  %v3514_v42 = vld [vmem:[%s14659_s6 + $0x1c0] sm:$0xff]  ;;  %15006 = vst [vmem:[#allocation138_spill] sm:$0xff] %v9748_v59 }
 0x298   : > { %v1615_v57 = vpop.f32.mrb[51].mxu0  ;;  %v2107_v49 = vadd.f32 %v2106_v9, %v2044_v44  ;;  %v1973_v55 = vadd.f32 %v1972_v35, %v9720_v2  ;;  %v3516_v44 = vld [vmem:[%s14659_s6 + $0x1d0] sm:$0xff]  ;;  %v9750_v2 = vpop.permute.xlu1 %3649 }
 0x299   : > { %15007 = vst [vmem:[#allocation139_spill] sm:$0xff] %v9750_v2 }
 0x29a   : > { %4115 = vperm.xlu1 %7366, %v3510_v60   ;;  %v9724_v60 = vmax.f32 %v9571_v11, 0.0  ;;  %v9739_v11 = vmax.f32 %v9573_v20, 0.0  ;;  %v2108_v57 = vadd.f32 %v2107_v49, %v2045_v17  ;;  %v9758_v49 = vmax.f32 %v9594_v34, 0.0 }
 0x29c   : > { %15003 = vst [vmem:[#allocation135_spill] sm:$0xff] %v9724_v60  ;;  %v2046_v31 = vmul.f32 %v9724_v60, %v9724_v60  ;;  %15005 = vst [vmem:[#allocation137_spill] sm:$0xff] %v9739_v11  ;;  %v1974_v9 = vadd.f32 %v1973_v55, %v9724_v60  ;;  %v2047_v20 = vmul.f32 %v9739_v11, %v9739_v11 }
 0x29d   : > { %v9733_v33 = vpop.f32.mrb[52].mxu0  ;;  %15008 = vst [vmem:[#allocation140_spill] sm:$0xff] %v9758_v49 }
 0x29e   : > { %4123 = vperm.xlu1 %7366, %v3512_v5   ;;  %v1620_v5 = vpop.f32.mrb[53].mxu0  ;;  %v2109_v62 = vadd.f32 %v2108_v57, %v2046_v31  ;;  %v9764_v31 = vmax.f32 %v9619_v13, 0.0 }
 0x29f   : > { %v9741_v6 = vpop.f32.mrb[54].mxu0  ;;  %v2048_v5 = vmul.f32 %v9748_v59, %v9748_v59 }
 0x2a0   : > { %v1623_v35 = vpop.f32.mrb[55].mxu0  ;;  %v2110_v40 = vadd.f32 %v2109_v62, %v2047_v20  ;;  %15009 = vst [vmem:[#allocation141_spill] sm:$0xff] %v9764_v31  ;;  %v2050_v34 = vmul.f32 %v9764_v31, %v9764_v31  ;;  %v9774_v62 = vmax.f32 %v9625_v52, 0.0 }
 0x2a2   : > { %4131 = vperm.xlu1 %7366, %v3514_v42   ;;  %v1975_v42 = vadd.f32 %v1974_v9, %v9739_v11  ;;  %v2049_v9 = vmul.f32 %v9758_v49, %v9758_v49  ;;  %15010 = vst [vmem:[#allocation142_spill] sm:$0xff] %v9774_v62 }
 0x2a4   : > { %v1976_v55 = vadd.f32 %v1975_v42, %v9748_v59  ;;  %v9778_v42 = vmax.f32 %v9647_v12, 0.0 }
 0x2a5   : > { %v9760_v17 = vpop.f32.mrb[56].mxu0 }
 0x2a6   : > { %4139 = vperm.xlu1 %7366, %v3516_v44   ;;  %v1628_v57 = vpop.f32.mrb[57].mxu0  ;;  %v2111_v44 = vadd.f32 %v2110_v40, %v2048_v5  ;;  %v1977_v60 = vadd.f32 %v1976_v55, %v9758_v49  ;;  %v2051_v40 = vmul.f32 %v9774_v62, %v9774_v62  ;;  %v2052_v52 = vmul.f32 %v9778_v42, %v9778_v42 }
 0x2a7   : > { %v9766_v35 = vpop.f32.mrb[58].mxu0 }
 0x2a8   : > { %v1631_v2 = vpop.f32.mrb[59].mxu0  ;;  %v2112_v20 = vadd.f32 %v2111_v44, %v2049_v9  ;;  %v1978_v13 = vadd.f32 %v1977_v60, %v9764_v31  ;;  %v9788_v44 = vmax.f32 %v9655_v4, 0.0 }
 0x2aa   : > { %v2113_v5 = vadd.f32 %v2112_v20, %v2050_v34  ;;  %v1979_v55 = vadd.f32 %v1978_v13, %v9774_v62  ;;  %15011 = vst [vmem:[#allocation143_spill] sm:$0xff] %v9788_v44  ;;  %v9792_v34 = vmax.f32 %v9677_v3, 0.0  ;;  %v9794_v20 = vpop.permute.xlu0 %2818  ;;  %v2053_v31 = vmul.f32 %v9788_v44, %v9788_v44 }
 0x2ab   : > { %15012 = vst [vmem:[#allocation144_spill] sm:$0xff] %v9794_v20  ;;  %v9810_v20 = vpop.permute.xlu1 %3659 }
 0x2ac   : > { %v2114_v9 = vadd.f32 %v2113_v5, %v2051_v40  ;;  %v1980_v12 = vadd.f32 %v1979_v55, %v9778_v42  ;;  %v2054_v4 = vmul.f32 %v9792_v34, %v9792_v34  ;;  %15013 = vst [vmem:[#allocation145_spill] sm:$0xff] %v9810_v20 }
 0x2ad   : > { %v1634_v57 = vpop.f32.mrb[60].mxu0 }
 0x2ae   : > { %v1636_v2 = vpop.f32.mrb[61].mxu0  ;;  %v1981_v62 = vadd.f32 %v1980_v12, %v9788_v44  ;;  %v9812_v49 = vpop.permute.xlu0 %2828  ;;  %v9855_v22 = vmax.f32 %v1634_v57, 0.0 }
 0x2af   : > { %v9782_v59 = vpop.f32.mrb[62].mxu0  ;;  %v2115_v2 = vadd.f32 %v2114_v9, %v2052_v52  ;;  %v9808_v52 = vmax.f32 %v9705_v51, 0.0  ;;  %15014 = vst [vmem:[#allocation146_spill] sm:$0xff] %v9812_v49 }
 0x2b0   : > { %v1639_v60 = vpop.f32.mrb[63].mxu0  ;;  %v1982_v55 = vadd.f32 %v1981_v62, %v9792_v34 }
 0x2b1   : > { %v9802_v60 = vmax.f32 %v9683_v14, 0.0  ;;  %v2116_v3 = vadd.f32 %v2115_v2, %v2053_v31  ;;  %v9820_v31 = vmax.f32 %v9711_v16, 0.0 }
 0x2b2   : > { %v9828_v49 = vpop.permute.xlu0 %2838 }
 0x2b3   : > { %v2117_v12 = vadd.f32 %v2116_v3, %v2054_v4  ;;  %v2055_v44 = vmul.f32 %v9802_v60, %v9802_v60  ;;  %v1983_v14 = vadd.f32 %v1982_v55, %v9802_v60  ;;  %v9826_v4 = vpop.permute.xlu1 %3669  ;;  %15016 = vst [vmem:[#allocation148_spill] sm:$0xff] %v9828_v49  ;;  %v2057_v11 = vmul.f32 %v9820_v31, %v9820_v31 }
 0x2b4   : > { %15015 = vst [vmem:[#allocation147_spill] sm:$0xff] %v9826_v4 }
 0x2b5   : > { %v1642_v13 = vpop.f32.mrb[64].mxu0  ;;  %v2118_v51 = vadd.f32 %v2117_v12, %v2055_v44  ;;  %v1984_v2 = vadd.f32 %v1983_v14, %v9808_v52  ;;  %v9836_v12 = vmax.f32 %v9741_v6, 0.0  ;;  %v9840_v14 = vmax.f32 %v9760_v17, 0.0 }
 0x2b6   : > { %v1644_v5 = vpop.f32.mrb[65].mxu0 }
 0x2b7   : > { %v9804_v40 = vpop.f32.mrb[66].mxu0  ;;  %v2056_v5 = vmul.f32 %v9808_v52, %v9808_v52  ;;  %v1985_v16 = vadd.f32 %v1984_v2, %v9820_v31  ;;  %v9842_v4 = vpop.permute.xlu1 %3679  ;;  %v2059_v2 = vmul.f32 %v9836_v12, %v9836_v12 }
 0x2b8   : > { %v1647_v9 = vpop.f32.mrb[67].mxu0  ;;  %15017 = vst [vmem:[#allocation149_spill] sm:$0xff] %v9842_v4 }
 0x2b9   : > { %v9824_v9 = vmax.f32 %v9733_v33, 0.0  ;;  %v2119_v55 = vadd.f32 %v2118_v51, %v2056_v5  ;;  %v9844_v51 = vpop.permute.xlu0 %2848 }
 0x2ba   : > { %15018 = vst [vmem:[#allocation150_spill] sm:$0xff] %v9844_v51 }
 0x2bb   : > { %v2058_v44 = vmul.f32 %v9824_v9, %v9824_v9  ;;  %v2120_v33 = vadd.f32 %v2119_v55, %v2057_v11  ;;  %v2060_v11 = vmul.f32 %v9840_v14, %v9840_v14  ;;  %v9852_v55 = vmax.f32 %v9766_v35, 0.0 }
 0x2bc   : > { %v2062_v35 = vmul.f32 %v9855_v22, %v9855_v22 }
 0x2bd   : > { %v1650_v62 = vpop.f32.mrb[68].mxu0 }
 0x2be   : > { %v1652_v20 = vpop.f32.mrb[69].mxu0 }
 0x2bf   : > { %v1653_v3 = vpop.f32.mrb[70].mxu0  ;;  %v1986_v20 = vadd.f32 %v1985_v16, %v9824_v9 }
 0x2c0   : > { %v1655_v7 = vpop.f32.mrb[71].mxu0 }
 0x2c1   : > { %v2121_v7 = vadd.f32 %v2120_v33, %v2058_v44  ;;  %v1987_v6 = vadd.f32 %v1986_v20, %v9836_v12  ;;  %v9857_v44 = vpop.permute.xlu1 %3689  ;;  %v9859_v33 = vpop.permute.xlu0 %2858  ;;  %v2061_v20 = vmul.f32 %v9852_v55, %v9852_v55 }
 0x2c2   : > { %15019 = vst [vmem:[#allocation151_spill] sm:$0xff] %v9857_v44  ;;  %15020 = vst [vmem:[#allocation152_spill] sm:$0xff] %v9859_v33  ;;  %v9870_v44 = vmax.f32 %v1642_v13, 0.0 }
 0x2c3   : > { %v2122_v16 = vadd.f32 %v2121_v7, %v2059_v2  ;;  %v1988_v4 = vadd.f32 %v1987_v6, %v9840_v14  ;;  %v9867_v7 = vmax.f32 %v9782_v59, 0.0 }
 0x2c4   : > { %v2064_v59 = vmul.f32 %v9870_v44, %v9870_v44 }
 0x2c5   : > { %v1658_v5 = vpop.f32.mrb[72].mxu0  ;;  %v1989_v36 = vadd.f32 %v1988_v4, %v9852_v55  ;;  %v9874_v33 = vpop.permute.xlu0 %2868  ;;  %v2063_v4 = vmul.f32 %v9867_v7, %v9867_v7 }
 0x2c6   : > { %v1660_v49 = vpop.f32.mrb[73].mxu0  ;;  %15022 = vst [vmem:[#allocation154_spill] sm:$0xff] %v9874_v33 }
 0x2c7   : > { %v1661_v26 = vpop.f32.mrb[74].mxu0  ;;  %v2123_v49 = vadd.f32 %v2122_v16, %v2060_v11  ;;  %v9872_v16 = vpop.permute.xlu1 %3699 }
 0x2c8   : > { %v1663_v17 = vpop.f32.mrb[75].mxu0  ;;  %15021 = vst [vmem:[#allocation153_spill] sm:$0xff] %v9872_v16 }
 0x2c9   : > { %v2124_v6 = vadd.f32 %v2123_v49, %v2061_v20  ;;  %v1990_v17 = vadd.f32 %v1989_v36, %v9855_v22  ;;  %v9882_v49 = vmax.f32 %v9804_v40, 0.0 }
 0x2cb   : > { %v2125_v53 = vadd.f32 %v2124_v6, %v2062_v35  ;;  %v1991_v61 = vadd.f32 %v1990_v17, %v9867_v7  ;;  %v9887_v16 = vpop.permute.xlu1 %3709  ;;  %v9889_v6 = vpop.permute.xlu0 %2878  ;;  %v2065_v17 = vmul.f32 %v9882_v49, %v9882_v49 }
 0x2cc   : > { %15023 = vst [vmem:[#allocation155_spill] sm:$0xff] %v9887_v16  ;;  %15024 = vst [vmem:[#allocation156_spill] sm:$0xff] %v9889_v6 }
 0x2cd   : > { %v1666_v51 = vpop.f32.mrb[76].mxu0  ;;  %v2126_v13 = vadd.f32 %v2125_v53, %v2063_v4  ;;  %v1992_v20 = vadd.f32 %v1991_v61, %v9870_v44  ;;  %v9896_v4 = vmax.f32 %v1653_v3, 0.0 }
 0x2ce   : > { %v1668_v2 = vpop.f32.mrb[77].mxu0 }
 0x2cf   : > { %v1669_v57 = vpop.f32.mrb[78].mxu0  ;;  %v9885_v2 = vmax.f32 %v1650_v62, 0.0  ;;  %v2127_v33 = vadd.f32 %v2126_v13, %v2064_v59  ;;  %v1993_v40 = vadd.f32 %v1992_v20, %v9882_v49  ;;  %v9901_v16 = vpop.permute.xlu1 %3719 }
 0x2d0   : > { %v1671_v11 = vpop.f32.mrb[79].mxu0  ;;  %15025 = vst [vmem:[#allocation157_spill] sm:$0xff] %v9901_v16  ;;  %v9903_v59 = vpop.permute.xlu0 %2888  ;;  %v9913_v16 = vmax.f32 %v1666_v51, 0.0 }
 0x2d1   : > { %v2066_v53 = vmul.f32 %v9885_v2, %v9885_v2  ;;  %v2128_v61 = vadd.f32 %v2127_v33, %v2065_v17  ;;  %v1994_v62 = vadd.f32 %v1993_v40, %v9885_v2  ;;  %15026 = vst [vmem:[#allocation158_spill] sm:$0xff] %v9903_v59  ;;  %v9910_v33 = vmax.f32 %v1661_v26, 0.0 }
 0x2d2   : > { %v2070_v26 = vmul.f32 %v9913_v16, %v9913_v16 }
 0x2d3   : > { %v2129_v13 = vadd.f32 %v2128_v61, %v2066_v53  ;;  %v1995_v21 = vadd.f32 %v1994_v62, %v9896_v4  ;;  %v9915_v59 = vpop.permute.xlu1 %3729 }
 0x2d4   : > { %15027 = vst [vmem:[#allocation159_spill] sm:$0xff] %v9915_v59  ;;  %v9917_v53 = vpop.permute.xlu0 %2898 }
 0x2d5   : > { %v1674_v36 = vpop.f32.mrb[80].mxu0  ;;  %15028 = vst [vmem:[#allocation160_spill] sm:$0xff] %v9917_v53 }
 0x2d6   : > { %v1676_v11 = vpop.f32.mrb[81].mxu0  ;;  %v9927_v59 = vmax.f32 %v1674_v36, 0.0 }
 0x2d7   : > { %v1677_v35 = vpop.f32.mrb[82].mxu0  ;;  %v9899_v11 = vmax.f32 %v1658_v5, 0.0 }
 0x2d8   : > { %v1679_v8 = vpop.f32.mrb[83].mxu0 }
 0x2d9   : > { %v2067_v8 = vmul.f32 %v9896_v4, %v9896_v4  ;;  %v2068_v3 = vmul.f32 %v9899_v11, %v9899_v11  ;;  %v1996_v40 = vadd.f32 %v1995_v21, %v9899_v11 }
 0x2db   : > { %v2130_v17 = vadd.f32 %v2129_v13, %v2067_v8  ;;  %v1997_v37 = vadd.f32 %v1996_v40, %v9910_v33 }
 0x2dd   : > { %v1682_v6 = vpop.f32.mrb[84].mxu0  ;;  %v2131_v61 = vadd.f32 %v2130_v17, %v2068_v3  ;;  %v1998_v8 = vadd.f32 %v1997_v37, %v9913_v16  ;;  %v9929_v3 = vpop.permute.xlu1 %3739 }
 0x2de   : > { %v1684_v20 = vpop.f32.mrb[85].mxu0  ;;  %15029 = vst [vmem:[#allocation161_spill] sm:$0xff] %v9929_v3  ;;  %v9931_v17 = vpop.permute.xlu0 %2908 }
 0x2df   : > { %v1685_v43 = vpop.f32.mrb[86].mxu0  ;;  %v2069_v20 = vmul.f32 %v9910_v33, %v9910_v33  ;;  %15030 = vst [vmem:[#allocation162_spill] sm:$0xff] %v9931_v17 }
 0x2e0   : > { %v1687_v5 = vpop.f32.mrb[87].mxu0 }
 0x2e1   : > { %v9924_v5 = vmax.f32 %v1669_v57, 0.0  ;;  %v2132_v51 = vadd.f32 %v2131_v61, %v2069_v20  ;;  %v2072_v57 = vmul.f32 %v9927_v59, %v9927_v59  ;;  %v9943_v3 = vpop.permute.xlu1 %3749 }
 0x2e2   : > { %15031 = vst [vmem:[#allocation163_spill] sm:$0xff] %v9943_v3 }
 0x2e3   : > { %v2133_v19 = vadd.f32 %v2132_v51, %v2070_v26  ;;  %v2071_v40 = vmul.f32 %v9924_v5, %v9924_v5  ;;  %v1999_v41 = vadd.f32 %v1998_v8, %v9924_v5  ;;  %v9945_v51 = vpop.permute.xlu0 %2918 }
 0x2e4   : > { %15032 = vst [vmem:[#allocation164_spill] sm:$0xff] %v9945_v51 }
 0x2e5   : > { %v1690_v62 = vpop.f32.mrb[88].mxu0  ;;  %v2134_v37 = vadd.f32 %v2133_v19, %v2071_v40  ;;  %v2000_v36 = vadd.f32 %v1999_v41, %v9927_v59  ;;  %v9952_v40 = vmax.f32 %v1685_v43, 0.0  ;;  %v9957_v3 = vpop.permute.xlu1 %3759 }
 0x2e6   : > { %v1692_v13 = vpop.f32.mrb[89].mxu0  ;;  %15033 = vst [vmem:[#allocation165_spill] sm:$0xff] %v9957_v3 }
 0x2e7   : > { %v1693_v21 = vpop.f32.mrb[90].mxu0  ;;  %v9938_v13 = vmax.f32 %v1677_v35, 0.0  ;;  %v2135_v17 = vadd.f32 %v2134_v37, %v2072_v57  ;;  %v9959_v57 = vpop.permute.xlu0 %2928 }
 0x2e8   : > { %v1695_v53 = vpop.f32.mrb[91].mxu0  ;;  %15034 = vst [vmem:[#allocation166_spill] sm:$0xff] %v9959_v57 }
 0x2e9   : > { %v9941_v53 = vmax.f32 %v1682_v6, 0.0  ;;  %v2073_v8 = vmul.f32 %v9938_v13, %v9938_v13  ;;  %v2001_v35 = vadd.f32 %v2000_v36, %v9938_v13  ;;  %v9971_v57 = vpop.permute.xlu1 %3769 }
 0x2ea   : > { %15035 = vst [vmem:[#allocation167_spill] sm:$0xff] %v9971_v57 }
 0x2eb   : > { %v2074_v19 = vmul.f32 %v9941_v53, %v9941_v53  ;;  %v2136_v41 = vadd.f32 %v2135_v17, %v2073_v8  ;;  %v2002_v6 = vadd.f32 %v2001_v35, %v9941_v53  ;;  %v9966_v17 = vmax.f32 %v1693_v21, 0.0 }
 0x2ed   : > { %v1698_v61 = vpop.f32.mrb[92].mxu0  ;;  %v2137_v37 = vadd.f32 %v2136_v41, %v2074_v19  ;;  %v2003_v39 = vadd.f32 %v2002_v6, %v9952_v40  ;;  %v9973_v19 = vpop.permute.xlu0 %2938 }
 0x2ee   : > { %v1700_v20 = vpop.f32.mrb[93].mxu0  ;;  %v9969_v3 = vmax.f32 %v1698_v61, 0.0  ;;  %15036 = vst [vmem:[#allocation168_spill] sm:$0xff] %v9973_v19 }
 0x2ef   : > { %v1701_v26 = vpop.f32.mrb[94].mxu0  ;;  %v9955_v20 = vmax.f32 %v1690_v62, 0.0 }
 0x2f0   : > { %v1703_v48 = vpop.f32.mrb[95].mxu0  ;;  %v2078_v21 = vmul.f32 %v9969_v3, %v9969_v3 }
 0x2f1   : > { %v2075_v48 = vmul.f32 %v9952_v40, %v9952_v40  ;;  %v2076_v43 = vmul.f32 %v9955_v20, %v9955_v20  ;;  %v2004_v35 = vadd.f32 %v2003_v39, %v9955_v20 }
 0x2f3   : > { %v2138_v8 = vadd.f32 %v2137_v37, %v2075_v48  ;;  %v2005_v25 = vadd.f32 %v2004_v35, %v9966_v17 }
 0x2f5   : > { %v1706_v51 = vpop.f32.mrb[96].mxu0  ;;  %v2139_v41 = vadd.f32 %v2138_v8, %v2076_v43  ;;  %v2006_v48 = vadd.f32 %v2005_v25, %v9969_v3  ;;  %v9985_v43 = vpop.permute.xlu1 %3779 }
 0x2f6   : > { %v1708_v36 = vpop.f32.mrb[97].mxu0  ;;  %v9983_v57 = vmax.f32 %v1706_v51, 0.0  ;;  %15037 = vst [vmem:[#allocation169_spill] sm:$0xff] %v9985_v43  ;;  %v9987_v8 = vpop.permute.xlu0 %2948 }
 0x2f7   : > { %v1709_v1 = vpop.f32.mrb[98].mxu0  ;;  %v2077_v36 = vmul.f32 %v9966_v17, %v9966_v17  ;;  %15038 = vst [vmem:[#allocation170_spill] sm:$0xff] %v9987_v8 }
 0x2f8   : > { %v1711_v62 = vpop.f32.mrb[99].mxu0 }
 0x2f9   : > { %v9980_v62 = vmax.f32 %v1701_v26, 0.0  ;;  %v2140_v61 = vadd.f32 %v2139_v41, %v2077_v36  ;;  %v2080_v26 = vmul.f32 %v9983_v57, %v9983_v57  ;;  %v9999_v43 = vpop.permute.xlu1 %3789 }
 0x2fa   : > { %15039 = vst [vmem:[#allocation171_spill] sm:$0xff] %v9999_v43 }
 0x2fb   : > { %v2141_v27 = vadd.f32 %v2140_v61, %v2078_v21  ;;  %v2079_v35 = vmul.f32 %v9980_v62, %v9980_v62  ;;  %v2007_v56 = vadd.f32 %v2006_v48, %v9980_v62  ;;  %v10001_v61 = vpop.permute.xlu0 %2958 }
 0x2fc   : > { %15040 = vst [vmem:[#allocation172_spill] sm:$0xff] %v10001_v61 }
 0x2fd   : > { %v1714_v6 = vpop.f32.mrb[100].mxu0  ;;  %v2142_v25 = vadd.f32 %v2141_v27, %v2079_v35  ;;  %v2008_v51 = vadd.f32 %v2007_v56, %v9983_v57  ;;  %v10013_v43 = vpop.permute.xlu1 %3799 }
 0x2fe   : > { %v1716_v37 = vpop.f32.mrb[101].mxu0  ;;  %15041 = vst [vmem:[#allocation173_spill] sm:$0xff] %v10013_v43 }
 0x2ff   : > { %v1717_v39 = vpop.f32.mrb[102].mxu0  ;;  %v9994_v37 = vmax.f32 %v1709_v1, 0.0  ;;  %v2143_v8 = vadd.f32 %v2142_v25, %v2080_v26  ;;  %v10015_v26 = vpop.permute.xlu0 %2968 }
 0x300   : > { %v1719_v19 = vpop.f32.mrb[103].mxu0  ;;  %v10008_v35 = vmax.f32 %v1717_v39, 0.0  ;;  %15042 = vst [vmem:[#allocation174_spill] sm:$0xff] %v10015_v26 }
 0x301   : > { %v9997_v19 = vmax.f32 %v1714_v6, 0.0  ;;  %v2081_v48 = vmul.f32 %v9994_v37, %v9994_v37  ;;  %v2009_v1 = vadd.f32 %v2008_v51, %v9994_v37  ;;  %v10027_v26 = vpop.permute.xlu1 %3809 }
 0x302   : > { %15043 = vst [vmem:[#allocation175_spill] sm:$0xff] %v10027_v26 }
 0x303   : > { %v2082_v27 = vmul.f32 %v9997_v19, %v9997_v19  ;;  %v2144_v56 = vadd.f32 %v2143_v8, %v2081_v48  ;;  %v2010_v6 = vadd.f32 %v2009_v1, %v9997_v19 }
 0x305   : > { %v1722_v41 = vpop.f32.mrb[104].mxu0  ;;  %v2145_v25 = vadd.f32 %v2144_v56, %v2082_v27  ;;  %v2011_v24 = vadd.f32 %v2010_v6, %v10008_v35  ;;  %v10029_v27 = vpop.permute.xlu0 %2978 }
 0x306   : > { %v1724_v36 = vpop.f32.mrb[105].mxu0  ;;  %15044 = vst [vmem:[#allocation176_spill] sm:$0xff] %v10029_v27 }
 0x307   : > { %v1725_v21 = vpop.f32.mrb[106].mxu0  ;;  %v10011_v36 = vmax.f32 %v1722_v41, 0.0 }
 0x308   : > { %v1727_v28 = vpop.f32.mrb[107].mxu0  ;;  %v10022_v8 = vmax.f32 %v1725_v21, 0.0 }
 0x309   : > { %v2083_v28 = vmul.f32 %v10008_v35, %v10008_v35  ;;  %v2084_v39 = vmul.f32 %v10011_v36, %v10011_v36  ;;  %v2012_v1 = vadd.f32 %v2011_v24, %v10011_v36 }
 0x30b   : > { %v2146_v48 = vadd.f32 %v2145_v25, %v2083_v28  ;;  %v2013_v15 = vadd.f32 %v2012_v1, %v10022_v8 }
 0x30d   : > { %v1730_v61 = vpop.f32.mrb[108].mxu0  ;;  %v2147_v56 = vadd.f32 %v2146_v48, %v2084_v39  ;;  %v10041_v39 = vpop.permute.xlu1 %3819 }
 0x30e   : > { %v1732_v51 = vpop.f32.mrb[109].mxu0  ;;  %v10025_v43 = vmax.f32 %v1730_v61, 0.0  ;;  %15045 = vst [vmem:[#allocation177_spill] sm:$0xff] %v10041_v39  ;;  %v10043_v48 = vpop.permute.xlu0 %2988 }
 0x30f   : > { %v1733_v63 = vpop.f32.mrb[110].mxu0  ;;  %v2085_v51 = vmul.f32 %v10022_v8, %v10022_v8  ;;  %15046 = vst [vmem:[#allocation178_spill] sm:$0xff] %v10043_v48 }
 0x310   : > { %v1735_v41 = vpop.f32.mrb[111].mxu0  ;;  %v2086_v21 = vmul.f32 %v10025_v43, %v10025_v43  ;;  %v2014_v28 = vadd.f32 %v2013_v15, %v10025_v43 }
 0x311   : > { %v10036_v41 = vmax.f32 %v1733_v63, 0.0  ;;  %v2148_v61 = vadd.f32 %v2147_v56, %v2085_v51  ;;  %v10055_v39 = vpop.permute.xlu1 %3829 }
 0x312   : > { %15047 = vst [vmem:[#allocation179_spill] sm:$0xff] %v10055_v39 }
 0x313   : > { %v2149_v0 = vadd.f32 %v2148_v61, %v2086_v21  ;;  %v2087_v1 = vmul.f32 %v10036_v41, %v10036_v41  ;;  %v2015_v50 = vadd.f32 %v2014_v28, %v10036_v41  ;;  %v10057_v61 = vpop.permute.xlu0 %2998 }
 0x314   : > { %15048 = vst [vmem:[#allocation180_spill] sm:$0xff] %v10057_v61 }
 0x315   : > { %v1738_v6 = vpop.f32.mrb[112].mxu0  ;;  %v2150_v15 = vadd.f32 %v2149_v0, %v2087_v1  ;;  %v10069_v39 = vpop.permute.xlu1 %3839 }
 0x316   : > { %v1740_v25 = vpop.f32.mrb[113].mxu0  ;;  %v10039_v26 = vmax.f32 %v1738_v6, 0.0  ;;  %15051 = vst [vmem:[#allocation183_spill] sm:$0xff] %v10069_v39 }
 0x317   : > { %v1741_v24 = vpop.f32.mrb[114].mxu0 }
 0x318   : > { %v1743_v27 = vpop.f32.mrb[115].mxu0  ;;  %v2088_v63 = vmul.f32 %v10039_v26, %v10039_v26  ;;  %v10050_v25 = vmax.f32 %v1741_v24, 0.0  ;;  %v2016_v51 = vadd.f32 %v2015_v50, %v10039_v26  ;;  %v10066_v50 = vpop.permute.xlu0 %3907 }
 0x319   : > { %15050 = vst [vmem:[#allocation182_spill] sm:$0xff] %v10066_v50 }
 0x31a   : > { %v2151_v48 = vadd.f32 %v2150_v15, %v2088_v63  ;;  %v2089_v28 = vmul.f32 %v10050_v25, %v10050_v25  ;;  %v2017_v24 = vadd.f32 %v2016_v51, %v10050_v25 }
 0x31d   : > { %v1746_v56 = vpop.f32.mrb[116].mxu0 }
 0x31e   : > { %v10053_v27 = vmax.f32 %v1746_v56, 0.0  ;;  %v1748_v6 = vpop.f32.mrb[117].mxu0  ;;  %v2152_v56 = vadd.f32 %v2151_v48, %v2089_v28  ;;  %v10080_v28 = vpop.permute.xlu0 %3919 }
 0x31f   : > { %v1749_v21 = vpop.f32.mrb[118].mxu0  ;;  %15054 = vst [vmem:[#allocation186_spill] sm:$0xff] %v10080_v28 }
 0x320   : > { %v1751_v38 = vpop.f32.mrb[119].mxu0  ;;  %v2090_v0 = vmul.f32 %v10053_v27, %v10053_v27  ;;  %v10064_v1 = vmax.f32 %v1749_v21, 0.0  ;;  %v2018_v6 = vadd.f32 %v2017_v24, %v10053_v27 }
 0x322   : > { %15049 = vst [vmem:[#allocation181_spill] sm:$0xff] %v10064_v1  ;;  %v2153_v63 = vadd.f32 %v2152_v56, %v2090_v0  ;;  %v2091_v15 = vmul.f32 %v10064_v1, %v10064_v1  ;;  %v2019_v30 = vadd.f32 %v2018_v6, %v10064_v1  ;;  %v10083_v56 = vpop.permute.xlu1 %3911  ;;  %v10090_v1 = vpop.permute.xlu0 %3927 }
 0x323   : > { %15055 = vst [vmem:[#allocation187_spill] sm:$0xff] %v10083_v56  ;;  %15057 = vst [vmem:[#allocation189_spill] sm:$0xff] %v10090_v1 }
 0x324   : > { %v2154_v24 = vadd.f32 %v2153_v63, %v2091_v15 }
 0x325   : > { %v1754_v61 = vpop.f32.mrb[120].mxu0 }
 0x326   : > { %v10073_v38 = vmax.f32 %v1754_v61, 0.0  ;;  %v1756_v51 = vpop.f32.mrb[121].mxu0  ;;  %v10102_v1 = vpop.permute.xlu0 %3935 }
 0x327   : > { %v1757_v10 = vpop.f32.mrb[122].mxu0  ;;  %15060 = vst [vmem:[#allocation192_spill] sm:$0xff] %v10102_v1 }
 0x328   : > { %15052 = vst [vmem:[#allocation184_spill] sm:$0xff] %v10073_v38  ;;  %v2092_v21 = vmul.f32 %v10073_v38, %v10073_v38  ;;  %v10078_v50 = vmax.f32 %v1757_v10, 0.0  ;;  %v1759_v48 = vpop.f32.mrb[123].mxu0  ;;  %v2020_v0 = vadd.f32 %v2019_v30, %v10073_v38 }
 0x32a   : > { %15053 = vst [vmem:[#allocation185_spill] sm:$0xff] %v10078_v50  ;;  %v2155_v39 = vadd.f32 %v2154_v24, %v2092_v21  ;;  %v2093_v61 = vmul.f32 %v10078_v50, %v10078_v50  ;;  %v2021_v6 = vadd.f32 %v2020_v0, %v10078_v50  ;;  %v10097_v24 = vpop.permute.xlu1 %3915  ;;  %v10106_v38 = vpop.permute.xlu0 %3943 }
 0x32b   : > { %15059 = vst [vmem:[#allocation191_spill] sm:$0xff] %v10097_v24  ;;  %15062 = vst [vmem:[#allocation194_spill] sm:$0xff] %v10106_v38  ;;  %v15122_v38 = vld [vmem:[#allocation33_spill] sm:$0xff] }
 0x32c   : > { %v2156_v48 = vadd.f32 %v2155_v39, %v2093_v61 }
 0x32d   : > { %v1762_v51 = vpop.f32.mrb[124].mxu0 }
 0x32e   : > { %v10088_v23 = vmax.f32 %v1762_v51, 0.0  ;;  %v1764_v46 = vpop.f32.mrb[125].mxu0 }
 0x32f   : > { %v1765_v10 = vpop.f32.mrb[126].mxu0 }
 0x330   : > { %15056 = vst [vmem:[#allocation188_spill] sm:$0xff] %v10088_v23  ;;  %v2022_v63 = vadd.f32 %v2021_v6, %v10088_v23  ;;  %v2094_v30 = vmul.f32 %v10088_v23, %v10088_v23  ;;  %v10095_v15 = vmax.f32 %v1765_v10, 0.0  ;;  %v1767_v21 = vpop.f32.mrb[127].mxu0  ;;  %v10104_v6 = vpop.permute.xlu1 %3923 }
 0x331   : > { %15061 = vst [vmem:[#allocation193_spill] sm:$0xff] %v10104_v6  ;;  %v15126_v6 = vld [vmem:[#allocation35_spill] sm:$0xff] }
 0x332   : > { %15058 = vst [vmem:[#allocation190_spill] sm:$0xff] %v10095_v15  ;;  %v2157_v28 = vadd.f32 %v2156_v48, %v2094_v30  ;;  %v2023_v0 = vadd.f32 %v2022_v63, %v10095_v15  ;;  %v2095_v46 = vmul.f32 %v10095_v15, %v10095_v15 }
 0x334   : > { %v2024_v51 = vrot.slane %v2023_v0, 4  ;;  %v2158_v56 = vadd.f32 %v2157_v28, %v2095_v46  ;;  %v10108_v63 = vpop.permute.xlu1 %3931  ;;  %v10110_v46 = vpop.permute.xlu0 %3951 }
 0x335   : > { %15063 = vst [vmem:[#allocation195_spill] sm:$0xff] %v10108_v63  ;;  %15064 = vst [vmem:[#allocation196_spill] sm:$0xff] %v10110_v46 }
 0x336   : > { %v2025_v39 = vadd.f32 %v2024_v51, %v2023_v0  ;;  %v2159_v61 = vrot.slane %v2158_v56, 4 }
 0x338   : > { %v2026_v23 = vrot.slane %v2025_v39, 2  ;;  %v2160_v10 = vadd.f32 %v2159_v61, %v2158_v56  ;;  %v10112_v0 = vpop.permute.xlu1 %3939  ;;  %v10114_v51 = vpop.permute.xlu0 %3959 }
 0x339   : > { %15065 = vst [vmem:[#allocation197_spill] sm:$0xff] %v10112_v0  ;;  %15066 = vst [vmem:[#allocation198_spill] sm:$0xff] %v10114_v51 }
 0x33a   : > { %v2027_v50 = vadd.f32 %v2026_v23, %v2025_v39  ;;  %v2161_v21 = vrot.slane %v2160_v10, 2 }
 0x33c   : > { %v2028_v48 = vrot.slane %v2027_v50, 1  ;;  %v2162_v30 = vadd.f32 %v2161_v21, %v2160_v10  ;;  %v10116_v56 = vpop.permute.xlu1 %3947  ;;  %v10118_v23 = vpop.permute.xlu0 %3967 }
 0x33d   : > { %15067 = vst [vmem:[#allocation199_spill] sm:$0xff] %v10116_v56  ;;  %15068 = vst [vmem:[#allocation200_spill] sm:$0xff] %v10118_v23  ;;  %v15121_v56 = vld [vmem:[#allocation8_spill] sm:$0xff] }
 0x33e   : > { %v2029_v24 = vadd.f32 %v2028_v48, %v2027_v50  ;;  %v2163_v15 = vrot.slane %v2162_v30, 1 }
 0x340   : > { %2030 = vadd.xlane.f32.xlu0 %v2029_v24  ;;  %v2164_v28 = vadd.f32 %v2163_v15, %v2162_v30  ;;  %v10120_v39 = vpop.permute.xlu1 %3955  ;;  %v10122_v61 = vpop.permute.xlu0 %3975 }
 0x341   : > { %15069 = vst [vmem:[#allocation201_spill] sm:$0xff] %v10120_v39  ;;  %15070 = vst [vmem:[#allocation202_spill] sm:$0xff] %v10122_v61 }
 0x342   : > { %2165 = vadd.xlane.f32.xlu1 %v2164_v28 }
 0x344   : > { %v10124_v10 = vpop.permute.xlu1 %3963  ;;  %v10126_v50 = vpop.permute.xlu0 %3983 }
 0x345   : > { %15071 = vst [vmem:[#allocation203_spill] sm:$0xff] %v10124_v10  ;;  %15072 = vst [vmem:[#allocation204_spill] sm:$0xff] %v10126_v50 }
 0x348   : > { %v10128_v15 = vpop.permute.xlu1 %3971  ;;  %v10130_v24 = vpop.permute.xlu0 %3991 }
 0x349   : > { %15073 = vst [vmem:[#allocation205_spill] sm:$0xff] %v10128_v15  ;;  %15074 = vst [vmem:[#allocation206_spill] sm:$0xff] %v10130_v24 }
 0x34c   : > { %v10132_v21 = vpop.permute.xlu1 %3979  ;;  %v10134_v48 = vpop.permute.xlu0 %3999 }
 0x34d   : > { %15075 = vst [vmem:[#allocation207_spill] sm:$0xff] %v10132_v21  ;;  %15076 = vst [vmem:[#allocation208_spill] sm:$0xff] %v10134_v48 }
 0x350   : > { %v10136_v30 = vpop.permute.xlu1 %3987  ;;  %v10138_v28 = vpop.permute.xlu0 %4007 }
 0x351   : > { %15077 = vst [vmem:[#allocation209_spill] sm:$0xff] %v10136_v30  ;;  %15078 = vst [vmem:[#allocation210_spill] sm:$0xff] %v10138_v28 }
 0x354   : > { %v10140_v23 = vpop.permute.xlu1 %3995  ;;  %v10142_v51 = vpop.permute.xlu0 %4015 }
 0x355   : > { %15079 = vst [vmem:[#allocation211_spill] sm:$0xff] %v10140_v23  ;;  %15080 = vst [vmem:[#allocation212_spill] sm:$0xff] %v10142_v51 }
 0x358   : > { %v10144_v61 = vpop.permute.xlu1 %4003  ;;  %v10146_v10 = vpop.permute.xlu0 %4023 }
 0x359   : > { %15081 = vst [vmem:[#allocation213_spill] sm:$0xff] %v10144_v61  ;;  %15082 = vst [vmem:[#allocation214_spill] sm:$0xff] %v10146_v10 }
 0x35c   : > { %v10148_v50 = vpop.permute.xlu1 %4011  ;;  %v10150_v15 = vpop.permute.xlu0 %4031 }
 0x35d   : > { %15083 = vst [vmem:[#allocation215_spill] sm:$0xff] %v10148_v50  ;;  %15084 = vst [vmem:[#allocation216_spill] sm:$0xff] %v10150_v15 }
 0x360   : > { %v10152_v24 = vpop.permute.xlu1 %4019  ;;  %v10154_v21 = vpop.permute.xlu0 %4039 }
 0x361   : > { %15085 = vst [vmem:[#allocation217_spill] sm:$0xff] %v10152_v24  ;;  %15086 = vst [vmem:[#allocation218_spill] sm:$0xff] %v10154_v21 }
 0x364   : > { %v10156_v48 = vpop.permute.xlu1 %4027  ;;  %v10158_v30 = vpop.permute.xlu0 %4047 }
 0x365   : > { %15087 = vst [vmem:[#allocation219_spill] sm:$0xff] %v10156_v48  ;;  %15088 = vst [vmem:[#allocation220_spill] sm:$0xff] %v10158_v30 }
 0x368   : > { %v10160_v28 = vpop.permute.xlu1 %4035  ;;  %v10162_v23 = vpop.permute.xlu0 %4055 }
 0x369   : > { %15089 = vst [vmem:[#allocation221_spill] sm:$0xff] %v10160_v28  ;;  %15090 = vst [vmem:[#allocation222_spill] sm:$0xff] %v10162_v23 }
 0x36c   : > { %v10164_v51 = vpop.permute.xlu1 %4043  ;;  %v10166_v61 = vpop.permute.xlu0 %4063 }
 0x36d   : > { %15091 = vst [vmem:[#allocation223_spill] sm:$0xff] %v10164_v51  ;;  %15092 = vst [vmem:[#allocation224_spill] sm:$0xff] %v10166_v61 }
 0x370   : > { %v10168_v10 = vpop.permute.xlu1 %4051  ;;  %v10170_v50 = vpop.permute.xlu0 %4071 }
 0x371   : > { %15093 = vst [vmem:[#allocation225_spill] sm:$0xff] %v10168_v10  ;;  %15094 = vst [vmem:[#allocation226_spill] sm:$0xff] %v10170_v50 }
 0x374   : > { %v10172_v15 = vpop.permute.xlu1 %4059  ;;  %v10174_v24 = vpop.permute.xlu0 %4079 }
 0x375   : > { %15095 = vst [vmem:[#allocation227_spill] sm:$0xff] %v10172_v15  ;;  %15096 = vst [vmem:[#allocation228_spill] sm:$0xff] %v10174_v24 }
 0x378   : > { %v10176_v21 = vpop.permute.xlu1 %4067  ;;  %v10178_v48 = vpop.permute.xlu0 %4087 }
 0x379   : > { %15097 = vst [vmem:[#allocation229_spill] sm:$0xff] %v10176_v21  ;;  %15098 = vst [vmem:[#allocation230_spill] sm:$0xff] %v10178_v48 }
 0x37c   : > { %v10180_v30 = vpop.permute.xlu1 %4075  ;;  %v10182_v28 = vpop.permute.xlu0 %4095 }
 0x37d   : > { %15099 = vst [vmem:[#allocation231_spill] sm:$0xff] %v10180_v30  ;;  %15100 = vst [vmem:[#allocation232_spill] sm:$0xff] %v10182_v28 }
 0x380   : > { %v10184_v23 = vpop.permute.xlu1 %4083  ;;  %v10186_v51 = vpop.permute.xlu0 %4103 }
 0x381   : > { %15101 = vst [vmem:[#allocation233_spill] sm:$0xff] %v10184_v23  ;;  %15102 = vst [vmem:[#allocation234_spill] sm:$0xff] %v10186_v51 }
 0x384   : > { %v10188_v61 = vpop.permute.xlu1 %4091  ;;  %v10190_v10 = vpop.permute.xlu0 %4111 }
 0x385   : > { %15103 = vst [vmem:[#allocation235_spill] sm:$0xff] %v10188_v61  ;;  %15104 = vst [vmem:[#allocation236_spill] sm:$0xff] %v10190_v10 }
 0x388   : > { %v10192_v50 = vpop.permute.xlu1 %4099  ;;  %v10194_v15 = vpop.permute.xlu0 %4119 }
 0x389   : > { %15105 = vst [vmem:[#allocation237_spill] sm:$0xff] %v10192_v50  ;;  %15106 = vst [vmem:[#allocation238_spill] sm:$0xff] %v10194_v15 }
 0x38c   : > { %v10196_v24 = vpop.permute.xlu1 %4107  ;;  %v10198_v21 = vpop.permute.xlu0 %4127 }
 0x38d   : > { %15107 = vst [vmem:[#allocation239_spill] sm:$0xff] %v10196_v24  ;;  %15108 = vst [vmem:[#allocation240_spill] sm:$0xff] %v10198_v21 }
 0x390   : > { %v10200_v48 = vpop.permute.xlu1 %4115  ;;  %v10202_v30 = vpop.permute.xlu0 %4135 }
 0x391   : > { %15109 = vst [vmem:[#allocation241_spill] sm:$0xff] %v10200_v48  ;;  %15110 = vst [vmem:[#allocation242_spill] sm:$0xff] %v10202_v30 }
 0x394   : > { %v10204_v28 = vpop.permute.xlu1 %4123  ;;  %v10206_v23 = vpop.permute.xlu0 %4143 }
 0x395   : > { %15111 = vst [vmem:[#allocation243_spill] sm:$0xff] %v10204_v28  ;;  %15112 = vst [vmem:[#allocation244_spill] sm:$0xff] %v10206_v23 }
 0x398   : > { %v10208_v51 = vpop.permute.xlu1 %4131 }
 0x399   : > { %15113 = vst [vmem:[#allocation245_spill] sm:$0xff] %v10208_v51 }
 0x39c   : > { %v10210_v10 = vpop.permute.xlu1 %4139 }
 0x39d   : > { %15114 = vst [vmem:[#allocation246_spill] sm:$0xff] %v10210_v10 }
 0x3cd   : > { %v2031_v61 = vpop.xlane.xlu0 %2030 }
 0x3ce   : > { %v10212_v50 = vmul.f32 1.5258789e-05, %v2031_v61 }
 0x3cf   : > { %v2166_v48 = vpop.xlane.xlu1 %2165 }
 0x3d0   : > { %15115 = vst [vmem:[#allocation247_spill] sm:$0xff] %v10212_v50  ;;  %v2172_v15 = vsub.f32 %v9589_v32, %v10212_v50  ;;  %v2173_v21 = vsub.f32 %v9584_v47, %v10212_v50  ;;  %v2174_v30 = vsub.f32 %v9592_v54, %v10212_v50  ;;  %v2175_v23 = vsub.f32 %v9610_v29, %v10212_v50 }
 0x3d1   : > { %v2177_v61 = vsub.f32 %v9634_v58, %v10212_v50  ;;  %v2192_v32 = vsub.f32 %v9778_v42, %v10212_v50  ;;  %v2194_v47 = vsub.f32 %v9792_v34, %v10212_v50  ;;  %v2195_v54 = vsub.f32 %v9802_v60, %v10212_v50 }
 0x3d2   : > { %v2196_v29 = vsub.f32 %v9808_v52, %v10212_v50  ;;  %v2197_v51 = vsub.f32 %v9820_v31, %v10212_v50  ;;  %v2168_v28 = vmul.f32 1.5258789e-05, %v2166_v48  ;;  %v2169_v58 = vmul.f32 %v10212_v50, %v10212_v50 }
 0x3d3   : > { %v2198_v10 = vsub.f32 %v9824_v9, %v10212_v50  ;;  %v2199_v42 = vsub.f32 %v9836_v12, %v10212_v50  ;;  %v2200_v34 = vsub.f32 %v9840_v14, %v10212_v50  ;;  %v2201_v60 = vsub.f32 %v9852_v55, %v10212_v50 }
 0x3d4   : > { %v2202_v52 = vsub.f32 %v9855_v22, %v10212_v50  ;;  %v2203_v31 = vsub.f32 %v9867_v7, %v10212_v50  ;;  %v2204_v48 = vsub.f32 %v9870_v44, %v10212_v50  ;;  %v2170_v24 = vsub.f32 %v2168_v28, %v2169_v58 }
 0x3d5   : > { %v2205_v9 = vsub.f32 %v9882_v49, %v10212_v50  ;;  %v2206_v12 = vsub.f32 %v9885_v2, %v10212_v50  ;;  %v2207_v14 = vsub.f32 %v9896_v4, %v10212_v50  ;;  %v2208_v55 = vsub.f32 %v9899_v11, %v10212_v50 }
 0x3d6   : > { %v2209_v22 = vsub.f32 %v9910_v33, %v10212_v50  ;;  %v2210_v7 = vsub.f32 %v9913_v16, %v10212_v50  ;;  %v2211_v44 = vsub.f32 %v9924_v5, %v10212_v50  ;;  %v2171_v28 = vmax.f32 %v2170_v24, 0.0 }
 0x3d7   : > { %v2212_v49 = vsub.f32 %v9927_v59, %v10212_v50  ;;  %v2213_v2 = vsub.f32 %v9938_v13, %v10212_v50  ;;  %v2214_v4 = vsub.f32 %v9941_v53, %v10212_v50  ;;  %v2215_v11 = vsub.f32 %v9952_v40, %v10212_v50 }
 0x3d8   : > { %v2216_v33 = vsub.f32 %v9955_v20, %v10212_v50  ;;  %v2217_v16 = vsub.f32 %v9966_v17, %v10212_v50  ;;  %v2218_v5 = vsub.f32 %v9969_v3, %v10212_v50  ;;  %v2620_v24 = vadd.f32 1e-08, %v2171_v28 }
 0x3d9   : > { %v2219_v59 = vsub.f32 %v9980_v62, %v10212_v50  ;;  %v2220_v13 = vsub.f32 %v9983_v57, %v10212_v50  ;;  %v2221_v53 = vsub.f32 %v9994_v37, %v10212_v50  ;;  %v2222_v40 = vsub.f32 %v9997_v19, %v10212_v50 }
 0x3da   : > { %v2223_v20 = vsub.f32 %v10008_v35, %v10212_v50  ;;  %v2224_v17 = vsub.f32 %v10011_v36, %v10212_v50  ;;  %v2225_v3 = vsub.f32 %v10022_v8, %v10212_v50  ;;  %7567 = vrsqrt.f32 %v2620_v24  ;;  %v15116_v36 = vld [vmem:[#allocation181_spill] sm:$0xff]  ;;  %v15117_v8 = vld [vmem:[#allocation184_spill] sm:$0xff] }
 0x3db   : > { %v2226_v62 = vsub.f32 %v10025_v43, %v10212_v50  ;;  %v2227_v57 = vsub.f32 %v10036_v41, %v10212_v50  ;;  %v2228_v37 = vsub.f32 %v10039_v26, %v10212_v50  ;;  %v2229_v19 = vsub.f32 %v10050_v25, %v10212_v50  ;;  %v15118_v43 = vld [vmem:[#allocation185_spill] sm:$0xff]  ;;  %v15119_v41 = vld [vmem:[#allocation188_spill] sm:$0xff]  ;;  %v15120_v26 = vld [vmem:[#allocation190_spill] sm:$0xff] }
 0x3dc   : > { %v2230_v35 = vsub.f32 %v10053_v27, %v10212_v50  ;;  %v2231_v58 = vsub.f32 %v15116_v36, %v10212_v50  ;;  %v2232_v28 = vsub.f32 %v15117_v8, %v10212_v50  ;;  %v2233_v24 = vsub.f32 %v15118_v43, %v10212_v50  ;;  %v15123_v27 = vld [vmem:[#allocation9_spill] sm:$0xff]  ;;  %v15125_v36 = vld [vmem:[#allocation34_spill] sm:$0xff] }
 0x3dd   : > { %v2234_v39 = vsub.f32 %v15119_v41, %v10212_v50  ;;  %v2235_v46 = vsub.f32 %v15120_v26, %v10212_v50  ;;  %v2556_v25 = vmul.f32 %v15121_v56, %v2172_v15  ;;  %v2557_v0 = vmul.f32 %v15122_v38, %v2173_v21  ;;  %v15130_v26 = vld [vmem:[#allocation10_spill] sm:$0xff]  ;;  %v15131_v15 = vld [vmem:[#allocation41_spill] sm:$0xff]  ;;  %v15132_v21 = vld [vmem:[#allocation11_spill] sm:$0xff] }
 0x3de   : > { %v10319_v1 = vmul.f32 %v15123_v27, %v2174_v30  ;;  %v2559_v63 = vmul.f32 %v15125_v36, %v2175_v23  ;;  %v10323_v8 = vmul.f32 %v15126_v6, %v2177_v61  ;;  %v2576_v43 = vmul.f32 %v15128_v45, %v2192_v32  ;;  %v15133_v27 = vld [vmem:[#allocation43_spill] sm:$0xff]  ;;  %v15135_v36 = vld [vmem:[#allocation46_spill] sm:$0xff]  ;;  %v15136_v61 = vld [vmem:[#allocation25_spill] sm:$0xff] }
 0x3df   : > { %v2578_v41 = vmul.f32 %v15129_v18, %v2194_v47  ;;  %v2579_v50 = vmul.f32 %v15130_v26, %v2195_v54  ;;  %v2580_v56 = vmul.f32 %v15131_v15, %v2196_v29  ;;  %v2581_v38 = vmul.f32 %v15132_v21, %v2197_v51  ;;  %v15137_v32 = vld [vmem:[#allocation48_spill] sm:$0xff]  ;;  %v15139_v26 = vld [vmem:[#allocation51_spill] sm:$0xff]  ;;  %v15140_v15 = vld [vmem:[#allocation14_spill] sm:$0xff] }
 0x3e0   : > { %15124 = vst [vmem:[#allocation181_spill] sm:$0xff] %v10319_v1  ;;  %15127 = vst [vmem:[#allocation184_spill] sm:$0xff] %v10323_v8  ;;  %v2582_v30 = vmul.f32 %v15133_v27, %v2198_v10  ;;  %v15134_v1 = vld [vmem:[#allocation30_spill] sm:$0xff]  ;;  %v2584_v6 = vmul.f32 %v15135_v36, %v2200_v34  ;;  %v2585_v8 = vmul.f32 %v15136_v61, %v2201_v60  ;;  %v15138_v18 = vld [vmem:[#allocation20_spill] sm:$0xff] }
 0x3e1   : > { %v2583_v23 = vmul.f32 %v15134_v1, %v2199_v42  ;;  %v2586_v45 = vmul.f32 %v15137_v32, %v2202_v52  ;;  %v2587_v47 = vmul.f32 %v15138_v18, %v2203_v31  ;;  %v2588_v54 = vmul.f32 %v15139_v26, %v2204_v48  ;;  %v15141_v21 = vld [vmem:[#allocation53_spill] sm:$0xff]  ;;  %v15142_v10 = vld [vmem:[#allocation15_spill] sm:$0xff]  ;;  %v15144_v34 = vld [vmem:[#allocation32_spill] sm:$0xff] }
 0x3e2   : > { %v2589_v29 = vmul.f32 %v15140_v15, %v2205_v9  ;;  %v2590_v51 = vmul.f32 %v15141_v21, %v2206_v12  ;;  %v2591_v27 = vmul.f32 %v15142_v10, %v2207_v14  ;;  %v15143_v1 = vld [vmem:[#allocation55_spill] sm:$0xff]  ;;  %v2593_v36 = vmul.f32 %v15144_v34, %v2209_v22  ;;  %v15145_v60 = vld [vmem:[#allocation58_spill] sm:$0xff]  ;;  %v15147_v18 = vld [vmem:[#allocation60_spill] sm:$0xff] }
 0x3e3   : > { %v2592_v42 = vmul.f32 %v15143_v1, %v2208_v55  ;;  %v2594_v61 = vmul.f32 %v15145_v60, %v2210_v7  ;;  %v15146_v32 = vld [vmem:[#allocation27_spill] sm:$0xff]  ;;  %v2596_v31 = vmul.f32 %v15147_v18, %v2212_v49  ;;  %v15148_v26 = vld [vmem:[#allocation37_spill] sm:$0xff]  ;;  %v15153_v55 = vld [vmem:[#allocation40_spill] sm:$0xff] }
 0x3e4   : > { %v2595_v52 = vmul.f32 %v15146_v32, %v2211_v44  ;;  %v2597_v48 = vmul.f32 %v15148_v26, %v2213_v2  ;;  %v10346_v9 = vpop.eup %7567  ;;  %v15150_v15 = vld [vmem:[#allocation63_spill] sm:$0xff]  ;;  %v15152_v14 = vld [vmem:[#allocation65_spill] sm:$0xff]  ;;  %v2601_v22 = vmul.f32 %v15153_v55, %v2217_v16  ;;  %v15154_v34 = vld [vmem:[#allocation68_spill] sm:$0xff] }
 0x3e5   : > { %15149 = vst [vmem:[#allocation185_spill] sm:$0xff] %v10346_v9  ;;  %v2598_v12 = vmul.f32 %v15150_v15, %v2214_v4  ;;  %v15151_v21 = vld [vmem:[#allocation39_spill] sm:$0xff]  ;;  %v2600_v1 = vmul.f32 %v15152_v14, %v2216_v33  ;;  %v2602_v7 = vmul.f32 %v15154_v34, %v2218_v5  ;;  %v15155_v60 = vld [vmem:[#allocation42_spill] sm:$0xff]  ;;  %v2623_v49 = vmul.f32 %v10346_v9, %v2557_v0  ;;  %v15157_v2 = vld [vmem:[#allocation44_spill] sm:$0xff] }
 0x3e6   : > { %v2599_v10 = vmul.f32 %v15151_v21, %v2215_v11  ;;  %v2603_v32 = vmul.f32 %v15155_v60, %v2219_v59  ;;  %v15156_v44 = vld [vmem:[#allocation70_spill] sm:$0xff]  ;;  %v2605_v26 = vmul.f32 %v15157_v2, %v2221_v53  ;;  %v15158_v4 = vld [vmem:[#allocation73_spill] sm:$0xff]  ;;  %v15160_v14 = vld [vmem:[#allocation75_spill] sm:$0xff] }
 0x3e7   : > { %v2604_v18 = vmul.f32 %v15156_v44, %v2220_v13  ;;  %v2606_v15 = vmul.f32 %v15158_v4, %v2222_v40  ;;  %v15159_v11 = vld [vmem:[#allocation45_spill] sm:$0xff]  ;;  %v2608_v33 = vmul.f32 %v15160_v14, %v2224_v17  ;;  %v15161_v16 = vld [vmem:[#allocation47_spill] sm:$0xff]  ;;  %v15167_v2 = vld [vmem:[#allocation50_spill] sm:$0xff] }
 0x3e8   : > { %v2607_v21 = vmul.f32 %v15159_v11, %v2223_v20  ;;  %v2609_v55 = vmul.f32 %v15161_v16, %v2225_v3  ;;  %v15162_v5 = vld [vmem:[#allocation77_spill] sm:$0xff]  ;;  %v15166_v0 = vld [vmem:[#allocation79_spill] sm:$0xff]  ;;  %v2613_v53 = vmul.f32 %v15167_v2, %v2229_v19  ;;  %v15169_v11 = vld [vmem:[#allocation52_spill] sm:$0xff] }
 0x3e9   : > { %v2610_v34 = vmul.f32 %v15162_v5, %v2226_v62  ;;  %v15163_v59 = vld [vmem:[#allocation49_spill] sm:$0xff]  ;;  %v2612_v9 = vmul.f32 %v15166_v0, %v2228_v37  ;;  %v2615_v20 = vmul.f32 %v15169_v11, %v2231_v58  ;;  %v15170_v14 = vld [vmem:[#allocation83_spill] sm:$0xff]  ;;  %v15171_v3 = vld [vmem:[#allocation54_spill] sm:$0xff] }
 0x3ea   : > { %v2611_v60 = vmul.f32 %v15163_v59, %v2227_v57  ;;  %v15164_v13 = vld [vmem:[#allocation57_spill] sm:$0xff]  ;;  %v2616_v17 = vmul.f32 %v15170_v14, %v2232_v28  ;;  %v2617_v16 = vmul.f32 %v15171_v3, %v2233_v24  ;;  %v15173_v57 = vld [vmem:[#allocation56_spill] sm:$0xff]  ;;  %v15176_v0 = vld [vmem:[#allocation87_spill] sm:$0xff] }
 0x3eb   : > { %v10364_v44 = vadd.f32 %v15164_v13, %v2623_v49  ;;  %v15168_v4 = vld [vmem:[#allocation81_spill] sm:$0xff]  ;;  %v2619_v59 = vmul.f32 %v15173_v57, %v2235_v46  ;;  %v15182_v14 = vld [vmem:[#allocation123_spill] sm:$0xff]  ;;  %v15186_v57 = vld [vmem:[#allocation128_spill] sm:$0xff] }
 0x3ec   : > { %v2614_v40 = vmul.f32 %v15168_v4, %v2230_v35  ;;  %v15172_v5 = vld [vmem:[#allocation85_spill] sm:$0xff] }
 0x3ed   : > { %15165 = vst [vmem:[#allocation188_spill] sm:$0xff] %v10364_v44  ;;  %v2618_v62 = vmul.f32 %v15172_v5, %v2234_v39  ;;  %3075 = vrot.lane.b32.xlu1 %v10364_v44, %s7733_s25  ;;  %v15174_v49 = vld [vmem:[#allocation185_spill] sm:$0xff]  ;;  %v15195_v44 = vld [vmem:[#allocation23_spill] sm:$0xff] }
 0x3ee   : > { %v2622_v37 = vmul.f32 %v15174_v49, %v2556_v25  ;;  %v2625_v19 = vmul.f32 %v15174_v49, %v2559_v63  ;;  %v10379_v35 = vmul.f32 %v15174_v49, %v2576_v43  ;;  %v10382_v58 = vmul.f32 %v15174_v49, %v2578_v41  ;;  %v15183_v3 = vld [vmem:[#allocation121_spill] sm:$0xff] }
 0x3ef   : > { %v10385_v28 = vmul.f32 %v15174_v49, %v2579_v50  ;;  %v10388_v39 = vmul.f32 %v15174_v49, %v2580_v56  ;;  %v10391_v46 = vmul.f32 %v15174_v49, %v2581_v38  ;;  %v10394_v24 = vmul.f32 %v15174_v49, %v2582_v30  ;;  %v15185_v5 = vld [vmem:[#allocation29_spill] sm:$0xff] }
 0x3f0   : > { %v10397_v63 = vmul.f32 %v15174_v49, %v2583_v23  ;;  %v10400_v25 = vmul.f32 %v15174_v49, %v2584_v6  ;;  %v10403_v43 = vmul.f32 %v15174_v49, %v2585_v8  ;;  %v10406_v50 = vmul.f32 %v15174_v49, %v2586_v45 }
 0x3f1   : > { %v10409_v41 = vmul.f32 %v15174_v49, %v2587_v47  ;;  %v10412_v56 = vmul.f32 %v15174_v49, %v2588_v54  ;;  %v10415_v38 = vmul.f32 %v15174_v49, %v2589_v29  ;;  %v10418_v30 = vmul.f32 %v15174_v49, %v2590_v51 }
 0x3f2   : > { %v10421_v23 = vmul.f32 %v15174_v49, %v2591_v27  ;;  %v10424_v8 = vmul.f32 %v15174_v49, %v2592_v42  ;;  %v10427_v6 = vmul.f32 %v15174_v49, %v2593_v36  ;;  %v10430_v45 = vmul.f32 %v15174_v49, %v2594_v61 }
 0x3f3   : > { %v10433_v47 = vmul.f32 %v15174_v49, %v2595_v52  ;;  %v10436_v54 = vmul.f32 %v15174_v49, %v2596_v31  ;;  %v10439_v29 = vmul.f32 %v15174_v49, %v2597_v48  ;;  %v10442_v51 = vmul.f32 %v15174_v49, %v2598_v12 }
 0x3f4   : > { %v10445_v27 = vmul.f32 %v15174_v49, %v2599_v10  ;;  %v10448_v42 = vmul.f32 %v15174_v49, %v2600_v1  ;;  %v10451_v36 = vmul.f32 %v15174_v49, %v2601_v22  ;;  %v10454_v61 = vmul.f32 %v15174_v49, %v2602_v7 }
 0x3f5   : > { %v10457_v52 = vmul.f32 %v15174_v49, %v2603_v32  ;;  %v10460_v31 = vmul.f32 %v15174_v49, %v2604_v18  ;;  %v10463_v48 = vmul.f32 %v15174_v49, %v2605_v26  ;;  %v10466_v12 = vmul.f32 %v15174_v49, %v2606_v15 }
 0x3f6   : > { %v10469_v10 = vmul.f32 %v15174_v49, %v2607_v21  ;;  %v10472_v1 = vmul.f32 %v15174_v49, %v2608_v33  ;;  %v10475_v22 = vmul.f32 %v15174_v49, %v2609_v55  ;;  %v10478_v7 = vmul.f32 %v15174_v49, %v2610_v34 }
 0x3f7   : > { %v10481_v32 = vmul.f32 %v15174_v49, %v2611_v60  ;;  %v10484_v18 = vmul.f32 %v15174_v49, %v2612_v9  ;;  %v10487_v26 = vmul.f32 %v15174_v49, %v2613_v53  ;;  %v10490_v15 = vmul.f32 %v15174_v49, %v2614_v40  ;;  %v15175_v9 = vld [vmem:[#allocation181_spill] sm:$0xff]  ;;  %v15178_v53 = vld [vmem:[#allocation184_spill] sm:$0xff]  ;;  %v15179_v40 = vld [vmem:[#allocation59_spill] sm:$0xff] }
 0x3f8   : > { %v10493_v21 = vmul.f32 %v15174_v49, %v2615_v20  ;;  %v10496_v33 = vmul.f32 %v15174_v49, %v2616_v17  ;;  %v10499_v55 = vmul.f32 %v15174_v49, %v2617_v16  ;;  %v10502_v34 = vmul.f32 %v15174_v49, %v2618_v62  ;;  %v15181_v20 = vld [vmem:[#allocation247_spill] sm:$0xff] }
 0x3f9   : > { %v2624_v60 = vmul.f32 %v15174_v49, %v15175_v9  ;;  %v10507_v13 = vmul.f32 %v15174_v49, %v2619_v59  ;;  %v10510_v2 = vadd.f32 %v15176_v0, %v2622_v37  ;;  %v2627_v4 = vmul.f32 %v15174_v49, %v15178_v53  ;;  %v15187_v37 = vld [vmem:[#allocation125_spill] sm:$0xff]  ;;  %v15189_v0 = vld [vmem:[#allocation36_spill] sm:$0xff] }
 0x3fa   : > { %v10515_v11 = vadd.f32 %v15179_v40, %v2625_v19  ;;  %v2178_v17 = vsub.f32 %v15182_v14, %v15181_v20  ;;  %v15184_v16 = vsub.f32 %v15183_v3, %v15181_v20  ;;  %v2181_v59 = vsub.f32 %v15186_v57, %v15181_v20  ;;  %v15190_v40 = vld [vmem:[#allocation89_spill] sm:$0xff]  ;;  %v15194_v57 = vld [vmem:[#allocation126_spill] sm:$0xff] }
 0x3fb   : > { %15177 = vst [vmem:[#allocation190_spill] sm:$0xff] %v10510_v2  ;;  %3073 = vrot.lane.b32.xlu0 %v10510_v2, %s7733_s25  ;;  %v15188_v9 = vsub.f32 %v15187_v37, %v15181_v20  ;;  %v10535_v14 = vadd.f32 %v15190_v40, %v2624_v60  ;;  %v2180_v2 = vsub.f32 %v15194_v57, %v15181_v20 }
 0x3fc   : > { %15180 = vst [vmem:[#allocation8_spill] sm:$0xff] %v10515_v11  ;;  %v2560_v62 = vmul.f32 %v15185_v5, %v15184_v16  ;;  %3079 = vrot.lane.b32.xlu1 %v10515_v11, %s7733_s25  ;;  %v15192_v16 = vld [vmem:[#allocation61_spill] sm:$0xff]  ;;  %v2562_v37 = vmul.f32 %v15195_v44, %v2178_v17 }
 0x3fd   : > { %v2563_v19 = vmul.f32 %v15189_v0, %v15188_v9  ;;  %15191 = vst [vmem:[#allocation33_spill] sm:$0xff] %v10535_v14  ;;  %v10539_v5 = vadd.f32 %v15192_v16, %v2627_v4  ;;  %v15196_v9 = vld [vmem:[#allocation131_spill] sm:$0xff]  ;;  %v15200_v16 = vld [vmem:[#allocation62_spill] sm:$0xff]  ;;  %v15202_v17 = vld [vmem:[#allocation129_spill] sm:$0xff] }
 0x3fe   : > { %v2626_v53 = vmul.f32 %v15174_v49, %v2560_v62  ;;  %v2183_v0 = vsub.f32 %v15196_v9, %v15181_v20  ;;  %v15197_v62 = vld [vmem:[#allocation6_spill] sm:$0xff]  ;;  %v2628_v60 = vmul.f32 %v15174_v49, %v2562_v37  ;;  %v15198_v4 = vld [vmem:[#allocation91_spill] sm:$0xff]  ;;  %v2182_v57 = vsub.f32 %v15202_v17, %v15181_v20 }
 0x3ff   : > { %v2629_v3 = vmul.f32 %v15174_v49, %v2563_v19  ;;  %15193 = vst [vmem:[#allocation9_spill] sm:$0xff] %v10539_v5  ;;  %3077 = vrot.lane.b32.xlu0 %v10535_v14, %s7733_s25  ;;  %v2565_v11 = vmul.f32 %v15197_v62, %v2181_v59  ;;  %v15203_v14 = vld [vmem:[#allocation19_spill] sm:$0xff]  ;;  %v15204_v59 = vld [vmem:[#allocation134_spill] sm:$0xff] }
 0x400   : > { %3083 = vrot.lane.b32.xlu1 %v10539_v5, %s7733_s25  ;;  %v10553_v19 = vadd.f32 %v15198_v4, %v2626_v53  ;;  %v2564_v9 = vmul.f32 %v15203_v14, %v2180_v2  ;;  %v2185_v62 = vsub.f32 %v15204_v59, %v15181_v20  ;;  %v15205_v37 = vld [vmem:[#allocation18_spill] sm:$0xff]  ;;  %v15206_v53 = vld [vmem:[#allocation93_spill] sm:$0xff]  ;;  %v15210_v14 = vld [vmem:[#allocation132_spill] sm:$0xff] }
 0x401   : > { %v2631_v40 = vmul.f32 %v15174_v49, %v2565_v11  ;;  %v10557_v44 = vadd.f32 %v15200_v16, %v2629_v3  ;;  %v2567_v5 = vmul.f32 %v15205_v37, %v2183_v0  ;;  %v10571_v3 = vadd.f32 %v15206_v53, %v2628_v60  ;;  %v15208_v16 = vld [vmem:[#allocation64_spill] sm:$0xff]  ;;  %v15212_v0 = vld [vmem:[#allocation137_spill] sm:$0xff]  ;;  %v15214_v60 = vld [vmem:[#allocation95_spill] sm:$0xff] }
 0x402   : > { %15199 = vst [vmem:[#allocation34_spill] sm:$0xff] %v10553_v19  ;;  %v2630_v11 = vmul.f32 %v15174_v49, %v2564_v9  ;;  %v2184_v17 = vsub.f32 %v15210_v14, %v15181_v20  ;;  %v2187_v37 = vsub.f32 %v15212_v0, %v15181_v20  ;;  %v15213_v9 = vld [vmem:[#allocation16_spill] sm:$0xff] }
 0x403   : > { %15201 = vst [vmem:[#allocation35_spill] sm:$0xff] %v10557_v44  ;;  %3081 = vrot.lane.b32.xlu0 %v10553_v19, %s7733_s25  ;;  %15207 = vst [vmem:[#allocation24_spill] sm:$0xff] %v10571_v3  ;;  %v2633_v4 = vmul.f32 %v15174_v49, %v2567_v5  ;;  %v10575_v2 = vadd.f32 %v15208_v16, %v2631_v40  ;;  %v15211_v19 = vld [vmem:[#allocation12_spill] sm:$0xff]  ;;  %v15216_v16 = vld [vmem:[#allocation66_spill] sm:$0xff] }
 0x404   : > { %3087 = vrot.lane.b32.xlu1 %v10557_v44, %s7733_s25  ;;  %v2566_v59 = vmul.f32 %v15211_v19, %v2182_v57  ;;  %v2569_v44 = vmul.f32 %v15213_v9, %v2185_v62  ;;  %v10589_v40 = vadd.f32 %v15214_v60, %v2630_v11  ;;  %v15218_v57 = vld [vmem:[#allocation135_spill] sm:$0xff]  ;;  %v15220_v62 = vld [vmem:[#allocation140_spill] sm:$0xff]  ;;  %v15222_v11 = vld [vmem:[#allocation97_spill] sm:$0xff] }
 0x405   : > { %15209 = vst [vmem:[#allocation38_spill] sm:$0xff] %v10575_v2  ;;  %v10593_v19 = vadd.f32 %v15216_v16, %v2633_v4  ;;  %v2186_v14 = vsub.f32 %v15218_v57, %v15181_v20  ;;  %v2189_v9 = vsub.f32 %v15220_v62, %v15181_v20  ;;  %v15224_v16 = vld [vmem:[#allocation67_spill] sm:$0xff] }
 0x406   : > { %v2632_v5 = vmul.f32 %v15174_v49, %v2566_v59  ;;  %15215 = vst [vmem:[#allocation10_spill] sm:$0xff] %v10589_v40  ;;  %v2635_v53 = vmul.f32 %v15174_v49, %v2569_v44  ;;  %v15221_v59 = vld [vmem:[#allocation7_spill] sm:$0xff] }
 0x407   : > { %3085 = vrot.lane.b32.xlu0 %v10571_v3, %s7733_s25  ;;  %15217 = vst [vmem:[#allocation41_spill] sm:$0xff] %v10593_v19  ;;  %v15219_v3 = vld [vmem:[#allocation13_spill] sm:$0xff] }
 0x408   : > { %3091 = vrot.lane.b32.xlu1 %v10575_v2, %s7733_s25  ;;  %v2568_v0 = vmul.f32 %v15219_v3, %v2184_v17  ;;  %v2571_v2 = vmul.f32 %v15221_v59, %v2187_v37  ;;  %v10607_v4 = vadd.f32 %v15222_v11, %v2632_v5  ;;  %v10611_v3 = vadd.f32 %v15224_v16, %v2635_v53  ;;  %v15226_v17 = vld [vmem:[#allocation138_spill] sm:$0xff]  ;;  %v15230_v5 = vld [vmem:[#allocation99_spill] sm:$0xff]  ;;  %v15231_v16 = vld [vmem:[#allocation69_spill] sm:$0xff] }
 0x409   : > { %v2188_v57 = vsub.f32 %v15226_v17, %v15181_v20  ;;  %v15228_v37 = vld [vmem:[#allocation142_spill] sm:$0xff] }
 0x40a   : > { %v2634_v44 = vmul.f32 %v15174_v49, %v2568_v0  ;;  %15223 = vst [vmem:[#allocation11_spill] sm:$0xff] %v10607_v4  ;;  %v2637_v60 = vmul.f32 %v15174_v49, %v2571_v2  ;;  %15225 = vst [vmem:[#allocation43_spill] sm:$0xff] %v10611_v3  ;;  %v2191_v59 = vsub.f32 %v15228_v37, %v15181_v20  ;;  %v15229_v0 = vld [vmem:[#allocation28_spill] sm:$0xff] }
 0x40b   : > { %3089 = vrot.lane.b32.xlu0 %v10589_v40, %s7733_s25  ;;  %v15227_v40 = vld [vmem:[#allocation31_spill] sm:$0xff] }
 0x40c   : > { %3095 = vrot.lane.b32.xlu1 %v10593_v19, %s7733_s25  ;;  %v2570_v62 = vmul.f32 %v15227_v40, %v2186_v14  ;;  %v2573_v19 = vmul.f32 %v15229_v0, %v2189_v9  ;;  %v10625_v53 = vadd.f32 %v15230_v5, %v2634_v44  ;;  %v10629_v40 = vadd.f32 %v15231_v16, %v2637_v60  ;;  %v15232_v14 = vld [vmem:[#allocation141_spill] sm:$0xff]  ;;  %v15234_v9 = vld [vmem:[#allocation143_spill] sm:$0xff] }
 0x40d   : > { %v2190_v17 = vsub.f32 %v15232_v14, %v15181_v20  ;;  %v2193_v0 = vsub.f32 %v15234_v9, %v15181_v20  ;;  %v15236_v44 = vld [vmem:[#allocation101_spill] sm:$0xff]  ;;  %v15237_v16 = vld [vmem:[#allocation71_spill] sm:$0xff] }
 0x40e   : > { %v2636_v2 = vmul.f32 %v15174_v49, %v2570_v62  ;;  %v2639_v11 = vmul.f32 %v15174_v49, %v2573_v19  ;;  %v15235_v62 = vld [vmem:[#allocation21_spill] sm:$0xff]  ;;  %v15240_v9 = vld [vmem:[#allocation103_spill] sm:$0xff] }
 0x40f   : > { %3093 = vrot.lane.b32.xlu0 %v10607_v4, %s7733_s25  ;;  %v15233_v4 = vld [vmem:[#allocation26_spill] sm:$0xff]  ;;  %v15239_v20 = vld [vmem:[#allocation17_spill] sm:$0xff] }
 0x410   : > { %3099 = vrot.lane.b32.xlu1 %v10611_v3, %s7733_s25  ;;  %v2572_v37 = vmul.f32 %v15233_v4, %v2188_v57  ;;  %v2575_v3 = vmul.f32 %v15235_v62, %v2191_v59  ;;  %v10643_v60 = vadd.f32 %v15236_v44, %v2636_v2  ;;  %v10647_v4 = vadd.f32 %v15237_v16, %v2639_v11  ;;  %v15238_v57 = vld [vmem:[#allocation22_spill] sm:$0xff]  ;;  %v15241_v62 = vld [vmem:[#allocation72_spill] sm:$0xff] }
 0x411   : > { %v2574_v14 = vmul.f32 %v15238_v57, %v2190_v17  ;;  %v2577_v59 = vmul.f32 %v15239_v20, %v2193_v0  ;;  %v15242_v17 = vld [vmem:[#allocation105_spill] sm:$0xff]  ;;  %v15243_v44 = vld [vmem:[#allocation74_spill] sm:$0xff] }
 0x412   : > { %v2638_v19 = vmul.f32 %v15174_v49, %v2572_v37  ;;  %v2641_v5 = vmul.f32 %v15174_v49, %v2575_v3 }
 0x413   : > { %3097 = vrot.lane.b32.xlu0 %v10625_v53, %s7733_s25  ;;  %v2640_v37 = vmul.f32 %v15174_v49, %v2574_v14  ;;  %v2643_v3 = vmul.f32 %v15174_v49, %v2577_v59  ;;  %v15244_v49 = vld [vmem:[#allocation107_spill] sm:$0xff]  ;;  %v15246_v14 = vld [vmem:[#allocation109_spill] sm:$0xff]  ;;  %v15247_v59 = vld [vmem:[#allocation78_spill] sm:$0xff] }
 0x414   : > { %3103 = vrot.lane.b32.xlu1 %v10629_v40, %s7733_s25  ;;  %v10657_v2 = vadd.f32 %v15240_v9, %v2638_v19  ;;  %v10661_v11 = vadd.f32 %v15241_v62, %v2641_v5  ;;  %v10679_v19 = vadd.f32 %v15244_v49, %v10379_v35  ;;  %v15245_v5 = vld [vmem:[#allocation76_spill] sm:$0xff]  ;;  %v10691_v20 = vadd.f32 %v15246_v14, %v10382_v58  ;;  %v15248_v35 = vld [vmem:[#allocation111_spill] sm:$0xff]  ;;  %v15251_v62 = vld [vmem:[#allocation82_spill] sm:$0xff] }
 0x415   : > { %v10668_v0 = vadd.f32 %v15242_v17, %v2640_v37  ;;  %v10671_v16 = vadd.f32 %v15243_v44, %v2643_v3  ;;  %v10683_v57 = vadd.f32 %v15245_v5, %v10385_v28  ;;  %v10695_v37 = vadd.f32 %v15247_v59, %v10391_v46  ;;  %v15249_v9 = vld [vmem:[#allocation80_spill] sm:$0xff]  ;;  %v15255_v5 = vld [vmem:[#allocation86_spill] sm:$0xff] }
 0x416   : > { %v10703_v28 = vadd.f32 %v15248_v35, %v10388_v39  ;;  %v10707_v3 = vadd.f32 %v15249_v9, %v10397_v63  ;;  %v15250_v58 = vld [vmem:[#allocation144_spill] sm:$0xff]  ;;  %v10719_v17 = vadd.f32 %v15251_v62, %v10403_v43  ;;  %v15252_v39 = vld [vmem:[#allocation146_spill] sm:$0xff]  ;;  %v10743_v14 = vadd.f32 %v15255_v5, %v10415_v38 }
 0x417   : > { %3101 = vrot.lane.b32.xlu0 %v10643_v60, %s7733_s25  ;;  %v10715_v46 = vadd.f32 %v15250_v58, %v10394_v24  ;;  %v10727_v63 = vadd.f32 %v15252_v39, %v10400_v25  ;;  %v15253_v44 = vld [vmem:[#allocation84_spill] sm:$0xff]  ;;  %v15256_v25 = vld [vmem:[#allocation150_spill] sm:$0xff] }
 0x418   : > { %3107 = vrot.lane.b32.xlu1 %v10647_v4, %s7733_s25  ;;  %v10731_v49 = vadd.f32 %v15253_v44, %v10409_v41  ;;  %v15254_v24 = vld [vmem:[#allocation148_spill] sm:$0xff]  ;;  %v10751_v41 = vadd.f32 %v15256_v25, %v10412_v56  ;;  %v15259_v9 = vld [vmem:[#allocation90_spill] sm:$0xff] }
 0x419   : > { %v10739_v43 = vadd.f32 %v15254_v24, %v10406_v50  ;;  %v15257_v59 = vld [vmem:[#allocation88_spill] sm:$0xff]  ;;  %v10767_v58 = vadd.f32 %v15259_v9, %v10427_v6  ;;  %v15260_v56 = vld [vmem:[#allocation154_spill] sm:$0xff] }
 0x41a   : > { %v10755_v35 = vadd.f32 %v15257_v59, %v10421_v23  ;;  %v15258_v50 = vld [vmem:[#allocation152_spill] sm:$0xff]  ;;  %v10775_v23 = vadd.f32 %v15260_v56, %v10424_v8  ;;  %v15263_v44 = vld [vmem:[#allocation94_spill] sm:$0xff] }
 0x41b   : > { %3105 = vrot.lane.b32.xlu0 %v10657_v2, %s7733_s25  ;;  %v10763_v38 = vadd.f32 %v15258_v50, %v10418_v30  ;;  %v15261_v62 = vld [vmem:[#allocation92_spill] sm:$0xff]  ;;  %v10791_v24 = vadd.f32 %v15263_v44, %v10439_v29  ;;  %v15264_v8 = vld [vmem:[#allocation158_spill] sm:$0xff] }
 0x41c   : > { %3111 = vrot.lane.b32.xlu1 %v10661_v11, %s7733_s25  ;;  %v10779_v39 = vadd.f32 %v15261_v62, %v10433_v47  ;;  %v15262_v30 = vld [vmem:[#allocation156_spill] sm:$0xff]  ;;  %v10799_v47 = vadd.f32 %v15264_v8, %v10436_v54  ;;  %v15268_v59 = vld [vmem:[#allocation98_spill] sm:$0xff] }
 0x41d   : > { %v10787_v6 = vadd.f32 %v15262_v30, %v10430_v45  ;;  %v15265_v5 = vld [vmem:[#allocation96_spill] sm:$0xff]  ;;  %v10815_v50 = vadd.f32 %v15268_v59, %v10451_v36  ;;  %v15270_v54 = vld [vmem:[#allocation162_spill] sm:$0xff] }
 0x41e   : > { %v10803_v25 = vadd.f32 %v15265_v5, %v10445_v27  ;;  %v15267_v45 = vld [vmem:[#allocation160_spill] sm:$0xff]  ;;  %v10823_v27 = vadd.f32 %v15270_v54, %v10448_v42  ;;  %v15276_v62 = vld [vmem:[#allocation102_spill] sm:$0xff] }
 0x41f   : > { %3109 = vrot.lane.b32.xlu0 %v10668_v0, %s7733_s25  ;;  %v10811_v29 = vadd.f32 %v15267_v45, %v10442_v51  ;;  %15269 = vst [vmem:[#allocation46_spill] sm:$0xff] %v10815_v50  ;;  %v15272_v9 = vld [vmem:[#allocation100_spill] sm:$0xff]  ;;  %v10839_v30 = vadd.f32 %v15276_v62, %v10463_v48  ;;  %v15278_v42 = vld [vmem:[#allocation166_spill] sm:$0xff] }
 0x420   : > { %3115 = vrot.lane.b32.xlu1 %v10671_v16, %s7733_s25  ;;  %15266 = vst [vmem:[#allocation30_spill] sm:$0xff] %v10803_v25  ;;  %15271 = vst [vmem:[#allocation25_spill] sm:$0xff] %v10823_v27  ;;  %v10827_v56 = vadd.f32 %v15272_v9, %v10457_v52  ;;  %v15274_v51 = vld [vmem:[#allocation164_spill] sm:$0xff]  ;;  %v10847_v52 = vadd.f32 %v15278_v42, %v10460_v31  ;;  %v15284_v5 = vld [vmem:[#allocation106_spill] sm:$0xff] }
 0x421   : > { %v10835_v36 = vadd.f32 %v15274_v51, %v10454_v61  ;;  %15277 = vst [vmem:[#allocation51_spill] sm:$0xff] %v10839_v30  ;;  %v15280_v44 = vld [vmem:[#allocation104_spill] sm:$0xff]  ;;  %v10863_v45 = vadd.f32 %v15284_v5, %v10475_v22  ;;  %v15286_v31 = vld [vmem:[#allocation170_spill] sm:$0xff] }
 0x422   : > { %15273 = vst [vmem:[#allocation48_spill] sm:$0xff] %v10827_v56  ;;  %15279 = vst [vmem:[#allocation14_spill] sm:$0xff] %v10847_v52  ;;  %v10851_v8 = vadd.f32 %v15280_v44, %v10469_v10  ;;  %v15282_v61 = vld [vmem:[#allocation168_spill] sm:$0xff]  ;;  %v10871_v10 = vadd.f32 %v15286_v31, %v10472_v1  ;;  %v15292_v9 = vld [vmem:[#allocation110_spill] sm:$0xff] }
 0x423   : > { %3113 = vrot.lane.b32.xlu0 %v10679_v19, %s7733_s25  ;;  %15275 = vst [vmem:[#allocation20_spill] sm:$0xff] %v10835_v36  ;;  %v10859_v48 = vadd.f32 %v15282_v61, %v10466_v12  ;;  %15285 = vst [vmem:[#allocation55_spill] sm:$0xff] %v10863_v45  ;;  %v15288_v59 = vld [vmem:[#allocation108_spill] sm:$0xff]  ;;  %v10887_v51 = vadd.f32 %v15292_v9, %v10487_v26  ;;  %v15309_v9 = vld [vmem:[#allocation114_spill] sm:$0xff] }
 0x424   : > { %3119 = vrot.lane.b32.xlu1 %v10683_v57, %s7733_s25  ;;  %15281 = vst [vmem:[#allocation53_spill] sm:$0xff] %v10851_v8  ;;  %15287 = vst [vmem:[#allocation32_spill] sm:$0xff] %v10871_v10  ;;  %v10875_v54 = vadd.f32 %v15288_v59, %v10481_v32  ;;  %v15290_v12 = vld [vmem:[#allocation172_spill] sm:$0xff]  ;;  %v15295_v32 = vld [vmem:[#allocation174_spill] sm:$0xff] }
 0x425   : > { %15283 = vst [vmem:[#allocation15_spill] sm:$0xff] %v10859_v48  ;;  %v10883_v22 = vadd.f32 %v15290_v12, %v10478_v7  ;;  %15293 = vst [vmem:[#allocation60_spill] sm:$0xff] %v10887_v51  ;;  %v10897_v62 = vadd.f32 %v15295_v32, %v10484_v18  ;;  %v15297_v42 = vld [vmem:[#allocation112_spill] sm:$0xff]  ;;  %v15303_v18 = vld [vmem:[#allocation113_spill] sm:$0xff]  ;;  %v10933_v32 = vadd.f32 %v15309_v9, %v10507_v13 }
 0x426   : > { %15289 = vst [vmem:[#allocation58_spill] sm:$0xff] %v10875_v54  ;;  %v10901_v7 = vadd.f32 %v15297_v42, %v10493_v21  ;;  %v15299_v26 = vld [vmem:[#allocation176_spill] sm:$0xff]  ;;  %v10917_v31 = vadd.f32 %v15303_v18, %v10499_v55  ;;  %v15306_v59 = vld [vmem:[#allocation178_spill] sm:$0xff] }
 0x427   : > { %3117 = vrot.lane.b32.xlu0 %v10691_v20, %s7733_s25  ;;  %15291 = vst [vmem:[#allocation27_spill] sm:$0xff] %v10883_v22  ;;  %15296 = vst [vmem:[#allocation63_spill] sm:$0xff] %v10897_v62  ;;  %v10909_v44 = vadd.f32 %v15299_v26, %v10490_v15  ;;  %v10927_v15 = vadd.f32 %v15306_v59, %v10496_v33  ;;  %v15312_v42 = vld [vmem:[#allocation180_spill] sm:$0xff]  ;;  %v15318_v9 = vld [vmem:[#allocation190_spill] sm:$0xff] }
 0x428   : > { %3123 = vrot.lane.b32.xlu1 %v10695_v37, %s7733_s25  ;;  %15298 = vst [vmem:[#allocation39_spill] sm:$0xff] %v10901_v7  ;;  %15304 = vst [vmem:[#allocation42_spill] sm:$0xff] %v10917_v31  ;;  %v10943_v26 = vadd.f32 %v15312_v42, %v10502_v34  ;;  %v15315_v13 = vld [vmem:[#allocation188_spill] sm:$0xff] }
 0x429   : > { %15300 = vst [vmem:[#allocation65_spill] sm:$0xff] %v10909_v44  ;;  %15307 = vst [vmem:[#allocation44_spill] sm:$0xff] %v10927_v15 }
 0x42a   : > { %15310 = vst [vmem:[#allocation45_spill] sm:$0xff] %v10933_v32  ;;  %15313 = vst [vmem:[#allocation47_spill] sm:$0xff] %v10943_v26 }
 0x42b   : > { %3121 = vrot.lane.b32.xlu0 %v10703_v28, %s7733_s25 }
 0x42c   : > { %3127 = vrot.lane.b32.xlu1 %v10707_v3, %s7733_s25 }
 0x42f   : > { %3125 = vrot.lane.b32.xlu0 %v10715_v46, %s7733_s25 }
 0x430   : > { %3131 = vrot.lane.b32.xlu1 %v10719_v17, %s7733_s25 }
 0x433   : > { %3129 = vrot.lane.b32.xlu0 %v10727_v63, %s7733_s25 }
 0x434   : > { %3135 = vrot.lane.b32.xlu1 %v10731_v49, %s7733_s25 }
 0x437   : > { %3133 = vrot.lane.b32.xlu0 %v10739_v43, %s7733_s25 }
 0x438   : > { %3139 = vrot.lane.b32.xlu1 %v10743_v14, %s7733_s25 }
 0x43b   : > { %3137 = vrot.lane.b32.xlu0 %v10751_v41, %s7733_s25 }
 0x43c   : > { %3143 = vrot.lane.b32.xlu1 %v10755_v35, %s7733_s25 }
 0x43f   : > { %3141 = vrot.lane.b32.xlu0 %v10763_v38, %s7733_s25 }
 0x440   : > { %3147 = vrot.lane.b32.xlu1 %v10767_v58, %s7733_s25 }
 0x443   : > { %3145 = vrot.lane.b32.xlu0 %v10775_v23, %s7733_s25 }
 0x444   : > { %3151 = vrot.lane.b32.xlu1 %v10779_v39, %s7733_s25 }
 0x447   : > { %3149 = vrot.lane.b32.xlu0 %v10787_v6, %s7733_s25 }
 0x448   : > { %3155 = vrot.lane.b32.xlu1 %v10791_v24, %s7733_s25 }
 0x44b   : > { %3153 = vrot.lane.b32.xlu0 %v10799_v47, %s7733_s25 }
 0x44c   : > { %3159 = vrot.lane.b32.xlu1 %v10803_v25, %s7733_s25 }
 0x44f   : > { %3157 = vrot.lane.b32.xlu0 %v10811_v29, %s7733_s25 }
 0x450   : > { %3163 = vrot.lane.b32.xlu1 %v10815_v50, %s7733_s25 }
 0x453   : > { %3161 = vrot.lane.b32.xlu0 %v10823_v27, %s7733_s25 }
 0x454   : > { %3167 = vrot.lane.b32.xlu1 %v10827_v56, %s7733_s25 }
 0x457   : > { %3165 = vrot.lane.b32.xlu0 %v10835_v36, %s7733_s25 }
 0x458   : > { %3171 = vrot.lane.b32.xlu1 %v10839_v30, %s7733_s25 }
 0x45b   : > { %3169 = vrot.lane.b32.xlu0 %v10847_v52, %s7733_s25 }
 0x45c   : > { %3175 = vrot.lane.b32.xlu1 %v10851_v8, %s7733_s25 }
 0x45f   : > { %3173 = vrot.lane.b32.xlu0 %v10859_v48, %s7733_s25  ;;  %v10893_v1 = vpop.permute.xlu1 %3075 }
 0x460   : > { %3179 = vrot.lane.b32.xlu1 %v10863_v45, %s7733_s25  ;;  %15294 = vst [vmem:[#allocation37_spill] sm:$0xff] %v10893_v1  ;;  %v15331_v1 = vld [vmem:[#allocation38_spill] sm:$0xff] }
 0x463   : > { %3177 = vrot.lane.b32.xlu0 %v10871_v10, %s7733_s25 }
 0x464   : > { %3183 = vrot.lane.b32.xlu1 %v10875_v54, %s7733_s25 }
 0x467   : > { %3181 = vrot.lane.b32.xlu0 %v10883_v22, %s7733_s25 }
 0x468   : > { %3187 = vrot.lane.b32.xlu1 %v10887_v51, %s7733_s25 }
 0x46b   : > { %3185 = vrot.lane.b32.xlu0 %v10897_v62, %s7733_s25 }
 0x46c   : > { %3191 = vrot.lane.b32.xlu1 %v10901_v7, %s7733_s25 }
 0x46d   : > { %v10911_v61 = vpop.permute.xlu0 %3073 }
 0x46e   : > { %15301 = vst [vmem:[#allocation40_spill] sm:$0xff] %v10911_v61  ;;  %v10913_v5 = vpop.permute.xlu1 %3079  ;;  %v15323_v61 = vld [vmem:[#allocation9_spill] sm:$0xff] }
 0x46f   : > { %15302 = vst [vmem:[#allocation68_spill] sm:$0xff] %v10913_v5  ;;  %3189 = vrot.lane.b32.xlu0 %v10909_v44, %s7733_s25 }
 0x470   : > { %3195 = vrot.lane.b32.xlu1 %v10917_v31, %s7733_s25 }
 0x471   : > { %v10923_v21 = vpop.permute.xlu0 %3077 }
 0x472   : > { %15305 = vst [vmem:[#allocation70_spill] sm:$0xff] %v10923_v21  ;;  %v10929_v12 = vpop.permute.xlu1 %3083  ;;  %v15322_v21 = vld [vmem:[#allocation33_spill] sm:$0xff] }
 0x473   : > { %15308 = vst [vmem:[#allocation73_spill] sm:$0xff] %v10929_v12  ;;  %3193 = vrot.lane.b32.xlu0 %v10927_v15, %s7733_s25  ;;  %v15327_v12 = vld [vmem:[#allocation35_spill] sm:$0xff] }
 0x474   : > { %3199 = vrot.lane.b32.xlu1 %v10933_v32, %s7733_s25 }
 0x475   : > { %v10939_v55 = vpop.permute.xlu0 %3081 }
 0x476   : > { %15311 = vst [vmem:[#allocation75_spill] sm:$0xff] %v10939_v55  ;;  %v10945_v33 = vpop.permute.xlu1 %3087  ;;  %v15319_v55 = vld [vmem:[#allocation8_spill] sm:$0xff] }
 0x477   : > { %15314 = vst [vmem:[#allocation77_spill] sm:$0xff] %v10945_v33  ;;  %3197 = vrot.lane.b32.xlu0 %v10943_v26, %s7733_s25  ;;  %s6955_s25 = sshll.u32 %s378_s26, 8 }
 0x478   : > { %3268 = vrot.lane.b32.xlu1 %v15315_v13, %s7734_s30 }
 0x479   : > { %v10951_v18 = vpop.permute.xlu0 %3085 }
 0x47a   : > { %15316 = vst [vmem:[#allocation49_spill] sm:$0xff] %v10951_v18  ;;  %v10953_v59 = vpop.permute.xlu1 %3091 }
 0x47b   : > { %15317 = vst [vmem:[#allocation57_spill] sm:$0xff] %v10953_v59  ;;  %3266 = vrot.lane.b32.xlu0 %v15318_v9, %s7734_s30  ;;  %v15326_v59 = vld [vmem:[#allocation34_spill] sm:$0xff] }
 0x47c   : > { %3272 = vrot.lane.b32.xlu1 %v15319_v55, %s7734_s30 }
 0x47d   : > { %v10959_v34 = vpop.permute.xlu0 %3089 }
 0x47e   : > { %15320 = vst [vmem:[#allocation79_spill] sm:$0xff] %v10959_v34  ;;  %v10961_v42 = vpop.permute.xlu1 %3095 }
 0x47f   : > { %15321 = vst [vmem:[#allocation50_spill] sm:$0xff] %v10961_v42  ;;  %3270 = vrot.lane.b32.xlu0 %v15322_v21, %s7734_s30  ;;  %v15330_v42 = vld [vmem:[#allocation24_spill] sm:$0xff] }
 0x480   : > { %3276 = vrot.lane.b32.xlu1 %v15323_v61, %s7734_s30 }
 0x481   : > { %v10967_v33 = vpop.permute.xlu0 %3093 }
 0x482   : > { %15324 = vst [vmem:[#allocation81_spill] sm:$0xff] %v10967_v33  ;;  %v10969_v18 = vpop.permute.xlu1 %3099 }
 0x483   : > { %15325 = vst [vmem:[#allocation52_spill] sm:$0xff] %v10969_v18  ;;  %3274 = vrot.lane.b32.xlu0 %v15326_v59, %s7734_s30  ;;  %v15334_v18 = vld [vmem:[#allocation10_spill] sm:$0xff]  ;;  %v15335_v59 = vld [vmem:[#allocation41_spill] sm:$0xff] }
 0x484   : > { %3280 = vrot.lane.b32.xlu1 %v15327_v12, %s7734_s30 }
 0x485   : > { %v10975_v5 = vpop.permute.xlu0 %3097 }
 0x486   : > { %15328 = vst [vmem:[#allocation83_spill] sm:$0xff] %v10975_v5  ;;  %v10977_v34 = vpop.permute.xlu1 %3103 }
 0x487   : > { %15329 = vst [vmem:[#allocation54_spill] sm:$0xff] %v10977_v34  ;;  %3278 = vrot.lane.b32.xlu0 %v15330_v42, %s7734_s30  ;;  %v15338_v34 = vld [vmem:[#allocation11_spill] sm:$0xff] }
 0x488   : > { %3284 = vrot.lane.b32.xlu1 %v15331_v1, %s7734_s30  ;;  %v15339_v42 = vld [vmem:[#allocation43_spill] sm:$0xff] }
 0x489   : > { %v10983_v61 = vpop.permute.xlu0 %3101 }
 0x48a   : > { %15332 = vst [vmem:[#allocation85_spill] sm:$0xff] %v10983_v61  ;;  %v10985_v33 = vpop.permute.xlu1 %3107 }
 0x48b   : > { %15333 = vst [vmem:[#allocation56_spill] sm:$0xff] %v10985_v33  ;;  %3282 = vrot.lane.b32.xlu0 %v15334_v18, %s7734_s30 }
 0x48c   : > { %3288 = vrot.lane.b32.xlu1 %v15335_v59, %s7734_s30 }
 0x48d   : > { %v10991_v12 = vpop.permute.xlu0 %3105 }
 0x48e   : > { %15336 = vst [vmem:[#allocation185_spill] sm:$0xff] %v10991_v12  ;;  %v10993_v5 = vpop.permute.xlu1 %3111 }
 0x48f   : > { %15337 = vst [vmem:[#allocation181_spill] sm:$0xff] %v10993_v5  ;;  %3286 = vrot.lane.b32.xlu0 %v15338_v34, %s7734_s30 }
 0x490   : > { %3292 = vrot.lane.b32.xlu1 %v15339_v42, %s7734_s30 }
 0x491   : > { %v10999_v1 = vpop.permute.xlu0 %3109 }
 0x492   : > { %15340 = vst [vmem:[#allocation87_spill] sm:$0xff] %v10999_v1  ;;  %v11001_v61 = vpop.permute.xlu1 %3115 }
 0x493   : > { %15341 = vst [vmem:[#allocation184_spill] sm:$0xff] %v11001_v61  ;;  %3290 = vrot.lane.b32.xlu0 %v10625_v53, %s7734_s30 }
 0x494   : > { %3296 = vrot.lane.b32.xlu1 %v10629_v40, %s7734_s30 }
 0x495   : > { %v11007_v33 = vpop.permute.xlu0 %3113 }
 0x496   : > { %15342 = vst [vmem:[#allocation59_spill] sm:$0xff] %v11007_v33  ;;  %v11009_v12 = vpop.permute.xlu1 %3119 }
 0x497   : > { %15343 = vst [vmem:[#allocation247_spill] sm:$0xff] %v11009_v12  ;;  %3294 = vrot.lane.b32.xlu0 %v10643_v60, %s7734_s30 }
 0x498   : > { %3300 = vrot.lane.b32.xlu1 %v10647_v4, %s7734_s30 }
 0x499   : > { %v11015_v5 = vpop.permute.xlu0 %3117 }
 0x49a   : > { %15344 = vst [vmem:[#allocation123_spill] sm:$0xff] %v11015_v5  ;;  %v11017_v1 = vpop.permute.xlu1 %3123 }
 0x49b   : > { %15345 = vst [vmem:[#allocation121_spill] sm:$0xff] %v11017_v1  ;;  %3298 = vrot.lane.b32.xlu0 %v10657_v2, %s7734_s30 }
 0x49c   : > { %3304 = vrot.lane.b32.xlu1 %v10661_v11, %s7734_s30 }
 0x49d   : > { %v11023_v61 = vpop.permute.xlu0 %3121 }
 0x49e   : > { %15346 = vst [vmem:[#allocation29_spill] sm:$0xff] %v11023_v61  ;;  %v11025_v33 = vpop.permute.xlu1 %3127 }
 0x49f   : > { %15347 = vst [vmem:[#allocation128_spill] sm:$0xff] %v11025_v33  ;;  %3302 = vrot.lane.b32.xlu0 %v10668_v0, %s7734_s30 }
 0x4a0   : > { %3308 = vrot.lane.b32.xlu1 %v10671_v16, %s7734_s30 }
 0x4a1   : > { %v11031_v12 = vpop.permute.xlu0 %3125 }
 0x4a2   : > { %15348 = vst [vmem:[#allocation125_spill] sm:$0xff] %v11031_v12  ;;  %v11033_v5 = vpop.permute.xlu1 %3131 }
 0x4a3   : > { %15349 = vst [vmem:[#allocation36_spill] sm:$0xff] %v11033_v5  ;;  %3306 = vrot.lane.b32.xlu0 %v10679_v19, %s7734_s30 }
 0x4a4   : > { %3312 = vrot.lane.b32.xlu1 %v10683_v57, %s7734_s30 }
 0x4a5   : > { %v11039_v1 = vpop.permute.xlu0 %3129 }
 0x4a6   : > { %15350 = vst [vmem:[#allocation89_spill] sm:$0xff] %v11039_v1  ;;  %v11041_v61 = vpop.permute.xlu1 %3135 }
 0x4a7   : > { %15351 = vst [vmem:[#allocation61_spill] sm:$0xff] %v11041_v61  ;;  %3310 = vrot.lane.b32.xlu0 %v10691_v20, %s7734_s30 }
 0x4a8   : > { %3316 = vrot.lane.b32.xlu1 %v10695_v37, %s7734_s30 }
 0x4a9   : > { %v11047_v33 = vpop.permute.xlu0 %3133 }
 0x4aa   : > { %15352 = vst [vmem:[#allocation126_spill] sm:$0xff] %v11047_v33  ;;  %v11049_v12 = vpop.permute.xlu1 %3139 }
 0x4ab   : > { %15353 = vst [vmem:[#allocation23_spill] sm:$0xff] %v11049_v12  ;;  %3314 = vrot.lane.b32.xlu0 %v10703_v28, %s7734_s30 }
 0x4ac   : > { %3320 = vrot.lane.b32.xlu1 %v10707_v3, %s7734_s30 }
 0x4ad   : > { %v11055_v5 = vpop.permute.xlu0 %3137 }
 0x4ae   : > { %15354 = vst [vmem:[#allocation131_spill] sm:$0xff] %v11055_v5  ;;  %v11057_v1 = vpop.permute.xlu1 %3143 }
 0x4af   : > { %15355 = vst [vmem:[#allocation6_spill] sm:$0xff] %v11057_v1  ;;  %3318 = vrot.lane.b32.xlu0 %v10715_v46, %s7734_s30 }
 0x4b0   : > { %3324 = vrot.lane.b32.xlu1 %v10719_v17, %s7734_s30 }
 0x4b1   : > { %v11063_v61 = vpop.permute.xlu0 %3141 }
 0x4b2   : > { %15356 = vst [vmem:[#allocation91_spill] sm:$0xff] %v11063_v61  ;;  %v11065_v33 = vpop.permute.xlu1 %3147 }
 0x4b3   : > { %15357 = vst [vmem:[#allocation62_spill] sm:$0xff] %v11065_v33  ;;  %3322 = vrot.lane.b32.xlu0 %v10727_v63, %s7734_s30 }
 0x4b4   : > { %3328 = vrot.lane.b32.xlu1 %v10731_v49, %s7734_s30 }
 0x4b5   : > { %v11071_v12 = vpop.permute.xlu0 %3145 }
 0x4b6   : > { %15358 = vst [vmem:[#allocation129_spill] sm:$0xff] %v11071_v12  ;;  %v11073_v5 = vpop.permute.xlu1 %3151 }
 0x4b7   : > { %15359 = vst [vmem:[#allocation19_spill] sm:$0xff] %v11073_v5  ;;  %3326 = vrot.lane.b32.xlu0 %v10739_v43, %s7734_s30 }
 0x4b8   : > { %3332 = vrot.lane.b32.xlu1 %v10743_v14, %s7734_s30 }
 0x4b9   : > { %v11079_v1 = vpop.permute.xlu0 %3149 }
 0x4ba   : > { %15360 = vst [vmem:[#allocation134_spill] sm:$0xff] %v11079_v1  ;;  %v11081_v61 = vpop.permute.xlu1 %3155 }
 0x4bb   : > { %15361 = vst [vmem:[#allocation18_spill] sm:$0xff] %v11081_v61  ;;  %3330 = vrot.lane.b32.xlu0 %v10751_v41, %s7734_s30 }
 0x4bc   : > { %3336 = vrot.lane.b32.xlu1 %v10755_v35, %s7734_s30 }
 0x4bd   : > { %v11087_v33 = vpop.permute.xlu0 %3153 }
 0x4be   : > { %15362 = vst [vmem:[#allocation93_spill] sm:$0xff] %v11087_v33  ;;  %v11089_v12 = vpop.permute.xlu1 %3159 }
 0x4bf   : > { %15363 = vst [vmem:[#allocation64_spill] sm:$0xff] %v11089_v12  ;;  %3334 = vrot.lane.b32.xlu0 %v10763_v38, %s7734_s30 }
 0x4c0   : > { %3340 = vrot.lane.b32.xlu1 %v10767_v58, %s7734_s30 }
 0x4c1   : > { %v11095_v5 = vpop.permute.xlu0 %3157 }
 0x4c2   : > { %15364 = vst [vmem:[#allocation132_spill] sm:$0xff] %v11095_v5  ;;  %v11097_v1 = vpop.permute.xlu1 %3163 }
 0x4c3   : > { %15365 = vst [vmem:[#allocation12_spill] sm:$0xff] %v11097_v1  ;;  %3338 = vrot.lane.b32.xlu0 %v10775_v23, %s7734_s30 }
 0x4c4   : > { %3344 = vrot.lane.b32.xlu1 %v10779_v39, %s7734_s30 }
 0x4c5   : > { %v11103_v61 = vpop.permute.xlu0 %3161 }
 0x4c6   : > { %15366 = vst [vmem:[#allocation137_spill] sm:$0xff] %v11103_v61  ;;  %v11105_v33 = vpop.permute.xlu1 %3167 }
 0x4c7   : > { %15367 = vst [vmem:[#allocation16_spill] sm:$0xff] %v11105_v33  ;;  %3342 = vrot.lane.b32.xlu0 %v10787_v6, %s7734_s30 }
 0x4c8   : > { %3348 = vrot.lane.b32.xlu1 %v10791_v24, %s7734_s30 }
 0x4c9   : > { %v11111_v12 = vpop.permute.xlu0 %3165 }
 0x4ca   : > { %15368 = vst [vmem:[#allocation95_spill] sm:$0xff] %v11111_v12  ;;  %v11113_v5 = vpop.permute.xlu1 %3171 }
 0x4cb   : > { %15369 = vst [vmem:[#allocation66_spill] sm:$0xff] %v11113_v5  ;;  %3346 = vrot.lane.b32.xlu0 %v10799_v47, %s7734_s30 }
 0x4cc   : > { %3352 = vrot.lane.b32.xlu1 %v10803_v25, %s7734_s30 }
 0x4cd   : > { %v11119_v1 = vpop.permute.xlu0 %3169 }
 0x4ce   : > { %15370 = vst [vmem:[#allocation135_spill] sm:$0xff] %v11119_v1  ;;  %v11121_v61 = vpop.permute.xlu1 %3175 }
 0x4cf   : > { %15371 = vst [vmem:[#allocation13_spill] sm:$0xff] %v11121_v61  ;;  %3350 = vrot.lane.b32.xlu0 %v10811_v29, %s7734_s30 }
 0x4d0   : > { %3356 = vrot.lane.b32.xlu1 %v10815_v50, %s7734_s30 }
 0x4d1   : > { %v11127_v33 = vpop.permute.xlu0 %3173 }
 0x4d2   : > { %15372 = vst [vmem:[#allocation140_spill] sm:$0xff] %v11127_v33  ;;  %v11129_v12 = vpop.permute.xlu1 %3179 }
 0x4d3   : > { %15373 = vst [vmem:[#allocation7_spill] sm:$0xff] %v11129_v12  ;;  %3354 = vrot.lane.b32.xlu0 %v10823_v27, %s7734_s30 }
 0x4d4   : > { %3360 = vrot.lane.b32.xlu1 %v10827_v56, %s7734_s30  ;;  %v7602_v56 = vld [vmem:[%s14659_s6 + $0xf8] sm:$0xff] }
 0x4d5   : > { %v11135_v5 = vpop.permute.xlu0 %3177 }
 0x4d6   : > { %15374 = vst [vmem:[#allocation97_spill] sm:$0xff] %v11135_v5  ;;  %v11137_v1 = vpop.permute.xlu1 %3183 }
 0x4d7   : > { %15375 = vst [vmem:[#allocation67_spill] sm:$0xff] %v11137_v1  ;;  %3358 = vrot.lane.b32.xlu0 %v10835_v36, %s7734_s30 }
 0x4d8   : > { %3364 = vrot.lane.b32.xlu1 %v10839_v30, %s7734_s30 }
 0x4d9   : > { %v11143_v61 = vpop.permute.xlu0 %3181 }
 0x4da   : > { %15376 = vst [vmem:[#allocation138_spill] sm:$0xff] %v11143_v61  ;;  %v11145_v33 = vpop.permute.xlu1 %3187 }
 0x4db   : > { %15377 = vst [vmem:[#allocation31_spill] sm:$0xff] %v11145_v33  ;;  %3362 = vrot.lane.b32.xlu0 %v10847_v52, %s7734_s30 }
 0x4dc   : > { %3368 = vrot.lane.b32.xlu1 %v10851_v8, %s7734_s30 }
 0x4dd   : > { %v11151_v12 = vpop.permute.xlu0 %3185 }
 0x4de   : > { %15378 = vst [vmem:[#allocation142_spill] sm:$0xff] %v11151_v12  ;;  %v11153_v5 = vpop.permute.xlu1 %3191 }
 0x4df   : > { %15379 = vst [vmem:[#allocation28_spill] sm:$0xff] %v11153_v5  ;;  %3366 = vrot.lane.b32.xlu0 %v10859_v48, %s7734_s30  ;;  %v7596_v48 = vld [vmem:[%s14659_s6 + $0xc8] sm:$0xff] }
 0x4e0   : > { %3372 = vrot.lane.b32.xlu1 %v10863_v45, %s7734_s30  ;;  %v7590_v45 = vld [vmem:[%s14659_s6 + $0x98] sm:$0xff] }
 0x4e1   : > { %v11159_v1 = vpop.permute.xlu0 %3189 }
 0x4e2   : > { %15380 = vst [vmem:[#allocation99_spill] sm:$0xff] %v11159_v1  ;;  %v11161_v61 = vpop.permute.xlu1 %3195 }
 0x4e3   : > { %15381 = vst [vmem:[#allocation69_spill] sm:$0xff] %v11161_v61  ;;  %3370 = vrot.lane.b32.xlu0 %v10871_v10, %s7734_s30 }
 0x4e4   : > { %3376 = vrot.lane.b32.xlu1 %v10875_v54, %s7734_s30 }
 0x4e5   : > { %v11167_v33 = vpop.permute.xlu0 %3193 }
 0x4e6   : > { %15382 = vst [vmem:[#allocation141_spill] sm:$0xff] %v11167_v33  ;;  %v11169_v12 = vpop.permute.xlu1 %3199 }
 0x4e7   : > { %15383 = vst [vmem:[#allocation26_spill] sm:$0xff] %v11169_v12  ;;  %3374 = vrot.lane.b32.xlu0 %v10883_v22, %s7734_s30 }
 0x4e8   : > { %3380 = vrot.lane.b32.xlu1 %v10887_v51, %s7734_s30 }
 0x4e9   : > { %v11175_v5 = vpop.permute.xlu0 %3197 }
 0x4ea   : > { %15384 = vst [vmem:[#allocation143_spill] sm:$0xff] %v11175_v5  ;;  %v11179_v1 = vpop.permute.xlu1 %3268  ;;  %v7574_v5 = vld [vmem:[%s14659_s6 + $0x18] sm:$0xff] }
 0x4eb   : > { %3378 = vrot.lane.b32.xlu0 %v10897_v62, %s7734_s30  ;;  %15385 = vst [vmem:[#allocation21_spill] sm:$0xff] %v11179_v1  ;;  %v7584_v62 = vld [vmem:[%s14659_s6 + $0x68] sm:$0xff] }
 0x4ec   : > { %3384 = vrot.lane.b32.xlu1 %v10901_v7, %s7734_s30 }
 0x4ed   : > { %v11183_v61 = vpop.permute.xlu0 %3266 }
 0x4ee   : > { %15386 = vst [vmem:[#allocation101_spill] sm:$0xff] %v11183_v61  ;;  %v11191_v12 = vpop.permute.xlu1 %3272  ;;  %v11202_v61 = vld [vmem:[%s14659_s6 + $0x1e0] sm:$0xff] }
 0x4ef   : > { %3382 = vrot.lane.b32.xlu0 %v10909_v44, %s7734_s30  ;;  %15388 = vst [vmem:[#allocation22_spill] sm:$0xff] %v11191_v12 }
 0x4f0   : > { %3388 = vrot.lane.b32.xlu1 %v10917_v31, %s7734_s30 }
 0x4f1   : > { %v11189_v33 = vpop.permute.xlu0 %3270 }
 0x4f2   : > { %15387 = vst [vmem:[#allocation71_spill] sm:$0xff] %v11189_v33  ;;  %v11206_v31 = vpop.permute.xlu1 %3276 }
 0x4f3   : > { %3386 = vrot.lane.b32.xlu0 %v10927_v15, %s7734_s30  ;;  %15390 = vst [vmem:[#allocation103_spill] sm:$0xff] %v11206_v31  ;;  %v11219_v15 = vld [vmem:[%s14659_s6 + $0x1e8] sm:$0xff]  ;;  %v14736_v31 = vmov 2  }
 0x4f4   : > { %3392 = vrot.lane.b32.xlu1 %v10933_v32, %s7734_s30  ;;  %v11214_v32 = vld [vmem:[%s14659_s6 + $0x1f0] sm:$0xff] }
 0x4f5   : > { %v11197_v1 = vpop.permute.xlu0 %3274 }
 0x4f6   : > { %15389 = vst [vmem:[#allocation17_spill] sm:$0xff] %v11197_v1  ;;  %v11225_v1 = vpop.permute.xlu1 %3280 }
 0x4f7   : > { %3390 = vrot.lane.b32.xlu0 %v10943_v26, %s7734_s30  ;;  %15393 = vst [vmem:[#allocation74_spill] sm:$0xff] %v11225_v1  ;;  %s14507_s30 = scalar_lea.vmem [#allocation3], %s6955_s25 }
 0x4f8   : > { %4147 = vperm.xlu1 %7366, %v11202_v61   ;;  %s6889_s13 = sshll.u32 %s14507_s30, 4  ;;  %s14606_s13 = int_to_ptr.vmem [resolvable:$true] %s6889_s13 }
 0x4f9   : > { %v11209_v33 = vpop.permute.xlu0 %3278 }
 0x4fa   : > { %15391 = vst [vmem:[#allocation72_spill] sm:$0xff] %v11209_v33  ;;  %v11231_v33 = vld [vmem:[%s14659_s6] sm:$0xff]  ;;  %v11240_v1 = vpop.permute.xlu1 %3284 }
 0x4fb   : > { %4151 = vperm.xlu0 %7365, %v11219_v15   ;;  %15395 = vst [vmem:[#allocation76_spill] sm:$0xff] %v11240_v1  ;;  %v7578_v1 = vld [vmem:[%s14659_s6 + $0x38] sm:$0xff] }
 0x4fc   : > { %4155 = vperm.xlu1 %7366, %v11214_v32  }
 0x4fd   : > { %v11223_v26 = vpop.permute.xlu0 %3282 }
 0x4fe   : > { %15392 = vst [vmem:[#allocation105_spill] sm:$0xff] %v11223_v26  ;;  %v7573_v26 = vld [vmem:[%s14659_s6 + $0x8] sm:$0xff] }
 0x4ff   : > { %7367 = vset.pattern.permute.xlu0 %v14736_v31 }
 0x500   : > { %4291 = vperm.xlu0 %7367, %v11231_v33   ;;  %7368 = vset.pattern.permute.xlu1 %v14736_v31  ;;  %v11250_v31 = vld [vmem:[%s14659_s6 + $0x10] sm:$0xff] }
 0x501   : > { %v11235_v12 = vpop.permute.xlu0 %3286  ;;  %4295 = vperm.xlu1 %7368, %v7573_v26   ;;  %v7576_v26 = vld [vmem:[%s14659_s6 + $0x28] sm:$0xff] }
 0x502   : > { %15394 = vst [vmem:[#allocation107_spill] sm:$0xff] %v11235_v12 }
 0x504   : > { %4303 = vperm.xlu0 %7367, %v7574_v5   ;;  %v11261_v5 = vld [vmem:[%s14659_s6 + $0x20] sm:$0xff] }
 0x505   : > { %v11245_v7 = vpop.permute.xlu0 %3290  ;;  %4299 = vperm.xlu1 %7368, %v11250_v31  }
 0x506   : > { %15396 = vst [vmem:[#allocation109_spill] sm:$0xff] %v11245_v7  ;;  %v11264_v7 = vpop.permute.xlu1 %3288 }
 0x507   : > { %15398 = vst [vmem:[#allocation111_spill] sm:$0xff] %v11264_v7  ;;  %v7580_v7 = vld [vmem:[%s14659_s6 + $0x48] sm:$0xff] }
 0x508   : > { %4311 = vperm.xlu0 %7367, %v7576_v26   ;;  %v11274_v26 = vld [vmem:[%s14659_s6 + $0x30] sm:$0xff] }
 0x509   : > { %v11256_v12 = vpop.permute.xlu0 %3294  ;;  %4307 = vperm.xlu1 %7368, %v11261_v5  }
 0x50a   : > { %15397 = vst [vmem:[#allocation78_spill] sm:$0xff] %v11256_v12  ;;  %v11277_v12 = vpop.permute.xlu1 %3292 }
 0x50b   : > { %15400 = vst [vmem:[#allocation144_spill] sm:$0xff] %v11277_v12 }
 0x50c   : > { %4319 = vperm.xlu0 %7367, %v7578_v1   ;;  %v11287_v1 = vld [vmem:[%s14659_s6 + $0x40] sm:$0xff] }
 0x50d   : > { %v11269_v44 = vpop.permute.xlu0 %3298  ;;  %4315 = vperm.xlu1 %7368, %v11274_v26  }
 0x50e   : > { %15399 = vst [vmem:[#allocation80_spill] sm:$0xff] %v11269_v44  ;;  %v7582_v44 = vld [vmem:[%s14659_s6 + $0x58] sm:$0xff] }
 0x510   : > { %4327 = vperm.xlu0 %7367, %v7580_v7   ;;  %v11298_v7 = vld [vmem:[%s14659_s6 + $0x50] sm:$0xff] }
 0x511   : > { %v11282_v51 = vpop.permute.xlu0 %3302  ;;  %4323 = vperm.xlu1 %7368, %v11287_v1  }
 0x512   : > { %15401 = vst [vmem:[#allocation82_spill] sm:$0xff] %v11282_v51  ;;  %v11301_v51 = vpop.permute.xlu1 %3296 }
 0x513   : > { %15403 = vst [vmem:[#allocation84_spill] sm:$0xff] %v11301_v51  ;;  %v7586_v51 = vld [vmem:[%s14659_s6 + $0x78] sm:$0xff] }
 0x514   : > { %4335 = vperm.xlu0 %7367, %v7582_v44   ;;  %v11311_v44 = vld [vmem:[%s14659_s6 + $0x60] sm:$0xff] }
 0x515   : > { %v11293_v12 = vpop.permute.xlu0 %3306  ;;  %4331 = vperm.xlu1 %7368, %v11298_v7  }
 0x516   : > { %15402 = vst [vmem:[#allocation146_spill] sm:$0xff] %v11293_v12  ;;  %v11314_v12 = vpop.permute.xlu1 %3300 }
 0x517   : > { %15405 = vst [vmem:[#allocation86_spill] sm:$0xff] %v11314_v12 }
 0x518   : > { %4343 = vperm.xlu0 %7367, %v7584_v62   ;;  %v11324_v62 = vld [vmem:[%s14659_s6 + $0x70] sm:$0xff] }
 0x519   : > { %v11306_v54 = vpop.permute.xlu0 %3310  ;;  %4339 = vperm.xlu1 %7368, %v11311_v44  }
 0x51a   : > { %15404 = vst [vmem:[#allocation148_spill] sm:$0xff] %v11306_v54  ;;  %v7588_v54 = vld [vmem:[%s14659_s6 + $0x88] sm:$0xff] }
 0x51c   : > { %4351 = vperm.xlu0 %7367, %v7586_v51   ;;  %v11335_v51 = vld [vmem:[%s14659_s6 + $0x80] sm:$0xff] }
 0x51d   : > { %v11319_v22 = vpop.permute.xlu0 %3314  ;;  %4347 = vperm.xlu1 %7368, %v11324_v62  }
 0x51e   : > { %15406 = vst [vmem:[#allocation150_spill] sm:$0xff] %v11319_v22  ;;  %v11338_v22 = vpop.permute.xlu1 %3304 }
 0x51f   : > { %15408 = vst [vmem:[#allocation152_spill] sm:$0xff] %v11338_v22  ;;  %v7592_v22 = vld [vmem:[%s14659_s6 + $0xa8] sm:$0xff] }
 0x520   : > { %4359 = vperm.xlu0 %7367, %v7588_v54   ;;  %v11348_v54 = vld [vmem:[%s14659_s6 + $0x90] sm:$0xff] }
 0x521   : > { %v11330_v12 = vpop.permute.xlu0 %3318  ;;  %4355 = vperm.xlu1 %7368, %v11335_v51  }
 0x522   : > { %15407 = vst [vmem:[#allocation88_spill] sm:$0xff] %v11330_v12  ;;  %v11351_v12 = vpop.permute.xlu1 %3308 }
 0x523   : > { %15410 = vst [vmem:[#allocation154_spill] sm:$0xff] %v11351_v12 }
 0x524   : > { %4367 = vperm.xlu0 %7367, %v7590_v45   ;;  %v11361_v45 = vld [vmem:[%s14659_s6 + $0xa0] sm:$0xff] }
 0x525   : > { %v11343_v10 = vpop.permute.xlu0 %3322  ;;  %4363 = vperm.xlu1 %7368, %v11348_v54  }
 0x526   : > { %15409 = vst [vmem:[#allocation90_spill] sm:$0xff] %v11343_v10  ;;  %v7594_v10 = vld [vmem:[%s14659_s6 + $0xb8] sm:$0xff] }
 0x528   : > { %4375 = vperm.xlu0 %7367, %v7592_v22   ;;  %v11372_v22 = vld [vmem:[%s14659_s6 + $0xb0] sm:$0xff] }
 0x529   : > { %v11356_v8 = vpop.permute.xlu0 %3326  ;;  %4371 = vperm.xlu1 %7368, %v11361_v45  }
 0x52a   : > { %15411 = vst [vmem:[#allocation92_spill] sm:$0xff] %v11356_v8  ;;  %v11375_v8 = vpop.permute.xlu1 %3312 }
 0x52b   : > { %15413 = vst [vmem:[#allocation94_spill] sm:$0xff] %v11375_v8  ;;  %v7598_v8 = vld [vmem:[%s14659_s6 + $0xd8] sm:$0xff] }
 0x52c   : > { %4383 = vperm.xlu0 %7367, %v7594_v10   ;;  %v11385_v10 = vld [vmem:[%s14659_s6 + $0xc0] sm:$0xff] }
 0x52d   : > { %v11367_v12 = vpop.permute.xlu0 %3330  ;;  %4379 = vperm.xlu1 %7368, %v11372_v22  }
 0x52e   : > { %15412 = vst [vmem:[#allocation156_spill] sm:$0xff] %v11367_v12  ;;  %v11388_v12 = vpop.permute.xlu1 %3316 }
 0x52f   : > { %15415 = vst [vmem:[#allocation96_spill] sm:$0xff] %v11388_v12 }
 0x530   : > { %4391 = vperm.xlu0 %7367, %v7596_v48   ;;  %v11398_v48 = vld [vmem:[%s14659_s6 + $0xd0] sm:$0xff] }
 0x531   : > { %v11380_v30 = vpop.permute.xlu0 %3334  ;;  %4387 = vperm.xlu1 %7368, %v11385_v10  }
 0x532   : > { %15414 = vst [vmem:[#allocation158_spill] sm:$0xff] %v11380_v30  ;;  %v7600_v30 = vld [vmem:[%s14659_s6 + $0xe8] sm:$0xff] }
 0x534   : > { %4399 = vperm.xlu0 %7367, %v7598_v8   ;;  %v11409_v8 = vld [vmem:[%s14659_s6 + $0xe0] sm:$0xff] }
 0x535   : > { %v11393_v52 = vpop.permute.xlu0 %3338  ;;  %4395 = vperm.xlu1 %7368, %v11398_v48  }
 0x536   : > { %15416 = vst [vmem:[#allocation160_spill] sm:$0xff] %v11393_v52  ;;  %v11412_v52 = vpop.permute.xlu1 %3320 }
 0x537   : > { %15418 = vst [vmem:[#allocation162_spill] sm:$0xff] %v11412_v52  ;;  %v7604_v52 = vld [vmem:[%s14659_s6 + $0x108] sm:$0xff] }
 0x538   : > { %4407 = vperm.xlu0 %7367, %v7600_v30   ;;  %v11422_v30 = vld [vmem:[%s14659_s6 + $0xf0] sm:$0xff] }
 0x539   : > { %v11404_v12 = vpop.permute.xlu0 %3342  ;;  %4403 = vperm.xlu1 %7368, %v11409_v8  }
 0x53a   : > { %15417 = vst [vmem:[#allocation98_spill] sm:$0xff] %v11404_v12  ;;  %v11425_v12 = vpop.permute.xlu1 %3324 }
 0x53b   : > { %15420 = vst [vmem:[#allocation164_spill] sm:$0xff] %v11425_v12 }
 0x53c   : > { %4415 = vperm.xlu0 %7367, %v7602_v56   ;;  %v11435_v56 = vld [vmem:[%s14659_s6 + $0x100] sm:$0xff] }
 0x53d   : > { %v11417_v36 = vpop.permute.xlu0 %3346  ;;  %4411 = vperm.xlu1 %7368, %v11422_v30   ;;  %15422 = vst [vmem:[#allocation166_spill] sm:$0xff] %v11435_v56 }
 0x53e   : > { %15419 = vst [vmem:[#allocation100_spill] sm:$0xff] %v11417_v36  ;;  %v7606_v36 = vld [vmem:[%s14659_s6 + $0x118] sm:$0xff] }
 0x540   : > { %4423 = vperm.xlu0 %7367, %v7604_v52   ;;  %v11446_v52 = vld [vmem:[%s14659_s6 + $0x110] sm:$0xff] }
 0x541   : > { %v11430_v50 = vpop.permute.xlu0 %3350  ;;  %4419 = vperm.xlu1 %7368, %v11435_v56   ;;  %15424 = vst [vmem:[#allocation168_spill] sm:$0xff] %v11446_v52  ;;  %v7608_v56 = vld [vmem:[%s14659_s6 + $0x128] sm:$0xff] }
 0x542   : > { %15421 = vst [vmem:[#allocation102_spill] sm:$0xff] %v11430_v50  ;;  %v11449_v50 = vpop.permute.xlu1 %3328 }
 0x543   : > { %15425 = vst [vmem:[#allocation106_spill] sm:$0xff] %v11449_v50  ;;  %v7610_v50 = vld [vmem:[%s14659_s6 + $0x138] sm:$0xff] }
 0x544   : > { %4431 = vperm.xlu0 %7367, %v7606_v36   ;;  %v11459_v36 = vld [vmem:[%s14659_s6 + $0x120] sm:$0xff] }
 0x545   : > { %v11441_v12 = vpop.permute.xlu0 %3354  ;;  %4427 = vperm.xlu1 %7368, %v11446_v52   ;;  %15427 = vst [vmem:[#allocation108_spill] sm:$0xff] %v11459_v36 }
 0x546   : > { %15423 = vst [vmem:[#allocation104_spill] sm:$0xff] %v11441_v12  ;;  %v11462_v12 = vpop.permute.xlu1 %3332 }
 0x547   : > { %15428 = vst [vmem:[#allocation172_spill] sm:$0xff] %v11462_v12  ;;  %v11481_v12 = vld [vmem:[%s14659_s6 + $0x140] sm:$0xff] }
 0x548   : > { %4439 = vperm.xlu0 %7367, %v7608_v56   ;;  %v11472_v56 = vld [vmem:[%s14659_s6 + $0x130] sm:$0xff]  ;;  %15431 = vst [vmem:[#allocation112_spill] sm:$0xff] %v11481_v12 }
 0x549   : > { %v11454_v27 = vpop.permute.xlu0 %3358  ;;  %4435 = vperm.xlu1 %7368, %v11459_v36   ;;  %15430 = vst [vmem:[#allocation174_spill] sm:$0xff] %v11472_v56 }
 0x54a   : > { %15426 = vst [vmem:[#allocation170_spill] sm:$0xff] %v11454_v27  ;;  %v7612_v27 = vld [vmem:[%s14659_s6 + $0x148] sm:$0xff] }
 0x54c   : > { %4447 = vperm.xlu0 %7367, %v7610_v50   ;;  %v11484_v50 = vpop.permute.xlu1 %3336 }
 0x54d   : > { %v11467_v52 = vpop.permute.xlu0 %3362  ;;  %4443 = vperm.xlu1 %7368, %v11472_v56   ;;  %15432 = vst [vmem:[#allocation176_spill] sm:$0xff] %v11484_v50  ;;  %v7614_v56 = vld [vmem:[%s14659_s6 + $0x158] sm:$0xff] }
 0x54e   : > { %15429 = vst [vmem:[#allocation110_spill] sm:$0xff] %v11467_v52  ;;  %v7618_v50 = vld [vmem:[%s14659_s6 + $0x178] sm:$0xff] }
 0x550   : > { %4455 = vperm.xlu0 %7367, %v7612_v27   ;;  %v11494_v27 = vld [vmem:[%s14659_s6 + $0x150] sm:$0xff]  ;;  %v11497_v36 = vpop.permute.xlu1 %3340 }
 0x551   : > { %4451 = vperm.xlu1 %7368, %v11481_v12   ;;  %v11486_v52 = vpop.permute.xlu0 %3366  ;;  %15434 = vst [vmem:[#allocation178_spill] sm:$0xff] %v11494_v27  ;;  %15435 = vst [vmem:[#allocation114_spill] sm:$0xff] %v11497_v36 }
 0x552   : > { %15433 = vst [vmem:[#allocation113_spill] sm:$0xff] %v11486_v52  ;;  %v7616_v52 = vld [vmem:[%s14659_s6 + $0x168] sm:$0xff] }
 0x554   : > { %4463 = vperm.xlu0 %7367, %v7614_v56   ;;  %v11507_v56 = vld [vmem:[%s14659_s6 + $0x160] sm:$0xff] }
 0x555   : > { %4459 = vperm.xlu1 %7368, %v11494_v27   ;;  %v11499_v25 = vpop.permute.xlu0 %3370  ;;  %15437 = vst [vmem:[#allocation188_spill] sm:$0xff] %v11507_v56 }
 0x556   : > { %15436 = vst [vmem:[#allocation180_spill] sm:$0xff] %v11499_v25  ;;  %v11516_v25 = vld [vmem:[%s14659_s6 + $0x170] sm:$0xff] }
 0x557   : > { %15438 = vst [vmem:[#allocation190_spill] sm:$0xff] %v11516_v25 }
 0x558   : > { %4471 = vperm.xlu0 %7367, %v7616_v52   ;;  %v11519_v52 = vpop.permute.xlu1 %3344 }
 0x559   : > { %4467 = vperm.xlu1 %7368, %v11507_v56   ;;  %15439 = vst [vmem:[#allocation8_spill] sm:$0xff] %v11519_v52  ;;  %v11521_v36 = vpop.permute.xlu0 %3374  ;;  %v7620_v56 = vld [vmem:[%s14659_s6 + $0x188] sm:$0xff] }
 0x55a   : > { %15440 = vst [vmem:[#allocation33_spill] sm:$0xff] %v11521_v36  ;;  %v7622_v36 = vld [vmem:[%s14659_s6 + $0x198] sm:$0xff]  ;;  %v7624_v52 = vld [vmem:[%s14659_s6 + $0x1a8] sm:$0xff] }
 0x55c   : > { %4479 = vperm.xlu0 %7367, %v7618_v50   ;;  %v11529_v50 = vld [vmem:[%s14659_s6 + $0x180] sm:$0xff]  ;;  %v11532_v27 = vpop.permute.xlu1 %3348 }
 0x55d   : > { %4475 = vperm.xlu1 %7368, %v11516_v25   ;;  %15441 = vst [vmem:[#allocation10_spill] sm:$0xff] %v11529_v50  ;;  %15442 = vst [vmem:[#allocation41_spill] sm:$0xff] %v11532_v27  ;;  %v11534_v12 = vpop.permute.xlu0 %3378 }
 0x55e   : > { %15443 = vst [vmem:[#allocation11_spill] sm:$0xff] %v11534_v12  ;;  %v11551_v12 = vld [vmem:[%s14659_s6 + $0x1a0] sm:$0xff] }
 0x560   : > { %4487 = vperm.xlu0 %7367, %v7620_v56   ;;  %v11542_v56 = vld [vmem:[%s14659_s6 + $0x190] sm:$0xff] }
 0x561   : > { %4483 = vperm.xlu1 %7368, %v11529_v50   ;;  %15444 = vst [vmem:[#allocation43_spill] sm:$0xff] %v11542_v56  ;;  %v11556_v27 = vpop.permute.xlu0 %3382 }
 0x562   : > { %15446 = vst [vmem:[#allocation249_spill] sm:$0xff] %v11556_v27  ;;  %v7628_v27 = vld [vmem:[%s14659_s6 + $0x1c8] sm:$0xff] }
 0x564   : > { %4495 = vperm.xlu0 %7367, %v7622_v36   ;;  %v11554_v36 = vpop.permute.xlu1 %3352 }
 0x565   : > { %4491 = vperm.xlu1 %7368, %v11542_v56   ;;  %15445 = vst [vmem:[#allocation248_spill] sm:$0xff] %v11554_v36  ;;  %v7626_v56 = vld [vmem:[%s14659_s6 + $0x1b8] sm:$0xff]  ;;  %v11569_v25 = vpop.permute.xlu0 %3386 }
 0x566   : > { %15449 = vst [vmem:[#allocation252_spill] sm:$0xff] %v11569_v25  ;;  %v7630_v36 = vld [vmem:[%s14659_s6 + $0x1d8] sm:$0xff]  ;;  %v11586_v25 = vld [vmem:[%s14659_s6 + $0x1d0] sm:$0xff] }
 0x567   : > { %15451 = vst [vmem:[#allocation254_spill] sm:$0xff] %v11586_v25 }
 0x568   : > { %4503 = vperm.xlu0 %7367, %v7624_v52   ;;  %v11564_v52 = vld [vmem:[%s14659_s6 + $0x1b0] sm:$0xff]  ;;  %v11567_v50 = vpop.permute.xlu1 %3356 }
 0x569   : > { %4499 = vperm.xlu1 %7368, %v11551_v12   ;;  %15447 = vst [vmem:[#allocation250_spill] sm:$0xff] %v11564_v52  ;;  %15448 = vst [vmem:[#allocation251_spill] sm:$0xff] %v11567_v50  ;;  %v11591_v50 = vpop.permute.xlu0 %3390 }
 0x56a   : > { %15453 = vst [vmem:[#allocation256_spill] sm:$0xff] %v11591_v50  ;;  %v15457_v50 = vmov 0  }
 0x56c   : > { %4511 = vperm.xlu0 %7367, %v7626_v56   ;;  %v11577_v56 = vld [vmem:[%s14659_s6 + $0x1c0] sm:$0xff] }
 0x56d   : > { %4507 = vperm.xlu1 %7368, %v11564_v52   ;;  %15450 = vst [vmem:[#allocation253_spill] sm:$0xff] %v11577_v56 }
 0x570   : > { %4519 = vperm.xlu0 %7367, %v7628_v27   ;;  %v11589_v27 = vpop.permute.xlu1 %3360 }
 0x571   : > { %4515 = vperm.xlu1 %7368, %v11577_v56   ;;  %15452 = vst [vmem:[#allocation255_spill] sm:$0xff] %v11589_v27 }
 0x574   : > { %4527 = vperm.xlu0 %7367, %v7630_v36   ;;  %v11597_v52 = vpop.permute.xlu1 %3364  ;;  %v15455_v36 = vmov 1  }
 0x575   : > { %4523 = vperm.xlu1 %7368, %v11586_v25   ;;  %v7632_v25 = vld [vmem:[%s14659_s6 + $0x1f8] sm:$0xff] }
 0x578   : > { %4535 = vperm.xlu0 %7367, %v11219_v15   ;;  %v15458_v15 = vmov 2  }
 0x579   : > { %4531 = vperm.xlu1 %7368, %v11202_v61   ;;  %v11608_v61 = vpop.permute.xlu1 %3368 }
 0x57a   : > { %v11595_v56 = vpop.permute.xlu0 %4151 }
 0x57b   : > { %15454 = vst [vmem:[#allocation257_spill] sm:$0xff] %v11595_v56 }
 0x57c   : > { %4539 = vperm.xlu0 %7367, %v11214_v32   ;;  %v4885_v32 = vld [vmem:[%s14661_s8 + $0x88] sm:$0xff] }
 0x57d   : > { %7369 = vset.pattern.permute.xlu1 %v15455_v36 }
 0x57e   : > { %4159 = vperm.xlu1 %7369, %v7632_v25  }
 0x57f   : > { %v11604_v27 = vpop.permute.xlu0 %4291 }
 0x580   : > { %15456 = vst [vmem:[#allocation258_spill] sm:$0xff] %v11604_v27  ;;  %7370 = vset.pattern.permute.xlu0 %v15457_v50  ;;  %v11620_v27 = vpop.permute.xlu1 %3372 }
 0x581   : > { %3524 = vperm.xlu0 %7370, %v11231_v33   ;;  %v4868_v33 = vld [vmem:[%s14661_s8] sm:$0xff] }
 0x582   : > { %7371 = vset.pattern.permute.xlu1 %v15458_v15 }
 0x583   : > { %v11611_v56 = vpop.permute.xlu0 %4303  ;;  %4543 = vperm.xlu1 %7371, %v7632_v25  }
 0x584   : > { %v11632_v15 = vpop.permute.xlu1 %3376 }
 0x585   : > { %3534 = vperm.xlu0 %7370, %v11250_v31   ;;  %v4869_v31 = vld [vmem:[%s14661_s8 + $0x8] sm:$0xff]  ;;  %15459 = vst [vmem:[#allocation259_spill] sm:$0xff] %v11632_v15 }
 0x587   : > { %v11617_v36 = vpop.permute.xlu0 %4311  ;;  %7372 = vset.pattern.permute.xlu1 %v15457_v50 }
 0x588   : > { %5358 = vperm.xlu1 %7372, %v4885_v32  }
 0x589   : > { %3544 = vperm.xlu0 %7370, %v11261_v5   ;;  %v4886_v5 = vld [vmem:[%s14661_s8 + $0x90] sm:$0xff] }
 0x58b   : > { %v11626_v25 = vpop.permute.xlu0 %4319 }
 0x58c   : > { %5273 = vperm.xlu1 %7372, %v4868_v33   ;;  %v11642_v33 = vpop.permute.xlu1 %3380 }
 0x58d   : > { %3554 = vperm.xlu0 %7370, %v11274_v26   ;;  %15461 = vst [vmem:[#allocation261_spill] sm:$0xff] %v11642_v33  ;;  %v4887_v26 = vld [vmem:[%s14661_s8 + $0x98] sm:$0xff] }
 0x58f   : > { %v11634_v50 = vpop.permute.xlu0 %4327 }
 0x590   : > { %5278 = vperm.xlu1 %7372, %v4869_v31   ;;  %v11654_v31 = vpop.permute.xlu1 %3384 }
 0x591   : > { %3564 = vperm.xlu0 %7370, %v11287_v1   ;;  %v4948_v1 = vld [vmem:[%s14662_s9 + $0x80] sm:$0xff]  ;;  %15463 = vst [vmem:[#allocation263_spill] sm:$0xff] %v11654_v31 }
 0x593   : > { %v11640_v32 = vpop.permute.xlu0 %4335 }
 0x594   : > { %15460 = vst [vmem:[#allocation260_spill] sm:$0xff] %v11640_v32  ;;  %5363 = vperm.xlu1 %7372, %v4886_v5  }
 0x595   : > { %3574 = vperm.xlu0 %7370, %v11298_v7   ;;  %v4949_v7 = vld [vmem:[%s14662_s9 + $0x88] sm:$0xff] }
 0x597   : > { %v11648_v15 = vpop.permute.xlu0 %4343 }
 0x598   : > { %15462 = vst [vmem:[#allocation262_spill] sm:$0xff] %v11648_v15  ;;  %5368 = vperm.xlu1 %7372, %v4887_v26   ;;  %v11664_v26 = vpop.permute.xlu1 %3388 }
 0x599   : > { %3584 = vperm.xlu0 %7370, %v11311_v44   ;;  %15466 = vst [vmem:[#allocation266_spill] sm:$0xff] %v11664_v26  ;;  %v4871_v44 = vld [vmem:[%s14661_s8 + $0x18] sm:$0xff] }
 0x59a   : > { %v15485_v26 = vld [vmem:[#allocation189_spill] sm:$0xff] }
 0x59b   : > { %v11656_v32 = vpop.permute.xlu0 %4351 }
 0x59c   : > { %15464 = vst [vmem:[#allocation264_spill] sm:$0xff] %v11656_v32  ;;  %5803 = vperm.xlu1 %7372, %v4948_v1   ;;  %v11676_v1 = vpop.permute.xlu1 %3392  ;;  %v15482_v32 = vld [vmem:[#allocation193_spill] sm:$0xff] }
 0x59d   : > { %3594 = vperm.xlu0 %7370, %v11324_v62   ;;  %v4933_v62 = vld [vmem:[%s14662_s9 + $0x8] sm:$0xff]  ;;  %15468 = vst [vmem:[#allocation268_spill] sm:$0xff] %v11676_v1  ;;  %v15484_v1 = vld [vmem:[#allocation9_spill] sm:$0xff] }
 0x59e   : > { %v11730_v31 = vmul.f32 %v15485_v26, %v15484_v1  ;;  %v15496_v26 = vld [vmem:[#allocation199_spill] sm:$0xff] }
 0x59f   : > { %v11662_v5 = vpop.permute.xlu0 %4359  ;;  %v11752_v1 = vmul.f32 %v15496_v26, %v15338_v34  ;;  %v15504_v34 = vld [vmem:[#allocation200_spill] sm:$0xff] }
 0x5a0   : > { %15465 = vst [vmem:[#allocation265_spill] sm:$0xff] %v11662_v5  ;;  %5808 = vperm.xlu1 %7372, %v4949_v7   ;;  %v11684_v7 = vpop.permute.xlu1 %4147  ;;  %v11772_v26 = vmul.f32 %v15504_v34, %v10629_v40 }
 0x5a1   : > { %3604 = vperm.xlu0 %7370, %v11335_v51   ;;  %v4889_v51 = vld [vmem:[%s14661_s8 + $0xa8] sm:$0xff]  ;;  %15470 = vst [vmem:[#allocation270_spill] sm:$0xff] %v11684_v7  ;;  %15497 = vst [vmem:[#allocation9_spill] sm:$0xff] %v11752_v1 }
 0x5a3   : > { %v11670_v15 = vpop.permute.xlu0 %4367 }
 0x5a4   : > { %15467 = vst [vmem:[#allocation267_spill] sm:$0xff] %v11670_v15  ;;  %5288 = vperm.xlu1 %7372, %v4871_v44  }
 0x5a5   : > { %3614 = vperm.xlu0 %7370, %v11348_v54   ;;  %v4951_v54 = vld [vmem:[%s14662_s9 + $0x98] sm:$0xff] }
 0x5a7   : > { %v11678_v5 = vpop.permute.xlu0 %4375 }
 0x5a8   : > { %15469 = vst [vmem:[#allocation269_spill] sm:$0xff] %v11678_v5  ;;  %5728 = vperm.xlu1 %7372, %v4933_v62   ;;  %v11694_v62 = vpop.permute.xlu1 %4155 }
 0x5a9   : > { %3624 = vperm.xlu0 %7370, %v11361_v45   ;;  %15473 = vst [vmem:[#allocation273_spill] sm:$0xff] %v11694_v62  ;;  %v4873_v45 = vld [vmem:[%s14661_s8 + $0x28] sm:$0xff] }
 0x5ab   : > { %v11686_v44 = vpop.permute.xlu0 %4383 }
 0x5ac   : > { %15471 = vst [vmem:[#allocation271_spill] sm:$0xff] %v11686_v44  ;;  %5378 = vperm.xlu1 %7372, %v4889_v51   ;;  %v15478_v44 = vld [vmem:[#allocation191_spill] sm:$0xff] }
 0x5ad   : > { %3634 = vperm.xlu0 %7370, %v11372_v22   ;;  %v15475_v22 = vld [vmem:[#allocation187_spill] sm:$0xff]  ;;  %v11716_v62 = vmul.f32 %v15478_v44, %v15322_v21  ;;  %v15490_v44 = vld [vmem:[#allocation192_spill] sm:$0xff] }
 0x5ae   : > { %v11704_v51 = vmul.f32 %v15475_v22, %v15315_v13  ;;  %v3070_v13 = vlaneseq  ;;  %v11722_v22 = vpop.permute.xlu1 %4295  ;;  %v15489_v21 = vld [vmem:[#allocation35_spill] sm:$0xff] }
 0x5af   : > { %v11692_v15 = vpop.permute.xlu0 %4391 }
 0x5b0   : > { %15472 = vst [vmem:[#allocation272_spill] sm:$0xff] %v11692_v15  ;;  %5818 = vperm.xlu1 %7372, %v4951_v54   ;;  %v4935_v15 = vld [vmem:[%s14662_s9 + $0x18] sm:$0xff]  ;;  %v15476_v54 = vld [vmem:[#allocation182_spill] sm:$0xff]  ;;  %v11790_v40 = vand.u32 127, %v3070_v13  ;;  %v15517_v13 = vld [vmem:[#allocation208_spill] sm:$0xff] }
 0x5b1   : > { %3644 = vperm.xlu0 %7370, %v11385_v10   ;;  %v11712_v10 = vmul.f32 %v15476_v54, %v15318_v9  ;;  %15479 = vst [vmem:[#allocation182_spill] sm:$0xff] %v11716_v62  ;;  %v15486_v9 = vld [vmem:[#allocation24_spill] sm:$0xff]  ;;  %v15487_v54 = vld [vmem:[#allocation195_spill] sm:$0xff]  ;;  %v11738_v62 = vmul.f32 %v15490_v44, %v15489_v21  ;;  %v15499_v21 = vld [vmem:[#allocation201_spill] sm:$0xff] }
 0x5b2   : > { %v11760_v44 = vmul.f32 %v15499_v21, %v10625_v53  ;;  %v15505_v53 = vld [vmem:[#allocation205_spill] sm:$0xff]  ;;  %vm3072_vm0 = vcmp.eq.s32.totalorder %v11790_v40, 0  ;;  %vm3265_vm1 = vcmp.eq.s32.totalorder %v11790_v40, 127 }
 0x5b3   : > { %v11700_v5 = vpop.permute.xlu0 %4399  ;;  %15477 = vst [vmem:[#allocation187_spill] sm:$0xff] %v11712_v10  ;;  %v11734_v10 = vmul.f32 %v15487_v54, %v15486_v9  ;;  %v15498_v9 = vld [vmem:[#allocation196_spill] sm:$0xff] }
 0x5b4   : > { %15474 = vst [vmem:[#allocation274_spill] sm:$0xff] %v11700_v5  ;;  %5298 = vperm.xlu1 %7372, %v4873_v45   ;;  %v15480_v45 = vld [vmem:[#allocation186_spill] sm:$0xff]  ;;  %v11756_v54 = vmul.f32 %v15498_v9, %v15335_v59  ;;  %15500 = vst [vmem:[#allocation189_spill] sm:$0xff] %v11760_v44  ;;  %v4891_v59 = vld [vmem:[%s14661_s8 + $0xb8] sm:$0xff] }
 0x5b5   : > { %3654 = vperm.xlu0 %7370, %v11398_v48   ;;  %v11720_v5 = vmul.f32 %v15480_v45, %v15319_v55  ;;  %v15481_v48 = vld [vmem:[#allocation34_spill] sm:$0xff]  ;;  %15488 = vst [vmem:[#allocation186_spill] sm:$0xff] %v11734_v10  ;;  %v15492_v45 = vld [vmem:[#allocation197_spill] sm:$0xff] }
 0x5b6   : > { %v11726_v7 = vmul.f32 %v15482_v32, %v15481_v48  ;;  %v11744_v33 = vmul.f32 %v15492_v45, %v15334_v18  ;;  %v15494_v32 = vld [vmem:[#allocation38_spill] sm:$0xff] }
 0x5b7   : > { %v11740_v55 = vpop.permute.xlu0 %4407  ;;  %v15495_v48 = vld [vmem:[#allocation194_spill] sm:$0xff] }
 0x5b8   : > { %15483 = vst [vmem:[#allocation191_spill] sm:$0xff] %v11726_v7  ;;  %15491 = vst [vmem:[#allocation34_spill] sm:$0xff] %v11740_v55  ;;  %v11748_v7 = vmul.f32 %v15495_v48, %v15494_v32  ;;  %5738 = vperm.xlu1 %7372, %v4935_v15   ;;  %v15501_v18 = vld [vmem:[#allocation198_spill] sm:$0xff]  ;;  %v15502_v32 = vld [vmem:[#allocation203_spill] sm:$0xff]  ;;  %v11780_v15 = vmul.f32 %v15505_v53, %v10657_v2 }
 0x5b9   : > { %15493 = vst [vmem:[#allocation193_spill] sm:$0xff] %v11744_v33  ;;  %v11764_v45 = vmul.f32 %v15501_v18, %v15339_v42  ;;  %v11768_v48 = vmul.f32 %v15502_v32, %v10643_v60  ;;  %3664 = vperm.xlu0 %7370, %v11409_v8   ;;  %v15507_v42 = vld [vmem:[#allocation202_spill] sm:$0xff]  ;;  %v15508_v60 = vld [vmem:[#allocation207_spill] sm:$0xff]  ;;  %v15510_v8 = vld [vmem:[#allocation204_spill] sm:$0xff] }
 0x5ba   : > { %15506 = vst [vmem:[#allocation195_spill] sm:$0xff] %v11780_v15  ;;  %v11784_v9 = vmul.f32 %v15507_v42, %v10647_v4  ;;  %v11788_v21 = vmul.f32 %v15508_v60, %v10668_v0  ;;  %v11794_v18 = vmul.f32 %v15510_v8, %v10661_v11  ;;  %v15511_v32 = vld [vmem:[#allocation209_spill] sm:$0xff]  ;;  %v15513_v2 = vld [vmem:[#allocation206_spill] sm:$0xff]  ;;  %v15514_v4 = vld [vmem:[#allocation211_spill] sm:$0xff]  ;;  %v11812_v60 = vmul.f32 %v15517_v13, %v10683_v57 }
 0x5bb   : > { %15503 = vst [vmem:[#allocation24_spill] sm:$0xff] %v11768_v48  ;;  %v11798_v34 = vmul.f32 %v15511_v32, %v10679_v19  ;;  %v11802_v53 = vmul.f32 %v15513_v2, %v10671_v16  ;;  %v11806_v42 = vmul.f32 %v15514_v4, %v10691_v20  ;;  %v11808_v0 = vpop.permute.xlu0 %4415  ;;  %v15518_v11 = vld [vmem:[#allocation213_spill] sm:$0xff]  ;;  %v15520_v19 = vld [vmem:[#allocation210_spill] sm:$0xff]  ;;  %v15521_v16 = vld [vmem:[#allocation215_spill] sm:$0xff]  ;;  %v11826_v20 = vpop.permute.xlu1 %4299 }
 0x5bc   : > { %15509 = vst [vmem:[#allocation35_spill] sm:$0xff] %v11788_v21  ;;  %15516 = vst [vmem:[#allocation38_spill] sm:$0xff] %v11808_v0  ;;  %v11816_v8 = vmul.f32 %v15518_v11, %v10703_v28  ;;  %v11820_v32 = vmul.f32 %v15520_v19, %v10695_v37  ;;  %v11824_v2 = vmul.f32 %v15521_v16, %v10715_v46  ;;  %5388 = vperm.xlu1 %7372, %v4891_v59   ;;  %v15523_v4 = vld [vmem:[#allocation212_spill] sm:$0xff]  ;;  %v15524_v57 = vld [vmem:[#allocation217_spill] sm:$0xff] }
 0x5bd   : > { %15512 = vst [vmem:[#allocation192_spill] sm:$0xff] %v11798_v34  ;;  %15515 = vst [vmem:[#allocation197_spill] sm:$0xff] %v11806_v42  ;;  %v11830_v42 = vmul.f32 %v15523_v4, %v10707_v3  ;;  %v11834_v13 = vmul.f32 %v15524_v57, %v10727_v63  ;;  %v15526_v28 = vld [vmem:[#allocation214_spill] sm:$0xff]  ;;  %v15527_v37 = vld [vmem:[#allocation219_spill] sm:$0xff]  ;;  %3674 = vperm.xlu0 %7370, %v11422_v30  }
 0x5be   : > { %15519 = vst [vmem:[#allocation194_spill] sm:$0xff] %v11816_v8  ;;  %15522 = vst [vmem:[#allocation199_spill] sm:$0xff] %v11824_v2  ;;  %v11838_v11 = vmul.f32 %v15526_v28, %v10719_v17  ;;  %v11842_v19 = vmul.f32 %v15527_v37, %v10739_v43  ;;  %v4953_v46 = vld [vmem:[%s14662_s9 + $0xa8] sm:$0xff]  ;;  %v15529_v3 = vld [vmem:[#allocation216_spill] sm:$0xff] }
 0x5bf   : > { %15525 = vst [vmem:[#allocation196_spill] sm:$0xff] %v11834_v13  ;;  %v11850_v59 = vmul.f32 %v15529_v3, %v10731_v49  ;;  %v15530_v63 = vld [vmem:[#allocation221_spill] sm:$0xff]  ;;  %v15532_v17 = vld [vmem:[#allocation218_spill] sm:$0xff]  ;;  %v15533_v43 = vld [vmem:[#allocation223_spill] sm:$0xff] }
 0x5c0   : > { %15528 = vst [vmem:[#allocation201_spill] sm:$0xff] %v11842_v19  ;;  %v11854_v16 = vmul.f32 %v15530_v63, %v10751_v41  ;;  %v11858_v4 = vmul.f32 %v15532_v17, %v10743_v14  ;;  %v11863_v30 = vmul.f32 %v15533_v43, %v10763_v38  ;;  %v15535_v57 = vld [vmem:[#allocation220_spill] sm:$0xff]  ;;  %v15536_v49 = vld [vmem:[#allocation225_spill] sm:$0xff]  ;;  %v15538_v41 = vld [vmem:[#allocation222_spill] sm:$0xff]  ;;  %v11877_v14 = vpop.permute.xlu0 %4423  ;;  %5828 = vperm.xlu1 %7372, %v4953_v46  }
 0x5c1   : > { %v11867_v28 = vmul.f32 %v15535_v57, %v10755_v35  ;;  %v11871_v37 = vmul.f32 %v15536_v49, %v10775_v23  ;;  %v11875_v3 = vmul.f32 %v15538_v41, %v10767_v58  ;;  %15539 = vst [vmem:[#allocation205_spill] sm:$0xff] %v11877_v14  ;;  %v15540_v63 = vld [vmem:[#allocation227_spill] sm:$0xff]  ;;  %v15542_v38 = vld [vmem:[#allocation224_spill] sm:$0xff]  ;;  %v15543_v35 = vld [vmem:[#allocation229_spill] sm:$0xff] }
 0x5c2   : > { %15531 = vst [vmem:[#allocation198_spill] sm:$0xff] %v11854_v16  ;;  %15534 = vst [vmem:[#allocation203_spill] sm:$0xff] %v11863_v30  ;;  %v11881_v17 = vmul.f32 %v15540_v63, %v10787_v6  ;;  %v11885_v43 = vmul.f32 %v15542_v38, %v10779_v39  ;;  %v11889_v57 = vmul.f32 %v15543_v35, %v10799_v47  ;;  %v15545_v23 = vld [vmem:[#allocation226_spill] sm:$0xff]  ;;  %v15546_v58 = vld [vmem:[#allocation231_spill] sm:$0xff] }
 0x5c3   : > { %15537 = vst [vmem:[#allocation200_spill] sm:$0xff] %v11871_v37  ;;  %v11893_v49 = vmul.f32 %v15545_v23, %v10791_v24  ;;  %v11897_v41 = vmul.f32 %v15546_v58, %v10811_v29  ;;  %v15548_v37 = vld [vmem:[#allocation30_spill] sm:$0xff]  ;;  %v15549_v6 = vld [vmem:[#allocation228_spill] sm:$0xff]  ;;  %v15551_v39 = vld [vmem:[#allocation233_spill] sm:$0xff] }
 0x5c4   : > { %15541 = vst [vmem:[#allocation202_spill] sm:$0xff] %v11881_v17  ;;  %15544 = vst [vmem:[#allocation207_spill] sm:$0xff] %v11889_v57  ;;  %v11901_v63 = vmul.f32 %v15549_v6, %v15548_v37  ;;  %v15550_v17 = vld [vmem:[#allocation25_spill] sm:$0xff]  ;;  %v15554_v35 = vld [vmem:[#allocation166_spill] sm:$0xff] }
 0x5c5   : > { %15547 = vst [vmem:[#allocation204_spill] sm:$0xff] %v11897_v41  ;;  %v11905_v38 = vmul.f32 %v15551_v39, %v15550_v17  ;;  %v15553_v30 = vld [vmem:[#allocation37_spill] sm:$0xff]  ;;  %3684 = vperm.xlu0 %7370, %v15554_v35   ;;  %v15555_v29 = vld [vmem:[#allocation46_spill] sm:$0xff]  ;;  %v15557_v37 = vld [vmem:[#allocation20_spill] sm:$0xff]  ;;  %v11930_v35 = vpop.permute.xlu1 %4307 }
 0x5c6   : > { %v3202_v47 = vsel %vm3072_vm0, 0.0, %v15553_v30  ;;  %v4875_v24 = vld [vmem:[%s14661_s8 + $0x38] sm:$0xff]  ;;  %v15556_v46 = vld [vmem:[#allocation230_spill] sm:$0xff]  ;;  %v15558_v58 = vld [vmem:[#allocation235_spill] sm:$0xff] }
 0x5c7   : > { %15552 = vst [vmem:[#allocation209_spill] sm:$0xff] %v11905_v38  ;;  %v11916_v23 = vmul.f32 %v15556_v46, %v15555_v29  ;;  %v11920_v6 = vmul.f32 %v15558_v58, %v15557_v37  ;;  %v15560_v17 = vld [vmem:[#allocation48_spill] sm:$0xff]  ;;  %v15562_v41 = vld [vmem:[#allocation14_spill] sm:$0xff]  ;;  %v15563_v30 = vld [vmem:[#allocation237_spill] sm:$0xff]  ;;  %5308 = vperm.xlu1 %7372, %v4875_v24  }
 0x5c8   : > { %v15561_v39 = vld [vmem:[#allocation232_spill] sm:$0xff]  ;;  %v11928_v57 = vmul.f32 %v15563_v30, %v15562_v41  ;;  %v15565_v16 = vld [vmem:[#allocation51_spill] sm:$0xff]  ;;  %v15566_v19 = vld [vmem:[#allocation234_spill] sm:$0xff]  ;;  %v11946_v41 = vpop.permute.xlu0 %4431 }
 0x5c9   : > { %15559 = vst [vmem:[#allocation206_spill] sm:$0xff] %v11920_v6  ;;  %v11924_v38 = vmul.f32 %v15561_v39, %v15560_v17  ;;  %v11934_v13 = vmul.f32 %v15566_v19, %v15565_v16  ;;  %v15567_v29 = vld [vmem:[#allocation15_spill] sm:$0xff]  ;;  %v15570_v37 = vld [vmem:[#allocation68_spill] sm:$0xff]  ;;  %v15571_v17 = vld [vmem:[#allocation73_spill] sm:$0xff] }
 0x5ca   : > { %15564 = vst [vmem:[#allocation211_spill] sm:$0xff] %v11928_v57  ;;  %v15568_v46 = vld [vmem:[#allocation239_spill] sm:$0xff]  ;;  %v3204_v58 = vsel %vm3072_vm0, 0.0, %v15570_v37  ;;  %v3206_v39 = vsel %vm3072_vm0, 0.0, %v15571_v17  ;;  %15572 = vst [vmem:[#allocation213_spill] sm:$0xff] %v11946_v41  ;;  %v15573_v30 = vld [vmem:[#allocation53_spill] sm:$0xff] }
 0x5cb   : > { %v11938_v2 = vmul.f32 %v15568_v46, %v15567_v29  ;;  %v15574_v57 = vld [vmem:[#allocation236_spill] sm:$0xff]  ;;  %v15576_v16 = vld [vmem:[#allocation241_spill] sm:$0xff]  ;;  %v15578_v29 = vld [vmem:[#allocation115_spill] sm:$0xff] }
 0x5cc   : > { %v11950_v6 = vmul.f32 %v15574_v57, %v15573_v30  ;;  %v15575_v19 = vld [vmem:[#allocation32_spill] sm:$0xff]  ;;  %v3843_v46 = vmul.f32 %v15578_v29, %v3202_v47  ;;  %v15580_v34 = vld [vmem:[#allocation55_spill] sm:$0xff]  ;;  %v15581_v21 = vld [vmem:[#allocation238_spill] sm:$0xff]  ;;  %v12000_v1 = vpop.permute.xlu0 %4439 }
 0x5cd   : > { %15569 = vst [vmem:[#allocation208_spill] sm:$0xff] %v11938_v2  ;;  %v11954_v8 = vmul.f32 %v15576_v16, %v15575_v19  ;;  %v15579_v2 = vld [vmem:[#allocation77_spill] sm:$0xff]  ;;  %v11962_v17 = vmul.f32 %v15581_v21, %v15580_v34  ;;  %v15582_v41 = vld [vmem:[#allocation27_spill] sm:$0xff]  ;;  %v15585_v57 = vld [vmem:[#allocation58_spill] sm:$0xff] }
 0x5ce   : > { %v3208_v37 = vsel %vm3072_vm0, 0.0, %v15579_v2  ;;  %v15583_v15 = vld [vmem:[#allocation243_spill] sm:$0xff]  ;;  %v15586_v30 = vld [vmem:[#allocation240_spill] sm:$0xff]  ;;  %v15587_v19 = vld [vmem:[#allocation57_spill] sm:$0xff]  ;;  %15602 = vst [vmem:[#allocation214_spill] sm:$0xff] %v12000_v1 }
 0x5cf   : > { %15577 = vst [vmem:[#allocation210_spill] sm:$0xff] %v11954_v8  ;;  %v11966_v14 = vmul.f32 %v15583_v15, %v15582_v41  ;;  %v11970_v0 = vmul.f32 %v15586_v30, %v15585_v57  ;;  %v3210_v47 = vsel %vm3072_vm0, 0.0, %v15587_v19  ;;  %v15588_v16 = vld [vmem:[#allocation168_spill] sm:$0xff]  ;;  %v4937_v2 = vld [vmem:[%s14662_s9 + $0x28] sm:$0xff]  ;;  %v15590_v24 = vld [vmem:[#allocation117_spill] sm:$0xff] }
 0x5d0   : > { %3694 = vperm.xlu0 %7370, %v15588_v16   ;;  %v15589_v21 = vld [vmem:[#allocation116_spill] sm:$0xff]  ;;  %v3847_v29 = vmul.f32 %v15590_v24, %v3206_v39  ;;  %v15591_v15 = vld [vmem:[#allocation50_spill] sm:$0xff]  ;;  %v15594_v19 = vld [vmem:[#allocation245_spill] sm:$0xff]  ;;  %5748 = vperm.xlu1 %7372, %v4937_v2  }
 0x5d1   : > { %15584 = vst [vmem:[#allocation215_spill] sm:$0xff] %v11966_v14  ;;  %v3845_v34 = vmul.f32 %v15589_v21, %v3204_v58  ;;  %v3212_v41 = vsel %vm3072_vm0, 0.0, %v15591_v15  ;;  %v15592_v57 = vld [vmem:[#allocation52_spill] sm:$0xff]  ;;  %v15593_v14 = vld [vmem:[#allocation63_spill] sm:$0xff]  ;;  %v15597_v48 = vld [vmem:[#allocation242_spill] sm:$0xff] }
 0x5d2   : > { %v3214_v30 = vsel %vm3072_vm0, 0.0, %v15592_v57  ;;  %v11989_v8 = vmul.f32 %v15594_v19, %v15593_v14  ;;  %v15596_v16 = vld [vmem:[#allocation60_spill] sm:$0xff]  ;;  %v15598_v55 = vld [vmem:[#allocation65_spill] sm:$0xff]  ;;  %v15599_v58 = vld [vmem:[#allocation246_spill] sm:$0xff]  ;;  %v12007_v57 = vadd.f32 %v11704_v51, %v3843_v46 }
 0x5d3   : > { %v11993_v44 = vmul.f32 %v15597_v48, %v15596_v16  ;;  %v11997_v21 = vmul.f32 %v15599_v58, %v15598_v55  ;;  %v15601_v39 = vld [vmem:[#allocation118_spill] sm:$0xff]  ;;  %v15603_v15 = vld [vmem:[#allocation39_spill] sm:$0xff]  ;;  %v15604_v33 = vld [vmem:[#allocation244_spill] sm:$0xff]  ;;  %v12013_v16 = vpop.permute.xlu1 %4315  ;;  %v12030_v2 = vadd.f32 %v11720_v5, %v3845_v34 }
 0x5d4   : > { %15595 = vst [vmem:[#allocation212_spill] sm:$0xff] %v11989_v8  ;;  %v3849_v24 = vmul.f32 %v15601_v39, %v3208_v37  ;;  %v12004_v10 = vmul.f32 %v15604_v33, %v15603_v15  ;;  %v15605_v14 = vld [vmem:[#allocation119_spill] sm:$0xff]  ;;  %v15606_v8 = vld [vmem:[#allocation54_spill] sm:$0xff]  ;;  %v15607_v55 = vld [vmem:[#allocation40_spill] sm:$0xff] }
 0x5d5   : > { %15600 = vst [vmem:[#allocation217_spill] sm:$0xff] %v11997_v21  ;;  %v3851_v19 = vmul.f32 %v15605_v14, %v3210_v47  ;;  %v3216_v48 = vsel %vm3072_vm0, 0.0, %v15606_v8  ;;  %v12018_v37 = vsel %vm3072_vm0, 0.0, %v15607_v55  ;;  %v15608_v58 = vld [vmem:[#allocation120_spill] sm:$0xff]  ;;  %v15609_v39 = vld [vmem:[#allocation122_spill] sm:$0xff]  ;;  %v4893_v8 = vld [vmem:[%s14661_s8 + $0xc8] sm:$0xff] }
 0x5d6   : > { %v3853_v33 = vmul.f32 %v15608_v58, %v3212_v41  ;;  %v3855_v15 = vmul.f32 %v15609_v39, %v3214_v30  ;;  %v15610_v51 = vld [vmem:[#allocation56_spill] sm:$0xff]  ;;  %v15612_v14 = vld [vmem:[#allocation70_spill] sm:$0xff]  ;;  %v12038_v41 = vadd.f32 %v11730_v31, %v3847_v29  ;;  %v15614_v30 = vld [vmem:[#allocation75_spill] sm:$0xff]  ;;  %v12046_v39 = vadd.f32 %v11738_v62, %v3849_v24  ;;  %v12055_v31 = vpop.permute.xlu0 %4447  ;;  %5398 = vperm.xlu1 %7372, %v4893_v8  }
 0x5d7   : > { %v3218_v46 = vsel %vm3072_vm0, 0.0, %v15610_v51  ;;  %v15611_v47 = vld [vmem:[#allocation108_spill] sm:$0xff]  ;;  %v12035_v55 = vsel %vm3072_vm0, 0.0, %v15612_v14  ;;  %v12043_v58 = vsel %vm3072_vm0, 0.0, %v15614_v30  ;;  %v15617_v5 = vld [vmem:[#allocation181_spill] sm:$0xff]  ;;  %15619 = vst [vmem:[#allocation221_spill] sm:$0xff] %v12055_v31  ;;  %v12063_v62 = vadd.f32 %v11748_v7, %v3851_v19 }
 0x5d8   : > { %3704 = vperm.xlu0 %7370, %v15611_v47   ;;  %15613 = vst [vmem:[#allocation219_spill] sm:$0xff] %v12035_v55  ;;  %15615 = vst [vmem:[#allocation216_spill] sm:$0xff] %v12043_v58  ;;  %v15616_v51 = vld [vmem:[#allocation124_spill] sm:$0xff]  ;;  %v3220_v34 = vsel %vm3072_vm0, 0.0, %v15617_v5  ;;  %v15620_v29 = vld [vmem:[#allocation49_spill] sm:$0xff]  ;;  %v12075_v31 = vadd.f32 %v11756_v54, %v3853_v33  ;;  %v12083_v19 = vadd.f32 %v11764_v45, %v3855_v15  ;;  %v12097_v45 = vpop.permute.xlu1 %4323 }
 0x5d9   : > { %v3857_v47 = vmul.f32 %v15616_v51, %v3216_v48  ;;  %v15618_v21 = vld [vmem:[#allocation184_spill] sm:$0xff]  ;;  %v12060_v30 = vsel %vm3072_vm0, 0.0, %v15620_v29  ;;  %v15622_v24 = vld [vmem:[#allocation127_spill] sm:$0xff]  ;;  %v15626_v29 = vld [vmem:[#allocation81_spill] sm:$0xff]  ;;  %15633 = vst [vmem:[#allocation225_spill] sm:$0xff] %v12097_v45 }
 0x5da   : > { %v3222_v14 = vsel %vm3072_vm0, 0.0, %v15618_v21  ;;  %15621 = vst [vmem:[#allocation218_spill] sm:$0xff] %v12060_v30  ;;  %v3859_v48 = vmul.f32 %v15622_v24, %v3218_v46  ;;  %v15623_v51 = vld [vmem:[#allocation247_spill] sm:$0xff]  ;;  %v12080_v7 = vsel %vm3072_vm0, 0.0, %v15626_v29  ;;  %v15628_v46 = vld [vmem:[#allocation174_spill] sm:$0xff]  ;;  %v4955_v8 = vld [vmem:[%s14662_s9 + $0xb8] sm:$0xff] }
 0x5db   : > { %v3224_v5 = vsel %vm3072_vm0, 0.0, %v15623_v51  ;;  %v15624_v1 = vld [vmem:[#allocation79_spill] sm:$0xff]  ;;  %15627 = vst [vmem:[#allocation220_spill] sm:$0xff] %v12080_v7  ;;  %v15629_v24 = vld [vmem:[#allocation130_spill] sm:$0xff]  ;;  %v15630_v51 = vld [vmem:[#allocation133_spill] sm:$0xff]  ;;  %v12105_v7 = vadd.f32 %v11772_v26, %v3857_v47  ;;  %5838 = vperm.xlu1 %7372, %v4955_v8  }
 0x5dc   : > { %v12072_v21 = vsel %vm3072_vm0, 0.0, %v15624_v1  ;;  %3714 = vperm.xlu0 %7370, %v15628_v46   ;;  %v3861_v1 = vmul.f32 %v15629_v24, %v3220_v34  ;;  %v15631_v54 = vld [vmem:[#allocation121_spill] sm:$0xff]  ;;  %v15632_v30 = vld [vmem:[#allocation128_spill] sm:$0xff]  ;;  %v15634_v15 = vld [vmem:[#allocation83_spill] sm:$0xff]  ;;  %v12119_v55 = vadd.f32 %v11784_v9, %v3859_v48 }
 0x5dd   : > { %15625 = vst [vmem:[#allocation223_spill] sm:$0xff] %v12072_v21  ;;  %v3863_v21 = vmul.f32 %v15630_v51, %v3222_v14  ;;  %v3226_v33 = vsel %vm3072_vm0, 0.0, %v15631_v54  ;;  %v3228_v29 = vsel %vm3072_vm0, 0.0, %v15632_v30  ;;  %v12102_v46 = vsel %vm3072_vm0, 0.0, %v15634_v15  ;;  %v15636_v34 = vld [vmem:[#allocation136_spill] sm:$0xff]  ;;  %v12111_v54 = vpop.permute.xlu0 %4455  ;;  %v15639_v58 = vld [vmem:[#allocation85_spill] sm:$0xff] }
 0x5de   : > { %15635 = vst [vmem:[#allocation222_spill] sm:$0xff] %v12102_v46  ;;  %v3865_v14 = vmul.f32 %v15636_v34, %v3224_v5  ;;  %v15637_v24 = vld [vmem:[#allocation36_spill] sm:$0xff]  ;;  %15638 = vst [vmem:[#allocation227_spill] sm:$0xff] %v12111_v54  ;;  %v12116_v30 = vsel %vm3072_vm0, 0.0, %v15639_v58  ;;  %v15641_v15 = vld [vmem:[#allocation185_spill] sm:$0xff] }
 0x5df   : > { %v3230_v51 = vsel %vm3072_vm0, 0.0, %v15637_v24  ;;  %15640 = vst [vmem:[#allocation224_spill] sm:$0xff] %v12116_v30  ;;  %v12124_v26 = vsel %vm3072_vm0, 0.0, %v15641_v15  ;;  %v15643_v47 = vld [vmem:[#allocation61_spill] sm:$0xff]  ;;  %v15644_v34 = vld [vmem:[#allocation139_spill] sm:$0xff]  ;;  %v15647_v9 = vld [vmem:[#allocation6_spill] sm:$0xff]  ;;  %v12139_v15 = vadd.f32 %v11794_v18, %v3861_v1 }
 0x5e0   : > { %15642 = vst [vmem:[#allocation229_spill] sm:$0xff] %v12124_v26  ;;  %v3232_v5 = vsel %vm3072_vm0, 0.0, %v15643_v47  ;;  %v3867_v24 = vmul.f32 %v15644_v34, %v3226_v33  ;;  %v15645_v54 = vld [vmem:[#allocation145_spill] sm:$0xff]  ;;  %v15646_v45 = vld [vmem:[#allocation23_spill] sm:$0xff]  ;;  %v3236_v48 = vsel %vm3072_vm0, 0.0, %v15647_v9  ;;  %v15648_v30 = vld [vmem:[#allocation112_spill] sm:$0xff]  ;;  %v12147_v33 = vadd.f32 %v11802_v53, %v3863_v21 }
 0x5e1   : > { %v3869_v46 = vmul.f32 %v15645_v54, %v3228_v29  ;;  %v3234_v58 = vsel %vm3072_vm0, 0.0, %v15646_v45  ;;  %3724 = vperm.xlu0 %7370, %v15648_v30   ;;  %v15649_v26 = vld [vmem:[#allocation87_spill] sm:$0xff]  ;;  %v12156_v30 = vadd.f32 %v11812_v60, %v3865_v14  ;;  %v15655_v18 = vld [vmem:[#allocation149_spill] sm:$0xff]  ;;  %v15656_v34 = vld [vmem:[#allocation62_spill] sm:$0xff]  ;;  %v12162_v9 = vpop.permute.xlu0 %4463  ;;  %v12174_v14 = vpop.permute.xlu1 %4331 }
 0x5e2   : > { %v12144_v8 = vsel %vm3072_vm0, 0.0, %v15649_v26  ;;  %v15651_v29 = vld [vmem:[#allocation147_spill] sm:$0xff]  ;;  %v3873_v1 = vmul.f32 %v15655_v18, %v3232_v5  ;;  %v3238_v26 = vsel %vm3072_vm0, 0.0, %v15656_v34  ;;  %15657 = vst [vmem:[#allocation228_spill] sm:$0xff] %v12162_v9  ;;  %v12177_v5 = vadd.f32 %v11820_v32, %v3867_v24  ;;  %v15664_v18 = vld [vmem:[#allocation29_spill] sm:$0xff]  ;;  %v15674_v9 = vld [vmem:[#allocation18_spill] sm:$0xff] }
 0x5e3   : > { %15650 = vst [vmem:[#allocation226_spill] sm:$0xff] %v12144_v8  ;;  %v3871_v54 = vmul.f32 %v15651_v29, %v3230_v51  ;;  %v15652_v45 = vld [vmem:[#allocation59_spill] sm:$0xff]  ;;  %15654 = vst [vmem:[#allocation30_spill] sm:$0xff] %v12156_v30  ;;  %v12182_v34 = vsel %vm3072_vm0, 0.0, %v15664_v18  ;;  %v15671_v32 = vld [vmem:[#allocation89_spill] sm:$0xff] }
 0x5e4   : > { %v12153_v47 = vsel %vm3072_vm0, 0.0, %v15652_v45  ;;  %v15658_v53 = vld [vmem:[#allocation123_spill] sm:$0xff]  ;;  %v15661_v45 = vld [vmem:[#allocation153_spill] sm:$0xff]  ;;  %15663 = vst [vmem:[#allocation233_spill] sm:$0xff] %v12177_v5  ;;  %15665 = vst [vmem:[#allocation37_spill] sm:$0xff] %v12182_v34  ;;  %v12199_v24 = vsel %vm3072_vm0, 0.0, %v15671_v32 }
 0x5e5   : > { %15653 = vst [vmem:[#allocation231_spill] sm:$0xff] %v12153_v47  ;;  %v12167_v21 = vsel %vm3072_vm0, 0.0, %v15658_v53  ;;  %v15660_v51 = vld [vmem:[#allocation151_spill] sm:$0xff]  ;;  %v3877_v47 = vmul.f32 %v15661_v45, %v3236_v48  ;;  %v12185_v53 = vadd.f32 %v11830_v42, %v3869_v46  ;;  %15672 = vst [vmem:[#allocation20_spill] sm:$0xff] %v12199_v24  ;;  %v3242_v42 = vsel %vm3072_vm0, 0.0, %v15674_v9  ;;  %v12217_v24 = vpop.permute.xlu0 %4471  ;;  %v15790_v5 = vld [vmem:[#allocation88_spill] sm:$0xff] }
 0x5e6   : > { %15659 = vst [vmem:[#allocation25_spill] sm:$0xff] %v12167_v21  ;;  %v3875_v29 = vmul.f32 %v15660_v51, %v3234_v58  ;;  %v15662_v8 = vld [vmem:[#allocation19_spill] sm:$0xff]  ;;  %v15667_v58 = vld [vmem:[#allocation125_spill] sm:$0xff]  ;;  %v15669_v51 = vld [vmem:[#allocation178_spill] sm:$0xff]  ;;  %v12206_v46 = vadd.f32 %v11850_v59, %v3873_v1 }
 0x5e7   : > { %v3240_v60 = vsel %vm3072_vm0, 0.0, %v15662_v8  ;;  %15666 = vst [vmem:[#allocation166_spill] sm:$0xff] %v12185_v53  ;;  %v12190_v48 = vsel %vm3072_vm0, 0.0, %v15667_v58  ;;  %3734 = vperm.xlu0 %7370, %v15669_v51   ;;  %v12194_v8 = vadd.f32 %v11838_v11, %v3871_v54  ;;  %v15673_v45 = vld [vmem:[#allocation155_spill] sm:$0xff]  ;;  %v15676_v58 = vld [vmem:[#allocation126_spill] sm:$0xff]  ;;  %v15678_v11 = vld [vmem:[#allocation157_spill] sm:$0xff]  ;;  %v12228_v1 = vadd.f32 %v11867_v28, %v3877_v47 }
 0x5e8   : > { %15668 = vst [vmem:[#allocation46_spill] sm:$0xff] %v12190_v48  ;;  %v3879_v18 = vmul.f32 %v15673_v45, %v3238_v26  ;;  %15675 = vst [vmem:[#allocation235_spill] sm:$0xff] %v12206_v46  ;;  %v12211_v51 = vsel %vm3072_vm0, 0.0, %v15676_v58  ;;  %v3881_v54 = vmul.f32 %v15678_v11, %v3240_v60  ;;  %v15679_v48 = vld [vmem:[#allocation64_spill] sm:$0xff]  ;;  %v12220_v26 = vadd.f32 %v11858_v4, %v3875_v29  ;;  %v15682_v9 = vld [vmem:[#allocation131_spill] sm:$0xff] }
 0x5e9   : > { %15670 = vst [vmem:[#allocation230_spill] sm:$0xff] %v12194_v8  ;;  %15677 = vst [vmem:[#allocation48_spill] sm:$0xff] %v12211_v51  ;;  %v3244_v32 = vsel %vm3072_vm0, 0.0, %v15679_v48  ;;  %v12225_v59 = vsel %vm3072_vm0, 0.0, %v15682_v9  ;;  %v15685_v45 = vld [vmem:[#allocation12_spill] sm:$0xff]  ;;  %v15686_v58 = vld [vmem:[#allocation91_spill] sm:$0xff]  ;;  %v12259_v51 = vpop.permute.xlu1 %4339 }
 0x5ea   : > { %15680 = vst [vmem:[#allocation232_spill] sm:$0xff] %v12217_v24  ;;  %15681 = vst [vmem:[#allocation14_spill] sm:$0xff] %v12220_v26  ;;  %v3246_v60 = vsel %vm3072_vm0, 0.0, %v15685_v45  ;;  %v12236_v48 = vsel %vm3072_vm0, 0.0, %v15686_v58  ;;  %v15688_v11 = vld [vmem:[#allocation159_spill] sm:$0xff]  ;;  %v15689_v29 = vld [vmem:[#allocation16_spill] sm:$0xff] }
 0x5eb   : > { %15683 = vst [vmem:[#allocation237_spill] sm:$0xff] %v12225_v59  ;;  %15684 = vst [vmem:[#allocation51_spill] sm:$0xff] %v12228_v1  ;;  %v3883_v4 = vmul.f32 %v15688_v11, %v3242_v42  ;;  %v3248_v24 = vsel %vm3072_vm0, 0.0, %v15689_v29  ;;  %v15690_v9 = vld [vmem:[#allocation66_spill] sm:$0xff]  ;;  %v15691_v47 = vld [vmem:[#allocation188_spill] sm:$0xff]  ;;  %v12247_v59 = vadd.f32 %v11875_v3, %v3879_v18 }
 0x5ec   : > { %15687 = vst [vmem:[#allocation234_spill] sm:$0xff] %v12236_v48  ;;  %v3250_v28 = vsel %vm3072_vm0, 0.0, %v15690_v9  ;;  %3744 = vperm.xlu0 %7370, %v15691_v47   ;;  %v15693_v45 = vld [vmem:[#allocation129_spill] sm:$0xff]  ;;  %v12262_v9 = vadd.f32 %v11885_v43, %v3881_v54  ;;  %v15698_v3 = vld [vmem:[#allocation163_spill] sm:$0xff]  ;;  %v15705_v54 = vld [vmem:[#allocation28_spill] sm:$0xff] }
 0x5ed   : > { %15692 = vst [vmem:[#allocation15_spill] sm:$0xff] %v12247_v59  ;;  %v12252_v58 = vsel %vm3072_vm0, 0.0, %v15693_v45  ;;  %v15695_v48 = vld [vmem:[#allocation161_spill] sm:$0xff]  ;;  %v3887_v18 = vmul.f32 %v15698_v3, %v3246_v60  ;;  %v15699_v47 = vld [vmem:[#allocation7_spill] sm:$0xff]  ;;  %v3260_v60 = vsel %vm3072_vm0, 0.0, %v15705_v54  ;;  %v15706_v3 = vld [vmem:[#allocation134_spill] sm:$0xff] }
 0x5ee   : > { %15694 = vst [vmem:[#allocation239_spill] sm:$0xff] %v12252_v58  ;;  %v3885_v42 = vmul.f32 %v15695_v48, %v3244_v32  ;;  %v15696_v11 = vld [vmem:[#allocation13_spill] sm:$0xff]  ;;  %15697 = vst [vmem:[#allocation68_spill] sm:$0xff] %v12262_v9  ;;  %v3254_v45 = vsel %vm3072_vm0, 0.0, %v15699_v47  ;;  %v15700_v58 = vld [vmem:[#allocation67_spill] sm:$0xff]  ;;  %v12271_v48 = vpop.permute.xlu0 %4479  ;;  %v12284_v47 = vsel %vm3072_vm0, 0.0, %v15706_v3 }
 0x5ef   : > { %v3252_v29 = vsel %vm3072_vm0, 0.0, %v15696_v11  ;;  %v3256_v32 = vsel %vm3072_vm0, 0.0, %v15700_v58  ;;  %15701 = vst [vmem:[#allocation73_spill] sm:$0xff] %v12271_v48  ;;  %v15702_v11 = vld [vmem:[#allocation165_spill] sm:$0xff]  ;;  %v15703_v34 = vld [vmem:[#allocation167_spill] sm:$0xff]  ;;  %15707 = vst [vmem:[#allocation53_spill] sm:$0xff] %v12284_v47  ;;  %v12287_v58 = vadd.f32 %v11893_v49, %v3883_v4  ;;  %v12307_v9 = vadd.f32 %v11916_v23, %v3887_v18 }
 0x5f0   : > { %v3889_v59 = vmul.f32 %v15702_v11, %v3248_v24  ;;  %v3891_v1 = vmul.f32 %v15703_v34, %v3250_v28  ;;  %v15704_v21 = vld [vmem:[#allocation31_spill] sm:$0xff]  ;;  %v15709_v48 = vld [vmem:[#allocation93_spill] sm:$0xff]  ;;  %v12297_v11 = vadd.f32 %v11901_v63, %v3885_v42  ;;  %v15714_v54 = vld [vmem:[#allocation132_spill] sm:$0xff] }
 0x5f1   : > { %v3258_v43 = vsel %vm3072_vm0, 0.0, %v15704_v21  ;;  %15708 = vst [vmem:[#allocation236_spill] sm:$0xff] %v12287_v58  ;;  %v12292_v34 = vsel %vm3072_vm0, 0.0, %v15709_v48  ;;  %v15711_v24 = vld [vmem:[#allocation169_spill] sm:$0xff]  ;;  %v15712_v21 = vld [vmem:[#allocation190_spill] sm:$0xff]  ;;  %v12302_v3 = vsel %vm3072_vm0, 0.0, %v15714_v54 }
 0x5f2   : > { %15710 = vst [vmem:[#allocation32_spill] sm:$0xff] %v12292_v34  ;;  %v3893_v28 = vmul.f32 %v15711_v24, %v3252_v29  ;;  %3754 = vperm.xlu0 %7370, %v15712_v21   ;;  %15713 = vst [vmem:[#allocation241_spill] sm:$0xff] %v12297_v11  ;;  %v15716_v47 = vld [vmem:[#allocation171_spill] sm:$0xff]  ;;  %v15717_v4 = vld [vmem:[#allocation173_spill] sm:$0xff]  ;;  %v12316_v34 = vpop.permute.xlu0 %4487  ;;  %v12319_v54 = vadd.f32 %v11924_v38, %v3889_v59  ;;  %v12327_v23 = vadd.f32 %v11934_v13, %v3891_v1 }
 0x5f3   : > { %15715 = vst [vmem:[#allocation115_spill] sm:$0xff] %v12302_v3  ;;  %v3895_v49 = vmul.f32 %v15716_v47, %v3254_v45  ;;  %v3897_v58 = vmul.f32 %v15717_v4, %v3256_v32  ;;  %15718 = vst [vmem:[#allocation77_spill] sm:$0xff] %v12307_v9  ;;  %v15719_v48 = vld [vmem:[#allocation137_spill] sm:$0xff]  ;;  %v15721_v24 = vld [vmem:[#allocation175_spill] sm:$0xff] }
 0x5f4   : > { %v12312_v29 = vsel %vm3072_vm0, 0.0, %v15719_v48  ;;  %v3899_v63 = vmul.f32 %v15721_v24, %v3258_v43  ;;  %v15722_v42 = vld [vmem:[#allocation177_spill] sm:$0xff]  ;;  %15723 = vst [vmem:[#allocation238_spill] sm:$0xff] %v12316_v34  ;;  %15724 = vst [vmem:[#allocation27_spill] sm:$0xff] %v12319_v54  ;;  %v15725_v45 = vld [vmem:[#allocation95_spill] sm:$0xff]  ;;  %v12336_v43 = vpop.permute.xlu1 %4347  ;;  %v12339_v38 = vadd.f32 %v11950_v6, %v3893_v28 }
 0x5f5   : > { %15720 = vst [vmem:[#allocation55_spill] sm:$0xff] %v12312_v29  ;;  %v3901_v21 = vmul.f32 %v15722_v42, %v3260_v60  ;;  %v12324_v32 = vsel %vm3072_vm0, 0.0, %v15725_v45  ;;  %15727 = vst [vmem:[#allocation58_spill] sm:$0xff] %v12327_v23  ;;  %v15728_v18 = vld [vmem:[#allocation135_spill] sm:$0xff]  ;;  %v15731_v59 = vld [vmem:[#allocation140_spill] sm:$0xff]  ;;  %v12354_v42 = vadd.f32 %v11962_v17, %v3895_v49  ;;  %v12362_v45 = vadd.f32 %v11970_v0, %v3897_v58 }
 0x5f6   : > { %15726 = vst [vmem:[#allocation243_spill] sm:$0xff] %v12324_v32  ;;  %v12332_v47 = vsel %vm3072_vm0, 0.0, %v15728_v18  ;;  %15730 = vst [vmem:[#allocation57_spill] sm:$0xff] %v12339_v38  ;;  %v12344_v60 = vsel %vm3072_vm0, 0.0, %v15731_v59  ;;  %v15733_v4 = vld [vmem:[#allocation69_spill] sm:$0xff]  ;;  %v15734_v1 = vld [vmem:[#allocation26_spill] sm:$0xff]  ;;  %v12385_v58 = vpop.permute.xlu0 %4495  ;;  %v12478_v29 = vstv %s12334_s23 }
 0x5f7   : > { %15729 = vst [vmem:[#allocation240_spill] sm:$0xff] %v12332_v47  ;;  %15732 = vst [vmem:[#allocation168_spill] sm:$0xff] %v12344_v60  ;;  %v3262_v13 = vsel %vm3072_vm0, 0.0, %v15733_v4  ;;  %v3264_v48 = vsel %vm3072_vm0, 0.0, %v15734_v1  ;;  %v15735_v24 = vld [vmem:[#allocation10_spill] sm:$0xff]  ;;  %v15737_v6 = vld [vmem:[#allocation97_spill] sm:$0xff]  ;;  %v12370_v4 = vadd.f32 %v11993_v44, %v3899_v63  ;;  %v12378_v49 = vadd.f32 %v12004_v10, %v3901_v21 }
 0x5f8   : > { %3764 = vperm.xlu0 %7370, %v15735_v24   ;;  %15736 = vst [vmem:[#allocation116_spill] sm:$0xff] %v12354_v42  ;;  %v12359_v28 = vsel %vm3072_vm0, 0.0, %v15737_v6  ;;  %15739 = vst [vmem:[#allocation50_spill] sm:$0xff] %v12362_v45  ;;  %v15740_v18 = vld [vmem:[#allocation138_spill] sm:$0xff]  ;;  %v15746_v24 = vld [vmem:[#allocation99_spill] sm:$0xff]  ;;  %s7671_s23 = sshll.u32 %s7736_s18, 4  ;;  %s7672_s23 = int_to_ptr.vmem [resolvable:$false] %s7671_s23 }
 0x5f9   : > { %15738 = vst [vmem:[#allocation117_spill] sm:$0xff] %v12359_v28  ;;  %v12367_v59 = vsel %vm3072_vm0, 0.0, %v15740_v18  ;;  %15742 = vst [vmem:[#allocation63_spill] sm:$0xff] %v12370_v4  ;;  %v15743_v1 = vld [vmem:[#allocation142_spill] sm:$0xff]  ;;  %v12383_v0 = vsel %vm3072_vm0, 0.0, %v15746_v24  ;;  %v15749_v6 = vld [vmem:[#allocation179_spill] sm:$0xff]  ;;  %p7674_p0 = scmp.lt.s32.totalorder %s14606_s13, %s7672_s23 }
 0x5fa   : > { %15741 = vst [vmem:[#allocation52_spill] sm:$0xff] %v12367_v59  ;;  %v12375_v17 = vsel %vm3072_vm0, 0.0, %v15743_v1  ;;  %15745 = vst [vmem:[#allocation60_spill] sm:$0xff] %v12378_v49  ;;  %v12388_v18 = vmul.f32 %v15749_v6, %v3262_v13  ;;  %v15750_v44 = vld [vmem:[#allocation141_spill] sm:$0xff]  ;;  %v15752_v1 = vld [vmem:[#allocation183_spill] sm:$0xff]  ;;  %v12460_v47 = vpop.permute.xlu0 %4503  ;;  %s7673_s25 = scalar_lea.vmem %s7672_s23, 8192 }
 0x5fb   : > { %15744 = vst [vmem:[#allocation245_spill] sm:$0xff] %v12375_v17  ;;  %15747 = vst [vmem:[#allocation242_spill] sm:$0xff] %v12383_v0  ;;  %v12393_v63 = vsel %vm3072_vm0, 0.0, %v15750_v44  ;;  %v12396_v17 = vmul.f32 %v15752_v1, %v3264_v48  ;;  %v15754_v10 = vld [vmem:[#allocation143_spill] sm:$0xff]  ;;  %v15756_v24 = vld [vmem:[#allocation21_spill] sm:$0xff] }
 0x5fc   : > { %15748 = vst [vmem:[#allocation65_spill] sm:$0xff] %v12385_v58  ;;  %15751 = vst [vmem:[#allocation246_spill] sm:$0xff] %v12393_v63  ;;  %v12401_v21 = vsel %vm3072_vm0, 0.0, %v15754_v10  ;;  %v3395_v0 = vsel %vm3265_vm1, 0.0, %v15756_v24  ;;  %v15757_v49 = vld [vmem:[#allocation101_spill] sm:$0xff]  ;;  %v15758_v6 = vld [vmem:[#allocation22_spill] sm:$0xff] }
 0x5fd   : > { %15753 = vst [vmem:[#allocation118_spill] sm:$0xff] %v12396_v17  ;;  %15755 = vst [vmem:[#allocation39_spill] sm:$0xff] %v12401_v21  ;;  %v12409_v13 = vsel %vm3265_vm1, 0.0, %v15757_v49  ;;  %v3397_v44 = vsel %vm3265_vm1, 0.0, %v15758_v6  ;;  %v15759_v48 = vld [vmem:[#allocation71_spill] sm:$0xff]  ;;  %v15762_v17 = vld [vmem:[#allocation17_spill] sm:$0xff] }
 0x5fe   : > { %v12417_v1 = vsel %vm3265_vm1, 0.0, %v15759_v48  ;;  %v15760_v10 = vld [vmem:[#allocation43_spill] sm:$0xff]  ;;  %v12428_v49 = vsel %vm3265_vm1, 0.0, %v15762_v17  ;;  %v15763_v63 = vld [vmem:[#allocation74_spill] sm:$0xff]  ;;  %v15764_v59 = vld [vmem:[#allocation72_spill] sm:$0xff]  ;;  %15769 = vst [vmem:[#allocation244_spill] sm:$0xff] %v12460_v47  ;;  %v12541_v53 = vpop.permute.xlu0 %4511 }
 0x5ff   : > { %3774 = vperm.xlu0 %7370, %v15760_v10   ;;  %v15761_v21 = vld [vmem:[#allocation103_spill] sm:$0xff]  ;;  %v3401_v6 = vsel %vm3265_vm1, 0.0, %v15763_v63  ;;  %v12436_v48 = vsel %vm3265_vm1, 0.0, %v15764_v59  ;;  %v12438_v10 = vpop.permute.xlu1 %4355  ;;  %v15765_v28 = vld [vmem:[#allocation76_spill] sm:$0xff]  ;;  %v15766_v4 = vld [vmem:[#allocation105_spill] sm:$0xff]  ;;  %15789 = vst [vmem:[#allocation122_spill] sm:$0xff] %v12541_v53 }
 0x600   : > { %v12423_v24 = vsel %vm3265_vm1, 0.0, %v15761_v21  ;;  %v12443_v21 = vsel %vm3265_vm1, 0.0, %v15765_v28  ;;  %v12448_v17 = vsel %vm3265_vm1, 0.0, %v15766_v4  ;;  %v15767_v45 = vld [vmem:[#allocation111_spill] sm:$0xff]  ;;  %v15770_v42 = vld [vmem:[#allocation144_spill] sm:$0xff]  ;;  %v15771_v32 = vld [vmem:[#allocation109_spill] sm:$0xff] }
 0x601   : > { %v12453_v63 = vsel %vm3265_vm1, 0.0, %v15767_v45  ;;  %v15768_v60 = vld [vmem:[#allocation107_spill] sm:$0xff]  ;;  %v12465_v28 = vsel %vm3265_vm1, 0.0, %v15770_v42  ;;  %v12470_v4 = vsel %vm3265_vm1, 0.0, %v15771_v32  ;;  %v15772_v38 = vld [vmem:[#allocation84_spill] sm:$0xff]  ;;  %v15774_v58 = vld [vmem:[#allocation86_spill] sm:$0xff] }
 0x602   : > { %v12458_v59 = vsel %vm3265_vm1, 0.0, %v15768_v60  ;;  %v12475_v45 = vsel %vm3265_vm1, 0.0, %v15772_v38  ;;  %v15773_v60 = vld [vmem:[#allocation78_spill] sm:$0xff]  ;;  %v12488_v42 = vsel %vm3265_vm1, 0.0, %v15774_v58  ;;  %v15775_v3 = vld [vmem:[#allocation80_spill] sm:$0xff] }
 0x603   : > { %v12483_v47 = vsel %vm3265_vm1, 0.0, %v15773_v60  ;;  %v12493_v32 = vsel %vm3265_vm1, 0.0, %v15775_v3  ;;  %v15776_v23 = vld [vmem:[#allocation152_spill] sm:$0xff]  ;;  %3784 = vperm.xlu0 %7370, %v11551_v12   ;;  %v15777_v34 = vld [vmem:[#allocation82_spill] sm:$0xff]  ;;  %v12563_v53 = vpop.permute.xlu1 %4363 }
 0x604   : > { %v12498_v38 = vsel %vm3265_vm1, 0.0, %v15776_v23  ;;  %v12504_v60 = vsel %vm3265_vm1, 0.0, %v15777_v34  ;;  %v15778_v54 = vld [vmem:[#allocation154_spill] sm:$0xff]  ;;  %v15781_v12 = vld [vmem:[#allocation148_spill] sm:$0xff] }
 0x605   : > { %v12509_v58 = vsel %vm3265_vm1, 0.0, %v15778_v54  ;;  %v15779_v9 = vld [vmem:[#allocation146_spill] sm:$0xff]  ;;  %v12524_v34 = vsel %vm3265_vm1, 0.0, %v15781_v12  ;;  %v15783_v26 = vld [vmem:[#allocation96_spill] sm:$0xff]  ;;  %v12546_v12 = vsel %vm3265_vm1, 0.0, %v15790_v5 }
 0x606   : > { %v12514_v3 = vsel %vm3265_vm1, 0.0, %v15779_v9  ;;  %v15780_v11 = vld [vmem:[#allocation94_spill] sm:$0xff]  ;;  %15782 = vst [vmem:[#allocation119_spill] sm:$0xff] %v12524_v34  ;;  %v12529_v54 = vsel %vm3265_vm1, 0.0, %v15783_v26  ;;  %15791 = vst [vmem:[#allocation56_spill] sm:$0xff] %v12546_v12  ;;  %v15792_v34 = vld [vmem:[#allocation164_spill] sm:$0xff] }
 0x607   : > { %v12519_v23 = vsel %vm3265_vm1, 0.0, %v15780_v11  ;;  %15784 = vst [vmem:[#allocation54_spill] sm:$0xff] %v12529_v54  ;;  %v15785_v46 = vld [vmem:[#allocation150_spill] sm:$0xff]  ;;  %v12551_v26 = vsel %vm3265_vm1, 0.0, %v15792_v34  ;;  %v15800_v12 = vld [vmem:[#allocation172_spill] sm:$0xff] }
 0x608   : > { %v12534_v9 = vsel %vm3265_vm1, 0.0, %v15785_v46  ;;  %v15787_v8 = vld [vmem:[#allocation162_spill] sm:$0xff]  ;;  %15793 = vst [vmem:[#allocation108_spill] sm:$0xff] %v12551_v26  ;;  %v12573_v34 = vsel %vm3265_vm1, 0.0, %v15800_v12  ;;  %v15802_v26 = vld [vmem:[#allocation156_spill] sm:$0xff] }
 0x609   : > { %15786 = vst [vmem:[#allocation40_spill] sm:$0xff] %v12534_v9  ;;  %v12539_v11 = vsel %vm3265_vm1, 0.0, %v15787_v8  ;;  %v15794_v30 = vld [vmem:[#allocation90_spill] sm:$0xff]  ;;  %15801 = vst [vmem:[#allocation181_spill] sm:$0xff] %v12573_v34  ;;  %v15810_v34 = vld [vmem:[#allocation160_spill] sm:$0xff] }
 0x60a   : > { %15788 = vst [vmem:[#allocation120_spill] sm:$0xff] %v12539_v11  ;;  %v12556_v46 = vsel %vm3265_vm1, 0.0, %v15794_v30  ;;  %v15796_v9 = vld [vmem:[#allocation106_spill] sm:$0xff]  ;;  %v15798_v11 = vld [vmem:[#allocation92_spill] sm:$0xff]  ;;  %v12578_v30 = vsel %vm3265_vm1, 0.0, %v15802_v26  ;;  %v4547_v26 = vmul.f32 %v11722_v22, %v3395_v0 }
 0x60b   : > { %15795 = vst [vmem:[#allocation70_spill] sm:$0xff] %v12556_v46  ;;  %v12561_v8 = vsel %vm3265_vm1, 0.0, %v15796_v9  ;;  %v12568_v5 = vsel %vm3265_vm1, 0.0, %v15798_v11  ;;  %15803 = vst [vmem:[#allocation184_spill] sm:$0xff] %v12578_v30  ;;  %v15804_v46 = vld [vmem:[#allocation176_spill] sm:$0xff]  ;;  %v15807_v54 = vld [vmem:[#allocation158_spill] sm:$0xff]  ;;  %v4549_v30 = vmul.f32 %v11611_v56, %v3397_v44  ;;  %v12618_v56 = vpop.permute.xlu0 %4519 }
 0x60c   : > { %15797 = vst [vmem:[#allocation75_spill] sm:$0xff] %v12561_v8  ;;  %15799 = vst [vmem:[#allocation124_spill] sm:$0xff] %v12568_v5  ;;  %v12583_v9 = vsel %vm3265_vm1, 0.0, %v15804_v46  ;;  %v15806_v8 = vld [vmem:[#allocation250_spill] sm:$0xff]  ;;  %v12589_v11 = vsel %vm3265_vm1, 0.0, %v15807_v54  ;;  %v12601_v46 = vsel %vm3265_vm1, 0.0, %v15810_v34 }
 0x60d   : > { %15805 = vst [vmem:[#allocation49_spill] sm:$0xff] %v12583_v9  ;;  %3794 = vperm.xlu0 %7370, %v15806_v8   ;;  %15808 = vst [vmem:[#allocation127_spill] sm:$0xff] %v12589_v11  ;;  %v15809_v5 = vld [vmem:[#allocation114_spill] sm:$0xff]  ;;  %v15812_v8 = vld [vmem:[#allocation8_spill] sm:$0xff] }
 0x60e   : > { %v12594_v12 = vsel %vm3265_vm1, 0.0, %v15809_v5  ;;  %15811 = vst [vmem:[#allocation247_spill] sm:$0xff] %v12601_v46  ;;  %v12606_v9 = vsel %vm3265_vm1, 0.0, %v15812_v8  ;;  %v15813_v54 = vld [vmem:[#allocation98_spill] sm:$0xff]  ;;  %v15815_v5 = vld [vmem:[#allocation41_spill] sm:$0xff]  ;;  %15816 = vst [vmem:[#allocation81_spill] sm:$0xff] %v12618_v56 }
 0x60f   : > { %v12611_v11 = vsel %vm3265_vm1, 0.0, %v15813_v54  ;;  %v12616_v22 = vsel %vm3265_vm1, 0.0, %v15815_v5  ;;  %v15817_v0 = vld [vmem:[#allocation100_spill] sm:$0xff]  ;;  %v15821_v46 = vld [vmem:[#allocation102_spill] sm:$0xff] }
 0x610   : > { %15814 = vst [vmem:[#allocation79_spill] sm:$0xff] %v12611_v11  ;;  %v12623_v44 = vsel %vm3265_vm1, 0.0, %v15817_v0  ;;  %v15819_v34 = vld [vmem:[#allocation248_spill] sm:$0xff]  ;;  %v12633_v54 = vsel %vm3265_vm1, 0.0, %v15821_v46  ;;  %v15823_v11 = vld [vmem:[#allocation251_spill] sm:$0xff] }
 0x611   : > { %15818 = vst [vmem:[#allocation174_spill] sm:$0xff] %v12623_v44  ;;  %v12628_v8 = vsel %vm3265_vm1, 0.0, %v15819_v34  ;;  %15822 = vst [vmem:[#allocation133_spill] sm:$0xff] %v12633_v54  ;;  %v12638_v5 = vsel %vm3265_vm1, 0.0, %v15823_v11  ;;  %v15825_v56 = vld [vmem:[#allocation104_spill] sm:$0xff]  ;;  %v15827_v44 = vld [vmem:[#allocation255_spill] sm:$0xff] }
 0x612   : > { %15820 = vst [vmem:[#allocation130_spill] sm:$0xff] %v12628_v8  ;;  %15824 = vst [vmem:[#allocation121_spill] sm:$0xff] %v12638_v5  ;;  %v12643_v0 = vsel %vm3265_vm1, 0.0, %v15825_v56  ;;  %v12648_v34 = vsel %vm3265_vm1, 0.0, %v15827_v44  ;;  %v15828_v8 = vld [vmem:[#allocation170_spill] sm:$0xff]  ;;  %v12658_v11 = vsel %vm3265_vm1, 0.0, %v11597_v52 }
 0x613   : > { %15826 = vst [vmem:[#allocation128_spill] sm:$0xff] %v12643_v0  ;;  %v12653_v46 = vsel %vm3265_vm1, 0.0, %v15828_v8  ;;  %v15830_v54 = vld [vmem:[#allocation253_spill] sm:$0xff]  ;;  %v15831_v5 = vld [vmem:[#allocation110_spill] sm:$0xff]  ;;  %v12669_v44 = vsel %vm3265_vm1, 0.0, %v11608_v61  ;;  %v4611_v8 = vadd.f32 %v4547_v26, %v12007_v57  ;;  %v12673_v0 = vpop.permute.xlu1 %4371  ;;  %v4551_v61 = vmul.f32 %v11617_v36, %v12423_v24  ;;  %v12688_v57 = vpop.permute.xlu0 %4527  ;;  %v15839_v26 = vld [vmem:[#allocation259_spill] sm:$0xff] }
 0x614   : > { %15829 = vst [vmem:[#allocation83_spill] sm:$0xff] %v12653_v46  ;;  %3804 = vperm.xlu0 %7370, %v15830_v54   ;;  %v12664_v56 = vsel %vm3265_vm1, 0.0, %v15831_v5  ;;  %v4613_v46 = vadd.f32 %v4549_v30, %v12030_v2  ;;  %v15833_v52 = vld [vmem:[#allocation113_spill] sm:$0xff]  ;;  %v12683_v5 = vsel %vm3265_vm1, 0.0, %v11620_v27  ;;  %15836 = vst [vmem:[#allocation185_spill] sm:$0xff] %v12688_v57  ;;  %v15837_v2 = vld [vmem:[#allocation180_spill] sm:$0xff]  ;;  %v4555_v36 = vmul.f32 %v11634_v50, %v12443_v21 }
 0x615   : > { %15832 = vst [vmem:[#allocation136_spill] sm:$0xff] %v12664_v56  ;;  %v12678_v54 = vsel %vm3265_vm1, 0.0, %v15833_v52  ;;  %15835 = vst [vmem:[#allocation85_spill] sm:$0xff] %v12683_v5  ;;  %v4553_v56 = vmul.f32 %v11626_v25, %v3401_v6  ;;  %v12693_v30 = vsel %vm3265_vm1, 0.0, %v15837_v2  ;;  %v12698_v52 = vsel %vm3265_vm1, 0.0, %v15839_v26  ;;  %v15843_v25 = vld [vmem:[#allocation261_spill] sm:$0xff] }
 0x616   : > { %15834 = vst [vmem:[#allocation36_spill] sm:$0xff] %v12678_v54  ;;  %15838 = vst [vmem:[#allocation61_spill] sm:$0xff] %v12693_v30  ;;  %v15841_v54 = vld [vmem:[#allocation33_spill] sm:$0xff]  ;;  %v12710_v24 = vsel %vm3265_vm1, 0.0, %v15843_v25  ;;  %v15845_v6 = vld [vmem:[#allocation11_spill] sm:$0xff]  ;;  %vm4676_vm2 = vcmp.ge.f32.partialorder %v4611_v8, 0.0 }
 0x617   : > { %15840 = vst [vmem:[#allocation139_spill] sm:$0xff] %v12698_v52  ;;  %v12703_v27 = vsel %vm3265_vm1, 0.0, %v15841_v54  ;;  %15844 = vst [vmem:[#allocation23_spill] sm:$0xff] %v12710_v24  ;;  %v12715_v2 = vsel %vm3265_vm1, 0.0, %v15845_v6  ;;  %v15847_v26 = vld [vmem:[#allocation263_spill] sm:$0xff]  ;;  %v15849_v54 = vld [vmem:[#allocation249_spill] sm:$0xff]  ;;  %v4741_v52 = vmul.f32 %v12478_v29, %v4611_v8  ;;  %v4743_v6 = vmul.f32 %v12478_v29, %v4613_v46  ;;  %v12736_v5 = vpop.permute.xlu0 %4535 }
 0x618   : > { %15842 = vst [vmem:[#allocation145_spill] sm:$0xff] %v12703_v27  ;;  %15846 = vst [vmem:[#allocation6_spill] sm:$0xff] %v12715_v2  ;;  %v12720_v57 = vsel %vm3265_vm1, 0.0, %v15847_v26  ;;  %v12725_v27 = vsel %vm3265_vm1, 0.0, %v15849_v54  ;;  %v15850_v50 = vld [vmem:[#allocation254_spill] sm:$0xff]  ;;  %v15852_v25 = vld [vmem:[#allocation257_spill] sm:$0xff]  ;;  %v4615_v2 = vadd.f32 %v4551_v61, %v12038_v41  ;;  %v4617_v26 = vadd.f32 %v4553_v56, %v12046_v39  ;;  %v12751_v61 = vpop.permute.xlu1 %4379 }
 0x619   : > { %15848 = vst [vmem:[#allocation112_spill] sm:$0xff] %v12720_v57  ;;  %3814 = vperm.xlu0 %7370, %v15850_v50   ;;  %v15851_v21 = vld [vmem:[#allocation42_spill] sm:$0xff]  ;;  %v15853_v57 = vld [vmem:[#allocation260_spill] sm:$0xff]  ;;  %15854 = vst [vmem:[#allocation87_spill] sm:$0xff] %v12736_v5  ;;  %vm4678_vm3 = vcmp.ge.f32.partialorder %v4613_v46, 0.0  ;;  %v4619_v41 = vadd.f32 %v4555_v36, %v12063_v62 }
 0x61a   : > { %v4223_v24 = vmul.f32 %v15852_v25, %v15851_v21  ;;  %v4557_v30 = vmul.f32 %v15853_v57, %v12453_v63  ;;  %v15855_v54 = vld [vmem:[#allocation266_spill] sm:$0xff]  ;;  %v15857_v21 = vld [vmem:[#allocation252_spill] sm:$0xff]  ;;  %vm4682_vm4 = vcmp.ge.f32.partialorder %v4617_v26, 0.0  ;;  %vm4680_vm5 = vcmp.ge.f32.partialorder %v4615_v2, 0.0 }
 0x61b   : > { %v12741_v50 = vsel %vm3265_vm1, 0.0, %v15855_v54  ;;  %v12746_v25 = vsel %vm3265_vm1, 0.0, %v15857_v21  ;;  %v15859_v39 = vld [vmem:[#allocation262_spill] sm:$0xff]  ;;  %v15860_v63 = vld [vmem:[#allocation268_spill] sm:$0xff]  ;;  %vm4684_vm6 = vcmp.ge.f32.partialorder %v4619_v41, 0.0 }
 0x61c   : > { %15856 = vst [vmem:[#allocation147_spill] sm:$0xff] %v12741_v50  ;;  %15858 = vst [vmem:[#allocation59_spill] sm:$0xff] %v12746_v25  ;;  %v4559_v56 = vmul.f32 %v15859_v39, %v12465_v28  ;;  %v12756_v57 = vsel %vm3265_vm1, 0.0, %v15860_v63  ;;  %v15862_v5 = vld [vmem:[#allocation256_spill] sm:$0xff]  ;;  %v15865_v21 = vld [vmem:[#allocation270_spill] sm:$0xff]  ;;  %v12773_v39 = vadd.f32 %v4223_v24, %v12388_v18  ;;  %v12789_v18 = vpop.permute.xlu0 %4539  ;;  %v4749_v24 = vmul.f32 %v12478_v29, %v4619_v41 }
 0x61d   : > { %15861 = vst [vmem:[#allocation149_spill] sm:$0xff] %v12756_v57  ;;  %v12761_v54 = vsel %vm3265_vm1, 0.0, %v15862_v5  ;;  %v15864_v50 = vld [vmem:[#allocation44_spill] sm:$0xff]  ;;  %v7633_v28 = vld [vmem:[%s14659_s6 + $0x1e0] sm:$0xff]  ;;  %v15869_v63 = vld [vmem:[#allocation47_spill] sm:$0xff]  ;;  %v12780_v5 = vsel %vm4676_vm2, %v4611_v8, %v4741_v52 }
 0x61e   : > { %15863 = vst [vmem:[#allocation62_spill] sm:$0xff] %v12761_v54  ;;  %v12765_v25 = vmul.f32 %v15865_v21, %v15864_v50  ;;  %v15867_v62 = vld [vmem:[#allocation264_spill] sm:$0xff]  ;;  %3824 = vperm.xlu0 %7370, %v7633_v28   ;;  %15868 = vst [vmem:[#allocation151_spill] sm:$0xff] %v12773_v39  ;;  %v15870_v57 = vld [vmem:[#allocation273_spill] sm:$0xff]  ;;  %v12782_v50 = vsel %vm4678_vm3, %v4613_v46, %v4743_v6  ;;  %v4745_v21 = vmul.f32 %v12478_v29, %v4615_v2 }
 0x61f   : > { %v4561_v36 = vmul.f32 %v15867_v62, %v12475_v45  ;;  %v12777_v40 = vmul.f32 %v15870_v57, %v15869_v63  ;;  %15872 = vst [vmem:[#allocation19_spill] sm:$0xff] %v12780_v5  ;;  %v4747_v45 = vmul.f32 %v12478_v29, %v4617_v26  ;;  %v4621_v62 = vadd.f32 %v4557_v30, %v12075_v31  ;;  %v15873_v28 = vld [vmem:[#allocation265_spill] sm:$0xff]  ;;  %v15875_v46 = vld [vmem:[#allocation258_spill] sm:$0xff]  ;;  %v15876_v6 = vld [vmem:[#allocation267_spill] sm:$0xff] }
 0x620   : > { %15866 = vst [vmem:[#allocation123_spill] sm:$0xff] %v12765_v25  ;;  %v4563_v54 = vmul.f32 %v15873_v28, %v12488_v42  ;;  %15874 = vst [vmem:[#allocation29_spill] sm:$0xff] %v12789_v18  ;;  %v4623_v57 = vadd.f32 %v4559_v56, %v12083_v19  ;;  %v4546_v8 = vmul.f32 %v15875_v46, %v12409_v13  ;;  %v7634_v42 = vld [vmem:[%s14659_s6 + $0x1f0] sm:$0xff]  ;;  %v12807_v56 = vpop.permute.xlu1 %4387  ;;  %v3525_v46 = vpop.permute.xlu0 %3524 }
 0x621   : > { %15871 = vst [vmem:[#allocation153_spill] sm:$0xff] %v12777_v40  ;;  %v4625_v52 = vadd.f32 %v4561_v36, %v12105_v7  ;;  %v4565_v31 = vmul.f32 %v15876_v6, %v12498_v38  ;;  %v4548_v30 = vmul.f32 %v11826_v20, %v12417_v1  ;;  %v12805_v19 = vmul.f32 %v11930_v35, %v12428_v49  ;;  %v4884_v7 = vld [vmem:[%s14661_s8 + $0x80] sm:$0xff] }
 0x622   : > { %3834 = vperm.xlu0 %7370, %v7634_v42   ;;  %v12814_v13 = vmul.f32 %v12780_v5, %v12780_v5  ;;  %v12818_v38 = vmul.f32 %v12782_v50, %v12782_v50  ;;  %v12821_v20 = vsel %vm4682_vm4, %v4617_v26, %v4747_v45  ;;  %v4751_v35 = vmul.f32 %v12478_v29, %v4621_v62  ;;  %v15883_v42 = vld [vmem:[#allocation269_spill] sm:$0xff] }
 0x623   : > { %15877 = vst [vmem:[#allocation125_spill] sm:$0xff] %v12821_v20  ;;  %v4627_v1 = vadd.f32 %v4563_v54, %v12119_v55  ;;  %v12826_v49 = vsel %vm4680_vm5, %v4615_v2, %v4745_v21  ;;  %v12830_v36 = vmul.f32 %v12013_v16, %v12436_v48  ;;  %v12833_v63 = vsel %vm4684_vm6, %v4619_v41, %v4749_v24  ;;  %v15879_v16 = vld [vmem:[#allocation225_spill] sm:$0xff]  ;;  %v4870_v41 = vld [vmem:[%s14661_s8 + $0x10] sm:$0xff]  ;;  %v15881_v24 = vld [vmem:[#allocation187_spill] sm:$0xff] }
 0x624   : > { %15878 = vst [vmem:[#allocation178_spill] sm:$0xff] %v12833_v63  ;;  %vm4686_vm7 = vcmp.ge.f32.partialorder %v4621_v62, 0.0  ;;  %v4753_v28 = vmul.f32 %v12478_v29, %v4623_v57  ;;  %vm4688_vm8 = vcmp.ge.f32.partialorder %v4623_v57, 0.0  ;;  %v4755_v26 = vmul.f32 %v12478_v29, %v4625_v52 }
 0x625   : > { %v4629_v45 = vadd.f32 %v4565_v31, %v12139_v15  ;;  %v3842_v55 = vmul.f32 %v3525_v46, %v12018_v37  ;;  %v12841_v2 = vmul.f32 %v12821_v20, %v12821_v20  ;;  %v12845_v48 = vmul.f32 %v15879_v16, %v12448_v17  ;;  %v12870_v46 = vpop.permute.xlu1 %4395  ;;  %v15885_v16 = vld [vmem:[#allocation219_spill] sm:$0xff] }
 0x626   : > { %5353 = vperm.xlu0 %7370, %v4884_v7   ;;  %vm4690_vm9 = vcmp.ge.f32.partialorder %v4625_v52, 0.0  ;;  %v12852_v54 = vmul.f32 %v12826_v49, %v12826_v49  ;;  %v12854_v15 = vsel %vm4686_vm7, %v4621_v62, %v4751_v35  ;;  %v12858_v37 = vmul.f32 %v12174_v14, %v12458_v59  ;;  %v3535_v62 = vpop.permute.xlu0 %3534 }
 0x627   : > { %15880 = vst [vmem:[#allocation89_spill] sm:$0xff] %v12854_v15  ;;  %v4757_v21 = vmul.f32 %v12478_v29, %v4627_v1  ;;  %v4226_v17 = vadd.f32 %v15881_v24, %v3842_v55  ;;  %v12864_v6 = vmul.f32 %v12833_v63, %v12833_v63  ;;  %v12866_v31 = vsel %vm4688_vm8, %v4623_v57, %v4753_v28 }
 0x628   : > { %15882 = vst [vmem:[#allocation155_spill] sm:$0xff] %v12866_v31  ;;  %v4567_v7 = vmul.f32 %v15883_v42, %v12509_v58  ;;  %vm4692_vm10 = vcmp.ge.f32.partialorder %v4627_v1, 0.0  ;;  %v12872_v35 = vsel %vm4690_vm9, %v4625_v52, %v4755_v26  ;;  %v4759_v14 = vmul.f32 %v12478_v29, %v4629_v45  ;;  %v4932_v52 = vld [vmem:[%s14662_s9] sm:$0xff] }
 0x629   : > { %15884 = vst [vmem:[#allocation18_spill] sm:$0xff] %v12872_v35  ;;  %v4610_v59 = vadd.f32 %v4546_v8, %v4226_v17  ;;  %v3844_v55 = vmul.f32 %v3535_v62, %v15885_v16  ;;  %v12878_v24 = vmul.f32 %v12854_v15, %v12854_v15  ;;  %v12882_v57 = vmul.f32 %v12259_v51, %v12470_v4  ;;  %v15886_v26 = vld [vmem:[#allocation182_spill] sm:$0xff]  ;;  %v15887_v62 = vld [vmem:[#allocation216_spill] sm:$0xff] }
 0x62a   : > { %5283 = vperm.xlu0 %7370, %v4870_v41   ;;  %v12886_v58 = vmul.f32 %v12336_v43, %v12483_v47  ;;  %vm4694_vm11 = vcmp.ge.f32.partialorder %v4629_v45, 0.0  ;;  %v12893_v8 = vmul.f32 %v12866_v31, %v12866_v31  ;;  %v12897_v17 = vsel %vm4692_vm10, %v4627_v1, %v4757_v21  ;;  %v3545_v4 = vpop.permute.xlu0 %3544 }
 0x62b   : > { %v4740_v28 = vmul.f32 %v12478_v29, %v4610_v59  ;;  %v4228_v41 = vadd.f32 %v15886_v26, %v3844_v55  ;;  %v12901_v51 = vmul.f32 %v12872_v35, %v12872_v35  ;;  %v12905_v47 = vmul.f32 %v12438_v10, %v12493_v32  ;;  %v15889_v55 = vld [vmem:[#allocation271_spill] sm:$0xff]  ;;  %v12919_v32 = vpop.permute.xlu1 %4403 }
 0x62c   : > { %v4631_v43 = vadd.f32 %v4567_v7, %v12147_v33  ;;  %vm4675_vm12 = vcmp.ge.f32.partialorder %v4610_v59, 0.0  ;;  %v3846_v16 = vmul.f32 %v3545_v4, %v15887_v62  ;;  %v12911_v1 = vsel %vm4694_vm11, %v4629_v45, %v4759_v14  ;;  %v4888_v33 = vld [vmem:[%s14661_s8 + $0xa0] sm:$0xff] }
 0x62d   : > { %v4612_v42 = vadd.f32 %v4548_v30, %v4228_v41  ;;  %v12909_v40 = vsel %vm4675_vm12, %v4610_v59, %v4740_v28  ;;  %v12915_v21 = vmul.f32 %v12563_v53, %v12504_v60  ;;  %v4569_v10 = vmul.f32 %v15889_v55, %v12519_v23  ;;  %v15890_v23 = vld [vmem:[#allocation191_spill] sm:$0xff]  ;;  %v15891_v59 = vld [vmem:[#allocation54_spill] sm:$0xff] }
 0x62e   : > { %5723 = vperm.xlu0 %7370, %v4932_v52   ;;  %15888 = vst [vmem:[#allocation126_spill] sm:$0xff] %v12909_v40  ;;  %v12926_v30 = vmul.f32 %v12897_v17, %v12897_v17  ;;  %v5067_v45 = vmul.f32 %v12909_v40, %v12909_v40  ;;  %v12932_v53 = vmul.f32 %v12673_v0, %v12514_v3  ;;  %v15892_v52 = vld [vmem:[#allocation272_spill] sm:$0xff]  ;;  %v3555_v26 = vpop.permute.xlu0 %3554  ;;  %v15893_v0 = vld [vmem:[#allocation218_spill] sm:$0xff]  ;;  %vm4696_vm14 = vcmp.ge.f32.partialorder %v4631_v43, 0.0 }
 0x62f   : > { %v4742_v60 = vmul.f32 %v12478_v29, %v4612_v42  ;;  %v4230_v7 = vadd.f32 %v15890_v23, %v3846_v16  ;;  %vm4677_vm13 = vcmp.ge.f32.partialorder %v4612_v42, 0.0  ;;  %v4761_v14 = vmul.f32 %v12478_v29, %v4631_v43  ;;  %v15895_v55 = vld [vmem:[#allocation30_spill] sm:$0xff] }
 0x630   : > { %v4571_v28 = vmul.f32 %v15892_v52, %v15891_v59  ;;  %v4996_v41 = vadd.f32 %v12780_v5, %v12909_v40  ;;  %v12943_v4 = vmul.f32 %v12911_v1, %v12911_v1  ;;  %v3848_v62 = vmul.f32 %v3555_v26, %v15893_v0  ;;  %v4950_v59 = vld [vmem:[%s14662_s9 + $0x90] sm:$0xff]  ;;  %v12964_v0 = vpop.permute.xlu1 %4411 }
 0x631   : > { %v4614_v3 = vadd.f32 %v12805_v19, %v4230_v7  ;;  %v12947_v16 = vsel %vm4677_vm13, %v4612_v42, %v4742_v60  ;;  %v4633_v23 = vadd.f32 %v4569_v10, %v15895_v55  ;;  %v5131_v52 = vadd.f32 %v12814_v13, %v5067_v45  ;;  %v15896_v19 = vld [vmem:[#allocation119_spill] sm:$0xff]  ;;  %v15898_v10 = vld [vmem:[#allocation233_spill] sm:$0xff] }
 0x632   : > { %5373 = vperm.xlu0 %7370, %v4888_v33   ;;  %15894 = vst [vmem:[#allocation157_spill] sm:$0xff] %v12947_v16  ;;  %v5069_v5 = vmul.f32 %v12947_v16, %v12947_v16  ;;  %v4997_v40 = vadd.f32 %v4996_v41, %v12947_v16  ;;  %v12959_v7 = vmul.f32 %v12751_v61, %v15896_v19  ;;  %v15897_v33 = vld [vmem:[#allocation186_spill] sm:$0xff]  ;;  %v3565_v55 = vpop.permute.xlu0 %3564  ;;  %v15899_v41 = vld [vmem:[#allocation120_spill] sm:$0xff]  ;;  %v15901_v19 = vld [vmem:[#allocation223_spill] sm:$0xff] }
 0x633   : > { %v4744_v42 = vmul.f32 %v12478_v29, %v4614_v3  ;;  %v4232_v60 = vadd.f32 %v15897_v33, %v3848_v62  ;;  %vm4679_vm15 = vcmp.ge.f32.partialorder %v4614_v3, 0.0  ;;  %v4635_v26 = vadd.f32 %v4571_v28, %v15898_v10  ;;  %v15900_v16 = vld [vmem:[#allocation274_spill] sm:$0xff] }
 0x634   : > { %v5132_v13 = vadd.f32 %v5131_v52, %v5069_v5  ;;  %v12966_v45 = vsel %vm4696_vm14, %v4631_v43, %v4761_v14  ;;  %v4998_v18 = vadd.f32 %v4997_v40, %v12782_v50  ;;  %v4573_v25 = vmul.f32 %v15900_v16, %v15899_v41  ;;  %v4872_v28 = vld [vmem:[%s14661_s8 + $0x20] sm:$0xff]  ;;  %v15902_v16 = vld [vmem:[#allocation193_spill] sm:$0xff]  ;;  %v12992_v41 = vpop.permute.xlu1 %4419 }
 0x635   : > { %v4616_v61 = vadd.f32 %v12830_v36, %v4232_v60  ;;  %v3850_v39 = vmul.f32 %v3565_v55, %v15901_v19  ;;  %v12973_v62 = vsel %vm4679_vm15, %v4614_v3, %v4744_v42  ;;  %vm4698_vm0 = vcmp.ge.f32.partialorder %v4633_v23, 0.0  ;;  %v15903_v60 = vld [vmem:[#allocation166_spill] sm:$0xff]  ;;  %v4934_v19 = vld [vmem:[%s14662_s9 + $0x10] sm:$0xff] }
 0x636   : > { %5813 = vperm.xlu0 %7370, %v4950_v59   ;;  %v5071_v5 = vmul.f32 %v12973_v62, %v12973_v62  ;;  %v4999_v40 = vadd.f32 %v4998_v18, %v12973_v62  ;;  %v5133_v43 = vadd.f32 %v5132_v13, %v12818_v38  ;;  %v4763_v14 = vmul.f32 %v12478_v29, %v4633_v23  ;;  %v3575_v52 = vpop.permute.xlu0 %3574  ;;  %v15905_v38 = vld [vmem:[#allocation220_spill] sm:$0xff] }
 0x637   : > { %vm4681_vm1 = vcmp.ge.f32.partialorder %v4616_v61, 0.0  ;;  %v4746_v36 = vmul.f32 %v12478_v29, %v4616_v61  ;;  %v4234_v3 = vadd.f32 %v15902_v16, %v3850_v39  ;;  %vm4700_vm2 = vcmp.ge.f32.partialorder %v4635_v26, 0.0 }
 0x638   : > { %v4765_v59 = vmul.f32 %v12478_v29, %v4635_v26  ;;  %v5000_v42 = vadd.f32 %v4999_v40, %v12826_v49  ;;  %v5134_v33 = vadd.f32 %v5133_v43, %v5071_v5  ;;  %v4637_v10 = vadd.f32 %v4573_v25, %v15903_v60  ;;  %v15907_v43 = vld [vmem:[#allocation9_spill] sm:$0xff] }
 0x639   : > { %v12988_v55 = vsel %vm4681_vm1, %v4616_v61, %v4746_v36  ;;  %v4618_v18 = vadd.f32 %v12845_v48, %v4234_v3  ;;  %v3852_v13 = vmul.f32 %v3575_v52, %v15905_v38  ;;  %v13001_v5 = vmul.f32 %v12966_v45, %v12966_v45  ;;  %v15906_v61 = vld [vmem:[#allocation40_spill] sm:$0xff] }
 0x63a   : > { %15904 = vst [vmem:[#allocation64_spill] sm:$0xff] %v12988_v55  ;;  %5293 = vperm.xlu0 %7370, %v4872_v28   ;;  %v5073_v39 = vmul.f32 %v12988_v55, %v12988_v55  ;;  %v5001_v25 = vadd.f32 %v5000_v42, %v12988_v55  ;;  %v5135_v48 = vadd.f32 %v5134_v33, %v12852_v54  ;;  %v3585_v52 = vpop.permute.xlu0 %3584  ;;  %vm4702_vm4 = vcmp.ge.f32.partialorder %v4637_v10, 0.0  ;;  %v15909_v33 = vld [vmem:[#allocation222_spill] sm:$0xff] }
 0x63b   : > { %v13007_v28 = vmul.f32 %v12807_v56, %v15906_v61  ;;  %vm4683_vm3 = vcmp.ge.f32.partialorder %v4618_v18, 0.0  ;;  %v4748_v40 = vmul.f32 %v12478_v29, %v4618_v18  ;;  %v4236_v36 = vadd.f32 %v15907_v43, %v3852_v13 }
 0x63c   : > { %v13012_v16 = vsel %vm4698_vm0, %v4633_v23, %v4763_v14  ;;  %v13015_v3 = vsel %vm4700_vm2, %v4635_v26, %v4765_v59  ;;  %v5002_v42 = vadd.f32 %v5001_v25, %v12821_v20  ;;  %v5136_v60 = vadd.f32 %v5135_v48, %v5073_v39  ;;  %v4890_v26 = vld [vmem:[%s14661_s8 + $0xb0] sm:$0xff]  ;;  %v15911_v39 = vld [vmem:[#allocation34_spill] sm:$0xff]  ;;  %v15924_v20 = vld [vmem:[#allocation229_spill] sm:$0xff] }
 0x63d   : > { %v13018_v54 = vsel %vm4683_vm3, %v4618_v18, %v4748_v40  ;;  %v4620_v56 = vadd.f32 %v12858_v37, %v4236_v36  ;;  %v3854_v38 = vmul.f32 %v3585_v52, %v15909_v33  ;;  %v4767_v13 = vmul.f32 %v12478_v29, %v4637_v10  ;;  %v15910_v18 = vld [vmem:[#allocation108_spill] sm:$0xff]  ;;  %v13042_v36 = vpop.permute.xlu1 %4427 }
 0x63e   : > { %15908 = vst [vmem:[#allocation131_spill] sm:$0xff] %v13018_v54  ;;  %5733 = vperm.xlu0 %7370, %v4934_v19   ;;  %v5075_v23 = vmul.f32 %v13018_v54, %v13018_v54  ;;  %v5003_v14 = vadd.f32 %v5002_v42, %v13018_v54  ;;  %v5137_v59 = vadd.f32 %v5136_v60, %v12841_v2  ;;  %v15912_v19 = vld [vmem:[#allocation189_spill] sm:$0xff]  ;;  %v15913_v40 = vld [vmem:[#allocation56_spill] sm:$0xff]  ;;  %v3595_v52 = vpop.permute.xlu0 %3594 }
 0x63f   : > { %v4575_v25 = vmul.f32 %v15911_v39, %v15910_v18  ;;  %vm4685_vm5 = vcmp.ge.f32.partialorder %v4620_v56, 0.0  ;;  %v4750_v37 = vmul.f32 %v12478_v29, %v4620_v56  ;;  %v4238_v48 = vadd.f32 %v15912_v19, %v3854_v38  ;;  %v15915_v18 = vld [vmem:[#allocation224_spill] sm:$0xff] }
 0x640   : > { %v13036_v61 = vmul.f32 %v13012_v16, %v13012_v16  ;;  %v13040_v43 = vmul.f32 %v12870_v46, %v15913_v40  ;;  %v5004_v2 = vadd.f32 %v5003_v14, %v12833_v63  ;;  %v5138_v42 = vadd.f32 %v5137_v59, %v5075_v23  ;;  %v4952_v23 = vld [vmem:[%s14662_s9 + $0xa0] sm:$0xff]  ;;  %v15919_v40 = vld [vmem:[#allocation75_spill] sm:$0xff] }
 0x641   : > { %v13047_v60 = vmul.f32 %v13015_v3, %v13015_v3  ;;  %v13049_v33 = vsel %vm4685_vm5, %v4620_v56, %v4750_v37  ;;  %v4622_v38 = vadd.f32 %v12882_v57, %v4238_v48  ;;  %v3856_v39 = vmul.f32 %v3595_v52, %v15915_v18  ;;  %v15916_v59 = vld [vmem:[#allocation230_spill] sm:$0xff] }
 0x642   : > { %15914 = vst [vmem:[#allocation12_spill] sm:$0xff] %v13049_v33  ;;  %5383 = vperm.xlu0 %7370, %v4890_v26   ;;  %v13054_v46 = vsel %vm4702_vm4, %v4637_v10, %v4767_v13  ;;  %v5077_v19 = vmul.f32 %v13049_v33, %v13049_v33  ;;  %v5005_v14 = vadd.f32 %v5004_v2, %v13049_v33  ;;  %v15917_v26 = vld [vmem:[#allocation24_spill] sm:$0xff]  ;;  %v15918_v10 = vld [vmem:[#allocation70_spill] sm:$0xff]  ;;  %v3605_v54 = vpop.permute.xlu0 %3604  ;;  %v15921_v33 = vld [vmem:[#allocation181_spill] sm:$0xff] }
 0x643   : > { %v5139_v56 = vadd.f32 %v5138_v42, %v12864_v6  ;;  %v4639_v37 = vadd.f32 %v4575_v25, %v15916_v59  ;;  %vm4687_vm6 = vcmp.ge.f32.partialorder %v4622_v38, 0.0  ;;  %v4752_v57 = vmul.f32 %v12478_v29, %v4622_v38  ;;  %v15920_v52 = vld [vmem:[#allocation38_spill] sm:$0xff]  ;;  %v15922_v6 = vld [vmem:[#allocation205_spill] sm:$0xff] }
 0x644   : > { %v4240_v48 = vadd.f32 %v15917_v26, %v3856_v39  ;;  %v13068_v13 = vmul.f32 %v12919_v32, %v15918_v10  ;;  %v4577_v18 = vmul.f32 %v15920_v52, %v15919_v40  ;;  %v5006_v63 = vadd.f32 %v5005_v14, %v12854_v15  ;;  %v13083_v26 = vpop.permute.xlu1 %4435  ;;  %v15927_v52 = vld [vmem:[#allocation14_spill] sm:$0xff] }
 0x645   : > { %v5140_v2 = vadd.f32 %v5139_v56, %v5077_v19  ;;  %v4579_v42 = vmul.f32 %v15922_v6, %v15921_v33  ;;  %v13075_v25 = vsel %vm4687_vm6, %v4622_v38, %v4752_v57  ;;  %v3858_v39 = vmul.f32 %v3605_v54, %v15924_v20  ;;  %v4874_v33 = vld [vmem:[%s14661_s8 + $0x30] sm:$0xff]  ;;  %v15925_v19 = vld [vmem:[#allocation195_spill] sm:$0xff] }
 0x646   : > { %15923 = vst [vmem:[#allocation91_spill] sm:$0xff] %v13075_v25  ;;  %v4624_v59 = vadd.f32 %v12886_v58, %v4240_v48  ;;  %5823 = vperm.xlu0 %7370, %v4952_v23   ;;  %v13081_v32 = vmul.f32 %v13054_v46, %v13054_v46  ;;  %v5079_v14 = vmul.f32 %v13075_v25, %v13075_v25  ;;  %vm4704_vm8 = vcmp.ge.f32.partialorder %v4639_v37, 0.0  ;;  %v15926_v56 = vld [vmem:[#allocation235_spill] sm:$0xff]  ;;  %v3615_v48 = vpop.permute.xlu0 %3614 }
 0x647   : > { %v5007_v38 = vadd.f32 %v5006_v63, %v13075_v25  ;;  %v5141_v58 = vadd.f32 %v5140_v2, %v12878_v24  ;;  %v4769_v20 = vmul.f32 %v12478_v29, %v4639_v37  ;;  %v4242_v23 = vadd.f32 %v15925_v19, %v3858_v39  ;;  %v15929_v24 = vld [vmem:[#allocation226_spill] sm:$0xff]  ;;  %v15930_v25 = vld [vmem:[#allocation124_spill] sm:$0xff] }
 0x648   : > { %vm4689_vm7 = vcmp.ge.f32.partialorder %v4624_v59, 0.0  ;;  %v4754_v54 = vmul.f32 %v12478_v29, %v4624_v59  ;;  %v4641_v57 = vadd.f32 %v4577_v18, %v15926_v56  ;;  %v4643_v6 = vadd.f32 %v4579_v42, %v15927_v52  ;;  %v4936_v39 = vld [vmem:[%s14662_s9 + $0x20] sm:$0xff] }
 0x649   : > { %v5008_v10 = vadd.f32 %v5007_v38, %v12866_v31  ;;  %v5142_v40 = vadd.f32 %v5141_v58, %v5079_v14  ;;  %v4626_v63 = vadd.f32 %v12905_v47, %v4242_v23  ;;  %v3860_v2 = vmul.f32 %v3615_v48, %v15929_v24  ;;  %v4892_v48 = vld [vmem:[%s14661_s8 + $0xc0] sm:$0xff]  ;;  %v15934_v24 = vld [vmem:[#allocation49_spill] sm:$0xff] }
 0x64a   : > { %v13098_v15 = vsel %vm4689_vm7, %v4624_v59, %v4754_v54  ;;  %5303 = vperm.xlu0 %7370, %v4874_v33   ;;  %v13104_v55 = vmul.f32 %v12964_v0, %v15930_v25  ;;  %v13113_v14 = vsel %vm4704_vm8, %v4639_v37, %v4769_v20  ;;  %v15932_v33 = vld [vmem:[#allocation35_spill] sm:$0xff]  ;;  %vm4706_vm10 = vcmp.ge.f32.partialorder %v4641_v57, 0.0  ;;  %v13118_v25 = vpop.permute.xlu1 %4443  ;;  %v3625_v58 = vpop.permute.xlu0 %3624 }
 0x64b   : > { %15928 = vst [vmem:[#allocation159_spill] sm:$0xff] %v13098_v15  ;;  %v5081_v18 = vmul.f32 %v13098_v15, %v13098_v15  ;;  %v5009_v42 = vadd.f32 %v5008_v10, %v13098_v15  ;;  %v5143_v59 = vadd.f32 %v5142_v40, %v12893_v8  ;;  %15931 = vst [vmem:[#allocation16_spill] sm:$0xff] %v13113_v14  ;;  %vm4691_vm9 = vcmp.ge.f32.partialorder %v4626_v63, 0.0  ;;  %v15933_v8 = vld [vmem:[#allocation231_spill] sm:$0xff] }
 0x64c   : > { %v4756_v47 = vmul.f32 %v12478_v29, %v4626_v63  ;;  %v4244_v38 = vadd.f32 %v15932_v33, %v3860_v2  ;;  %v4771_v0 = vmul.f32 %v12478_v29, %v4641_v57  ;;  %vm4708_vm11 = vcmp.ge.f32.partialorder %v4643_v6, 0.0  ;;  %v15950_v15 = vld [vmem:[#allocation247_spill] sm:$0xff] }
 0x64d   : > { %v5010_v54 = vadd.f32 %v5009_v42, %v12872_v35  ;;  %v5144_v19 = vadd.f32 %v5143_v59, %v5081_v18  ;;  %v3862_v37 = vmul.f32 %v3625_v58, %v15933_v8  ;;  %v4773_v56 = vmul.f32 %v12478_v29, %v4643_v6  ;;  %v15937_v59 = vld [vmem:[#allocation184_spill] sm:$0xff] }
 0x64e   : > { %v4628_v23 = vadd.f32 %v12915_v21, %v4244_v38  ;;  %5743 = vperm.xlu0 %7370, %v4936_v39   ;;  %v13123_v20 = vsel %vm4691_vm9, %v4626_v63, %v4756_v47  ;;  %v15935_v21 = vld [vmem:[#allocation213_spill] sm:$0xff]  ;;  %v15936_v63 = vld [vmem:[#allocation192_spill] sm:$0xff]  ;;  %v13139_v42 = vmul.f32 %v13113_v14, %v13113_v14  ;;  %v13143_v47 = vmul.f32 %v12992_v41, %v15937_v59  ;;  %v3635_v33 = vpop.permute.xlu0 %3634 }
 0x64f   : > { %v5083_v10 = vmul.f32 %v13123_v20, %v13123_v20  ;;  %v5011_v40 = vadd.f32 %v5010_v54, %v13123_v20  ;;  %v5145_v52 = vadd.f32 %v5144_v19, %v12901_v51  ;;  %v4581_v2 = vmul.f32 %v15935_v21, %v15934_v24  ;;  %v15939_v19 = vld [vmem:[#allocation25_spill] sm:$0xff]  ;;  %v13156_v21 = vpop.permute.xlu1 %4451  ;;  %v4954_v41 = vld [vmem:[%s14662_s9 + $0xb0] sm:$0xff] }
 0x650   : > { %v4758_v18 = vmul.f32 %v12478_v29, %v4628_v23  ;;  %v4246_v39 = vadd.f32 %v15936_v63, %v3862_v37  ;;  %vm4693_vm12 = vcmp.ge.f32.partialorder %v4628_v23, 0.0  ;;  %v13147_v58 = vsel %vm4706_vm10, %v4641_v57, %v4771_v0 }
 0x651   : > { %v5012_v38 = vadd.f32 %v5011_v40, %v12897_v17  ;;  %v5146_v51 = vadd.f32 %v5145_v52, %v5083_v10  ;;  %15938 = vst [vmem:[#allocation66_spill] sm:$0xff] %v13147_v58  ;;  %v3864_v8 = vmul.f32 %v3635_v33, %v15939_v19  ;;  %v13154_v24 = vsel %vm4708_vm11, %v4643_v6, %v4773_v56  ;;  %v15941_v10 = vld [vmem:[#allocation51_spill] sm:$0xff]  ;;  %v15942_v40 = vld [vmem:[#allocation197_spill] sm:$0xff]  ;;  %v15943_v52 = vld [vmem:[#allocation214_spill] sm:$0xff] }
 0x652   : > { %v4630_v54 = vadd.f32 %v12932_v53, %v4246_v39  ;;  %5393 = vperm.xlu0 %7370, %v4892_v48   ;;  %v13151_v37 = vsel %vm4693_vm12, %v4628_v23, %v4758_v18  ;;  %15940 = vst [vmem:[#allocation188_spill] sm:$0xff] %v13154_v24  ;;  %v4645_v48 = vadd.f32 %v4581_v2, %v15941_v10  ;;  %v3645_v63 = vpop.permute.xlu0 %3644  ;;  %v15944_v33 = vld [vmem:[#allocation127_spill] sm:$0xff] }
 0x653   : > { %v5085_v57 = vmul.f32 %v13151_v37, %v13151_v37  ;;  %v5013_v0 = vadd.f32 %v5012_v38, %v13151_v37  ;;  %v5147_v53 = vadd.f32 %v5146_v51, %v12926_v30  ;;  %v4248_v6 = vadd.f32 %v15942_v40, %v3864_v8  ;;  %v15945_v38 = vld [vmem:[#allocation37_spill] sm:$0xff] }
 0x654   : > { %v4760_v23 = vmul.f32 %v12478_v29, %v4630_v54  ;;  %vm4695_vm13 = vcmp.ge.f32.partialorder %v4630_v54, 0.0  ;;  %v13170_v56 = vmul.f32 %v13147_v58, %v13147_v58  ;;  %v4583_v18 = vmul.f32 %v15943_v52, %v12594_v12 }
 0x655   : > { %v5014_v39 = vadd.f32 %v5013_v0, %v12911_v1  ;;  %v5148_v59 = vadd.f32 %v5147_v53, %v5085_v57  ;;  %v13177_v30 = vmul.f32 %v13042_v36, %v15944_v33  ;;  %v4632_v2 = vadd.f32 %v12959_v7, %v4248_v6  ;;  %v15946_v53 = vld [vmem:[#allocation194_spill] sm:$0xff] }
 0x656   : > { %v3866_v51 = vmul.f32 %v3645_v63, %v15945_v38  ;;  %5833 = vperm.xlu0 %7370, %v4954_v41   ;;  %v13181_v19 = vsel %vm4695_vm13, %v4630_v54, %v4760_v23  ;;  %v13185_v8 = vmul.f32 %v13154_v24, %v13154_v24  ;;  %v4775_v36 = vmul.f32 %v12478_v29, %v4645_v48  ;;  %v15947_v54 = vld [vmem:[#allocation15_spill] sm:$0xff]  ;;  %v13195_v23 = vpop.permute.xlu1 %4459  ;;  %v3655_v40 = vpop.permute.xlu0 %3654  ;;  %v15948_v63 = vld [vmem:[#allocation221_spill] sm:$0xff]  ;;  %v15949_v33 = vld [vmem:[#allocation46_spill] sm:$0xff] }
 0x657   : > { %v5087_v12 = vmul.f32 %v13181_v19, %v13181_v19  ;;  %v5015_v57 = vadd.f32 %v5014_v39, %v13181_v19  ;;  %v5149_v0 = vadd.f32 %v5148_v59, %v12943_v4  ;;  %vm4697_vm14 = vcmp.ge.f32.partialorder %v4632_v2, 0.0 }
 0x658   : > { %v4762_v7 = vmul.f32 %v12478_v29, %v4632_v2  ;;  %v4250_v41 = vadd.f32 %v15946_v53, %v3866_v51  ;;  %vm4710_vm15 = vcmp.ge.f32.partialorder %v4645_v48, 0.0  ;;  %v4647_v10 = vadd.f32 %v4583_v18, %v15947_v54 }
 0x659   : > { %v5016_v6 = vadd.f32 %v5015_v57, %v12966_v45  ;;  %v5150_v52 = vadd.f32 %v5149_v0, %v5087_v12  ;;  %v4585_v39 = vmul.f32 %v15948_v63, %v12606_v9  ;;  %v3868_v38 = vmul.f32 %v3655_v40, %v15949_v33 }
 0x65a   : > { %v13200_v4 = vsel %vm4697_vm14, %v4632_v2, %v4762_v7  ;;  %v4634_v59 = vadd.f32 %v13007_v28, %v4250_v41  ;;  %v13206_v51 = vmul.f32 %v13083_v26, %v15950_v15  ;;  %v13212_v57 = vsel %vm4710_vm15, %v4645_v48, %v4775_v36  ;;  %v15952_v2 = vld [vmem:[#allocation199_spill] sm:$0xff]  ;;  %v3665_v7 = vpop.permute.xlu0 %3664  ;;  %v15953_v41 = vld [vmem:[#allocation68_spill] sm:$0xff] }
 0x65b   : > { %v5089_v18 = vmul.f32 %v13200_v4, %v13200_v4  ;;  %v5017_v53 = vadd.f32 %v5016_v6, %v13200_v4  ;;  %v5151_v12 = vadd.f32 %v5150_v52, %v13001_v5  ;;  %15951 = vst [vmem:[#allocation129_spill] sm:$0xff] %v13212_v57  ;;  %v4252_v28 = vadd.f32 %v15952_v2, %v3868_v38  ;;  %v15954_v48 = vld [vmem:[#allocation20_spill] sm:$0xff]  ;;  %v13227_v52 = vpop.permute.xlu1 %4467 }
 0x65c   : > { %vm4699_vm0 = vcmp.ge.f32.partialorder %v4634_v59, 0.0  ;;  %v4764_v9 = vmul.f32 %v12478_v29, %v4634_v59  ;;  %vm4712_vm1 = vcmp.ge.f32.partialorder %v4647_v10, 0.0  ;;  %v4777_v0 = vmul.f32 %v12478_v29, %v4647_v10 }
 0x65d   : > { %v5018_v15 = vadd.f32 %v5017_v53, %v13012_v16  ;;  %v5152_v26 = vadd.f32 %v5151_v12, %v5089_v18  ;;  %v4649_v54 = vadd.f32 %v4585_v39, %v15953_v41  ;;  %v4636_v5 = vadd.f32 %v13040_v43, %v4252_v28  ;;  %v15955_v39 = vld [vmem:[#allocation227_spill] sm:$0xff]  ;;  %v15956_v18 = vld [vmem:[#allocation196_spill] sm:$0xff] }
 0x65e   : > { %v13219_v40 = vsel %vm4699_vm0, %v4634_v59, %v4764_v9  ;;  %v3870_v36 = vmul.f32 %v3665_v7, %v15954_v48  ;;  %v13225_v6 = vmul.f32 %v13212_v57, %v13212_v57  ;;  %v4587_v59 = vmul.f32 %v15955_v39, %v12616_v22  ;;  %v15958_v9 = vld [vmem:[#allocation79_spill] sm:$0xff]  ;;  %v3675_v28 = vpop.permute.xlu0 %3674 }
 0x65f   : > { %v5091_v63 = vmul.f32 %v13219_v40, %v13219_v40  ;;  %v5019_v33 = vadd.f32 %v5018_v15, %v13219_v40  ;;  %v5153_v38 = vadd.f32 %v5152_v26, %v13036_v61  ;;  %vm4701_vm2 = vcmp.ge.f32.partialorder %v4636_v5, 0.0  ;;  %v15959_v26 = vld [vmem:[#allocation48_spill] sm:$0xff] }
 0x660   : > { %v4766_v43 = vmul.f32 %v12478_v29, %v4636_v5  ;;  %v4254_v53 = vadd.f32 %v15956_v18, %v3870_v36  ;;  %v13238_v12 = vsel %vm4712_vm1, %v4647_v10, %v4777_v0  ;;  %v13242_v2 = vmul.f32 %v13118_v25, %v15958_v9  ;;  %v15960_v36 = vld [vmem:[#allocation236_spill] sm:$0xff] }
 0x661   : > { %15957 = vst [vmem:[#allocation161_spill] sm:$0xff] %v13238_v12  ;;  %v5020_v7 = vadd.f32 %v5019_v33, %v13015_v3  ;;  %v5154_v15 = vadd.f32 %v5153_v38, %v5091_v63  ;;  %vm4714_vm3 = vcmp.ge.f32.partialorder %v4649_v54, 0.0  ;;  %v3872_v41 = vmul.f32 %v3675_v28, %v15959_v26  ;;  %v15962_v38 = vld [vmem:[#allocation130_spill] sm:$0xff] }
 0x662   : > { %v13245_v61 = vsel %vm4701_vm2, %v4636_v5, %v4766_v43  ;;  %v4638_v22 = vadd.f32 %v13068_v13, %v4254_v53  ;;  %v4779_v48 = vmul.f32 %v12478_v29, %v4649_v54  ;;  %v4651_v39 = vadd.f32 %v4587_v59, %v15960_v36  ;;  %v15961_v5 = vld [vmem:[#allocation201_spill] sm:$0xff]  ;;  %v15963_v43 = vld [vmem:[#allocation228_spill] sm:$0xff]  ;;  %v13263_v53 = vpop.permute.xlu1 %4475  ;;  %v3685_v9 = vpop.permute.xlu0 %3684 }
 0x663   : > { %v5093_v10 = vmul.f32 %v13245_v61, %v13245_v61  ;;  %v5021_v0 = vadd.f32 %v5020_v7, %v13245_v61  ;;  %v5155_v25 = vadd.f32 %v5154_v15, %v13047_v60  ;;  %v4256_v33 = vadd.f32 %v15961_v5, %v3872_v41  ;;  %v15964_v7 = vld [vmem:[#allocation174_spill] sm:$0xff]  ;;  %v15966_v41 = vld [vmem:[#allocation237_spill] sm:$0xff] }
 0x664   : > { %vm4703_vm4 = vcmp.ge.f32.partialorder %v4638_v22, 0.0  ;;  %v4768_v63 = vmul.f32 %v12478_v29, %v4638_v22  ;;  %v13259_v13 = vmul.f32 %v13238_v12, %v13238_v12  ;;  %v4589_v18 = vmul.f32 %v15963_v43, %v15962_v38 }
 0x665   : > { %v5022_v28 = vadd.f32 %v5021_v0, %v13054_v46  ;;  %v5156_v60 = vadd.f32 %v5155_v25, %v5093_v10  ;;  %v13268_v59 = vmul.f32 %v13156_v21, %v15964_v7  ;;  %v4640_v26 = vadd.f32 %v13104_v55, %v4256_v33  ;;  %v15969_v55 = vld [vmem:[#allocation241_spill] sm:$0xff]  ;;  %v15971_v7 = vld [vmem:[#allocation232_spill] sm:$0xff] }
 0x666   : > { %v13270_v15 = vsel %vm4703_vm4, %v4638_v22, %v4768_v63  ;;  %v3874_v36 = vmul.f32 %v3685_v9, %v15966_v41  ;;  %v13275_v5 = vsel %vm4714_vm3, %v4649_v54, %v4779_v48  ;;  %v4781_v0 = vmul.f32 %v12478_v29, %v4651_v39  ;;  %v15968_v22 = vld [vmem:[#allocation198_spill] sm:$0xff]  ;;  %v3695_v33 = vpop.permute.xlu0 %3694  ;;  %v15970_v9 = vld [vmem:[#allocation121_spill] sm:$0xff] }
 0x667   : > { %15965 = vst [vmem:[#allocation13_spill] sm:$0xff] %v13270_v15  ;;  %15967 = vst [vmem:[#allocation163_spill] sm:$0xff] %v13275_v5  ;;  %v5095_v38 = vmul.f32 %v13270_v15, %v13270_v15  ;;  %v5023_v43 = vadd.f32 %v5022_v28, %v13270_v15  ;;  %v5157_v10 = vadd.f32 %v5156_v60, %v13081_v32  ;;  %vm4705_vm5 = vcmp.ge.f32.partialorder %v4640_v26, 0.0  ;;  %v15973_v60 = vld [vmem:[#allocation234_spill] sm:$0xff]  ;;  %v16082_v15 = vld [vmem:[#allocation64_spill] sm:$0xff] }
 0x668   : > { %v4770_v21 = vmul.f32 %v12478_v29, %v4640_v26  ;;  %v4258_v25 = vadd.f32 %v15968_v22, %v3874_v36  ;;  %vm4716_vm6 = vcmp.ge.f32.partialorder %v4651_v39, 0.0  ;;  %v4653_v63 = vadd.f32 %v4589_v18, %v15969_v55  ;;  %v13296_v36 = vpop.permute.xlu1 %4483 }
 0x669   : > { %v5024_v54 = vadd.f32 %v5023_v43, %v13113_v14  ;;  %v5158_v48 = vadd.f32 %v5157_v10, %v5095_v38  ;;  %v4591_v41 = vmul.f32 %v15971_v7, %v15970_v9  ;;  %v3876_v35 = vmul.f32 %v3695_v33, %v15973_v60  ;;  %v15976_v9 = vld [vmem:[#allocation77_spill] sm:$0xff] }
 0x66a   : > { %v13288_v28 = vsel %vm4705_vm5, %v4640_v26, %v4770_v21  ;;  %v4642_v32 = vadd.f32 %v13143_v47, %v4258_v25  ;;  %v13294_v31 = vmul.f32 %v13275_v5, %v13275_v5  ;;  %v13302_v10 = vsel %vm4716_vm6, %v4651_v39, %v4781_v0  ;;  %v15975_v26 = vld [vmem:[#allocation203_spill] sm:$0xff]  ;;  %v3705_v25 = vpop.permute.xlu0 %3704 }
 0x66b   : > { %15972 = vst [vmem:[#allocation7_spill] sm:$0xff] %v13288_v28  ;;  %v5097_v18 = vmul.f32 %v13288_v28, %v13288_v28  ;;  %v5025_v38 = vadd.f32 %v5024_v54, %v13288_v28  ;;  %v5159_v43 = vadd.f32 %v5158_v48, %v13139_v42  ;;  %15974 = vst [vmem:[#allocation67_spill] sm:$0xff] %v13302_v10  ;;  %vm4718_vm8 = vcmp.ge.f32.partialorder %v4653_v63, 0.0  ;;  %v15978_v39 = vld [vmem:[#allocation239_spill] sm:$0xff]  ;;  %v15979_v54 = vld [vmem:[#allocation133_spill] sm:$0xff] }
 0x66c   : > { %vm4707_vm7 = vcmp.ge.f32.partialorder %v4642_v32, 0.0  ;;  %v4772_v47 = vmul.f32 %v12478_v29, %v4642_v32  ;;  %v4260_v21 = vadd.f32 %v15975_v26, %v3876_v35  ;;  %v4783_v22 = vmul.f32 %v12478_v29, %v4653_v63  ;;  %v4989_v28 = vld [vmem:[%s14662_s9 + $0x1c8] sm:$0xff] }
 0x66d   : > { %v5026_v55 = vadd.f32 %v5025_v38, %v13147_v58  ;;  %v5160_v33 = vadd.f32 %v5159_v43, %v5097_v18  ;;  %v4655_v7 = vadd.f32 %v4591_v41, %v15976_v9  ;;  %v3878_v0 = vmul.f32 %v3705_v25, %v15978_v39  ;;  %v15980_v18 = vld [vmem:[#allocation73_spill] sm:$0xff] }
 0x66e   : > { %v13309_v60 = vsel %vm4707_vm7, %v4642_v32, %v4772_v47  ;;  %v4644_v42 = vadd.f32 %v13177_v30, %v4260_v21  ;;  %v13315_v48 = vmul.f32 %v13195_v23, %v15979_v54  ;;  %v4593_v41 = vmul.f32 %v15980_v18, %v12648_v34  ;;  %v15981_v30 = vld [vmem:[#allocation200_spill] sm:$0xff]  ;;  %v13332_v21 = vpop.permute.xlu1 %4491  ;;  %v3715_v25 = vpop.permute.xlu0 %3714  ;;  %v15984_v9 = vld [vmem:[#allocation53_spill] sm:$0xff]  ;;  %v15985_v18 = vld [vmem:[#allocation27_spill] sm:$0xff] }
 0x66f   : > { %15977 = vst [vmem:[#allocation165_spill] sm:$0xff] %v13309_v60  ;;  %v5099_v35 = vmul.f32 %v13309_v60, %v13309_v60  ;;  %v5027_v26 = vadd.f32 %v5026_v55, %v13309_v60  ;;  %v5161_v38 = vadd.f32 %v5160_v33, %v13170_v56  ;;  %v4262_v43 = vadd.f32 %v15981_v30, %v3878_v0 }
 0x670   : > { %vm4709_vm9 = vcmp.ge.f32.partialorder %v4644_v42, 0.0  ;;  %v4774_v32 = vmul.f32 %v12478_v29, %v4644_v42  ;;  %v13327_v47 = vmul.f32 %v13302_v10, %v13302_v10  ;;  %v13330_v23 = vsel %vm4718_vm8, %v4653_v63, %v4783_v22 }
 0x671   : > { %15982 = vst [vmem:[#allocation167_spill] sm:$0xff] %v13330_v23  ;;  %v5028_v56 = vadd.f32 %v5027_v26, %v13154_v24  ;;  %v5162_v55 = vadd.f32 %v5161_v38, %v5099_v35  ;;  %vm4720_vm10 = vcmp.ge.f32.partialorder %v4655_v7, 0.0  ;;  %v4646_v33 = vadd.f32 %v13206_v51, %v4262_v43  ;;  %v15987_v38 = vld [vmem:[#allocation128_spill] sm:$0xff] }
 0x672   : > { %v13335_v34 = vsel %vm4709_vm9, %v4644_v42, %v4774_v32  ;;  %v3880_v39 = vmul.f32 %v3715_v25, %v15984_v9  ;;  %v4785_v0 = vmul.f32 %v12478_v29, %v4655_v7  ;;  %v4657_v30 = vadd.f32 %v4593_v41, %v15985_v18  ;;  %v15986_v42 = vld [vmem:[#allocation202_spill] sm:$0xff]  ;;  %v3725_v25 = vpop.permute.xlu0 %3724 }
 0x673   : > { %15983 = vst [vmem:[#allocation31_spill] sm:$0xff] %v13335_v34  ;;  %v5101_v54 = vmul.f32 %v13335_v34, %v13335_v34  ;;  %v5163_v63 = vadd.f32 %v5162_v55, %v13185_v8  ;;  %v5029_v22 = vadd.f32 %v5028_v56, %v13335_v34  ;;  %vm4711_vm11 = vcmp.ge.f32.partialorder %v4646_v33, 0.0  ;;  %v15988_v32 = vld [vmem:[#allocation238_spill] sm:$0xff]  ;;  %v15990_v55 = vld [vmem:[#allocation32_spill] sm:$0xff] }
 0x674   : > { %v4776_v35 = vmul.f32 %v12478_v29, %v4646_v33  ;;  %v4264_v26 = vadd.f32 %v15986_v42, %v3880_v39  ;;  %v4590_v51 = vmul.f32 %v13227_v52, %v15987_v38  ;;  %v4595_v43 = vmul.f32 %v15988_v32, %v12658_v11  ;;  %v13363_v52 = vpop.permute.xlu1 %4499  ;;  %v15993_v42 = vld [vmem:[#allocation58_spill] sm:$0xff]  ;;  %v15994_v32 = vld [vmem:[#allocation83_spill] sm:$0xff] }
 0x675   : > { %v5030_v9 = vadd.f32 %v5029_v22, %v13212_v57  ;;  %v5164_v60 = vadd.f32 %v5163_v63, %v5101_v54  ;;  %v13354_v8 = vmul.f32 %v13330_v23, %v13330_v23  ;;  %v3882_v39 = vmul.f32 %v3725_v25, %v15990_v55  ;;  %v4908_v57 = vld [vmem:[%s14661_s8 + $0x140] sm:$0xff] }
 0x676   : > { %v13356_v41 = vsel %vm4711_vm11, %v4646_v33, %v4776_v35  ;;  %v4648_v56 = vadd.f32 %v13242_v2, %v4264_v26  ;;  %v13361_v18 = vsel %vm4720_vm10, %v4655_v7, %v4785_v0  ;;  %v4787_v22 = vmul.f32 %v12478_v29, %v4657_v30  ;;  %v15992_v2 = vld [vmem:[#allocation207_spill] sm:$0xff]  ;;  %v3735_v0 = vpop.permute.xlu0 %3734 }
 0x677   : > { %15989 = vst [vmem:[#allocation28_spill] sm:$0xff] %v13356_v41  ;;  %15991 = vst [vmem:[#allocation134_spill] sm:$0xff] %v13361_v18  ;;  %v5103_v11 = vmul.f32 %v13356_v41, %v13356_v41  ;;  %v5031_v54 = vadd.f32 %v5030_v9, %v13356_v41  ;;  %v5165_v63 = vadd.f32 %v5164_v60, %v13225_v6  ;;  %vm4722_vm13 = vcmp.ge.f32.partialorder %v4657_v30, 0.0  ;;  %v15996_v60 = vld [vmem:[#allocation115_spill] sm:$0xff] }
 0x678   : > { %vm4713_vm12 = vcmp.ge.f32.partialorder %v4648_v56, 0.0  ;;  %v4778_v33 = vmul.f32 %v12478_v29, %v4648_v56  ;;  %v4266_v35 = vadd.f32 %v15992_v2, %v3882_v39  ;;  %v4659_v7 = vadd.f32 %v4595_v43, %v15993_v42 }
 0x679   : > { %v5032_v26 = vadd.f32 %v5031_v54, %v13238_v12  ;;  %v5166_v38 = vadd.f32 %v5165_v63, %v5103_v11  ;;  %v4592_v25 = vmul.f32 %v13263_v53, %v15994_v32  ;;  %v3884_v55 = vmul.f32 %v3735_v0, %v15996_v60  ;;  %v16002_v32 = vld [vmem:[#allocation136_spill] sm:$0xff] }
 0x67a   : > { %v13376_v9 = vsel %vm4713_vm12, %v4648_v56, %v4778_v33  ;;  %v4650_v6 = vadd.f32 %v13268_v59, %v4266_v35  ;;  %v13382_v41 = vmul.f32 %v13361_v18, %v13361_v18  ;;  %v13388_v54 = vsel %vm4722_vm13, %v4657_v30, %v4787_v22  ;;  %v15998_v56 = vld [vmem:[#allocation204_spill] sm:$0xff]  ;;  %v15999_v33 = vld [vmem:[#allocation65_spill] sm:$0xff]  ;;  %v13395_v35 = vpop.permute.xlu1 %4507  ;;  %v3745_v42 = vpop.permute.xlu0 %3744  ;;  %v16001_v22 = vld [vmem:[#allocation55_spill] sm:$0xff] }
 0x67b   : > { %15995 = vst [vmem:[#allocation93_spill] sm:$0xff] %v13376_v9  ;;  %v5105_v43 = vmul.f32 %v13376_v9, %v13376_v9  ;;  %v5033_v39 = vadd.f32 %v5032_v26, %v13376_v9  ;;  %v5167_v11 = vadd.f32 %v5166_v38, %v13259_v13  ;;  %15997 = vst [vmem:[#allocation169_spill] sm:$0xff] %v13388_v54  ;;  %vm4724_vm15 = vcmp.ge.f32.partialorder %v4659_v7, 0.0 }
 0x67c   : > { %vm4715_vm14 = vcmp.ge.f32.partialorder %v4650_v6, 0.0  ;;  %v4780_v53 = vmul.f32 %v12478_v29, %v4650_v6  ;;  %v4268_v59 = vadd.f32 %v15998_v56, %v3884_v55  ;;  %v4789_v63 = vmul.f32 %v12478_v29, %v4659_v7 }
 0x67d   : > { %v4597_v2 = vmul.f32 %v15999_v33, %v12669_v44  ;;  %v5034_v0 = vadd.f32 %v5033_v39, %v13275_v5  ;;  %v5168_v26 = vadd.f32 %v5167_v11, %v5105_v43  ;;  %v3886_v38 = vmul.f32 %v3745_v42, %v16001_v22  ;;  %v16007_v22 = vld [vmem:[#allocation244_spill] sm:$0xff] }
 0x67e   : > { %v13398_v13 = vsel %vm4715_vm14, %v4650_v6, %v4780_v53  ;;  %v4652_v30 = vadd.f32 %v13315_v48, %v4268_v59  ;;  %v4594_v60 = vmul.f32 %v13296_v36, %v16002_v32  ;;  %v13410_v43 = vmul.f32 %v13388_v54, %v13388_v54  ;;  %v16003_v48 = vld [vmem:[#allocation209_spill] sm:$0xff]  ;;  %v3755_v59 = vpop.permute.xlu0 %3754  ;;  %v16010_v5 = vld [vmem:[#allocation36_spill] sm:$0xff] }
 0x67f   : > { %16000 = vst [vmem:[#allocation190_spill] sm:$0xff] %v13398_v13  ;;  %v5107_v55 = vmul.f32 %v13398_v13, %v13398_v13  ;;  %v5035_v44 = vadd.f32 %v5034_v0, %v13398_v13  ;;  %v5169_v56 = vadd.f32 %v5168_v26, %v13294_v31  ;;  %v4270_v39 = vadd.f32 %v16003_v48, %v3886_v38  ;;  %v16005_v53 = vld [vmem:[#allocation57_spill] sm:$0xff]  ;;  %v16009_v13 = vld [vmem:[#allocation243_spill] sm:$0xff]  ;;  %v13425_v38 = vpop.permute.xlu1 %4515 }
 0x680   : > { %vm4717_vm0 = vcmp.ge.f32.partialorder %v4652_v30, 0.0  ;;  %v4782_v6 = vmul.f32 %v12478_v29, %v4652_v30  ;;  %v13414_v11 = vsel %vm4724_vm15, %v4659_v7, %v4789_v63  ;;  %v4661_v36 = vadd.f32 %v4597_v2, %v16005_v53  ;;  %v16006_v0 = vld [vmem:[#allocation85_spill] sm:$0xff]  ;;  %v16014_v53 = vld [vmem:[#allocation240_spill] sm:$0xff] }
 0x681   : > { %16004 = vst [vmem:[#allocation132_spill] sm:$0xff] %v13414_v11  ;;  %v5036_v33 = vadd.f32 %v5035_v44, %v13302_v10  ;;  %v5170_v42 = vadd.f32 %v5169_v56, %v5107_v55  ;;  %v4599_v31 = vmul.f32 %v16007_v22, %v16006_v0  ;;  %v4654_v32 = vadd.f32 %v4590_v51, %v4270_v39  ;;  %v4984_v10 = vld [vmem:[%s14662_s9 + $0x1a0] sm:$0xff] }
 0x682   : > { %v13420_v26 = vsel %vm4717_vm0, %v4652_v30, %v4782_v6  ;;  %v3888_v9 = vmul.f32 %v3755_v59, %v16009_v13  ;;  %v4596_v12 = vmul.f32 %v13332_v21, %v16010_v5  ;;  %v13433_v55 = vmul.f32 %v13414_v11, %v13414_v11  ;;  %v16011_v13 = vld [vmem:[#allocation206_spill] sm:$0xff]  ;;  %v3765_v21 = vpop.permute.xlu0 %3764  ;;  %v16012_v6 = vld [vmem:[#allocation116_spill] sm:$0xff] }
 0x683   : > { %16008 = vst [vmem:[#allocation171_spill] sm:$0xff] %v13420_v26  ;;  %v5109_v7 = vmul.f32 %v13420_v26, %v13420_v26  ;;  %v5037_v63 = vadd.f32 %v5036_v33, %v13420_v26  ;;  %v5171_v2 = vadd.f32 %v5170_v42, %v13327_v47  ;;  %vm4719_vm1 = vcmp.ge.f32.partialorder %v4654_v32, 0.0  ;;  %v16015_v33 = vld [vmem:[#allocation61_spill] sm:$0xff] }
 0x684   : > { %v4784_v51 = vmul.f32 %v12478_v29, %v4654_v32  ;;  %v4272_v30 = vadd.f32 %v16011_v13, %v3888_v9  ;;  %vm4726_vm2 = vcmp.ge.f32.partialorder %v4661_v36, 0.0  ;;  %v4791_v5 = vmul.f32 %v12478_v29, %v4661_v36  ;;  %v16016_v13 = vld [vmem:[#allocation139_spill] sm:$0xff] }
 0x685   : > { %v5038_v44 = vadd.f32 %v5037_v63, %v13330_v23  ;;  %v5172_v56 = vadd.f32 %v5171_v2, %v5109_v7  ;;  %v4663_v48 = vadd.f32 %v4599_v31, %v16012_v6  ;;  %v3890_v59 = vmul.f32 %v3765_v21, %v16014_v53  ;;  %v16017_v63 = vld [vmem:[#allocation122_spill] sm:$0xff]  ;;  %v13458_v21 = vpop.permute.xlu1 %4523 }
 0x686   : > { %v13440_v39 = vsel %vm4719_vm1, %v4654_v32, %v4784_v51  ;;  %v4656_v47 = vadd.f32 %v4592_v25, %v4272_v30  ;;  %v4598_v42 = vmul.f32 %v13363_v52, %v16015_v33  ;;  %v4601_v7 = vmul.f32 %v16017_v63, %v16016_v13  ;;  %v16018_v32 = vld [vmem:[#allocation211_spill] sm:$0xff]  ;;  %v16021_v52 = vld [vmem:[#allocation81_spill] sm:$0xff]  ;;  %v3775_v6 = vpop.permute.xlu0 %3774  ;;  %v16023_v33 = vld [vmem:[#allocation168_spill] sm:$0xff] }
 0x687   : > { %16013 = vst [vmem:[#allocation173_spill] sm:$0xff] %v13440_v39  ;;  %v5111_v9 = vmul.f32 %v13440_v39, %v13440_v39  ;;  %v5039_v0 = vadd.f32 %v5038_v44, %v13440_v39  ;;  %v5173_v22 = vadd.f32 %v5172_v56, %v13354_v8  ;;  %v4274_v25 = vadd.f32 %v16018_v32, %v3890_v59  ;;  %v16020_v51 = vld [vmem:[#allocation23_spill] sm:$0xff]  ;;  %v16024_v32 = vld [vmem:[#allocation50_spill] sm:$0xff] }
 0x688   : > { %vm4721_vm3 = vcmp.ge.f32.partialorder %v4656_v47, 0.0  ;;  %v4786_v31 = vmul.f32 %v12478_v29, %v4656_v47  ;;  %v13454_v2 = vsel %vm4726_vm2, %v4661_v36, %v4791_v5  ;;  %v4603_v30 = vmul.f32 %v16021_v52, %v16020_v51 }
 0x689   : > { %16019 = vst [vmem:[#allocation137_spill] sm:$0xff] %v13454_v2  ;;  %v5040_v44 = vadd.f32 %v5039_v0, %v13361_v18  ;;  %v5174_v8 = vadd.f32 %v5173_v22, %v5111_v9  ;;  %vm4728_vm4 = vcmp.ge.f32.partialorder %v4663_v48, 0.0  ;;  %v4658_v53 = vadd.f32 %v4594_v60, %v4274_v25  ;;  %v16025_v0 = vld [vmem:[#allocation208_spill] sm:$0xff]  ;;  %v16026_v22 = vld [vmem:[#allocation63_spill] sm:$0xff] }
 0x68a   : > { %v13461_v56 = vsel %vm4721_vm3, %v4656_v47, %v4786_v31  ;;  %v3892_v13 = vmul.f32 %v3775_v6, %v16023_v33  ;;  %v4793_v59 = vmul.f32 %v12478_v29, %v4663_v48  ;;  %v4665_v51 = vadd.f32 %v4601_v7, %v16024_v32  ;;  %v3785_v25 = vpop.permute.xlu0 %3784  ;;  %v16027_v33 = vld [vmem:[#allocation145_spill] sm:$0xff] }
 0x68b   : > { %16022 = vst [vmem:[#allocation175_spill] sm:$0xff] %v13461_v56  ;;  %v5113_v36 = vmul.f32 %v13461_v56, %v13461_v56  ;;  %v5041_v5 = vadd.f32 %v5040_v44, %v13461_v56  ;;  %v5175_v63 = vadd.f32 %v5174_v8, %v13382_v41  ;;  %vm4723_vm5 = vcmp.ge.f32.partialorder %v4658_v53, 0.0  ;;  %v16029_v8 = vld [vmem:[#allocation117_spill] sm:$0xff] }
 0x68c   : > { %v4788_v9 = vmul.f32 %v12478_v29, %v4658_v53  ;;  %v4276_v47 = vadd.f32 %v16025_v0, %v3892_v13  ;;  %v5118_v60 = vmul.f32 %v13454_v2, %v13454_v2  ;;  %v4667_v31 = vadd.f32 %v4603_v30, %v16026_v22  ;;  %v13484_v13 = vpop.permute.xlu1 %4531 }
 0x68d   : > { %v5042_v52 = vadd.f32 %v5041_v5, %v13388_v54  ;;  %v5176_v6 = vadd.f32 %v5175_v63, %v5113_v36  ;;  %v4600_v44 = vmul.f32 %v13395_v35, %v16027_v33  ;;  %v3894_v32 = vmul.f32 %v3785_v25, %v16029_v8  ;;  %v16033_v25 = vld [vmem:[#allocation52_spill] sm:$0xff]  ;;  %v16041_v54 = vld [vmem:[#allocation245_spill] sm:$0xff] }
 0x68e   : > { %v13478_v41 = vsel %vm4723_vm5, %v4658_v53, %v4788_v9  ;;  %v4660_v7 = vadd.f32 %v4596_v12, %v4276_v47  ;;  %v13482_v56 = vsel %vm4728_vm4, %v4663_v48, %v4793_v59  ;;  %vm4730_vm6 = vcmp.ge.f32.partialorder %v4665_v51, 0.0  ;;  %v16031_v53 = vld [vmem:[#allocation210_spill] sm:$0xff]  ;;  %v3795_v48 = vpop.permute.xlu0 %3794 }
 0x68f   : > { %16028 = vst [vmem:[#allocation177_spill] sm:$0xff] %v13478_v41  ;;  %16030 = vst [vmem:[#allocation95_spill] sm:$0xff] %v13482_v56  ;;  %v5115_v30 = vmul.f32 %v13478_v41, %v13478_v41  ;;  %v5043_v0 = vadd.f32 %v5042_v52, %v13478_v41  ;;  %v5177_v36 = vadd.f32 %v5176_v6, %v13410_v43  ;;  %vm4732_vm8 = vcmp.ge.f32.partialorder %v4667_v31, 0.0  ;;  %v16034_v52 = vld [vmem:[#allocation112_spill] sm:$0xff]  ;;  %v16035_v6 = vld [vmem:[#allocation185_spill] sm:$0xff] }
 0x690   : > { %vm4725_vm7 = vcmp.ge.f32.partialorder %v4660_v7, 0.0  ;;  %v4790_v35 = vmul.f32 %v12478_v29, %v4660_v7  ;;  %v4278_v12 = vadd.f32 %v16031_v53, %v3894_v32  ;;  %v4795_v5 = vmul.f32 %v12478_v29, %v4665_v51 }
 0x691   : > { %v5044_v59 = vadd.f32 %v5043_v0, %v13414_v11  ;;  %v5178_v63 = vadd.f32 %v5177_v36, %v5115_v30  ;;  %v4797_v9 = vmul.f32 %v12478_v29, %v4667_v31  ;;  %v3896_v43 = vmul.f32 %v3795_v48, %v16033_v25  ;;  %v16036_v0 = vld [vmem:[#allocation215_spill] sm:$0xff]  ;;  %v4160_v48 = vpop.permute.xlu1 %4159 }
 0x692   : > { %v13495_v47 = vsel %vm4725_vm7, %v4660_v7, %v4790_v35  ;;  %v4662_v22 = vadd.f32 %v4598_v42, %v4278_v12  ;;  %v4605_v33 = vmul.f32 %v16035_v6, %v16034_v52  ;;  %v5120_v30 = vmul.f32 %v13482_v56, %v13482_v56  ;;  %v16038_v35 = vld [vmem:[#allocation6_spill] sm:$0xff] }
 0x693   : > { %16032 = vst [vmem:[#allocation135_spill] sm:$0xff] %v13495_v47  ;;  %v5117_v8 = vmul.f32 %v13495_v47, %v13495_v47  ;;  %v5045_v32 = vadd.f32 %v5044_v59, %v13495_v47  ;;  %v5179_v53 = vadd.f32 %v5178_v63, %v13433_v55  ;;  %v4280_v42 = vadd.f32 %v16036_v0, %v3896_v43  ;;  %v3805_v25 = vpop.permute.xlu0 %3804  ;;  %v16042_v43 = vld [vmem:[#allocation60_spill] sm:$0xff] }
 0x694   : > { %vm4727_vm9 = vcmp.ge.f32.partialorder %v4662_v22, 0.0  ;;  %v4792_v7 = vmul.f32 %v12478_v29, %v4662_v22  ;;  %v13509_v36 = vsel %vm4730_vm6, %v4665_v51, %v4795_v5  ;;  %v4602_v12 = vmul.f32 %v13425_v38, %v16038_v35 }
 0x695   : > { %16037 = vst [vmem:[#allocation140_spill] sm:$0xff] %v13509_v36  ;;  %v5046_v59 = vadd.f32 %v5045_v32, %v13454_v2  ;;  %v5180_v52 = vadd.f32 %v5179_v53, %v5117_v8  ;;  %v13515_v55 = vsel %vm4732_vm8, %v4667_v31, %v4797_v9  ;;  %v4664_v6 = vadd.f32 %v4600_v44, %v4280_v42  ;;  %v16043_v9 = vld [vmem:[#allocation212_spill] sm:$0xff]  ;;  %v16045_v8 = vld [vmem:[#allocation87_spill] sm:$0xff] }
 0x696   : > { %16039 = vst [vmem:[#allocation69_spill] sm:$0xff] %v13515_v55  ;;  %v13517_v63 = vsel %vm4727_vm9, %v4662_v22, %v4792_v7  ;;  %v3898_v39 = vmul.f32 %v3805_v25, %v16041_v54  ;;  %v4669_v0 = vadd.f32 %v4605_v33, %v16042_v43  ;;  %v5122_v32 = vmul.f32 %v13509_v36, %v13509_v36  ;;  %v16044_v54 = vld [vmem:[#allocation147_spill] sm:$0xff] }
 0x697   : > { %16040 = vst [vmem:[#allocation26_spill] sm:$0xff] %v13517_v63  ;;  %v5119_v51 = vmul.f32 %v13517_v63, %v13517_v63  ;;  %v5047_v38 = vadd.f32 %v5046_v59, %v13517_v63  ;;  %v5181_v5 = vadd.f32 %v5180_v52, %v5118_v60  ;;  %vm4729_vm10 = vcmp.ge.f32.partialorder %v4664_v6, 0.0  ;;  %v16047_v59 = vld [vmem:[#allocation242_spill] sm:$0xff] }
 0x698   : > { %v4794_v31 = vmul.f32 %v12478_v29, %v4664_v6  ;;  %v4282_v22 = vadd.f32 %v16043_v9, %v3898_v39  ;;  %v4604_v44 = vmul.f32 %v13458_v21, %v12725_v27  ;;  %v4607_v33 = vmul.f32 %v16045_v8, %v16044_v54  ;;  %v3815_v53 = vpop.permute.xlu0 %3814  ;;  %v4544_v39 = vpop.permute.xlu1 %4543  ;;  %v16048_v9 = vld [vmem:[#allocation45_spill] sm:$0xff] }
 0x699   : > { %v5048_v7 = vadd.f32 %v5047_v38, %v13482_v56  ;;  %v5182_v42 = vadd.f32 %v5181_v5, %v5119_v51  ;;  %v5124_v60 = vmul.f32 %v13515_v55, %v13515_v55  ;;  %v3900_v52 = vmul.f32 %v3815_v53, %v16047_v59  ;;  %v16049_v38 = vld [vmem:[#allocation217_spill] sm:$0xff] }
 0x69a   : > { %v13535_v35 = vsel %vm4729_vm10, %v4664_v6, %v4794_v31  ;;  %v4666_v25 = vadd.f32 %v4602_v12, %v4282_v22  ;;  %vm4734_vm11 = vcmp.ge.f32.partialorder %v4669_v0, 0.0  ;;  %v4225_v54 = vmul.f32 %v4160_v48, %v16048_v9  ;;  %v16050_v12 = vld [vmem:[#allocation151_spill] sm:$0xff]  ;;  %v16051_v59 = vld [vmem:[#allocation149_spill] sm:$0xff] }
 0x69b   : > { %16046 = vst [vmem:[#allocation10_spill] sm:$0xff] %v13535_v35  ;;  %v5121_v27 = vmul.f32 %v13535_v35, %v13535_v35  ;;  %v5049_v21 = vadd.f32 %v5048_v7, %v13535_v35  ;;  %v5183_v43 = vadd.f32 %v5182_v42, %v5120_v30  ;;  %v4284_v5 = vadd.f32 %v16049_v38, %v3900_v52  ;;  %v16053_v7 = vld [vmem:[#allocation246_spill] sm:$0xff]  ;;  %v16054_v42 = vld [vmem:[#allocation59_spill] sm:$0xff] }
 0x69c   : > { %vm4731_vm12 = vcmp.ge.f32.partialorder %v4666_v25, 0.0  ;;  %v4796_v51 = vmul.f32 %v12478_v29, %v4666_v25  ;;  %v4799_v6 = vmul.f32 %v12478_v29, %v4669_v0  ;;  %v4671_v31 = vadd.f32 %v4607_v33, %v16050_v12  ;;  %v16055_v12 = vld [vmem:[#allocation118_spill] sm:$0xff] }
 0x69d   : > { %v3825_v22 = vpop.permute.xlu0 %3824  ;;  %v5050_v8 = vadd.f32 %v5049_v21, %v13509_v36  ;;  %v5184_v53 = vadd.f32 %v5183_v43, %v5121_v27  ;;  %v4609_v18 = vmul.f32 %v4544_v39, %v16051_v59  ;;  %v4668_v30 = vadd.f32 %v4604_v44, %v4284_v5  ;;  %v16056_v39 = vld [vmem:[#allocation123_spill] sm:$0xff]  ;;  %v4968_v35 = vld [vmem:[%s14662_s9 + $0x120] sm:$0xff] }
 0x69e   : > { %v13548_v26 = vsel %vm4731_vm12, %v4666_v25, %v4796_v51  ;;  %v3902_v48 = vmul.f32 %v3825_v22, %v16053_v7  ;;  %v4606_v9 = vmul.f32 %v13484_v13, %v16054_v42  ;;  %v4289_v23 = vadd.f32 %v4225_v54, %v16055_v12  ;;  %v16061_v7 = vld [vmem:[#allocation29_spill] sm:$0xff]  ;;  %v4924_v36 = vld [vmem:[%s14661_s8 + $0x1c0] sm:$0xff] }
 0x69f   : > { %16052 = vst [vmem:[#allocation97_spill] sm:$0xff] %v13548_v26  ;;  %v5123_v52 = vmul.f32 %v13548_v26, %v13548_v26  ;;  %v5051_v38 = vadd.f32 %v5050_v8, %v13548_v26  ;;  %v5185_v33 = vadd.f32 %v5184_v53, %v5122_v32  ;;  %vm4733_vm13 = vcmp.ge.f32.partialorder %v4668_v30, 0.0  ;;  %v16059_v8 = vld [vmem:[#allocation39_spill] sm:$0xff]  ;;  %v4906_v26 = vld [vmem:[%s14661_s8 + $0x130] sm:$0xff] }
 0x6a0   : > { %v4798_v27 = vmul.f32 %v12478_v29, %v4668_v30  ;;  %v4286_v25 = vadd.f32 %v16056_v39, %v3902_v48  ;;  %v13560_v44 = vsel %vm4734_vm11, %v4669_v0, %v4799_v6  ;;  %v4801_v21 = vmul.f32 %v12478_v29, %v4671_v31  ;;  %v16060_v6 = vld [vmem:[#allocation62_spill] sm:$0xff] }
 0x6a1   : > { %16057 = vst [vmem:[#allocation138_spill] sm:$0xff] %v13560_v44  ;;  %v3835_v43 = vpop.permute.xlu0 %3834  ;;  %v5052_v13 = vadd.f32 %v5051_v38, %v13515_v55  ;;  %v5186_v51 = vadd.f32 %v5185_v33, %v5123_v52  ;;  %v4673_v5 = vadd.f32 %v4609_v18, %v4289_v23  ;;  %vm4736_vm14 = vcmp.ge.f32.partialorder %v4671_v31, 0.0  ;;  %v16062_v52 = vld [vmem:[#allocation153_spill] sm:$0xff] }
 0x6a2   : > { %v13564_v22 = vsel %vm4733_vm13, %v4668_v30, %v4798_v27  ;;  %v4670_v32 = vadd.f32 %v4606_v9, %v4286_v25  ;;  %v3904_v54 = vmul.f32 %v3835_v43, %v16059_v8  ;;  %v4608_v48 = vmul.f32 %v16061_v7, %v16060_v6 }
 0x6a3   : > { %16058 = vst [vmem:[#allocation142_spill] sm:$0xff] %v13564_v22  ;;  %v5125_v53 = vmul.f32 %v13564_v22, %v13564_v22  ;;  %v5053_v59 = vadd.f32 %v5052_v13, %v13564_v22  ;;  %v5187_v0 = vadd.f32 %v5186_v51, %v5124_v60  ;;  %v5126_v18 = vmul.f32 %v13560_v44, %v13560_v44 }
 0x6a4   : > { %vm4735_vm15 = vcmp.ge.f32.partialorder %v4670_v32, 0.0  ;;  %v4800_v42 = vmul.f32 %v12478_v29, %v4670_v32  ;;  %v4288_v23 = vadd.f32 %v16062_v52, %v3904_v54  ;;  %v13577_v38 = vsel %vm4736_vm14, %v4671_v31, %v4801_v21 }
 0x6a5   : > { %v5054_v30 = vadd.f32 %v5053_v59, %v13560_v44  ;;  %v5188_v9 = vadd.f32 %v5187_v0, %v5125_v53  ;;  %16063 = vst [vmem:[#allocation99_spill] sm:$0xff] %v13577_v38  ;;  %v4803_v33 = vmul.f32 %v12478_v29, %v4673_v5  ;;  %vm4738_vm0 = vcmp.ge.f32.partialorder %v4673_v5, 0.0  ;;  %v4922_v44 = vld [vmem:[%s14661_s8 + $0x1b0] sm:$0xff] }
 0x6a6   : > { %v13580_v12 = vsel %vm4735_vm15, %v4670_v32, %v4800_v42  ;;  %v4672_v60 = vadd.f32 %v4608_v48, %v4288_v23  ;;  %v5128_v13 = vmul.f32 %v13577_v38, %v13577_v38 }
 0x6a7   : > { %16064 = vst [vmem:[#allocation179_spill] sm:$0xff] %v13580_v12  ;;  %v5127_v27 = vmul.f32 %v13580_v12, %v13580_v12  ;;  %v5055_v39 = vadd.f32 %v5054_v30, %v13580_v12  ;;  %v5189_v25 = vadd.f32 %v5188_v9, %v5126_v18  ;;  %v13589_v51 = vsel %vm4738_vm0, %v4673_v5, %v4803_v33  ;;  %v4904_v12 = vld [vmem:[%s14661_s8 + $0x120] sm:$0xff] }
 0x6a8   : > { %vm4737_vm1 = vcmp.ge.f32.partialorder %v4672_v60, 0.0  ;;  %v4802_v43 = vmul.f32 %v12478_v29, %v4672_v60  ;;  %16065 = vst [vmem:[#allocation141_spill] sm:$0xff] %v13589_v51  ;;  %v5130_v59 = vmul.f32 %v13589_v51, %v13589_v51 }
 0x6a9   : > { %v5056_v31 = vadd.f32 %v5055_v39, %v13577_v38  ;;  %v5190_v21 = vadd.f32 %v5189_v25, %v5127_v27  ;;  %v4877_v39 = vld [vmem:[%s14661_s8 + $0x48] sm:$0xff]  ;;  %v4876_v25 = vld [vmem:[%s14661_s8 + $0x40] sm:$0xff]  ;;  %v4966_v38 = vld [vmem:[%s14662_s9 + $0x110] sm:$0xff] }
 0x6aa   : > { %v13591_v32 = vsel %vm4737_vm1, %v4672_v60, %v4802_v43  ;;  %v4939_v43 = vld [vmem:[%s14662_s9 + $0x38] sm:$0xff] }
 0x6ab   : > { %16066 = vst [vmem:[#allocation183_spill] sm:$0xff] %v13591_v32  ;;  %v5129_v8 = vmul.f32 %v13591_v32, %v13591_v32  ;;  %v5057_v54 = vadd.f32 %v5056_v31, %v13591_v32  ;;  %v5191_v53 = vadd.f32 %v5190_v21, %v5128_v13  ;;  %v4938_v13 = vld [vmem:[%s14662_s9 + $0x30] sm:$0xff]  ;;  %v4895_v31 = vld [vmem:[%s14661_s8 + $0xd8] sm:$0xff] }
 0x6ac   : > { %v4894_v21 = vld [vmem:[%s14661_s8 + $0xd0] sm:$0xff] }
 0x6ad   : > { %v5058_v29 = vadd.f32 %v5057_v54, %v13589_v51  ;;  %v5192_v0 = vadd.f32 %v5191_v53, %v5129_v8  ;;  %v4957_v8 = vld [vmem:[%s14662_s9 + $0xc8] sm:$0xff]  ;;  %v13620_v54 = vpop.permute.xlu1 %5358  ;;  %v4956_v53 = vld [vmem:[%s14662_s9 + $0xc0] sm:$0xff]  ;;  %v4982_v51 = vld [vmem:[%s14662_s9 + $0x190] sm:$0xff] }
 0x6af   : > { %v5059_v6 = vrot.slane %v5058_v29, 4  ;;  %v5193_v7 = vadd.f32 %v5192_v0, %v5130_v59  ;;  %v4879_v59 = vld [vmem:[%s14661_s8 + $0x58] sm:$0xff]  ;;  %v4941_v0 = vld [vmem:[%s14662_s9 + $0x48] sm:$0xff] }
 0x6b1   : > { %v5060_v48 = vadd.f32 %v5059_v6, %v5058_v29  ;;  %v5194_v42 = vrot.slane %v5193_v7, 4  ;;  %v4878_v29 = vld [vmem:[%s14661_s8 + $0x50] sm:$0xff]  ;;  %v13634_v6 = vpop.permute.xlu1 %5273 }
 0x6b3   : > { %v5061_v5 = vrot.slane %v5060_v48, 2  ;;  %v5195_v52 = vadd.f32 %v5194_v42, %v5193_v7  ;;  %v4940_v7 = vld [vmem:[%s14662_s9 + $0x40] sm:$0xff] }
 0x6b5   : > { %v5062_v23 = vadd.f32 %v5061_v5, %v5060_v48  ;;  %v5196_v18 = vrot.slane %v5195_v52, 2  ;;  %v4897_v48 = vld [vmem:[%s14661_s8 + $0xe8] sm:$0xff]  ;;  %v13642_v42 = vpop.permute.xlu1 %5278  ;;  %v4896_v5 = vld [vmem:[%s14661_s8 + $0xe0] sm:$0xff] }
 0x6b7   : > { %v5063_v30 = vrot.slane %v5062_v23, 1  ;;  %v5197_v9 = vadd.f32 %v5196_v18, %v5195_v52  ;;  %v4959_v52 = vld [vmem:[%s14662_s9 + $0xd8] sm:$0xff]  ;;  %v4881_v18 = vld [vmem:[%s14661_s8 + $0x68] sm:$0xff] }
 0x6b9   : > { %v5064_v33 = vadd.f32 %v5063_v30, %v5062_v23  ;;  %v5198_v60 = vrot.slane %v5197_v9, 1  ;;  %v4958_v23 = vld [vmem:[%s14662_s9 + $0xd0] sm:$0xff]  ;;  %v13656_v30 = vpop.permute.xlu1 %5363 }
 0x6bb   : > { %5065 = vadd.xlane.f32.xlu0 %v5064_v33  ;;  %v5199_v27 = vadd.f32 %v5198_v60, %v5197_v9  ;;  %v4880_v9 = vld [vmem:[%s14661_s8 + $0x60] sm:$0xff]  ;;  %v4943_v33 = vld [vmem:[%s14662_s9 + $0x58] sm:$0xff] }
 0x6bd   : > { %5200 = vadd.xlane.f32.xlu1 %v5199_v27  ;;  %v13664_v60 = vpop.permute.xlu1 %5368  ;;  %v4942_v27 = vld [vmem:[%s14662_s9 + $0x50] sm:$0xff] }
 0x6ce   : > { %5318 = vperm.xlu1 %7372, %v4877_v39   ;;  %v4899_v39 = vld [vmem:[%s14661_s8 + $0xf8] sm:$0xff] }
 0x6d1   : > { %5313 = vperm.xlu0 %7370, %v4876_v25   ;;  %v4898_v25 = vld [vmem:[%s14661_s8 + $0xf0] sm:$0xff] }
 0x6d2   : > { %5758 = vperm.xlu1 %7372, %v4939_v43   ;;  %v4961_v43 = vld [vmem:[%s14662_s9 + $0xe8] sm:$0xff] }
 0x6d5   : > { %5753 = vperm.xlu0 %7370, %v4938_v13   ;;  %v13678_v13 = vpop.permute.xlu1 %5803 }
 0x6d6   : > { %5408 = vperm.xlu1 %7372, %v4895_v31   ;;  %v4960_v31 = vld [vmem:[%s14662_s9 + $0xe0] sm:$0xff] }
 0x6d9   : > { %5403 = vperm.xlu0 %7370, %v4894_v21   ;;  %v4883_v21 = vld [vmem:[%s14661_s8 + $0x78] sm:$0xff] }
 0x6da   : > { %5848 = vperm.xlu1 %7372, %v4957_v8   ;;  %v13686_v8 = vpop.permute.xlu1 %5808 }
 0x6dd   : > { %5843 = vperm.xlu0 %7370, %v4956_v53   ;;  %v4882_v53 = vld [vmem:[%s14661_s8 + $0x70] sm:$0xff] }
 0x6de   : > { %5328 = vperm.xlu1 %7372, %v4879_v59   ;;  %v4945_v59 = vld [vmem:[%s14662_s9 + $0x68] sm:$0xff] }
 0x6e1   : > { %5323 = vperm.xlu0 %7370, %v4878_v29   ;;  %v13694_v29 = vpop.permute.xlu0 %5353 }
 0x6e2   : > { %5768 = vperm.xlu1 %7372, %v4941_v0   ;;  %v4944_v0 = vld [vmem:[%s14662_s9 + $0x60] sm:$0xff] }
 0x6e5   : > { %5763 = vperm.xlu0 %7370, %v4940_v7   ;;  %v4963_v7 = vld [vmem:[%s14662_s9 + $0xf8] sm:$0xff] }
 0x6e6   : > { %5418 = vperm.xlu1 %7372, %v4897_v48   ;;  %v13702_v48 = vpop.permute.xlu1 %5288 }
 0x6e9   : > { %5413 = vperm.xlu0 %7370, %v4896_v5   ;;  %v13704_v5 = vpop.permute.xlu0 %5283 }
 0x6ea   : > { %5858 = vperm.xlu1 %7372, %v4959_v52   ;;  %v4962_v52 = vld [vmem:[%s14662_s9 + $0xf0] sm:$0xff] }
 0x6ed   : > { %5853 = vperm.xlu0 %7370, %v4958_v23   ;;  %v4947_v23 = vld [vmem:[%s14662_s9 + $0x78] sm:$0xff] }
 0x6ee   : > { %5338 = vperm.xlu1 %7372, %v4881_v18   ;;  %v13712_v18 = vpop.permute.xlu1 %5728 }
 0x6f1   : > { %5333 = vperm.xlu0 %7370, %v4880_v9   ;;  %v4946_v9 = vld [vmem:[%s14662_s9 + $0x70] sm:$0xff] }
 0x6f2   : > { %5778 = vperm.xlu1 %7372, %v4943_v33   ;;  %v4917_v33 = vld [vmem:[%s14661_s8 + $0x188] sm:$0xff] }
 0x6f5   : > { %5773 = vperm.xlu0 %7370, %v4942_v27   ;;  %v13720_v27 = vpop.permute.xlu0 %5723 }
 0x6f6   : > { %5428 = vperm.xlu1 %7372, %v4899_v39   ;;  %v4916_v39 = vld [vmem:[%s14661_s8 + $0x180] sm:$0xff] }
 0x6f9   : > { %5423 = vperm.xlu0 %7370, %v4898_v25   ;;  %v4901_v25 = vld [vmem:[%s14661_s8 + $0x108] sm:$0xff] }
 0x6fa   : > { %5868 = vperm.xlu1 %7372, %v4961_v43   ;;  %v13728_v43 = vpop.permute.xlu1 %5378 }
 0x6fd   : > { %5863 = vperm.xlu0 %7370, %v4960_v31   ;;  %v13730_v31 = vpop.permute.xlu0 %5373 }
 0x6fe   : > { %5348 = vperm.xlu1 %7372, %v4883_v21   ;;  %v4900_v21 = vld [vmem:[%s14661_s8 + $0x100] sm:$0xff] }
 0x701   : > { %5343 = vperm.xlu0 %7370, %v4882_v53   ;;  %v4919_v53 = vld [vmem:[%s14661_s8 + $0x198] sm:$0xff] }
 0x702   : > { %5788 = vperm.xlu1 %7372, %v4945_v59   ;;  %v7471_v59 = vld [vmem:[%s14663_s10 + $0x4] ss:$16 sps:$4 sm:$0xff]  }
 0x703   : > { %6553 = vmatprep.mubr.bf16.mxu1 %v7471_v59 }
 0x705   : > { %5783 = vperm.xlu0 %7370, %v4944_v0   ;;  %v13741_v0 = vpop.permute.xlu1 %5818 }
 0x706   : > { %5878 = vperm.xlu1 %7372, %v4963_v7   ;;  %v4918_v7 = vld [vmem:[%s14661_s8 + $0x190] sm:$0xff] }
 0x709   : > { %5873 = vperm.xlu0 %7370, %v4962_v52   ;;  %v4981_v52 = vld [vmem:[%s14662_s9 + $0x188] sm:$0xff] }
 0x70a   : > { %5798 = vperm.xlu1 %7372, %v4947_v23   ;;  %v13749_v23 = vpop.permute.xlu0 %5813 }
 0x70d   : > { %5793 = vperm.xlu0 %7370, %v4946_v9   ;;  %v4980_v9 = vld [vmem:[%s14662_s9 + $0x180] sm:$0xff] }
 0x70e   : > { %5518 = vperm.xlu1 %7372, %v4917_v33   ;;  %v4903_v33 = vld [vmem:[%s14661_s8 + $0x118] sm:$0xff] }
 0x711   : > { %5513 = vperm.xlu0 %7370, %v4916_v39   ;;  %v13757_v39 = vpop.permute.xlu1 %5298 }
 0x712   : > { %5438 = vperm.xlu1 %7372, %v4901_v25   ;;  %v13759_v25 = vpop.permute.xlu0 %5293 }
 0x715   : > { %5433 = vperm.xlu0 %7370, %v4900_v21   ;;  %v4902_v21 = vld [vmem:[%s14661_s8 + $0x110] sm:$0xff]  ;;  %v13767_v59 = vpop.permute.xlu1 %5738 }
 0x716   : > { %5528 = vperm.xlu1 %7372, %v4919_v53   ;;  %v4965_v53 = vld [vmem:[%s14662_s9 + $0x108] sm:$0xff] }
 0x719   : > { %5523 = vperm.xlu0 %7370, %v4918_v7   ;;  %v4964_v7 = vld [vmem:[%s14662_s9 + $0x100] sm:$0xff] }
 0x71a   : > { %5968 = vperm.xlu1 %7372, %v4981_v52   ;;  %v4921_v52 = vld [vmem:[%s14661_s8 + $0x1a8] sm:$0xff] }
 0x71d   : > { %5963 = vperm.xlu0 %7370, %v4980_v9   ;;  %v13775_v9 = vpop.permute.xlu0 %5733 }
 0x71e   : > { %5448 = vperm.xlu1 %7372, %v4903_v33   ;;  %v4920_v33 = vld [vmem:[%s14661_s8 + $0x1a0] sm:$0xff] }
 0x721   : > { %5443 = vperm.xlu0 %7370, %v4902_v21   ;;  %v4983_v21 = vld [vmem:[%s14662_s9 + $0x198] sm:$0xff]  ;;  %v13785_v32 = vpop.permute.xlu0 %5383 }
 0x722   : > { %5888 = vperm.xlu1 %7372, %v4965_v53   ;;  %v13783_v53 = vpop.permute.xlu1 %5388 }
 0x725   : > { %5883 = vperm.xlu0 %7370, %v4964_v7   ;;  %v4905_v7 = vld [vmem:[%s14661_s8 + $0x128] sm:$0xff] }
 0x726   : > { %5538 = vperm.xlu1 %7372, %v4921_v52   ;;  %v13793_v52 = vpop.permute.xlu1 %5828 }
 0x729   : > { %5533 = vperm.xlu0 %7370, %v4920_v33   ;;  %v4967_v33 = vld [vmem:[%s14662_s9 + $0x118] sm:$0xff] }
 0x72a   : > { %5978 = vperm.xlu1 %7372, %v4983_v21   ;;  %v13801_v21 = vpop.permute.xlu0 %5823 }
 0x72d   : > { %5973 = vperm.xlu0 %7370, %v4982_v51   ;;  %v4923_v51 = vld [vmem:[%s14661_s8 + $0x1b8] sm:$0xff] }
 0x72e   : > { %5458 = vperm.xlu1 %7372, %v4905_v7   ;;  %v13809_v7 = vpop.permute.xlu1 %5308  ;;  %v13811_v22 = vpop.permute.xlu0 %5303 }
 0x731   : > { %5453 = vperm.xlu0 %7370, %v4904_v12   ;;  %v4985_v12 = vld [vmem:[%s14662_s9 + $0x1a8] sm:$0xff] }
 0x732   : > { %5898 = vperm.xlu1 %7372, %v4967_v33   ;;  %v13819_v33 = vpop.permute.xlu1 %5748 }
 0x733   : > { %16067 = vst [vmem:[#allocation143_spill] sm:$0xff] %v13819_v33 }
 0x735   : > { %5893 = vperm.xlu0 %7370, %v4966_v38   ;;  %v4907_v38 = vld [vmem:[%s14661_s8 + $0x138] sm:$0xff] }
 0x736   : > { %5548 = vperm.xlu1 %7372, %v4923_v51   ;;  %v13827_v51 = vpop.permute.xlu0 %5743 }
 0x739   : > { %5543 = vperm.xlu0 %7370, %v4922_v44   ;;  %v4969_v44 = vld [vmem:[%s14662_s9 + $0x128] sm:$0xff] }
 0x73a   : > { %5988 = vperm.xlu1 %7372, %v4985_v12   ;;  %v13835_v12 = vpop.permute.xlu1 %5398  ;;  %v13837_v55 = vpop.permute.xlu0 %5393 }
 0x73d   : > { %5983 = vperm.xlu0 %7370, %v4984_v10   ;;  %v4925_v10 = vld [vmem:[%s14661_s8 + $0x1c8] sm:$0xff] }
 0x73e   : > { %5468 = vperm.xlu1 %7372, %v4907_v38   ;;  %v13845_v38 = vpop.permute.xlu1 %5838 }
 0x73f   : > { %16068 = vst [vmem:[#allocation21_spill] sm:$0xff] %v13845_v38 }
 0x741   : > { %5463 = vperm.xlu0 %7370, %v4906_v26   ;;  %v4987_v26 = vld [vmem:[%s14662_s9 + $0x1b8] sm:$0xff] }
 0x742   : > { %5908 = vperm.xlu1 %7372, %v4969_v44   ;;  %v13853_v44 = vpop.permute.xlu0 %5833 }
 0x743   : > { %16069 = vst [vmem:[#allocation101_spill] sm:$0xff] %v13853_v44  ;;  %v16083_v44 = vld [vmem:[#allocation125_spill] sm:$0xff] }
 0x745   : > { %5903 = vperm.xlu0 %7370, %v4968_v35   ;;  %v4986_v35 = vld [vmem:[%s14662_s9 + $0x1b0] sm:$0xff] }
 0x746   : > { %5558 = vperm.xlu1 %7372, %v4925_v10   ;;  %v4909_v10 = vld [vmem:[%s14661_s8 + $0x148] sm:$0xff] }
 0x748   : > { %v5066_v56 = vpop.xlane.xlu0 %5065 }
 0x749   : > { %5553 = vperm.xlu0 %7370, %v4924_v36   ;;  %v4971_v36 = vld [vmem:[%s14662_s9 + $0x138] sm:$0xff] }
 0x74a   : > { %5998 = vperm.xlu1 %7372, %v4987_v26   ;;  %v5201_v63 = vpop.xlane.xlu1 %5200  ;;  %v13869_v26 = vmul.f32 1.5258789e-05, %v5066_v56 }
 0x74b   : > { %v5203_v24 = vmul.f32 1.5258789e-05, %v5201_v63 }
 0x74c   : > { %v5204_v41 = vmul.f32 %v13869_v26, %v13869_v26  ;;  %v5213_v38 = vsub.f32 %v16082_v15, %v13869_v26  ;;  %v5228_v15 = vsub.f32 %v12966_v45, %v13869_v26  ;;  %v4991_v45 = vld [vmem:[%s14662_s9 + $0x1d8] sm:$0xff] }
 0x74d   : > { %5993 = vperm.xlu0 %7370, %v4986_v35   ;;  %v4970_v35 = vld [vmem:[%s14662_s9 + $0x130] sm:$0xff] }
 0x74e   : > { %5478 = vperm.xlu1 %7372, %v4909_v10   ;;  %v13861_v34 = vpop.permute.xlu1 %5318  ;;  %v4927_v10 = vld [vmem:[%s14661_s8 + $0x1d8] sm:$0xff]  ;;  %v5205_v11 = vsub.f32 %v5203_v24, %v5204_v41  ;;  %v4988_v24 = vld [vmem:[%s14662_s9 + $0x1c0] sm:$0xff] }
 0x74f   : > { %v4911_v41 = vld [vmem:[%s14661_s8 + $0x158] sm:$0xff] }
 0x750   : > { %v13871_v47 = vpop.permute.xlu0 %5313  ;;  %v5206_v58 = vmax.f32 %v5205_v11, 0.0 }
 0x751   : > { %5473 = vperm.xlu0 %7370, %v4908_v57  }
 0x752   : > { %5918 = vperm.xlu1 %7372, %v4971_v36   ;;  %v13873_v2 = vpop.permute.xlu1 %5758  ;;  %v4926_v36 = vld [vmem:[%s14661_s8 + $0x1d0] sm:$0xff] }
 0x753   : > { %16070 = vst [vmem:[#allocation22_spill] sm:$0xff] %v13873_v2  ;;  %v5655_v2 = vadd.f32 1e-08, %v5206_v58  ;;  %v4910_v58 = vld [vmem:[%s14661_s8 + $0x150] sm:$0xff] }
 0x754   : > { %v13883_v56 = vpop.permute.xlu0 %5753 }
 0x755   : > { %16071 = vst [vmem:[#allocation71_spill] sm:$0xff] %v13883_v56  ;;  %5913 = vperm.xlu0 %7370, %v4970_v35   ;;  %7569 = vrsqrt.f32 %v5655_v2  ;;  %v4972_v2 = vld [vmem:[%s14662_s9 + $0x140] sm:$0xff] }
 0x756   : > { %5568 = vperm.xlu1 %7372, %v4927_v10   ;;  %v13885_v57 = vpop.permute.xlu1 %5408 }
 0x758   : > { %v13893_v63 = vpop.permute.xlu0 %5403 }
 0x759   : > { %16072 = vst [vmem:[#allocation43_spill] sm:$0xff] %v13893_v63  ;;  %5563 = vperm.xlu0 %7370, %v4926_v36   ;;  %v5224_v63 = vsub.f32 %v12897_v17, %v13869_v26  ;;  %v5225_v17 = vsub.f32 %v13151_v37, %v13869_v26  ;;  %v5230_v37 = vsub.f32 %v13012_v16, %v13869_v26 }
 0x75a   : > { %6008 = vperm.xlu1 %7372, %v4989_v28   ;;  %v13895_v56 = vpop.permute.xlu1 %5848  ;;  %v4973_v28 = vld [vmem:[%s14662_s9 + $0x148] sm:$0xff] }
 0x75b   : > { %16073 = vst [vmem:[#allocation103_spill] sm:$0xff] %v13895_v56  ;;  %v4929_v56 = vld [vmem:[%s14661_s8 + $0x1e8] sm:$0xff] }
 0x75c   : > { %v13903_v35 = vpop.permute.xlu0 %5843 }
 0x75d   : > { %16074 = vst [vmem:[#allocation17_spill] sm:$0xff] %v13903_v35  ;;  %6003 = vperm.xlu0 %7370, %v4988_v24   ;;  %v16078_v24 = vld [vmem:[#allocation126_spill] sm:$0xff] }
 0x75e   : > { %5488 = vperm.xlu1 %7372, %v4911_v41   ;;  %v13905_v11 = vpop.permute.xlu1 %5328  ;;  %v5207_v41 = vsub.f32 %v16078_v24, %v13869_v26 }
 0x75f   : > { %16075 = vst [vmem:[#allocation74_spill] sm:$0xff] %v13905_v11  ;;  %v16079_v11 = vld [vmem:[#allocation19_spill] sm:$0xff]  ;;  %v13945_v33 = vpop.eup %7569 }
 0x760   : > { %v13913_v10 = vpop.permute.xlu0 %5323  ;;  %v5208_v35 = vsub.f32 %v16079_v11, %v13869_v26  ;;  %v5212_v11 = vsub.f32 %v12826_v49, %v13869_v26  ;;  %v5227_v49 = vsub.f32 %v13181_v19, %v13869_v26 }
 0x761   : > { %16076 = vst [vmem:[#allocation72_spill] sm:$0xff] %v13913_v10  ;;  %5483 = vperm.xlu0 %7370, %v4910_v58   ;;  %v16080_v10 = vld [vmem:[#allocation157_spill] sm:$0xff] }
 0x762   : > { %5928 = vperm.xlu1 %7372, %v4973_v28   ;;  %v13915_v36 = vpop.permute.xlu1 %5768  ;;  %v5209_v58 = vsub.f32 %v16080_v10, %v13869_v26  ;;  %v5210_v28 = vsub.f32 %v12782_v50, %v13869_v26  ;;  %v5214_v10 = vsub.f32 %v16083_v44, %v13869_v26  ;;  %v5223_v50 = vsub.f32 %v13123_v20, %v13869_v26  ;;  %v4928_v20 = vld [vmem:[%s14661_s8 + $0x1e0] sm:$0xff] }
 0x763   : > { %16077 = vst [vmem:[#allocation76_spill] sm:$0xff] %v13915_v36  ;;  %v5211_v36 = vsub.f32 %v12973_v62, %v13869_v26  ;;  %v5226_v62 = vsub.f32 %v12911_v1, %v13869_v26  ;;  %v5591_v1 = vmul.f32 %v13634_v6, %v5207_v41  ;;  %v5592_v19 = vmul.f32 %v13642_v42, %v5208_v35 }
 0x764   : > { %v13935_v24 = vpop.permute.xlu0 %5763  ;;  %v5594_v16 = vmul.f32 %v13702_v48, %v5210_v28  ;;  %v5609_v41 = vmul.f32 %v13656_v30, %v5225_v17  ;;  %v4990_v48 = vld [vmem:[%s14662_s9 + $0x1d0] sm:$0xff]  ;;  %v4913_v30 = vld [vmem:[%s14661_s8 + $0x168] sm:$0xff] }
 0x765   : > { %16081 = vst [vmem:[#allocation105_spill] sm:$0xff] %v13935_v24  ;;  %5923 = vperm.xlu0 %7370, %v4972_v2   ;;  %v5229_v2 = vsub.f32 %v13200_v4, %v13869_v26  ;;  %v5232_v24 = vsub.f32 %v13015_v3, %v13869_v26  ;;  %v5608_v4 = vmul.f32 %v13620_v54, %v5224_v63 }
 0x766   : > { %5578 = vperm.xlu1 %7372, %v4929_v56   ;;  %v13955_v44 = vpop.permute.xlu1 %5418  ;;  %v5231_v56 = vsub.f32 %v13219_v40, %v13869_v26  ;;  %v5595_v6 = vmul.f32 %v13759_v25, %v5211_v36  ;;  %v5657_v42 = vmul.f32 %v13945_v33, %v5591_v1  ;;  %v5658_v35 = vmul.f32 %v13945_v33, %v5592_v19  ;;  %v16087_v19 = vld [vmem:[#allocation89_spill] sm:$0xff] }
 0x767   : > { %16084 = vst [vmem:[#allocation111_spill] sm:$0xff] %v13955_v44  ;;  %v5593_v44 = vmul.f32 %v13704_v5, %v5209_v58  ;;  %v5607_v40 = vmul.f32 %v13694_v29, %v5223_v50  ;;  %v5610_v3 = vmul.f32 %v13664_v60, %v5226_v62  ;;  %v5674_v5 = vmul.f32 %v13945_v33, %v5608_v4 }
 0x768   : > { %v13975_v14 = vpop.permute.xlu0 %5413  ;;  %v5596_v25 = vmul.f32 %v13757_v39, %v5212_v11  ;;  %v5597_v63 = vmul.f32 %v13811_v22, %v5213_v38  ;;  %v5598_v36 = vmul.f32 %v13809_v7, %v5214_v10  ;;  %v5611_v29 = vmul.f32 %v13730_v31, %v5227_v49  ;;  %v16085_v10 = vld [vmem:[#allocation178_spill] sm:$0xff] }
 0x769   : > { %5573 = vperm.xlu0 %7370, %v4928_v20   ;;  %v5612_v60 = vmul.f32 %v13728_v43, %v5228_v15  ;;  %v5673_v58 = vmul.f32 %v13945_v33, %v5607_v40  ;;  %v5675_v28 = vmul.f32 %v13945_v33, %v5609_v41  ;;  %v5676_v50 = vmul.f32 %v13945_v33, %v5610_v3  ;;  %v4931_v41 = vld [vmem:[%s14661_s8 + $0x1f8] sm:$0xff] }
 0x76a   : > { %6018 = vperm.xlu1 %7372, %v4991_v45   ;;  %v13985_v54 = vpop.permute.xlu1 %5858  ;;  %v5613_v22 = vmul.f32 %v13785_v32, %v5229_v2  ;;  %v5614_v39 = vmul.f32 %v13783_v53, %v5230_v37  ;;  %v6041_v31 = vadd.f32 %v13720_v27, %v5657_v42  ;;  %v6042_v7 = vadd.f32 %v13712_v18, %v5658_v35  ;;  %v4912_v32 = vld [vmem:[%s14661_s8 + $0x160] sm:$0xff]  ;;  %v16086_v53 = vld [vmem:[#allocation131_spill] sm:$0xff] }
 0x76b   : > { %v5615_v38 = vmul.f32 %v13837_v55, %v5231_v56  ;;  %v5616_v43 = vmul.f32 %v13835_v12, %v5232_v24  ;;  %v6058_v11 = vadd.f32 %v13686_v8, %v5674_v5  ;;  %v5216_v62 = vsub.f32 %v16085_v10, %v13869_v26  ;;  %v4975_v8 = vld [vmem:[%s14662_s9 + $0x158] sm:$0xff] }
 0x76c   : > { %v14001_v17 = vpop.permute.xlu0 %5853  ;;  %v5659_v27 = vmul.f32 %v13945_v33, %v5593_v44  ;;  %v5660_v18 = vmul.f32 %v13945_v33, %v5594_v16  ;;  %v5677_v55 = vmul.f32 %v13945_v33, %v5611_v29  ;;  %v5215_v12 = vsub.f32 %v16086_v53, %v13869_v26  ;;  %v16093_v10 = vld [vmem:[#allocation13_spill] sm:$0xff] }
 0x76d   : > { %6013 = vperm.xlu0 %7370, %v4990_v48   ;;  %v5678_v24 = vmul.f32 %v13945_v33, %v5612_v60  ;;  %v6059_v15 = vadd.f32 %v13749_v23, %v5675_v28  ;;  %v6060_v20 = vadd.f32 %v13741_v0, %v5676_v50  ;;  %v6057_v2 = vadd.f32 %v13678_v13, %v5673_v58  ;;  %v16088_v0 = vld [vmem:[#allocation12_spill] sm:$0xff]  ;;  %v16090_v28 = vld [vmem:[#allocation143_spill] sm:$0xff]  ;;  %v16091_v50 = vld [vmem:[#allocation101_spill] sm:$0xff] }
 0x76e   : > { %5498 = vperm.xlu1 %7372, %v4913_v30   ;;  %v14012_v49 = vpop.permute.xlu1 %5338  ;;  %v5234_v37 = vsub.f32 %v13054_v46, %v13869_v26  ;;  %v5233_v1 = vsub.f32 %v13245_v61, %v13869_v26  ;;  %v5218_v45 = vsub.f32 %v16087_v19, %v13869_v26  ;;  %v6169_v56 = vpack.c.bf16 %v6042_v7, %v6041_v31  ;;  %v4974_v46 = vld [vmem:[%s14662_s9 + $0x150] sm:$0xff]  ;;  %v16107_v19 = vld [vmem:[#allocation105_spill] sm:$0xff] }
 0x76f   : > { %v5661_v4 = vmul.f32 %v13945_v33, %v5595_v6  ;;  %v5662_v23 = vmul.f32 %v13945_v33, %v5596_v25  ;;  %v5217_v13 = vsub.f32 %v16088_v0, %v13869_v26  ;;  %v6177_v16 = vpack.c.bf16 %v6058_v11, %v6057_v2  ;;  %v16100_v0 = vld [vmem:[#allocation43_spill] sm:$0xff] }
 0x770   : > { %v14029_v44 = vpop.permute.xlu0 %5333  ;;  %v5679_v61 = vmul.f32 %v13945_v33, %v5613_v22  ;;  %v5680_v35 = vmul.f32 %v13945_v33, %v5614_v39  ;;  %v6043_v40 = vadd.f32 %v13775_v9, %v5659_v27  ;;  %v6044_v6 = vadd.f32 %v13767_v59, %v5660_v18  ;;  %v16092_v22 = vld [vmem:[#allocation21_spill] sm:$0xff]  ;;  %v16094_v27 = vld [vmem:[#allocation22_spill] sm:$0xff] }
 0x771   : > { %5493 = vperm.xlu0 %7370, %v4912_v32   ;;  %v6061_v3 = vadd.f32 %v13801_v21, %v5677_v55  ;;  %v6062_v5 = vadd.f32 %v13793_v52, %v5678_v24  ;;  %v6178_v48 = vpack.c.bf16 %v6060_v20, %v6059_v15  ;;  %v5600_v25 = vmul.f32 %v13861_v34, %v5216_v62  ;;  %v16089_v52 = vld [vmem:[#allocation16_spill] sm:$0xff]  ;;  %v16095_v55 = vld [vmem:[#allocation71_spill] sm:$0xff] }
 0x772   : > { %5938 = vperm.xlu1 %7372, %v4975_v8   ;;  %v14041_v42 = vpop.permute.xlu1 %5778  ;;  %7093 = vmatprep.subr.bf16.mxu1 %v6177_v16  ;;  %v5599_v30 = vmul.f32 %v13871_v47, %v5215_v12  ;;  %v5664_v9 = vmul.f32 %v13945_v33, %v5598_v36  ;;  %v5663_v59 = vmul.f32 %v13945_v33, %v5597_v63  ;;  %v4930_v47 = vld [vmem:[%s14661_s8 + $0x1f0] sm:$0xff]  ;;  %v16096_v12 = vld [vmem:[#allocation155_spill] sm:$0xff] }
 0x773   : > { %7094 = vmatpush3.bf16.msra.mxu1 %v6169_v56  ;;  %v6045_v60 = vadd.f32 %v13827_v51, %v5661_v4  ;;  %v5618_v21 = vmul.f32 %v13885_v57, %v5234_v37  ;;  %v5236_v58 = vsub.f32 %v16089_v52, %v13869_v26  ;;  %v6046_v36 = vadd.f32 %v16090_v28, %v5662_v23  ;;  %v4993_v51 = vld [vmem:[%s14662_s9 + $0x1e8] sm:$0xff]  ;;  %v4992_v56 = vld [vmem:[%s14662_s9 + $0x1e0] sm:$0xff]  ;;  %v16105_v52 = vld [vmem:[#allocation76_spill] sm:$0xff] }
 0x774   : > { %v14056_v29 = vpop.permute.xlu0 %5773  ;;  %7095 = vmatprep.subr.bf16.mxu1 %v6178_v48  ;;  %v6063_v63 = vadd.f32 %v16091_v50, %v5679_v61  ;;  %v6064_v39 = vadd.f32 %v16092_v22, %v5680_v35  ;;  %v6170_v31 = vpack.c.bf16 %v6044_v6, %v6043_v40  ;;  %v6179_v57 = vpack.c.bf16 %v6062_v5, %v6061_v3  ;;  %v16097_v24 = vld [vmem:[#allocation91_spill] sm:$0xff]  ;;  %v4915_v35 = vld [vmem:[%s14661_s8 + $0x178] sm:$0xff] }
 0x775   : > { %5933 = vperm.xlu0 %7370, %v4974_v46   ;;  %v5682_v7 = vmul.f32 %v13945_v33, %v5616_v43  ;;  %v5681_v11 = vmul.f32 %v13945_v33, %v5615_v38  ;;  %v5235_v62 = vsub.f32 %v16093_v10, %v13869_v26  ;;  %v6048_v18 = vadd.f32 %v16094_v27, %v5664_v9  ;;  %v16098_v43 = vld [vmem:[#allocation66_spill] sm:$0xff]  ;;  %v16099_v20 = vld [vmem:[#allocation7_spill] sm:$0xff]  ;;  %v16101_v46 = vld [vmem:[#allocation72_spill] sm:$0xff] }
 0x776   : > { %5588 = vperm.xlu1 %7372, %v4931_v41   ;;  %v5429_v34 = vpop.permute.xlu1 %5428  ;;  %v6047_v53 = vadd.f32 %v16095_v55, %v5663_v59  ;;  %v5220_v8 = vsub.f32 %v16096_v12, %v13869_v26  ;;  %v5219_v15 = vsub.f32 %v16097_v24, %v13869_v26  ;;  %v5238_v38 = vsub.f32 %v16098_v43, %v13869_v26  ;;  %v16102_v40 = vld [vmem:[#allocation103_spill] sm:$0xff]  ;;  %v16103_v41 = vld [vmem:[#allocation17_spill] sm:$0xff] }
 0x777   : > { %7096 = vmatpush3.bf16.msra.mxu1 %v6170_v31  ;;  %v5237_v2 = vsub.f32 %v16099_v20, %v13869_v26  ;;  %v6171_v4 = vpack.c.bf16 %v6046_v36, %v6045_v60  ;;  %v6180_v23 = vpack.c.bf16 %v6064_v39, %v6063_v63  ;;  %v5617_v16 = vmul.f32 %v16100_v0, %v5233_v1  ;;  %v16104_v1 = vld [vmem:[#allocation74_spill] sm:$0xff]  ;;  %v16106_v28 = vld [vmem:[#allocation111_spill] sm:$0xff] }
 0x778   : > { %v5424_v32 = vpop.permute.xlu0 %5423  ;;  %7097 = vmatprep.subr.bf16.mxu1 %v6179_v57  ;;  %v5601_v61 = vmul.f32 %v16101_v46, %v5217_v13  ;;  %v6066_v6 = vadd.f32 %v16102_v40, %v5682_v7  ;;  %v6065_v3 = vadd.f32 %v16103_v41, %v5681_v11  ;;  %v5666_v5 = vmul.f32 %v13945_v33, %v5600_v25  ;;  %v4914_v25 = vld [vmem:[%s14661_s8 + $0x170] sm:$0xff] }
 0x779   : > { %5583 = vperm.xlu0 %7370, %v4930_v47   ;;  %v5619_v48 = vmul.f32 %v13975_v14, %v5235_v62  ;;  %v6172_v59 = vpack.c.bf16 %v6048_v18, %v6047_v53  ;;  %v5602_v60 = vmul.f32 %v16104_v1, %v5218_v45  ;;  %v5665_v13 = vmul.f32 %v13945_v33, %v5599_v30 }
 0x77a   : > { %6028 = vperm.xlu1 %7372, %v4993_v51   ;;  %v5869_v37 = vpop.permute.xlu1 %5868  ;;  %v6050_v47 = vadd.f32 %v16105_v52, %v5666_v5  ;;  %v5620_v36 = vmul.f32 %v16106_v28, %v5236_v58  ;;  %v5683_v50 = vmul.f32 %v13945_v33, %v5617_v16  ;;  %v5684_v45 = vmul.f32 %v13945_v33, %v5618_v21  ;;  %v4977_v58 = vld [vmem:[%s14662_s9 + $0x168] sm:$0xff]  ;;  %v4978_v5 = vld [vmem:[%s14662_s9 + $0x170] sm:$0xff] }
 0x77b   : > { %7098 = vmatpush3.bf16.msra.mxu1 %v6171_v4  ;;  %v6049_v63 = vadd.f32 %v16107_v19, %v5665_v13  ;;  %v5603_v30 = vmul.f32 %v14029_v44, %v5219_v15  ;;  %v5667_v22 = vmul.f32 %v13945_v33, %v5601_v61  ;;  %v6181_v39 = vpack.c.bf16 %v6066_v6, %v6065_v3  ;;  %v16109_v15 = vld [vmem:[#allocation159_spill] sm:$0xff]  ;;  %v4979_v61 = vld [vmem:[%s14662_s9 + $0x178] sm:$0xff]  ;;  %v16110_v19 = vld [vmem:[#allocation132_spill] sm:$0xff] }
 0x77c   : > { %v5864_v9 = vpop.permute.xlu0 %5863  ;;  %7099 = vmatprep.subr.bf16.mxu1 %v6180_v23  ;;  %v6067_v31 = vadd.f32 %v14001_v17, %v5683_v50  ;;  %v5604_v51 = vmul.f32 %v14012_v49, %v5220_v8  ;;  %v5685_v57 = vmul.f32 %v13945_v33, %v5619_v48  ;;  %v6068_v11 = vadd.f32 %v13985_v54, %v5684_v45  ;;  %v4976_v49 = vld [vmem:[%s14662_s9 + $0x160] sm:$0xff]  ;;  %v16111_v45 = vld [vmem:[#allocation177_spill] sm:$0xff] }
 0x77d   : > { %6023 = vperm.xlu0 %7370, %v4992_v56   ;;  %v5668_v21 = vmul.f32 %v13945_v33, %v5602_v60  ;;  %v6051_v44 = vadd.f32 %v14056_v29, %v5667_v22  ;;  %v5622_v10 = vmul.f32 %v5429_v34, %v5238_v38  ;;  %v5686_v62 = vmul.f32 %v13945_v33, %v5620_v36  ;;  %v4995_v29 = vld [vmem:[%s14662_s9 + $0x1f8] sm:$0xff]  ;;  %v16108_v8 = vld [vmem:[#allocation18_spill] sm:$0xff] }
 0x77e   : > { %5508 = vperm.xlu1 %7372, %v4915_v35   ;;  %v5349_v14 = vpop.permute.xlu1 %5348  ;;  %v6069_v27 = vadd.f32 %v5864_v9, %v5685_v57  ;;  %v6173_v18 = vpack.c.bf16 %v6050_v47, %v6049_v63  ;;  %v5621_v55 = vmul.f32 %v5424_v32, %v5237_v2  ;;  %v5669_v53 = vmul.f32 %v13945_v33, %v5603_v30  ;;  %v7469_v36 = vld [vmem:[%s14663_s10] ss:$16 sps:$4 sm:$0xff]   ;;  %v7472_v50 = vld [vmem:[%s14663_s10 + $0x24] ss:$16 sps:$4 sm:$0xff]  }
 0x77f   : > { %7100 = vmatpush3.bf16.msra.mxu1 %v6172_v59  ;;  %v6052_v54 = vadd.f32 %v14041_v42, %v5668_v21  ;;  %v6182_v34 = vpack.c.bf16 %v6068_v11, %v6067_v31  ;;  %v6070_v12 = vadd.f32 %v5869_v37, %v5686_v62  ;;  %v5222_v24 = vsub.f32 %v16108_v8, %v13869_v26  ;;  %v4994_v37 = vld [vmem:[%s14662_s9 + $0x1f0] sm:$0xff] }
 0x780   : > { %v5344_v7 = vpop.permute.xlu0 %5343  ;;  %7101 = vmatprep.subr.bf16.mxu1 %v6181_v39  ;;  %v5221_v43 = vsub.f32 %v16109_v15, %v13869_v26  ;;  %v5670_v42 = vmul.f32 %v13945_v33, %v5604_v51  ;;  %v5688_v4 = vmul.f32 %v13945_v33, %v5622_v10  ;;  %v5687_v46 = vmul.f32 %v13945_v33, %v5621_v55  ;;  %v7474_v51 = vld [vmem:[%s14663_s10 + $0x20] ss:$16 sps:$4 sm:$0xff]   ;;  %v7475_v57 = vld [vmem:[%s14663_s10 + $0x44] ss:$16 sps:$4 sm:$0xff]  }
 0x781   : > { %5503 = vperm.xlu0 %7370, %v4914_v25   ;;  %v6174_v20 = vpack.c.bf16 %v6052_v54, %v6051_v44  ;;  %v6183_v2 = vpack.c.bf16 %v6070_v12, %v6069_v27  ;;  %v5606_v23 = vmul.f32 %v5349_v14, %v5222_v24  ;;  %v5256_v63 = vsub.f32 %v16110_v19, %v13869_v26  ;;  %v16112_v10 = vld [vmem:[#allocation188_spill] sm:$0xff]  ;;  %v16113_v27 = vld [vmem:[#allocation165_spill] sm:$0xff] }
 0x782   : > { %5948 = vperm.xlu1 %7372, %v4977_v58   ;;  %v5789_v17 = vpop.permute.xlu1 %5788  ;;  %v5605_v0 = vmul.f32 %v5344_v7, %v5221_v43  ;;  %v5255_v30 = vsub.f32 %v16111_v45, %v13869_v26  ;;  %v5240_v62 = vsub.f32 %v16112_v10, %v13869_v26  ;;  %v7477_v12 = vld [vmem:[%s14663_s10 + $0x40] ss:$16 sps:$4 sm:$0xff]   ;;  %v7478_v8 = vld [vmem:[%s14663_s10 + $0x64] ss:$16 sps:$4 sm:$0xff]  }
 0x783   : > { %7102 = vmatpush3.bf16.msra.mxu1 %v6173_v18  ;;  %v6054_v16 = vadd.f32 %v5789_v17, %v5670_v42  ;;  %v5672_v9 = vmul.f32 %v13945_v33, %v5606_v23  ;;  %v5239_v17 = vsub.f32 %v16113_v27, %v13869_v26  ;;  %v7486_v10 = vld [vmem:[%s14663_s10 + $0xa0] ss:$16 sps:$4 sm:$0xff]  }
 0x784   : > { %v5784_v38 = vpop.permute.xlu0 %5783  ;;  %7103 = vmatprep.subr.bf16.mxu1 %v6182_v34  ;;  %v5671_v59 = vmul.f32 %v13945_v33, %v5605_v0 }
 0x785   : > { %v6053_v32 = vadd.f32 %v5784_v38, %v5669_v53  ;;  %5943 = vperm.xlu0 %7370, %v4976_v49  }
 0x786   : > { %6038 = vperm.xlu1 %7372, %v4995_v29   ;;  %v5879_v56 = vpop.permute.xlu1 %5878 }
 0x787   : > { %7104 = vmatpush3.bf16.msra.mxu1 %v6174_v20  ;;  %v6175_v40 = vpack.c.bf16 %v6054_v16, %v6053_v32  ;;  %v6072_v6 = vadd.f32 %v5879_v56, %v5688_v4  ;;  %v16114_v20 = vld [vmem:[#allocation137_spill] sm:$0xff]  ;;  %v16115_v32 = vld [vmem:[#allocation135_spill] sm:$0xff] }
 0x788   : > { %v5874_v35 = vpop.permute.xlu0 %5873  ;;  %7105 = vmatprep.subr.bf16.mxu1 %v6183_v2  ;;  %v5258_v42 = vsub.f32 %v16114_v20, %v13869_v26  ;;  %v5257_v2 = vsub.f32 %v16115_v32, %v13869_v26  ;;  %v7489_v20 = vld [vmem:[%s14663_s10 + $0xc0] ss:$16 sps:$4 sm:$0xff]  }
 0x789   : > { %v6071_v41 = vadd.f32 %v5874_v35, %v5687_v46  ;;  %6033 = vperm.xlu0 %7370, %v4994_v37   ;;  %v7481_v35 = vld [vmem:[%s14663_s10 + $0x84] ss:$16 sps:$4 sm:$0xff]  }
 0x78a   : > { %5958 = vperm.xlu1 %7372, %v4979_v61   ;;  %v5799_v3 = vpop.permute.xlu1 %5798  ;;  %v7480_v61 = vld [vmem:[%s14663_s10 + $0x60] ss:$16 sps:$4 sm:$0xff]  }
 0x78b   : > { %v6184_v48 = vpack.c.bf16 %v6072_v6, %v6071_v41  ;;  %7106 = vmatpush3.bf16.msra.mxu1 %v6175_v40  ;;  %v6056_v60 = vadd.f32 %v5799_v3, %v5672_v9  ;;  %v16117_v9 = vld [vmem:[#allocation31_spill] sm:$0xff] }
 0x78c   : > { %v5794_v1 = vpop.permute.xlu0 %5793 }
 0x78d   : > { %v6055_v13 = vadd.f32 %v5794_v1, %v5671_v59  ;;  %5953 = vperm.xlu0 %7370, %v4978_v5   ;;  %7107 = vmatprep.subr.bf16.mxu1 %v6184_v48  ;;  %v16116_v5 = vld [vmem:[#allocation129_spill] sm:$0xff]  ;;  %v5241_v59 = vsub.f32 %v16117_v9, %v13869_v26 }
 0x78e   : > { %v5519_v52 = vpop.permute.xlu1 %5518  ;;  %v5242_v48 = vsub.f32 %v16116_v5, %v13869_v26  ;;  %v7492_v5 = vld [vmem:[%s14663_s10 + $0xe0] ss:$16 sps:$4 sm:$0xff]  }
 0x78f   : > { %v6176_v47 = vpack.c.bf16 %v6056_v60, %v6055_v13  ;;  %v5640_v58 = vmul.f32 %v5519_v52, %v5256_v63 }
 0x790   : > { %v5514_v28 = vpop.permute.xlu0 %5513 }
 0x791   : > { %7108 = vmatpush3.bf16.msra.mxu1 %v6176_v47  ;;  %v5639_v39 = vmul.f32 %v5514_v28, %v5255_v30  ;;  %v5706_v11 = vmul.f32 %v13945_v33, %v5640_v58  ;;  %v16118_v30 = vld [vmem:[#allocation95_spill] sm:$0xff]  ;;  %v16119_v58 = vld [vmem:[#allocation26_spill] sm:$0xff] }
 0x792   : > { %v5439_v14 = vpop.permute.xlu1 %5438 }
 0x793   : > { %v5705_v21 = vmul.f32 %v13945_v33, %v5639_v39  ;;  %v5624_v55 = vmul.f32 %v5439_v14, %v5240_v62  ;;  %v7484_v14 = vld [vmem:[%s14663_s10 + $0xa4] ss:$16 sps:$4 sm:$0xff]   ;;  %v5259_v39 = vsub.f32 %v16119_v58, %v13869_v26 }
 0x794   : > { %6554 = vmatmul.mubr.bf16.vlgmr.msra.gmra.mrb[0].mxu1 %v7469_v36  ;;  %v5434_v25 = vpop.permute.xlu0 %5433  ;;  %v7487_v62 = vld [vmem:[%s14663_s10 + $0xc4] ss:$16 sps:$4 sm:$0xff]  }
 0x795   : > { %6561 = vmatprep.mubr.bf16.mxu1 %v7472_v50  ;;  %v5623_v53 = vmul.f32 %v5434_v25, %v5239_v17  ;;  %v5690_v15 = vmul.f32 %v13945_v33, %v5624_v55  ;;  %v7483_v50 = vld [vmem:[%s14663_s10 + $0x80] ss:$16 sps:$4 sm:$0xff]  }
 0x796   : > { %v5529_v22 = vpop.permute.xlu1 %5528 }
 0x797   : > { %v5689_v43 = vmul.f32 %v13945_v33, %v5623_v53  ;;  %v5642_v23 = vmul.f32 %v5529_v22, %v5258_v42  ;;  %v5260_v22 = vsub.f32 %v16118_v30, %v13869_v26  ;;  %v16121_v53 = vld [vmem:[#allocation28_spill] sm:$0xff] }
 0x798   : > { %v5524_v31 = vpop.permute.xlu0 %5523  ;;  %v7490_v42 = vld [vmem:[%s14663_s10 + $0xe4] ss:$16 sps:$4 sm:$0xff]   ;;  %v7495_v30 = vld [vmem:[%s14663_s10 + $0x100] ss:$16 sps:$4 sm:$0xff]  }
 0x799   : > { %v5641_v0 = vmul.f32 %v5524_v31, %v5257_v2  ;;  %v5708_v6 = vmul.f32 %v13945_v33, %v5642_v23 }
 0x79a   : > { %v5969_v7 = vpop.permute.xlu1 %5968 }
 0x79b   : > { %v6090_v49 = vadd.f32 %v5969_v7, %v5706_v11  ;;  %v5707_v41 = vmul.f32 %v13945_v33, %v5641_v0  ;;  %v16123_v0 = vld [vmem:[#allocation10_spill] sm:$0xff] }
 0x79c   : > { %6562 = vmatmul.mubr.bf16.gmra.mrb[4].mxu1 %v7474_v51  ;;  %v5964_v44 = vpop.permute.xlu0 %5963 }
 0x79d   : > { %v6089_v18 = vadd.f32 %v5964_v44, %v5705_v21  ;;  %6569 = vmatprep.mubr.bf16.mxu1 %v7475_v57 }
 0x79e   : > { %v5449_v54 = vpop.permute.xlu1 %5448 }
 0x79f   : > { %v6193_v29 = vpack.c.bf16 %v6090_v49, %v6089_v18  ;;  %v5626_v52 = vmul.f32 %v5449_v54, %v5242_v48  ;;  %v16120_v54 = vld [vmem:[#allocation161_spill] sm:$0xff]  ;;  %v7493_v48 = vld [vmem:[%s14663_s10 + $0x104] ss:$16 sps:$4 sm:$0xff]  }
 0x7a0   : > { %v5444_v34 = vpop.permute.xlu0 %5443  ;;  %v5244_v55 = vsub.f32 %v16120_v54, %v13869_v26  ;;  %v7498_v54 = vld [vmem:[%s14663_s10 + $0x120] ss:$16 sps:$4 sm:$0xff]  }
 0x7a1   : > { %7205 = vmatprep.subr.bf16.mxu1 %v6193_v29  ;;  %v5625_v47 = vmul.f32 %v5444_v34, %v5241_v59  ;;  %v5692_v19 = vmul.f32 %v13945_v33, %v5626_v52  ;;  %v5243_v29 = vsub.f32 %v16121_v53, %v13869_v26 }
 0x7a2   : > { %v5889_v24 = vpop.permute.xlu1 %5888 }
 0x7a3   : > { %v6074_v56 = vadd.f32 %v5889_v24, %v5690_v15  ;;  %v5691_v63 = vmul.f32 %v13945_v33, %v5625_v47  ;;  %v16125_v47 = vld [vmem:[#allocation93_spill] sm:$0xff] }
 0x7a4   : > { %6570 = vmatmul.mubr.bf16.gmra.mrb[8].mxu1 %v7477_v12  ;;  %v5884_v38 = vpop.permute.xlu0 %5883 }
 0x7a5   : > { %v6073_v4 = vadd.f32 %v5884_v38, %v5689_v43  ;;  %6577 = vmatprep.mubr.bf16.mxu1 %v7478_v8 }
 0x7a6   : > { %v5539_v37 = vpop.permute.xlu1 %5538 }
 0x7a7   : > { %v6185_v16 = vpack.c.bf16 %v6074_v56, %v6073_v4  ;;  %v5644_v7 = vmul.f32 %v5539_v37, %v5260_v22  ;;  %v16122_v37 = vld [vmem:[#allocation140_spill] sm:$0xff] }
 0x7a8   : > { %v5534_v46 = vpop.permute.xlu0 %5533  ;;  %v5262_v23 = vsub.f32 %v16122_v37, %v13869_v26  ;;  %v7496_v22 = vld [vmem:[%s14663_s10 + $0x124] ss:$16 sps:$4 sm:$0xff]   ;;  %v7501_v37 = vld [vmem:[%s14663_s10 + $0x140] ss:$16 sps:$4 sm:$0xff]  }
 0x7a9   : > { %7206 = vmatpush3.bf16.msra.mxu1 %v6185_v16  ;;  %v5643_v11 = vmul.f32 %v5534_v46, %v5259_v39  ;;  %v5710_v17 = vmul.f32 %v13945_v33, %v5644_v7  ;;  %v5261_v16 = vsub.f32 %v16123_v0, %v13869_v26 }
 0x7aa   : > { %v5979_v40 = vpop.permute.xlu1 %5978 }
 0x7ab   : > { %v6092_v1 = vadd.f32 %v5979_v40, %v5708_v6  ;;  %v5709_v49 = vmul.f32 %v13945_v33, %v5643_v11  ;;  %v16127_v11 = vld [vmem:[#allocation97_spill] sm:$0xff] }
 0x7ac   : > { %6578 = vmatmul.mubr.bf16.gmra.mrb[12].mxu1 %v7480_v61  ;;  %v5974_v3 = vpop.permute.xlu0 %5973 }
 0x7ad   : > { %v6091_v60 = vadd.f32 %v5974_v3, %v5707_v41  ;;  %6585 = vmatprep.mubr.bf16.mxu1 %v7481_v35 }
 0x7ae   : > { %v5459_v13 = vpop.permute.xlu1 %5458 }
 0x7af   : > { %v6194_v28 = vpack.c.bf16 %v6092_v1, %v6091_v60  ;;  %v5628_v24 = vmul.f32 %v5459_v13, %v5244_v55  ;;  %v16124_v13 = vld [vmem:[#allocation163_spill] sm:$0xff]  ;;  %v7499_v55 = vld [vmem:[%s14663_s10 + $0x144] ss:$16 sps:$4 sm:$0xff]  }
 0x7b0   : > { %v5454_v36 = vpop.permute.xlu0 %5453  ;;  %v5246_v52 = vsub.f32 %v16124_v13, %v13869_v26  ;;  %v7504_v13 = vld [vmem:[%s14663_s10 + $0x160] ss:$16 sps:$4 sm:$0xff]  }
 0x7b1   : > { %7207 = vmatprep.subr.bf16.mxu1 %v6194_v28  ;;  %v5627_v15 = vmul.f32 %v5454_v36, %v5243_v29  ;;  %v5694_v2 = vmul.f32 %v13945_v33, %v5628_v24  ;;  %v5245_v28 = vsub.f32 %v16125_v47, %v13869_v26 }
 0x7b2   : > { %v5899_v25 = vpop.permute.xlu1 %5898 }
 0x7b3   : > { %v6076_v31 = vadd.f32 %v5899_v25, %v5692_v19  ;;  %v5693_v56 = vmul.f32 %v13945_v33, %v5627_v15  ;;  %v16129_v15 = vld [vmem:[#allocation190_spill] sm:$0xff] }
 0x7b4   : > { %6586 = vmatmul.mubr.bf16.gmra.mrb[16].mxu1 %v7483_v50  ;;  %v5894_v45 = vpop.permute.xlu0 %5893 }
 0x7b5   : > { %v6075_v51 = vadd.f32 %v5894_v45, %v5691_v63  ;;  %6593 = vmatprep.mubr.bf16.mxu1 %v7484_v14 }
 0x7b6   : > { %v5549_v57 = vpop.permute.xlu1 %5548 }
 0x7b7   : > { %v6186_v21 = vpack.c.bf16 %v6076_v31, %v6075_v51  ;;  %v5646_v40 = vmul.f32 %v5549_v57, %v5262_v23  ;;  %v16126_v57 = vld [vmem:[#allocation69_spill] sm:$0xff]  ;;  %v7502_v23 = vld [vmem:[%s14663_s10 + $0x164] ss:$16 sps:$4 sm:$0xff]  }
 0x7b8   : > { %v5544_v44 = vpop.permute.xlu0 %5543  ;;  %v5264_v7 = vsub.f32 %v16126_v57, %v13869_v26  ;;  %v7507_v57 = vld [vmem:[%s14663_s10 + $0x180] ss:$16 sps:$4 sm:$0xff]  }
 0x7b9   : > { %7208 = vmatpush3.bf16.msra.mxu1 %v6186_v21  ;;  %v5645_v6 = vmul.f32 %v5544_v44, %v5261_v16  ;;  %v5712_v59 = vmul.f32 %v13945_v33, %v5646_v40  ;;  %v5263_v21 = vsub.f32 %v16127_v11, %v13869_v26 }
 0x7ba   : > { %v5989_v27 = vpop.permute.xlu1 %5988 }
 0x7bb   : > { %v6094_v34 = vadd.f32 %v5989_v27, %v5710_v17  ;;  %v5711_v1 = vmul.f32 %v13945_v33, %v5645_v6  ;;  %v16131_v6 = vld [vmem:[#allocation142_spill] sm:$0xff] }
 0x7bc   : > { %6594 = vmatmul.mubr.bf16.gmra.mrb[20].mxu1 %v7486_v10  ;;  %v5984_v18 = vpop.permute.xlu0 %5983 }
 0x7bd   : > { %v6093_v12 = vadd.f32 %v5984_v18, %v5709_v49  ;;  %6601 = vmatprep.mubr.bf16.mxu1 %v7487_v62 }
 0x7be   : > { %v5469_v8 = vpop.permute.xlu1 %5468 }
 0x7bf   : > { %v6195_v43 = vpack.c.bf16 %v6094_v34, %v6093_v12  ;;  %v5630_v25 = vmul.f32 %v5469_v8, %v5246_v52  ;;  %v16128_v8 = vld [vmem:[#allocation67_spill] sm:$0xff]  ;;  %v7505_v52 = vld [vmem:[%s14663_s10 + $0x184] ss:$16 sps:$4 sm:$0xff]  }
 0x7c0   : > { %v5464_v38 = vpop.permute.xlu0 %5463  ;;  %v5248_v24 = vsub.f32 %v16128_v8, %v13869_v26  ;;  %v7510_v8 = vld [vmem:[%s14663_s10 + $0x1a0] ss:$16 sps:$4 sm:$0xff]  }
 0x7c1   : > { %7209 = vmatprep.subr.bf16.mxu1 %v6195_v43  ;;  %v5629_v19 = vmul.f32 %v5464_v38, %v5245_v28  ;;  %v5696_v39 = vmul.f32 %v13945_v33, %v5630_v25  ;;  %v5247_v43 = vsub.f32 %v16129_v15, %v13869_v26 }
 0x7c2   : > { %v5909_v32 = vpop.permute.xlu1 %5908 }
 0x7c3   : > { %v6078_v46 = vadd.f32 %v5909_v32, %v5694_v2  ;;  %v5695_v31 = vmul.f32 %v13945_v33, %v5629_v19  ;;  %v16133_v19 = vld [vmem:[#allocation171_spill] sm:$0xff] }
 0x7c4   : > { %6602 = vmatmul.mubr.bf16.gmra.mrb[24].mxu1 %v7489_v20  ;;  %v5904_v4 = vpop.permute.xlu0 %5903 }
 0x7c5   : > { %v6077_v61 = vadd.f32 %v5904_v4, %v5693_v56  ;;  %6609 = vmatprep.mubr.bf16.mxu1 %v7490_v42 }
 0x7c6   : > { %v5559_v35 = vpop.permute.xlu1 %5558 }
 0x7c7   : > { %v6187_v41 = vpack.c.bf16 %v6078_v46, %v6077_v61  ;;  %v5648_v27 = vmul.f32 %v5559_v35, %v5264_v7  ;;  %v16130_v35 = vld [vmem:[#allocation138_spill] sm:$0xff] }
 0x7c8   : > { %v5554_v3 = vpop.permute.xlu0 %5553  ;;  %v5266_v40 = vsub.f32 %v16130_v35, %v13869_v26  ;;  %v7508_v7 = vld [vmem:[%s14663_s10 + $0x1a4] ss:$16 sps:$4 sm:$0xff]  }
 0x7c9   : > { %7210 = vmatpush3.bf16.msra.mxu1 %v6187_v41  ;;  %v5647_v17 = vmul.f32 %v5554_v3, %v5263_v21  ;;  %v5714_v29 = vmul.f32 %v13945_v33, %v5648_v27  ;;  %v5265_v41 = vsub.f32 %v16131_v6, %v13869_v26  ;;  %v7513_v6 = vld [vmem:[%s14663_s10 + $0x1c0] ss:$16 sps:$4 sm:$0xff]  }
 0x7ca   : > { %v5999_v9 = vpop.permute.xlu1 %5998 }
 0x7cb   : > { %v6096_v36 = vadd.f32 %v5999_v9, %v5712_v59  ;;  %v5713_v34 = vmul.f32 %v13945_v33, %v5647_v17  ;;  %v16135_v17 = vld [vmem:[#allocation179_spill] sm:$0xff] }
 0x7cc   : > { %6610 = vmatmul.mubr.bf16.gmra.mrb[28].mxu1 %v7492_v5  ;;  %v5994_v60 = vpop.permute.xlu0 %5993 }
 0x7cd   : > { %v6095_v50 = vadd.f32 %v5994_v60, %v5711_v1  ;;  %6617 = vmatprep.mubr.bf16.mxu1 %v7493_v48 }
 0x7ce   : > { %v5479_v14 = vpop.permute.xlu1 %5478 }
 0x7cf   : > { %v6196_v63 = vpack.c.bf16 %v6096_v36, %v6095_v50  ;;  %v5632_v32 = vmul.f32 %v5479_v14, %v5248_v24  ;;  %v16132_v14 = vld [vmem:[#allocation167_spill] sm:$0xff]  ;;  %v7511_v24 = vld [vmem:[%s14663_s10 + $0x1c4] ss:$16 sps:$4 sm:$0xff]  }
 0x7d0   : > { %v5474_v45 = vpop.permute.xlu0 %5473  ;;  %v5250_v25 = vsub.f32 %v16132_v14, %v13869_v26 }
 0x7d1   : > { %7211 = vmatprep.subr.bf16.mxu1 %v6196_v63  ;;  %v5631_v2 = vmul.f32 %v5474_v45, %v5247_v43  ;;  %v5698_v16 = vmul.f32 %v13945_v33, %v5632_v32  ;;  %v5249_v63 = vsub.f32 %v16133_v19, %v13869_v26 }
 0x7d2   : > { %v5919_v58 = vpop.permute.xlu1 %5918 }
 0x7d3   : > { %v6080_v44 = vadd.f32 %v5919_v58, %v5696_v39  ;;  %v5697_v46 = vmul.f32 %v13945_v33, %v5631_v2  ;;  %v16137_v2 = vld [vmem:[#allocation173_spill] sm:$0xff] }
 0x7d4   : > { %6618 = vmatmul.mubr.bf16.gmra.mrb[32].mxu1 %v7495_v30  ;;  %v5914_v51 = vpop.permute.xlu0 %5913 }
 0x7d5   : > { %v6079_v10 = vadd.f32 %v5914_v51, %v5695_v31  ;;  %6625 = vmatprep.mubr.bf16.mxu1 %v7496_v22 }
 0x7d6   : > { %v5569_v62 = vpop.permute.xlu1 %5568 }
 0x7d7   : > { %v6188_v49 = vpack.c.bf16 %v6080_v44, %v6079_v10  ;;  %v5650_v9 = vmul.f32 %v5569_v62, %v5266_v40  ;;  %v16134_v62 = vld [vmem:[#allocation99_spill] sm:$0xff] }
 0x7d8   : > { %v5564_v18 = vpop.permute.xlu0 %5563  ;;  %v5268_v27 = vsub.f32 %v16134_v62, %v13869_v26 }
 0x7d9   : > { %7212 = vmatpush3.bf16.msra.mxu1 %v6188_v49  ;;  %v5649_v59 = vmul.f32 %v5564_v18, %v5265_v41  ;;  %v5716_v28 = vmul.f32 %v13945_v33, %v5650_v9  ;;  %v5267_v49 = vsub.f32 %v16135_v17, %v13869_v26  ;;  %v16139_v41 = vld [vmem:[#allocation183_spill] sm:$0xff] }
 0x7da   : > { %v6009_v53 = vpop.permute.xlu1 %6008  ;;  %v7517_v17 = vld [vmem:[%s14663_s10 + $0x8] ss:$16 sps:$4 sm:$0xff]  }
 0x7db   : > { %v6098_v38 = vadd.f32 %v6009_v53, %v5714_v29  ;;  %v5715_v36 = vmul.f32 %v13945_v33, %v5649_v59 }
 0x7dc   : > { %6626 = vmatmul.mubr.bf16.gmra.mrb[36].mxu1 %v7498_v54  ;;  %v6004_v12 = vpop.permute.xlu0 %6003 }
 0x7dd   : > { %v6097_v20 = vadd.f32 %v6004_v12, %v5713_v34  ;;  %6633 = vmatprep.mubr.bf16.mxu1 %v7499_v55 }
 0x7de   : > { %v5489_v42 = vpop.permute.xlu1 %5488 }
 0x7df   : > { %v6197_v56 = vpack.c.bf16 %v6098_v38, %v6097_v20  ;;  %v5634_v58 = vmul.f32 %v5489_v42, %v5250_v25  ;;  %v16136_v42 = vld [vmem:[#allocation134_spill] sm:$0xff] }
 0x7e0   : > { %v5484_v4 = vpop.permute.xlu0 %5483  ;;  %v5252_v32 = vsub.f32 %v16136_v42, %v13869_v26  ;;  %v7543_v42 = vld [vmem:[%s14663_s10 + $0x108] ss:$16 sps:$4 sm:$0xff]  }
 0x7e1   : > { %7213 = vmatprep.subr.bf16.mxu1 %v6197_v56  ;;  %v5633_v39 = vmul.f32 %v5484_v4, %v5249_v63  ;;  %v5700_v21 = vmul.f32 %v13945_v33, %v5634_v58  ;;  %v5251_v56 = vsub.f32 %v16137_v2, %v13869_v26  ;;  %v7546_v2 = vld [vmem:[%s14663_s10 + $0x128] ss:$16 sps:$4 sm:$0xff]  }
 0x7e2   : > { %v5929_v0 = vpop.permute.xlu1 %5928 }
 0x7e3   : > { %v6082_v3 = vadd.f32 %v5929_v0, %v5698_v16  ;;  %v5699_v44 = vmul.f32 %v13945_v33, %v5633_v39  ;;  %v7516_v39 = vld [vmem:[%s14663_s10 + $0x1e0] ss:$16 sps:$4 sm:$0xff]  }
 0x7e4   : > { %6634 = vmatmul.mubr.bf16.gmra.mrb[40].mxu1 %v7501_v37  ;;  %v5924_v61 = vpop.permute.xlu0 %5923 }
 0x7e5   : > { %v6081_v5 = vadd.f32 %v5924_v61, %v5697_v46  ;;  %6641 = vmatprep.mubr.bf16.mxu1 %v7502_v23  ;;  %v16138_v61 = vld [vmem:[#allocation141_spill] sm:$0xff] }
 0x7e6   : > { %v5579_v48 = vpop.permute.xlu1 %5578  ;;  %v5270_v35 = vsub.f32 %v16138_v61, %v13869_v26 }
 0x7e7   : > { %v6189_v1 = vpack.c.bf16 %v6082_v3, %v6081_v5  ;;  %v5652_v53 = vmul.f32 %v5579_v48, %v5268_v27  ;;  %v5269_v3 = vsub.f32 %v16139_v41, %v13869_v26  ;;  %v7514_v5 = vld [vmem:[%s14663_s10 + $0x1e4] ss:$16 sps:$4 sm:$0xff]  }
 0x7e8   : > { %v5574_v60 = vpop.permute.xlu0 %5573 }
 0x7e9   : > { %7214 = vmatpush3.bf16.msra.mxu1 %v6189_v1  ;;  %v5651_v29 = vmul.f32 %v5574_v60, %v5267_v49  ;;  %v5718_v43 = vmul.f32 %v13945_v33, %v5652_v53  ;;  %v7520_v49 = vld [vmem:[%s14663_s10 + $0x2c] ss:$16 sps:$4 sm:$0xff]   ;;  %v7528_v53 = vld [vmem:[%s14663_s10 + $0x68] ss:$16 sps:$4 sm:$0xff]  }
 0x7ea   : > { %v6019_v47 = vpop.permute.xlu1 %6018 }
 0x7eb   : > { %v6100_v45 = vadd.f32 %v6019_v47, %v5716_v28  ;;  %v5717_v38 = vmul.f32 %v13945_v33, %v5651_v29  ;;  %v16141_v28 = vld [vmem:[#allocation175_spill] sm:$0xff] }
 0x7ec   : > { %6642 = vmatmul.mubr.bf16.gmra.mrb[44].mxu1 %v7504_v13  ;;  %v6014_v50 = vpop.permute.xlu0 %6013  ;;  %v7529_v29 = vld [vmem:[%s14663_s10 + $0x8c] ss:$16 sps:$4 sm:$0xff]  }
 0x7ed   : > { %v6099_v30 = vadd.f32 %v6014_v50, %v5715_v36  ;;  %6649 = vmatprep.mubr.bf16.mxu1 %v7505_v52  ;;  %v16140_v52 = vld [vmem:[#allocation169_spill] sm:$0xff]  ;;  %v5253_v36 = vsub.f32 %v16141_v28, %v13869_v26 }
 0x7ee   : > { %v5499_v22 = vpop.permute.xlu1 %5498  ;;  %v5254_v47 = vsub.f32 %v16140_v52, %v13869_v26  ;;  %v7519_v26 = vld [vmem:[%s14663_s10 + $0xc] ss:$16 sps:$4 sm:$0xff]   ;;  %v7558_v52 = vld [vmem:[%s14663_s10 + $0x1a8] ss:$16 sps:$4 sm:$0xff]  }
 0x7ef   : > { %v6198_v31 = vpack.c.bf16 %v6100_v45, %v6099_v30  ;;  %v5636_v0 = vmul.f32 %v5499_v22, %v5252_v32  ;;  %v7544_v32 = vld [vmem:[%s14663_s10 + $0x12c] ss:$16 sps:$4 sm:$0xff]  }
 0x7f0   : > { %v5494_v51 = vpop.permute.xlu0 %5493  ;;  %v7559_v28 = vld [vmem:[%s14663_s10 + $0x1cc] ss:$16 sps:$4 sm:$0xff]  }
 0x7f1   : > { %7215 = vmatprep.subr.bf16.mxu1 %v6198_v31  ;;  %v5635_v16 = vmul.f32 %v5494_v51, %v5251_v56  ;;  %v5702_v1 = vmul.f32 %v13945_v33, %v5636_v0  ;;  %v7547_v56 = vld [vmem:[%s14663_s10 + $0x14c] ss:$16 sps:$4 sm:$0xff]   ;;  %v7552_v0 = vld [vmem:[%s14663_s10 + $0x168] ss:$16 sps:$4 sm:$0xff]  }
 0x7f2   : > { %v5939_v11 = vpop.permute.xlu1 %5938 }
 0x7f3   : > { %v6084_v18 = vadd.f32 %v5939_v11, %v5700_v21  ;;  %v5701_v60 = vmul.f32 %v13945_v33, %v5635_v16 }
 0x7f4   : > { %6650 = vmatmul.mubr.bf16.gmra.mrb[48].mxu1 %v7507_v57  ;;  %v5934_v10 = vpop.permute.xlu0 %5933 }
 0x7f5   : > { %v6083_v54 = vadd.f32 %v5934_v10, %v5699_v44  ;;  %6657 = vmatprep.mubr.bf16.mxu1 %v7508_v7 }
 0x7f6   : > { %v5589_v55 = vpop.permute.xlu1 %5588 }
 0x7f7   : > { %v6190_v34 = vpack.c.bf16 %v6084_v18, %v6083_v54  ;;  %v5654_v48 = vmul.f32 %v5589_v55, %v5270_v35  ;;  %v7523_v18 = vld [vmem:[%s14663_s10 + $0x4c] ss:$16 sps:$4 sm:$0xff]   ;;  %v7525_v54 = vld [vmem:[%s14663_s10 + $0x48] ss:$16 sps:$4 sm:$0xff]  }
 0x7f8   : > { %v5584_v12 = vpop.permute.xlu0 %5583  ;;  %v7526_v55 = vld [vmem:[%s14663_s10 + $0x6c] ss:$16 sps:$4 sm:$0xff]  }
 0x7f9   : > { %7216 = vmatpush3.bf16.msra.mxu1 %v6190_v34  ;;  %v5653_v59 = vmul.f32 %v5584_v12, %v5269_v3  ;;  %v5720_v19 = vmul.f32 %v13945_v33, %v5654_v48  ;;  %v7531_v34 = vld [vmem:[%s14663_s10 + $0x88] ss:$16 sps:$4 sm:$0xff]   ;;  %v7532_v12 = vld [vmem:[%s14663_s10 + $0xac] ss:$16 sps:$4 sm:$0xff]  }
 0x7fa   : > { %v6029_v15 = vpop.permute.xlu1 %6028  ;;  %v7555_v3 = vld [vmem:[%s14663_s10 + $0x188] ss:$16 sps:$4 sm:$0xff]   ;;  %v7556_v48 = vld [vmem:[%s14663_s10 + $0x1ac] ss:$16 sps:$4 sm:$0xff]  }
 0x7fb   : > { %v6102_v4 = vadd.f32 %v6029_v15, %v5718_v43  ;;  %v5719_v22 = vmul.f32 %v13945_v33, %v5653_v59  ;;  %v7537_v15 = vld [vmem:[%s14663_s10 + $0xc8] ss:$16 sps:$4 sm:$0xff]   ;;  %v7538_v43 = vld [vmem:[%s14663_s10 + $0xec] ss:$16 sps:$4 sm:$0xff]  }
 0x7fc   : > { %6658 = vmatmul.mubr.bf16.gmra.mrb[52].mxu1 %v7510_v8  ;;  %v6024_v20 = vpop.permute.xlu0 %6023  ;;  %v7534_v8 = vld [vmem:[%s14663_s10 + $0xa8] ss:$16 sps:$4 sm:$0xff]  }
 0x7fd   : > { %v6101_v37 = vadd.f32 %v6024_v20, %v5717_v38  ;;  %6665 = vmatprep.mubr.bf16.mxu1 %v7511_v24  ;;  %v7535_v24 = vld [vmem:[%s14663_s10 + $0xcc] ss:$16 sps:$4 sm:$0xff]   ;;  %v7540_v38 = vld [vmem:[%s14663_s10 + $0xe8] ss:$16 sps:$4 sm:$0xff]  }
 0x7fe   : > { %v5509_v23 = vpop.permute.xlu1 %5508  ;;  %v7541_v20 = vld [vmem:[%s14663_s10 + $0x10c] ss:$16 sps:$4 sm:$0xff]  }
 0x7ff   : > { %v6199_v46 = vpack.c.bf16 %v6102_v4, %v6101_v37  ;;  %v5638_v63 = vmul.f32 %v5509_v23, %v5254_v47  ;;  %v7549_v4 = vld [vmem:[%s14663_s10 + $0x148] ss:$16 sps:$4 sm:$0xff]   ;;  %v7550_v37 = vld [vmem:[%s14663_s10 + $0x16c] ss:$16 sps:$4 sm:$0xff]  }
 0x800   : > { %v5504_v40 = vpop.permute.xlu0 %5503 }
 0x801   : > { %7217 = vmatprep.subr.bf16.mxu1 %v6199_v46  ;;  %v5637_v45 = vmul.f32 %v5504_v40, %v5253_v36  ;;  %v5704_v11 = vmul.f32 %v13945_v33, %v5638_v63  ;;  %v7553_v46 = vld [vmem:[%s14663_s10 + $0x18c] ss:$16 sps:$4 sm:$0xff]   ;;  %v7561_v63 = vld [vmem:[%s14663_s10 + $0x1c8] ss:$16 sps:$4 sm:$0xff]  }
 0x802   : > { %v5949_v9 = vpop.permute.xlu1 %5948 }
 0x803   : > { %v6086_v50 = vadd.f32 %v5949_v9, %v5702_v1  ;;  %v5703_v21 = vmul.f32 %v13945_v33, %v5637_v45  ;;  %v7522_v33 = vld [vmem:[%s14663_s10 + $0x28] ss:$16 sps:$4 sm:$0xff]  }
 0x804   : > { %6666 = vmatmul.mubr.bf16.gmra.mrb[56].mxu1 %v7513_v6  ;;  %v5944_v13 = vpop.permute.xlu0 %5943 }
 0x805   : > { %v6085_v14 = vadd.f32 %v5944_v13, %v5701_v60  ;;  %6673 = vmatprep.mubr.bf16.mxu1 %v7514_v5 }
 0x806   : > { %v6039_v25 = vpop.permute.xlu1 %6038 }
 0x807   : > { %v6191_v30 = vpack.c.bf16 %v6086_v50, %v6085_v14  ;;  %v6104_v31 = vadd.f32 %v6039_v25, %v5720_v19 }
 0x808   : > { %v6034_v58 = vpop.permute.xlu0 %6033 }
 0x809   : > { %v6103_v51 = vadd.f32 %v6034_v58, %v5719_v22  ;;  %7218 = vmatpush3.bf16.msra.mxu1 %v6191_v30  ;;  %v7562_v30 = vld [vmem:[%s14663_s10 + $0x1ec] ss:$16 sps:$4 sm:$0xff]  }
 0x80a   : > { %v5959_v57 = vpop.permute.xlu1 %5958 }
 0x80b   : > { %v6200_v7 = vpack.c.bf16 %v6104_v31, %v6103_v51  ;;  %v6088_v10 = vadd.f32 %v5959_v57, %v5704_v11 }
 0x80c   : > { %6674 = vmatmul.mubr.bf16.gmra.mrb[60].mxu1 %v7516_v39  ;;  %v5954_v44 = vpop.permute.xlu0 %5953 }
 0x80d   : > { %v6087_v62 = vadd.f32 %v5954_v44, %v5703_v21  ;;  %7219 = vmatprep.subr.bf16.mxu1 %v6200_v7  ;;  %6714 = vmatprep.mubr.bf16.mxu1 %v7519_v26  ;;  %v7564_v26 = vld [vmem:[%s14663_s10 + $0x1e8] ss:$16 sps:$4 sm:$0xff]  }
 0x80f   : > { %v6192_v27 = vpack.c.bf16 %v6088_v10, %v6087_v62 }
 0x811   : > { %7220 = vmatpush3.bf16.msra.mxu1 %v6192_v27 }
 0x814   : > { %6715 = vmatmul.mubr.bf16.vlgmr.msra.gmra.mrb[64].mxu1 %v7517_v17 }
 0x815   : > { %6722 = vmatprep.mubr.bf16.mxu1 %v7520_v49 }
 0x81c   : > { %6723 = vmatmul.mubr.bf16.gmra.mrb[68].mxu1 %v7522_v33 }
 0x81d   : > { %6730 = vmatprep.mubr.bf16.mxu1 %v7523_v18 }
 0x824   : > { %6731 = vmatmul.mubr.bf16.gmra.mrb[72].mxu1 %v7525_v54 }
 0x825   : > { %6738 = vmatprep.mubr.bf16.mxu1 %v7526_v55 }
 0x82c   : > { %6739 = vmatmul.mubr.bf16.gmra.mrb[76].mxu1 %v7528_v53 }
 0x82d   : > { %6746 = vmatprep.mubr.bf16.mxu1 %v7529_v29 }
 0x834   : > { %6747 = vmatmul.mubr.bf16.gmra.mrb[80].mxu1 %v7531_v34 }
 0x835   : > { %6754 = vmatprep.mubr.bf16.mxu1 %v7532_v12 }
 0x83c   : > { %6755 = vmatmul.mubr.bf16.gmra.mrb[84].mxu1 %v7534_v8 }
 0x83d   : > { %6762 = vmatprep.mubr.bf16.mxu1 %v7535_v24 }
 0x844   : > { %6763 = vmatmul.mubr.bf16.gmra.mrb[88].mxu1 %v7537_v15 }
 0x845   : > { %6770 = vmatprep.mubr.bf16.mxu1 %v7538_v43 }
 0x84c   : > { %6771 = vmatmul.mubr.bf16.gmra.mrb[92].mxu1 %v7540_v38 }
 0x84d   : > { %6778 = vmatprep.mubr.bf16.mxu1 %v7541_v20 }
 0x854   : > { %6779 = vmatmul.mubr.bf16.gmra.mrb[96].mxu1 %v7543_v42 }
 0x855   : > { %6786 = vmatprep.mubr.bf16.mxu1 %v7544_v32 }
 0x85c   : > { %6787 = vmatmul.mubr.bf16.gmra.mrb[100].mxu1 %v7546_v2 }
 0x85d   : > { %6794 = vmatprep.mubr.bf16.mxu1 %v7547_v56 }
 0x864   : > { %6795 = vmatmul.mubr.bf16.gmra.mrb[104].mxu1 %v7549_v4 }
 0x865   : > { %6802 = vmatprep.mubr.bf16.mxu1 %v7550_v37 }
 0x867   : > { %v7109_v23 = vpop.f32.mrb[0].mxu1 }
 0x868   : > { %v7110_v16 = vpop.f32.mrb[1].mxu1 }
 0x869   : > { %v14415_v61 = vadd.f32 %v7110_v16, %v7109_v23  ;;  %v7112_v35 = vpop.f32.mrb[2].mxu1 }
 0x86a   : > { %v7113_v40 = vpop.f32.mrb[3].mxu1 }
 0x86b   : > { %v14417_v6 = vadd.f32 %v7113_v40, %v7112_v35 }
 0x86c   : > { %6803 = vmatmul.mubr.bf16.gmra.mrb[108].mxu1 %v7552_v0 }
 0x86d   : > { %6810 = vmatprep.mubr.bf16.mxu1 %v7553_v46 }
 0x86f   : > { %v7115_v41 = vpop.f32.mrb[4].mxu1 }
 0x870   : > { %v7116_v5 = vpop.f32.mrb[5].mxu1 }
 0x871   : > { %v14425_v9 = vadd.f32 %v7116_v5, %v7115_v41  ;;  %v7118_v59 = vpop.f32.mrb[6].mxu1 }
 0x872   : > { %v7119_v1 = vpop.f32.mrb[7].mxu1 }
 0x873   : > { %v14427_v60 = vadd.f32 %v7119_v1, %v7118_v59 }
 0x874   : > { %6811 = vmatmul.mubr.bf16.gmra.mrb[112].mxu1 %v7555_v3 }
 0x875   : > { %6818 = vmatprep.mubr.bf16.mxu1 %v7556_v48 }
 0x877   : > { %v7121_v13 = vpop.f32.mrb[8].mxu1 }
 0x878   : > { %v7122_v47 = vpop.f32.mrb[9].mxu1 }
 0x879   : > { %v14435_v36 = vadd.f32 %v7122_v47, %v7121_v13  ;;  %v7124_v50 = vpop.f32.mrb[10].mxu1 }
 0x87a   : > { %v7125_v14 = vpop.f32.mrb[11].mxu1 }
 0x87b   : > { %v14437_v25 = vadd.f32 %v7125_v14, %v7124_v50 }
 0x87c   : > { %6819 = vmatmul.mubr.bf16.gmra.mrb[116].mxu1 %v7558_v52 }
 0x87d   : > { %6826 = vmatprep.mubr.bf16.mxu1 %v7559_v28 }
 0x87f   : > { %v7127_v19 = vpop.f32.mrb[12].mxu1 }
 0x880   : > { %v7128_v45 = vpop.f32.mrb[13].mxu1 }
 0x881   : > { %v14445_v22 = vadd.f32 %v7128_v45, %v7127_v19  ;;  %v7130_v58 = vpop.f32.mrb[14].mxu1 }
 0x882   : > { %v7131_v39 = vpop.f32.mrb[15].mxu1 }
 0x883   : > { %v14447_v31 = vadd.f32 %v7131_v39, %v7130_v58 }
 0x884   : > { %6827 = vmatmul.mubr.bf16.gmra.mrb[120].mxu1 %v7561_v63 }
 0x885   : > { %6834 = vmatprep.mubr.bf16.mxu1 %v7562_v30 }
 0x887   : > { %v7133_v51 = vpop.f32.mrb[16].mxu1 }
 0x888   : > { %v7134_v57 = vpop.f32.mrb[17].mxu1 }
 0x889   : > { %v14452_v7 = vadd.f32 %v7134_v57, %v7133_v51  ;;  %v7136_v11 = vpop.f32.mrb[18].mxu1 }
 0x88a   : > { %v7137_v21 = vpop.f32.mrb[19].mxu1 }
 0x88b   : > { %v14454_v44 = vadd.f32 %v7137_v21, %v7136_v11 }
 0x88c   : > { %6835 = vmatmul.mubr.bf16.gmra.mrb[124].mxu1 %v7564_v26 }
 0x88f   : > { %v7139_v10 = vpop.f32.mrb[20].mxu1 }
 0x890   : > { %v7140_v62 = vpop.f32.mrb[21].mxu1 }
 0x891   : > { %v14456_v27 = vadd.f32 %v7140_v62, %v7139_v10  ;;  %v7142_v17 = vpop.f32.mrb[22].mxu1 }
 0x892   : > { %v7143_v49 = vpop.f32.mrb[23].mxu1 }
 0x893   : > { %v14458_v33 = vadd.f32 %v7143_v49, %v7142_v17 }
 0x897   : > { %v7145_v18 = vpop.f32.mrb[24].mxu1 }
 0x898   : > { %v7146_v54 = vpop.f32.mrb[25].mxu1 }
 0x899   : > { %v14460_v55 = vadd.f32 %v7146_v54, %v7145_v18  ;;  %v7148_v53 = vpop.f32.mrb[26].mxu1 }
 0x89a   : > { %v7149_v29 = vpop.f32.mrb[27].mxu1 }
 0x89b   : > { %v14462_v34 = vadd.f32 %v7149_v29, %v7148_v53 }
 0x89f   : > { %v7151_v12 = vpop.f32.mrb[28].mxu1 }
 0x8a0   : > { %v7152_v8 = vpop.f32.mrb[29].mxu1 }
 0x8a1   : > { %v14464_v24 = vadd.f32 %v7152_v8, %v7151_v12  ;;  %v7154_v15 = vpop.f32.mrb[30].mxu1 }
 0x8a2   : > { %v7155_v43 = vpop.f32.mrb[31].mxu1 }
 0x8a3   : > { %v14466_v38 = vadd.f32 %v7155_v43, %v7154_v15 }
 0x8a7   : > { %v7157_v20 = vpop.f32.mrb[32].mxu1 }
 0x8a8   : > { %v7158_v42 = vpop.f32.mrb[33].mxu1 }
 0x8a9   : > { %v14468_v32 = vadd.f32 %v7158_v42, %v7157_v20  ;;  %v7160_v2 = vpop.f32.mrb[34].mxu1 }
 0x8aa   : > { %v7161_v56 = vpop.f32.mrb[35].mxu1 }
 0x8ab   : > { %v14470_v4 = vadd.f32 %v7161_v56, %v7160_v2  ;;  %v7635_v2 = vld [vmem:[%s7876_s17] sm:$0xff] }
 0x8ac   : > { %v6556_v56 = vadd.f32 %v7635_v2, %v14415_v61  ;;  %v7641_v2 = vld [vmem:[%s7876_s17 + $0x30] sm:$0xff] }
 0x8af   : > { %v7163_v37 = vpop.f32.mrb[36].mxu1 }
 0x8b0   : > { %v7164_v23 = vpop.f32.mrb[37].mxu1 }
 0x8b1   : > { %v14472_v0 = vadd.f32 %v7164_v23, %v7163_v37  ;;  %v7166_v16 = vpop.f32.mrb[38].mxu1 }
 0x8b2   : > { %v7167_v46 = vpop.f32.mrb[39].mxu1 }
 0x8b3   : > { %v14474_v35 = vadd.f32 %v7167_v46, %v7166_v16  ;;  %v7636_v46 = vld [vmem:[%s7876_s17 + $0x8] sm:$0xff] }
 0x8b7   : > { %v7169_v40 = vpop.f32.mrb[40].mxu1 }
 0x8b8   : > { %v7170_v41 = vpop.f32.mrb[41].mxu1 }
 0x8b9   : > { %v14476_v3 = vadd.f32 %v7170_v41, %v7169_v40  ;;  %v7172_v5 = vpop.f32.mrb[42].mxu1  ;;  %v6559_v40 = vadd.f32 %v7636_v46, %v14417_v6 }
 0x8ba   : > { %v7173_v48 = vpop.f32.mrb[43].mxu1 }
 0x8bb   : > { %v14478_v59 = vadd.f32 %v7173_v48, %v7172_v5 }
 0x8bf   : > { %v7175_v1 = vpop.f32.mrb[44].mxu1 }
 0x8c0   : > { %v7176_v13 = vpop.f32.mrb[45].mxu1 }
 0x8c1   : > { %v14480_v52 = vadd.f32 %v7176_v13, %v7175_v1  ;;  %v7178_v47 = vpop.f32.mrb[46].mxu1  ;;  %v7637_v13 = vld [vmem:[%s7876_s17 + $0x10] sm:$0xff] }
 0x8c2   : > { %v7179_v28 = vpop.f32.mrb[47].mxu1 }
 0x8c3   : > { %v14482_v50 = vadd.f32 %v7179_v28, %v7178_v47  ;;  %v6564_v47 = vadd.f32 %v7637_v13, %v14425_v9 }
 0x8c7   : > { %v7181_v14 = vpop.f32.mrb[48].mxu1 }
 0x8c8   : > { %v7182_v19 = vpop.f32.mrb[49].mxu1 }
 0x8c9   : > { %v14484_v63 = vadd.f32 %v7182_v19, %v7181_v14  ;;  %v7184_v45 = vpop.f32.mrb[50].mxu1  ;;  %v7638_v19 = vld [vmem:[%s7876_s17 + $0x18] sm:$0xff] }
 0x8ca   : > { %v7185_v30 = vpop.f32.mrb[51].mxu1 }
 0x8cb   : > { %v14486_v58 = vadd.f32 %v7185_v30, %v7184_v45  ;;  %v6567_v45 = vadd.f32 %v7638_v19, %v14427_v60 }
 0x8cf   : > { %v7187_v39 = vpop.f32.mrb[52].mxu1 }
 0x8d0   : > { %v7188_v51 = vpop.f32.mrb[53].mxu1 }
 0x8d1   : > { %v14488_v26 = vadd.f32 %v7188_v51, %v7187_v39  ;;  %v7190_v57 = vpop.f32.mrb[54].mxu1 }
 0x8d2   : > { %v7191_v11 = vpop.f32.mrb[55].mxu1 }
 0x8d3   : > { %v14490_v21 = vadd.f32 %v7191_v11, %v7190_v57 }
 0x8d7   : > { %v7193_v10 = vpop.f32.mrb[56].mxu1 }
 0x8d8   : > { %v7194_v62 = vpop.f32.mrb[57].mxu1 }
 0x8d9   : > { %v14492_v17 = vadd.f32 %v7194_v62, %v7193_v10  ;;  %v7196_v49 = vpop.f32.mrb[58].mxu1  ;;  %v7639_v10 = vld [vmem:[%s7876_s17 + $0x20] sm:$0xff] }
 0x8da   : > { %v7197_v18 = vpop.f32.mrb[59].mxu1  ;;  %v6572_v9 = vadd.f32 %v7639_v10, %v14435_v36  ;;  %v6580_v36 = vadd.f32 %v7641_v2, %v14445_v22  ;;  %v7646_v10 = vld [vmem:[%s7876_s17 + $0x58] sm:$0xff] }
 0x8db   : > { %v14494_v54 = vadd.f32 %v7197_v18, %v7196_v49 }
 0x8df   : > { %v7199_v53 = vpop.f32.mrb[60].mxu1 }
 0x8e0   : > { %v7200_v29 = vpop.f32.mrb[61].mxu1 }
 0x8e1   : > { %v14496_v12 = vadd.f32 %v7200_v29, %v7199_v53  ;;  %v7202_v8 = vpop.f32.mrb[62].mxu1  ;;  %v7640_v53 = vld [vmem:[%s7876_s17 + $0x28] sm:$0xff] }
 0x8e2   : > { %v7203_v15 = vpop.f32.mrb[63].mxu1  ;;  %v6575_v60 = vadd.f32 %v7640_v53, %v14437_v25 }
 0x8e3   : > { %v14498_v43 = vadd.f32 %v7203_v15, %v7202_v8 }
 0x8e7   : > { %v7221_v20 = vpop.f32.mrb[64].mxu1 }
 0x8e8   : > { %v7222_v42 = vpop.f32.mrb[65].mxu1 }
 0x8e9   : > { %v7223_v37 = vadd.f32 %v7222_v42, %v7221_v20  ;;  %v7224_v23 = vpop.f32.mrb[66].mxu1 }
 0x8ea   : > { %v7225_v16 = vpop.f32.mrb[67].mxu1 }
 0x8eb   : > { %v6717_v41 = vadd.f32 %v7223_v37, %v6556_v56  ;;  %v7226_v5 = vadd.f32 %v7225_v16, %v7224_v23  ;;  %v7642_v16 = vld [vmem:[%s7876_s17 + $0x38] sm:$0xff] }
 0x8ec   : > { %v6583_v25 = vadd.f32 %v7642_v16, %v14447_v31 }
 0x8ed   : > { %6843 = vst [vmem:[%s14507_s30] sm:$0xff] %v6717_v41  ;;  %v6720_v48 = vadd.f32 %v7226_v5, %v6559_v40 }
 0x8ef   : > { %6844 = vst [vmem:[%s14507_s30 + $0x8] sm:$0xff] %v6720_v48  ;;  %v7227_v1 = vpop.f32.mrb[68].mxu1 }
 0x8f0   : > { %v7228_v61 = vpop.f32.mrb[69].mxu1 }
 0x8f1   : > { %v7229_v28 = vadd.f32 %v7228_v61, %v7227_v1  ;;  %v7230_v14 = vpop.f32.mrb[70].mxu1  ;;  %v7643_v1 = vld [vmem:[%s7876_s17 + $0x40] sm:$0xff] }
 0x8f2   : > { %v7231_v6 = vpop.f32.mrb[71].mxu1  ;;  %v6588_v22 = vadd.f32 %v7643_v1, %v14452_v7 }
 0x8f3   : > { %v6725_v30 = vadd.f32 %v7229_v28, %v6564_v47  ;;  %v7232_v39 = vadd.f32 %v7231_v6, %v7230_v14  ;;  %v7644_v28 = vld [vmem:[%s7876_s17 + $0x48] sm:$0xff] }
 0x8f4   : > { %v6591_v31 = vadd.f32 %v7644_v28, %v14454_v44  ;;  %v6599_v44 = vadd.f32 %v7646_v10, %v14458_v33 }
 0x8f5   : > { %6845 = vst [vmem:[%s14507_s30 + $0x10] sm:$0xff] %v6725_v30  ;;  %v6728_v51 = vadd.f32 %v7232_v39, %v6567_v45  ;;  %v7645_v39 = vld [vmem:[%s7876_s17 + $0x50] sm:$0xff] }
 0x8f6   : > { %v6596_v7 = vadd.f32 %v7645_v39, %v14456_v27  ;;  %v7653_v39 = vld [vmem:[%s7876_s17 + $0x90] sm:$0xff] }
 0x8f7   : > { %6846 = vst [vmem:[%s14507_s30 + $0x18] sm:$0xff] %v6728_v51  ;;  %v7233_v57 = vpop.f32.mrb[72].mxu1 }
 0x8f8   : > { %v7234_v11 = vpop.f32.mrb[73].mxu1 }
 0x8f9   : > { %v7235_v62 = vadd.f32 %v7234_v11, %v7233_v57  ;;  %v7236_v49 = vpop.f32.mrb[74].mxu1 }
 0x8fa   : > { %v7237_v18 = vpop.f32.mrb[75].mxu1 }
 0x8fb   : > { %v6733_v29 = vadd.f32 %v7235_v62, %v6572_v9  ;;  %v7238_v8 = vadd.f32 %v7237_v18, %v7236_v49 }
 0x8fd   : > { %6847 = vst [vmem:[%s14507_s30 + $0x20] sm:$0xff] %v6733_v29  ;;  %v6736_v15 = vadd.f32 %v7238_v8, %v6575_v60  ;;  %v7647_v60 = vld [vmem:[%s7876_s17 + $0x60] sm:$0xff] }
 0x8fe   : > { %v6604_v27 = vadd.f32 %v7647_v60, %v14460_v55 }
 0x8ff   : > { %6848 = vst [vmem:[%s14507_s30 + $0x28] sm:$0xff] %v6736_v15  ;;  %v7239_v20 = vpop.f32.mrb[76].mxu1 }
 0x900   : > { %v7240_v42 = vpop.f32.mrb[77].mxu1 }
 0x901   : > { %v7241_v56 = vadd.f32 %v7240_v42, %v7239_v20  ;;  %v7242_v37 = vpop.f32.mrb[78].mxu1  ;;  %v7648_v20 = vld [vmem:[%s7876_s17 + $0x68] sm:$0xff] }
 0x902   : > { %v7243_v23 = vpop.f32.mrb[79].mxu1  ;;  %v6607_v33 = vadd.f32 %v7648_v20, %v14462_v34 }
 0x903   : > { %v6741_v46 = vadd.f32 %v7241_v56, %v6580_v36  ;;  %v7244_v40 = vadd.f32 %v7243_v23, %v7242_v37  ;;  %v7649_v23 = vld [vmem:[%s7876_s17 + $0x70] sm:$0xff] }
 0x904   : > { %v6612_v55 = vadd.f32 %v7649_v23, %v14464_v24  ;;  %v7658_v23 = vld [vmem:[%s7876_s17 + $0xb8] sm:$0xff] }
 0x905   : > { %6849 = vst [vmem:[%s14507_s30 + $0x30] sm:$0xff] %v6741_v46  ;;  %v6744_v41 = vadd.f32 %v7244_v40, %v6583_v25  ;;  %v7650_v40 = vld [vmem:[%s7876_s17 + $0x78] sm:$0xff] }
 0x906   : > { %v6615_v34 = vadd.f32 %v7650_v40, %v14466_v38 }
 0x907   : > { %6850 = vst [vmem:[%s14507_s30 + $0x38] sm:$0xff] %v6744_v41  ;;  %v7245_v5 = vpop.f32.mrb[80].mxu1 }
 0x908   : > { %v7246_v48 = vpop.f32.mrb[81].mxu1 }
 0x909   : > { %v7247_v61 = vadd.f32 %v7246_v48, %v7245_v5  ;;  %v7248_v13 = vpop.f32.mrb[82].mxu1 }
 0x90a   : > { %v7249_v47 = vpop.f32.mrb[83].mxu1 }
 0x90b   : > { %v6749_v14 = vadd.f32 %v7247_v61, %v6588_v22  ;;  %v7250_v6 = vadd.f32 %v7249_v47, %v7248_v13  ;;  %v7651_v61 = vld [vmem:[%s7876_s17 + $0x80] sm:$0xff] }
 0x90c   : > { %v6620_v24 = vadd.f32 %v7651_v61, %v14468_v32  ;;  %v6628_v32 = vadd.f32 %v7653_v39, %v14472_v0 }
 0x90d   : > { %6851 = vst [vmem:[%s14507_s30 + $0x40] sm:$0xff] %v6749_v14  ;;  %v6752_v19 = vadd.f32 %v7250_v6, %v6591_v31  ;;  %v7652_v31 = vld [vmem:[%s7876_s17 + $0x88] sm:$0xff] }
 0x90e   : > { %v6623_v38 = vadd.f32 %v7652_v31, %v14470_v4 }
 0x90f   : > { %6852 = vst [vmem:[%s14507_s30 + $0x48] sm:$0xff] %v6752_v19  ;;  %v7251_v45 = vpop.f32.mrb[84].mxu1 }
 0x910   : > { %v7252_v30 = vpop.f32.mrb[85].mxu1 }
 0x911   : > { %v7253_v51 = vadd.f32 %v7252_v30, %v7251_v45  ;;  %v7254_v57 = vpop.f32.mrb[86].mxu1 }
 0x912   : > { %v7255_v11 = vpop.f32.mrb[87].mxu1 }
 0x913   : > { %v6757_v9 = vadd.f32 %v7253_v51, %v6596_v7  ;;  %v7256_v62 = vadd.f32 %v7255_v11, %v7254_v57  ;;  %v7654_v11 = vld [vmem:[%s7876_s17 + $0x98] sm:$0xff] }
 0x914   : > { %v6631_v4 = vadd.f32 %v7654_v11, %v14474_v35 }
 0x915   : > { %6853 = vst [vmem:[%s14507_s30 + $0x50] sm:$0xff] %v6757_v9  ;;  %v6760_v49 = vadd.f32 %v7256_v62, %v6599_v44 }
 0x917   : > { %6854 = vst [vmem:[%s14507_s30 + $0x58] sm:$0xff] %v6760_v49  ;;  %v7257_v18 = vpop.f32.mrb[88].mxu1 }
 0x918   : > { %v7258_v53 = vpop.f32.mrb[89].mxu1 }
 0x919   : > { %v7259_v29 = vadd.f32 %v7258_v53, %v7257_v18  ;;  %v7260_v8 = vpop.f32.mrb[90].mxu1  ;;  %v7655_v18 = vld [vmem:[%s7876_s17 + $0xa0] sm:$0xff] }
 0x91a   : > { %v7261_v15 = vpop.f32.mrb[91].mxu1  ;;  %v6636_v0 = vadd.f32 %v7655_v18, %v14476_v3  ;;  %v7665_v18 = vld [vmem:[%s7876_s17 + $0xf0] sm:$0xff] }
 0x91b   : > { %v6765_v42 = vadd.f32 %v7259_v29, %v6604_v27  ;;  %v7262_v2 = vadd.f32 %v7261_v15, %v7260_v8  ;;  %v7656_v29 = vld [vmem:[%s7876_s17 + $0xa8] sm:$0xff] }
 0x91c   : > { %v6639_v35 = vadd.f32 %v7656_v29, %v14478_v59  ;;  %v6647_v59 = vadd.f32 %v7658_v23, %v14482_v50 }
 0x91d   : > { %6855 = vst [vmem:[%s14507_s30 + $0x60] sm:$0xff] %v6765_v42  ;;  %v6768_v36 = vadd.f32 %v7262_v2, %v6607_v33  ;;  %v7657_v2 = vld [vmem:[%s7876_s17 + $0xb0] sm:$0xff] }
 0x91e   : > { %v6644_v3 = vadd.f32 %v7657_v2, %v14480_v52 }
 0x91f   : > { %6856 = vst [vmem:[%s14507_s30 + $0x68] sm:$0xff] %v6768_v36  ;;  %v7263_v56 = vpop.f32.mrb[92].mxu1 }
 0x920   : > { %v7264_v37 = vpop.f32.mrb[93].mxu1 }
 0x921   : > { %v7265_v16 = vadd.f32 %v7264_v37, %v7263_v56  ;;  %v7266_v25 = vpop.f32.mrb[94].mxu1 }
 0x922   : > { %v7267_v46 = vpop.f32.mrb[95].mxu1 }
 0x923   : > { %v6773_v41 = vadd.f32 %v7265_v16, %v6612_v55  ;;  %v7268_v5 = vadd.f32 %v7267_v46, %v7266_v25 }
 0x925   : > { %6857 = vst [vmem:[%s14507_s30 + $0x70] sm:$0xff] %v6773_v41  ;;  %v6776_v48 = vadd.f32 %v7268_v5, %v6615_v34  ;;  %v7659_v34 = vld [vmem:[%s7876_s17 + $0xc0] sm:$0xff] }
 0x926   : > { %v6652_v52 = vadd.f32 %v7659_v34, %v14484_v63 }
 0x927   : > { %6858 = vst [vmem:[%s14507_s30 + $0x78] sm:$0xff] %v6776_v48  ;;  %v7269_v1 = vpop.f32.mrb[96].mxu1 }
 0x928   : > { %v7270_v22 = vpop.f32.mrb[97].mxu1 }
 0x929   : > { %v7271_v13 = vadd.f32 %v7270_v22, %v7269_v1  ;;  %v7272_v47 = vpop.f32.mrb[98].mxu1  ;;  %v7660_v1 = vld [vmem:[%s7876_s17 + $0xc8] sm:$0xff] }
 0x92a   : > { %v7273_v28 = vpop.f32.mrb[99].mxu1  ;;  %v6655_v50 = vadd.f32 %v7660_v1, %v14486_v58 }
 0x92b   : > { %v6781_v14 = vadd.f32 %v7271_v13, %v6620_v24  ;;  %v7274_v6 = vadd.f32 %v7273_v28, %v7272_v47  ;;  %v7661_v28 = vld [vmem:[%s7876_s17 + $0xd0] sm:$0xff] }
 0x92c   : > { %v6660_v63 = vadd.f32 %v7661_v28, %v14488_v26 }
 0x92d   : > { %6859 = vst [vmem:[%s14507_s30 + $0x80] sm:$0xff] %v6781_v14  ;;  %v6784_v19 = vadd.f32 %v7274_v6, %v6623_v38  ;;  %v7662_v6 = vld [vmem:[%s7876_s17 + $0xd8] sm:$0xff] }
 0x92e   : > { %v6663_v58 = vadd.f32 %v7662_v6, %v14490_v21 }
 0x92f   : > { %6860 = vst [vmem:[%s14507_s30 + $0x88] sm:$0xff] %v6784_v19  ;;  %v7275_v45 = vpop.f32.mrb[100].mxu1 }
 0x930   : > { %v7276_v30 = vpop.f32.mrb[101].mxu1 }
 0x931   : > { %v7277_v7 = vadd.f32 %v7276_v30, %v7275_v45  ;;  %v7278_v51 = vpop.f32.mrb[102].mxu1 }
 0x932   : > { %v7279_v57 = vpop.f32.mrb[103].mxu1 }
 0x933   : > { %v6789_v10 = vadd.f32 %v7277_v7, %v6628_v32  ;;  %v7280_v44 = vadd.f32 %v7279_v57, %v7278_v51  ;;  %v7663_v7 = vld [vmem:[%s7876_s17 + $0xe0] sm:$0xff] }
 0x934   : > { %v6668_v26 = vadd.f32 %v7663_v7, %v14492_v17  ;;  %v6676_v17 = vadd.f32 %v7665_v18, %v14496_v12 }
 0x935   : > { %6861 = vst [vmem:[%s14507_s30 + $0x90] sm:$0xff] %v6789_v10  ;;  %v6792_v9 = vadd.f32 %v7280_v44, %v6631_v4  ;;  %v7664_v4 = vld [vmem:[%s7876_s17 + $0xe8] sm:$0xff] }
 0x936   : > { %v6671_v21 = vadd.f32 %v7664_v4, %v14494_v54  ;;  %v7666_v54 = vld [vmem:[%s7876_s17 + $0xf8] sm:$0xff]  ;;  %s7667_s17 = scalar_lea.vmem %s14606_s13, 4096 }
 0x937   : > { %6862 = vst [vmem:[%s14507_s30 + $0x98] sm:$0xff] %v6792_v9  ;;  %v7281_v62 = vpop.f32.mrb[104].mxu1  ;;  %p7668_p11 = scmp.ne.s32.totalorder %s14606_s13, %s7667_s17  ;;  %p7675_p1 = scmp.lt.s32.totalorder %s7673_s25, %s7667_s17 }
 0x938   : > { %v7282_v49 = vpop.f32.mrb[105].mxu1 }
 0x939   : > { %v7283_v53 = vadd.f32 %v7282_v49, %v7281_v62  ;;  %v7284_v60 = vpop.f32.mrb[106].mxu1  ;;  %p7669_p12 = pnand %p7668_p11, %p7840_p5  ;;  %p7676_p2 = por %p7675_p1, %p7674_p0 }
 0x93a   : > { %v7285_v27 = vpop.f32.mrb[107].mxu1 }
 0x93b   : > { %v6797_v8 = vadd.f32 %v7283_v53, %v6636_v0  ;;  %v7286_v15 = vadd.f32 %v7285_v27, %v7284_v60  ;;  %v6679_v27 = vadd.f32 %v7666_v54, %v14498_v43  ;;  %p7670_p13 = pneg %p7669_p12 }
 0x93d   : > { %6863 = vst [vmem:[%s14507_s30 + $0xa0] sm:$0xff] %v6797_v8  ;;  %v6800_v20 = vadd.f32 %v7286_v15, %v6639_v35  ;;  %p7677_p3 = pnand %p7676_p2, %p7670_p13 }
 0x93f   : > { %6864 = vst [vmem:[%s14507_s30 + $0xa8] sm:$0xff] %v6800_v20  ;;  %v7287_v33 = vpop.f32.mrb[108].mxu1 }
 0x940   : > { %v7288_v42 = vpop.f32.mrb[109].mxu1 }
 0x941   : > { %v7289_v36 = vadd.f32 %v7288_v42, %v7287_v33  ;;  %v7290_v56 = vpop.f32.mrb[110].mxu1 }
 0x942   : > { %v7291_v37 = vpop.f32.mrb[111].mxu1 }
 0x943   : > { %v6805_v55 = vadd.f32 %v7289_v36, %v6644_v3  ;;  %v7292_v16 = vadd.f32 %v7291_v37, %v7290_v56 }
 0x945   : > { %6865 = vst [vmem:[%s14507_s30 + $0xb0] sm:$0xff] %v6805_v55  ;;  %v6808_v25 = vadd.f32 %v7292_v16, %v6647_v59 }
 0x947   : > { %6866 = vst [vmem:[%s14507_s30 + $0xb8] sm:$0xff] %v6808_v25  ;;  %v7293_v46 = vpop.f32.mrb[112].mxu1 }
 0x948   : > { %v7294_v40 = vpop.f32.mrb[113].mxu1 }
 0x949   : > { %v7295_v41 = vadd.f32 %v7294_v40, %v7293_v46  ;;  %v7296_v5 = vpop.f32.mrb[114].mxu1 }
 0x94a   : > { %v7297_v48 = vpop.f32.mrb[115].mxu1 }
 0x94b   : > { %v6813_v22 = vadd.f32 %v7295_v41, %v6652_v52  ;;  %v7298_v61 = vadd.f32 %v7297_v48, %v7296_v5 }
 0x94d   : > { %6867 = vst [vmem:[%s14507_s30 + $0xc0] sm:$0xff] %v6813_v22  ;;  %v6816_v24 = vadd.f32 %v7298_v61, %v6655_v50 }
 0x94f   : > { %6868 = vst [vmem:[%s14507_s30 + $0xc8] sm:$0xff] %v6816_v24  ;;  %v7299_v13 = vpop.f32.mrb[116].mxu1 }
 0x950   : > { %v7300_v47 = vpop.f32.mrb[117].mxu1 }
 0x951   : > { %v7301_v31 = vadd.f32 %v7300_v47, %v7299_v13  ;;  %v7302_v38 = vpop.f32.mrb[118].mxu1 }
 0x952   : > { %v7303_v14 = vpop.f32.mrb[119].mxu1 }
 0x953   : > { %v6821_v19 = vadd.f32 %v7301_v31, %v6660_v63  ;;  %v7304_v45 = vadd.f32 %v7303_v14, %v7302_v38 }
 0x955   : > { %6869 = vst [vmem:[%s14507_s30 + $0xd0] sm:$0xff] %v6821_v19  ;;  %v6824_v30 = vadd.f32 %v7304_v45, %v6663_v58 }
 0x957   : > { %6870 = vst [vmem:[%s14507_s30 + $0xd8] sm:$0xff] %v6824_v30  ;;  %v7305_v39 = vpop.f32.mrb[120].mxu1 }
 0x958   : > { %v7306_v32 = vpop.f32.mrb[121].mxu1 }
 0x959   : > { %v7307_v51 = vadd.f32 %v7306_v32, %v7305_v39  ;;  %v7308_v57 = vpop.f32.mrb[122].mxu1 }
 0x95a   : > { %v7309_v11 = vpop.f32.mrb[123].mxu1 }
 0x95b   : > { %v6829_v10 = vadd.f32 %v7307_v51, %v6668_v26  ;;  %v7310_v44 = vadd.f32 %v7309_v11, %v7308_v57 }
 0x95d   : > { %6871 = vst [vmem:[%s14507_s30 + $0xe0] sm:$0xff] %v6829_v10  ;;  %v6832_v9 = vadd.f32 %v7310_v44, %v6671_v21 }
 0x95f   : > { %6872 = vst [vmem:[%s14507_s30 + $0xe8] sm:$0xff] %v6832_v9  ;;  %v7311_v62 = vpop.f32.mrb[124].mxu1 }
 0x960   : > { %v7312_v49 = vpop.f32.mrb[125].mxu1 }
 0x961   : > { %v7313_v0 = vadd.f32 %v7312_v49, %v7311_v62  ;;  %v7314_v53 = vpop.f32.mrb[126].mxu1 }
 0x962   : > { %v7315_v60 = vpop.f32.mrb[127].mxu1 }
 0x963   : > { %v6837_v29 = vadd.f32 %v7313_v0, %v6676_v17  ;;  %v7316_v35 = vadd.f32 %v7315_v60, %v7314_v53 }
 0x965   : > { %6873 = vst [vmem:[%s14507_s30 + $0xf0] sm:$0xff] %v6837_v29  ;;  %v6840_v12 = vadd.f32 %v7316_v35, %v6679_v27 }
 0x967   : > { %6874 = vst [vmem:[%s14507_s30 + $0xf8] sm:$0xff] %v6840_v12 }
 0x968   : > { %7680 = shalt.err (!%p7677_p3)
}
 0x969   : > { %s7681_s26 = scalar_lea.hbm %s14604_s15, 4096  ;;  %s7685_s14 = scalar_lea.hbm %s14664_s11, 8192 }
 0x96a   : > { %p7682_p4 = scmp.ne.s32.totalorder %s14604_s15, %s7681_s26  ;;  %p7686_p9 = scmp.lt.u32.totalorder %s14604_s15, %s14664_s11 }
 0x96b   : > { %p7687_p10 = scmp.lt.u32.totalorder %s7685_s14, %s7681_s26  ;;  %p7689_p12 = scmp.lt.u32.totalorder %s7681_s26, %s14604_s15 }
 0x96c   : > { %p7683_p7 = pnand %p7682_p4, %p7840_p5 }
 0x96d   : > { %p7688_p11 = por %p7687_p10, %p7686_p9 }
 0x96e   : > { %p7684_p8 = pneg %p7683_p7 }
 0x96f   : > { %p7690_p13 = por %p7689_p12, %p7688_p11 }
 0x971   : > { %p7691_p0 = pnand %p7690_p13, %p7684_p8 }
 0x973   : > { %7694 = shalt.err (!%p7691_p0)
}
 0x974   : > { %s7737_s17 = smov 128   ;;  %s7738_s23 = smov 8  }
 0x975   : > { %7317 = dma.vmem_to_hbm [thread:$0]  (%p7840_p5), %s14606_s13, 4096, %s14604_s15, %s14612_s7, %s7737_s17, %s7737_s17, %s7738_s23  }
 0x976 PF: > { %p7323_p1 = scmp.ge.s32.totalorder %s7729_s22, 2  ;;  %s6904_s25 = sand.u32 1, %s7717_s19  }
 0x977   : > { %s6905_s26 = scalar_lea.sflag [#allocation4], %s6904_s25 }
 0x978   : > { %p7320_p2 = pnand %p7323_p1, %p7844_p6 }
 0x97a   : > { %7712 = dma.done.wait (!%p7320_p2), %s6905_s26, 4096  }
 0x97b   : > { %7714 = vsyncadd (!%p7320_p2), %s6905_s26, 4294963200  ;;  %p22_p3 = scmp.ge.s32.totalorder %s7827_s24, 4   ;;  %s16142_s19 = smov %s7721_s20 }
 0x97c   : > { %s16143_s20 = smov %s7725_s21  ;;  %s16144_s21 = smov %s7838_s27 }
 0x97d   : > { %s16145_s22 = smov %s7827_s24  ;;  %24 = sbr.rel (!%p22_p3) target bundleno = 5 (0x5), region = 99 }
 0x984   :  { %6910 = vsyncpa [#allocation4], 1 }
 0x985   :  { %6912 = vsyncpa [#allocation4 + $0x1], 1 }

</bundles_post_ra>
